<compile_context>
chip_gen: v5e
topology: v5e:2x2
jax: 0.10.0
libtpu: 0.0.40
codegen_flags: <defaults>
</compile_context>

<pallas_src>
import functools

import jax
import jax.numpy as jnp
from jax.experimental import pallas as pl
from jax.experimental.pallas import tpu as pltpu


# ----------------------------------------------------------------------------
# Fused attention kernel (one batch *block* per grid step, fully VMEM-resident)
# ----------------------------------------------------------------------------

def _attention_kernel(x_ref, wqkv_ref, wp_ref, bp_ref, o_ref,
                      qkv_ref, ctx_ref, *, num_heads, seq_len):
    M, C = x_ref.shape            # M = bb * N (bb batch rows, flattened)
    D = C // num_heads
    N = seq_len
    bb = M // N

    # Fused q|k|v projection: one (M, C) @ (C, 3C) MXU pass, bf16 operands,
    # f32 accumulation.  Result is staged in VMEM scratch (bounds vreg live
    # ranges; the 3C-wide store is lane-dense).
    qkv_ref[...] = jnp.dot(x_ref[...], wqkv_ref[...],
                           preferred_element_type=jnp.float32
                           ).astype(jnp.bfloat16)

    # Per (batch-in-block, head) softmax attention.  Operands are re-read from
    # the scratch ref inside the (static) loop so nothing large stays live
    # across iterations; scale is already folded into the q columns of Wqkv.
    for b in range(bb):
        r = b * N
        for h in range(num_heads):
            c = h * D
            qh = qkv_ref[r:r + N, c:c + D]                       # (N, D) bf16
            kh = qkv_ref[r:r + N, C + c:C + c + D]               # (N, D) bf16
            vh = qkv_ref[r:r + N, 2 * C + c:2 * C + c + D]       # (N, D) bf16
            # scores = qh @ kh^T  (contract D on both sides; f32 accumulate)
            s = jax.lax.dot_general(qh, kh, (((1,), (1,)), ((), ())),
                                    preferred_element_type=jnp.float32)  # (N, N)
            # numerically-stable softmax in f32; reciprocal goes to the EUP
            # slot (already busy with exp) instead of an (N,N) VPU divide.
            s = s - jnp.max(s, axis=-1, keepdims=True)
            e = jnp.exp(s)
            p = e * pl.reciprocal(jnp.sum(e, axis=-1, keepdims=True),
                                  approx=True)
            ctx_ref[r:r + N, c:c + D] = jnp.dot(
                p.astype(jnp.bfloat16), vh,
                preferred_element_type=jnp.float32).astype(jnp.bfloat16)

    # Single K=C output projection (one MXU pass instead of num_heads K=D
    # matmuls) + bias; output stays f32 and lane-dense (C = 128).
    o_ref[...] = (jnp.dot(ctx_ref[...], wp_ref[...],
                          preferred_element_type=jnp.float32)
                  + bp_ref[...])


# ----------------------------------------------------------------------------
# Wrapper
# ----------------------------------------------------------------------------

def _batch_block(B):
    """Rows of the batch handled per grid step.

    v7x has 2 TensorCores per chip -> keep a per-batch 'parallel' grid so the
    megacore splits it.  v5e / v6e are single-TC, where the grid is a serial
    loop (~0.35us/step on a launch-bound kernel) -> collapse the whole batch
    into one step, which also doubles the MXU M rows of the projections.
    """
    try:
        kind = jax.devices()[0].device_kind.lower()
    except Exception:
        kind = ""
    if (("v7" in kind) or ("tpu7" in kind)) and B > 1:
        return 1
    return B


def attention_forward(x, H, W, packed, *, num_heads):
    """x: (B, N, C) float32.  H, W kept for signature fidelity (unused by this
    forward — the sr_ratio / linear paths are absent)."""
    del H, W
    B, N, C = x.shape
    assert C % num_heads == 0
    D = C // num_heads

    wqkv, wp, bp = packed["wqkv"], packed["wp"], packed["bp"]

    bb = _batch_block(B)           # B on single-TC chips, 1 on dual-TC v7x
    grid = (B // bb,)
    M = bb * N

    # Flatten batch rows outside the kernel (free layout change) and cast the
    # activation matmul operand to bf16 once.
    x2 = x.reshape(B * N, C).astype(jnp.bfloat16)

    kernel = functools.partial(_attention_kernel,
                               num_heads=num_heads, seq_len=N)

    # qkv proj + per-head (qk^T, pv) + out proj
    flops = (B * 2 * N * C * 3 * C
             + B * num_heads * 4 * N * N * D
             + B * 2 * N * C * C)
    cost = pl.CostEstimate(
        flops=flops,
        transcendentals=B * num_heads * N * (N + 1),      # exp + reciprocal
        bytes_accessed=(2 * B * N * C            # x (bf16)
                        + 2 * C * 3 * C          # Wqkv (bf16)
                        + 2 * C * C              # Wp (bf16)
                        + 4 * C                  # bias (f32)
                        + 4 * B * N * C),        # out (f32)
    )

    out = pl.pallas_call(
        kernel,
        out_shape=jax.ShapeDtypeStruct((B * N, C), jnp.float32),
        grid=grid,
        in_specs=[
            pl.BlockSpec((M, C), lambda i: (i, 0)),        # x (batch block)
            # Constant index maps -> weights stay VMEM-resident across steps.
            # (pl.Buffered(1) single-buffering would halve their footprint on
            #  v7x, but is negligible at dim=128.)
            pl.BlockSpec((C, 3 * C), lambda i: (0, 0)),    # Wqkv
            pl.BlockSpec((C, C), lambda i: (0, 0)),        # Wp
            pl.BlockSpec((1, C), lambda i: (0, 0)),        # proj bias
        ],
        out_specs=pl.BlockSpec((M, C), lambda i: (i, 0)),
        scratch_shapes=[
            pltpu.VMEM((M, 3 * C), jnp.bfloat16),          # q|k|v staging
            pltpu.VMEM((M, C), jnp.bfloat16),              # per-head contexts
        ],
        compiler_params=pltpu.CompilerParams(
            dimension_semantics=("parallel",)),
        cost_estimate=cost,
    )(x2, wqkv, wp, bp)

    return out.reshape(B, N, C)


def init_attention_params(key, dim, num_heads, qkv_bias=False):
    """f32 master weights, stored pre-transposed as (in, out): y = x @ W (+b)."""
    assert dim % num_heads == 0
    assert not qkv_bias  # module default; q/kv bias not generated
    kq, kkv, kp, kb = jax.random.split(key, 4)
    std = 0.02  # trunc_normal(std=0.02) like the PyTorch init
    return {
        "wq": std * jax.random.truncated_normal(kq, -2.0, 2.0, (dim, dim), jnp.float32),
        "wkv": std * jax.random.truncated_normal(kkv, -2.0, 2.0, (dim, 2 * dim), jnp.float32),
        "wp": std * jax.random.truncated_normal(kp, -2.0, 2.0, (dim, dim), jnp.float32),
        # spec inits proj bias to 0; use a small random bias so the add path
        # is exercised
        "bp": std * jax.random.normal(kb, (1, dim), jnp.float32),
    }


def pack_attention_params(params, *, num_heads):
    """One-time packing for the kernel: fuse Wq|Wkv into a single (C, 3C)
    operand with the attention scale folded into the q columns, and cast the
    matmul operands to bf16 (bias stays f32)."""
    wq, wkv, wp, bp = params["wq"], params["wkv"], params["wp"], params["bp"]
    C = wq.shape[0]
    scale = (C // num_heads) ** -0.5
    wqkv = jnp.concatenate([wq * scale, wkv], axis=1)      # (C, 3C)
    return {
        "wqkv": wqkv.astype(jnp.bfloat16),
        "wp": wp.astype(jnp.bfloat16),
        "bp": bp.astype(jnp.float32),
    }


# ----------------------------------------------------------------------------
# Pure-JAX reference (mirrors the PyTorch forward: reshape/permute head split)
# ----------------------------------------------------------------------------

def attention_ref(x, params, num_heads):
    B, N, C = x.shape
    D = C // num_heads
    scale = D ** -0.5
    q = (x @ params["wq"]).reshape(B, N, num_heads, D).transpose(0, 2, 1, 3)
    kv = (x @ params["wkv"]).reshape(B, N, 2, num_heads, D).transpose(2, 0, 3, 1, 4)
    k, v = kv[0], kv[1]
    attn = (q @ jnp.swapaxes(k, -2, -1)) * scale
    attn = jax.nn.softmax(attn, axis=-1)
    o = (attn @ v).transpose(0, 2, 1, 3).reshape(B, N, C)
    return o @ params["wp"] + params["bp"]


if __name__ == "__main__":
    B, H, W = 2, 8, 8
    DIM, NUM_HEADS = 128, 8          # head_dim = 16
    N = H * W

    key = jax.random.PRNGKey(0)
    k_param, k_x = jax.random.split(key)
    params = init_attention_params(k_param, DIM, NUM_HEADS)
    packed = pack_attention_params(params, num_heads=NUM_HEADS)
    x = jax.random.normal(k_x, (B, N, DIM), jnp.float32)

    fwd = jax.jit(functools.partial(attention_forward, num_heads=NUM_HEADS))
    out = fwd(x, H, W, packed)
    jax.block_until_ready(out)

    assert out.shape == (B, N, DIM), out.shape

    # f32 reference vs bf16-operand kernel: ~1e-2-scale agreement expected.
    ref = attention_ref(x, params, NUM_HEADS)
    rel_err = float(jnp.max(jnp.abs(out - ref)) / (jnp.max(jnp.abs(ref)) + 1e-12))
    assert rel_err < 2e-2, f"relative error too large: {rel_err}"

    print("KERNEL_OK")
</pallas_src>

<mosaic_0001>
module attributes {stable_mosaic.version = 11 : i64} {
  func.func @_attention_kernel(%arg0: i32, %arg1: memref<128x128xbf16, #tpu.memory_space<vmem>>, %arg2: memref<128x384xbf16, #tpu.memory_space<vmem>>, %arg3: memref<128x128xbf16, #tpu.memory_space<vmem>>, %arg4: memref<1x128xf32, #tpu.memory_space<vmem>>, %arg5: memref<128x128xf32, #tpu.memory_space<vmem>>, %arg6: memref<128x384xbf16, #tpu.memory_space<vmem>>, %arg7: memref<128x128xbf16, #tpu.memory_space<vmem>>) attributes {dimension_semantics = [#tpu.dimension_semantics<parallel>], iteration_bounds = array<i64: 1>, scalar_prefetch = 0 : i64, scratch_operands = 2 : i64, tpu.core_type = #tpu.core_type<tc>, window_params = [{transform_indices = @transform_0, window_bounds = array<i64: 128, 128>}, {pipeline_mode = #tpu.pipeline_mode<synchronous>, transform_indices = @transform_1, window_bounds = array<i64: 128, 384>}, {pipeline_mode = #tpu.pipeline_mode<synchronous>, transform_indices = @transform_2, window_bounds = array<i64: 128, 128>}, {pipeline_mode = #tpu.pipeline_mode<synchronous>, transform_indices = @transform_3, window_bounds = array<i64: 1, 128>}, {transform_indices = @transform_4, window_bounds = array<i64: 128, 128>}]} {
    %c0 = arith.constant 0 : index
    %c0_0 = arith.constant 0 : index
    %0 = vector.load %arg1[%c0, %c0_0] : memref<128x128xbf16, #tpu.memory_space<vmem>>, vector<128x128xbf16>
    %c0_1 = arith.constant 0 : index
    %c0_2 = arith.constant 0 : index
    %1 = vector.load %arg2[%c0_1, %c0_2] : memref<128x384xbf16, #tpu.memory_space<vmem>>, vector<128x384xbf16>
    %cst = arith.constant dense<0.000000e+00> : vector<128x384xf32>
    %2 = tpu.matmul %0, %1, %cst {dimension_numbers = #tpu.dot_dimension_numbers<[1], [0], [0], [1], [0, 0, 1, 1], [], []>} : vector<128x128xbf16>, vector<128x384xbf16>, vector<128x384xf32> -> vector<128x384xf32>
    %3 = arith.truncf %2 : vector<128x384xf32> to vector<128x384xbf16>
    %c0_3 = arith.constant 0 : index
    %c0_4 = arith.constant 0 : index
    %4 = vector.load %arg6[%c0_3, %c0_4] : memref<128x384xbf16, #tpu.memory_space<vmem>>, vector<128x384xbf16>
    tpu.vector_store %arg6[%c0_3, %c0_4], %3 {strides = array<i32>} : memref<128x384xbf16, #tpu.memory_space<vmem>>, vector<128x384xbf16>,
    %c0_5 = arith.constant 0 : index
    %c0_6 = arith.constant 0 : index
    %5 = vector.load %arg6[%c0_5, %c0_6] : memref<128x384xbf16, #tpu.memory_space<vmem>>, vector<64x16xbf16>
    %c0_7 = arith.constant 0 : index
    %c128 = arith.constant 128 : index
    %6 = vector.load %arg6[%c0_7, %c128] : memref<128x384xbf16, #tpu.memory_space<vmem>>, vector<64x16xbf16>
    %c0_8 = arith.constant 0 : index
    %c256 = arith.constant 256 : index
    %7 = vector.load %arg6[%c0_8, %c256] : memref<128x384xbf16, #tpu.memory_space<vmem>>, vector<64x16xbf16>
    %cst_9 = arith.constant dense<0.000000e+00> : vector<64x64xf32>
    %8 = tpu.matmul %5, %6, %cst_9 {dimension_numbers = #tpu.dot_dimension_numbers<[1], [1], [0], [0], [0, 0, 1, 0], [], []>} : vector<64x16xbf16>, vector<64x16xbf16>, vector<64x64xf32> -> vector<64x64xf32>
    %cst_10 = arith.constant dense<0xFF800000> : vector<64xf32>
    %9 = vector.multi_reduction <maximumf>, %8, %cst_10 [1] : vector<64x64xf32> to vector<64xf32>
    %10 = vector.shape_cast %9 : vector<64xf32> to vector<64x1xf32>
    %11 = vector.broadcast %10 : vector<64x1xf32> to vector<64x64xf32>
    %12 = arith.subf %8, %11 : vector<64x64xf32>
    %13 = math.exp %12 : vector<64x64xf32>
    %cst_11 = arith.constant dense<0.000000e+00> : vector<64xf32>
    %14 = vector.multi_reduction <add>, %13, %cst_11 [1] : vector<64x64xf32> to vector<64xf32>
    %15 = vector.shape_cast %14 : vector<64xf32> to vector<64x1xf32>
    %16 = tpu.reciprocal %15 {approx = true} : vector<64x1xf32> -> vector<64x1xf32>
    %17 = vector.broadcast %16 : vector<64x1xf32> to vector<64x64xf32>
    %18 = arith.mulf %13, %17 : vector<64x64xf32>
    %19 = arith.truncf %18 : vector<64x64xf32> to vector<64x64xbf16>
    %cst_12 = arith.constant dense<0.000000e+00> : vector<64x16xf32>
    %20 = tpu.matmul %19, %7, %cst_12 {dimension_numbers = #tpu.dot_dimension_numbers<[1], [0], [0], [1], [0, 0, 1, 1], [], []>} : vector<64x64xbf16>, vector<64x16xbf16>, vector<64x16xf32> -> vector<64x16xf32>
    %21 = arith.truncf %20 : vector<64x16xf32> to vector<64x16xbf16>
    %c0_13 = arith.constant 0 : index
    %c0_14 = arith.constant 0 : index
    %22 = vector.load %arg7[%c0_13, %c0_14] : memref<128x128xbf16, #tpu.memory_space<vmem>>, vector<64x16xbf16>
    tpu.vector_store %arg7[%c0_13, %c0_14], %21 {strides = array<i32>} : memref<128x128xbf16, #tpu.memory_space<vmem>>, vector<64x16xbf16>,
    %c0_15 = arith.constant 0 : index
    %c16 = arith.constant 16 : index
    %23 = vector.load %arg6[%c0_15, %c16] : memref<128x384xbf16, #tpu.memory_space<vmem>>, vector<64x16xbf16>
    %c0_16 = arith.constant 0 : index
    %c144 = arith.constant 144 : index
    %24 = vector.load %arg6[%c0_16, %c144] : memref<128x384xbf16, #tpu.memory_space<vmem>>, vector<64x16xbf16>
    %c0_17 = arith.constant 0 : index
    %c272 = arith.constant 272 : index
    %25 = vector.load %arg6[%c0_17, %c272] : memref<128x384xbf16, #tpu.memory_space<vmem>>, vector<64x16xbf16>
    %cst_18 = arith.constant dense<0.000000e+00> : vector<64x64xf32>
    %26 = tpu.matmul %23, %24, %cst_18 {dimension_numbers = #tpu.dot_dimension_numbers<[1], [1], [0], [0], [0, 0, 1, 0], [], []>} : vector<64x16xbf16>, vector<64x16xbf16>, vector<64x64xf32> -> vector<64x64xf32>
    %cst_19 = arith.constant dense<0xFF800000> : vector<64xf32>
    %27 = vector.multi_reduction <maximumf>, %26, %cst_19 [1] : vector<64x64xf32> to vector<64xf32>
    %28 = vector.shape_cast %27 : vector<64xf32> to vector<64x1xf32>
    %29 = vector.broadcast %28 : vector<64x1xf32> to vector<64x64xf32>
    %30 = arith.subf %26, %29 : vector<64x64xf32>
    %31 = math.exp %30 : vector<64x64xf32>
    %cst_20 = arith.constant dense<0.000000e+00> : vector<64xf32>
    %32 = vector.multi_reduction <add>, %31, %cst_20 [1] : vector<64x64xf32> to vector<64xf32>
    %33 = vector.shape_cast %32 : vector<64xf32> to vector<64x1xf32>
    %34 = tpu.reciprocal %33 {approx = true} : vector<64x1xf32> -> vector<64x1xf32>
    %35 = vector.broadcast %34 : vector<64x1xf32> to vector<64x64xf32>
    %36 = arith.mulf %31, %35 : vector<64x64xf32>
    %37 = arith.truncf %36 : vector<64x64xf32> to vector<64x64xbf16>
    %cst_21 = arith.constant dense<0.000000e+00> : vector<64x16xf32>
    %38 = tpu.matmul %37, %25, %cst_21 {dimension_numbers = #tpu.dot_dimension_numbers<[1], [0], [0], [1], [0, 0, 1, 1], [], []>} : vector<64x64xbf16>, vector<64x16xbf16>, vector<64x16xf32> -> vector<64x16xf32>
    %39 = arith.truncf %38 : vector<64x16xf32> to vector<64x16xbf16>
    %c0_22 = arith.constant 0 : index
    %c16_23 = arith.constant 16 : index
    %40 = vector.load %arg7[%c0_22, %c16_23] : memref<128x128xbf16, #tpu.memory_space<vmem>>, vector<64x16xbf16>
    tpu.vector_store %arg7[%c0_22, %c16_23], %39 {strides = array<i32>} : memref<128x128xbf16, #tpu.memory_space<vmem>>, vector<64x16xbf16>,
    %c0_24 = arith.constant 0 : index
    %c32 = arith.constant 32 : index
    %41 = vector.load %arg6[%c0_24, %c32] : memref<128x384xbf16, #tpu.memory_space<vmem>>, vector<64x16xbf16>
    %c0_25 = arith.constant 0 : index
    %c160 = arith.constant 160 : index
    %42 = vector.load %arg6[%c0_25, %c160] : memref<128x384xbf16, #tpu.memory_space<vmem>>, vector<64x16xbf16>
    %c0_26 = arith.constant 0 : index
    %c288 = arith.constant 288 : index
    %43 = vector.load %arg6[%c0_26, %c288] : memref<128x384xbf16, #tpu.memory_space<vmem>>, vector<64x16xbf16>
    %cst_27 = arith.constant dense<0.000000e+00> : vector<64x64xf32>
    %44 = tpu.matmul %41, %42, %cst_27 {dimension_numbers = #tpu.dot_dimension_numbers<[1], [1], [0], [0], [0, 0, 1, 0], [], []>} : vector<64x16xbf16>, vector<64x16xbf16>, vector<64x64xf32> -> vector<64x64xf32>
    %cst_28 = arith.constant dense<0xFF800000> : vector<64xf32>
    %45 = vector.multi_reduction <maximumf>, %44, %cst_28 [1] : vector<64x64xf32> to vector<64xf32>
    %46 = vector.shape_cast %45 : vector<64xf32> to vector<64x1xf32>
    %47 = vector.broadcast %46 : vector<64x1xf32> to vector<64x64xf32>
    %48 = arith.subf %44, %47 : vector<64x64xf32>
    %49 = math.exp %48 : vector<64x64xf32>
    %cst_29 = arith.constant dense<0.000000e+00> : vector<64xf32>
    %50 = vector.multi_reduction <add>, %49, %cst_29 [1] : vector<64x64xf32> to vector<64xf32>
    %51 = vector.shape_cast %50 : vector<64xf32> to vector<64x1xf32>
    %52 = tpu.reciprocal %51 {approx = true} : vector<64x1xf32> -> vector<64x1xf32>
    %53 = vector.broadcast %52 : vector<64x1xf32> to vector<64x64xf32>
    %54 = arith.mulf %49, %53 : vector<64x64xf32>
    %55 = arith.truncf %54 : vector<64x64xf32> to vector<64x64xbf16>
    %cst_30 = arith.constant dense<0.000000e+00> : vector<64x16xf32>
    %56 = tpu.matmul %55, %43, %cst_30 {dimension_numbers = #tpu.dot_dimension_numbers<[1], [0], [0], [1], [0, 0, 1, 1], [], []>} : vector<64x64xbf16>, vector<64x16xbf16>, vector<64x16xf32> -> vector<64x16xf32>
    %57 = arith.truncf %56 : vector<64x16xf32> to vector<64x16xbf16>
    %c0_31 = arith.constant 0 : index
    %c32_32 = arith.constant 32 : index
    %58 = vector.load %arg7[%c0_31, %c32_32] : memref<128x128xbf16, #tpu.memory_space<vmem>>, vector<64x16xbf16>
    tpu.vector_store %arg7[%c0_31, %c32_32], %57 {strides = array<i32>} : memref<128x128xbf16, #tpu.memory_space<vmem>>, vector<64x16xbf16>,
    %c0_33 = arith.constant 0 : index
    %c48 = arith.constant 48 : index
    %59 = vector.load %arg6[%c0_33, %c48] : memref<128x384xbf16, #tpu.memory_space<vmem>>, vector<64x16xbf16>
    %c0_34 = arith.constant 0 : index
    %c176 = arith.constant 176 : index
    %60 = vector.load %arg6[%c0_34, %c176] : memref<128x384xbf16, #tpu.memory_space<vmem>>, vector<64x16xbf16>
    %c0_35 = arith.constant 0 : index
    %c304 = arith.constant 304 : index
    %61 = vector.load %arg6[%c0_35, %c304] : memref<128x384xbf16, #tpu.memory_space<vmem>>, vector<64x16xbf16>
    %cst_36 = arith.constant dense<0.000000e+00> : vector<64x64xf32>
    %62 = tpu.matmul %59, %60, %cst_36 {dimension_numbers = #tpu.dot_dimension_numbers<[1], [1], [0], [0], [0, 0, 1, 0], [], []>} : vector<64x16xbf16>, vector<64x16xbf16>, vector<64x64xf32> -> vector<64x64xf32>
    %cst_37 = arith.constant dense<0xFF800000> : vector<64xf32>
    %63 = vector.multi_reduction <maximumf>, %62, %cst_37 [1] : vector<64x64xf32> to vector<64xf32>
    %64 = vector.shape_cast %63 : vector<64xf32> to vector<64x1xf32>
    %65 = vector.broadcast %64 : vector<64x1xf32> to vector<64x64xf32>
    %66 = arith.subf %62, %65 : vector<64x64xf32>
    %67 = math.exp %66 : vector<64x64xf32>
    %cst_38 = arith.constant dense<0.000000e+00> : vector<64xf32>
    %68 = vector.multi_reduction <add>, %67, %cst_38 [1] : vector<64x64xf32> to vector<64xf32>
    %69 = vector.shape_cast %68 : vector<64xf32> to vector<64x1xf32>
    %70 = tpu.reciprocal %69 {approx = true} : vector<64x1xf32> -> vector<64x1xf32>
    %71 = vector.broadcast %70 : vector<64x1xf32> to vector<64x64xf32>
    %72 = arith.mulf %67, %71 : vector<64x64xf32>
    %73 = arith.truncf %72 : vector<64x64xf32> to vector<64x64xbf16>
    %cst_39 = arith.constant dense<0.000000e+00> : vector<64x16xf32>
    %74 = tpu.matmul %73, %61, %cst_39 {dimension_numbers = #tpu.dot_dimension_numbers<[1], [0], [0], [1], [0, 0, 1, 1], [], []>} : vector<64x64xbf16>, vector<64x16xbf16>, vector<64x16xf32> -> vector<64x16xf32>
    %75 = arith.truncf %74 : vector<64x16xf32> to vector<64x16xbf16>
    %c0_40 = arith.constant 0 : index
    %c48_41 = arith.constant 48 : index
    %76 = vector.load %arg7[%c0_40, %c48_41] : memref<128x128xbf16, #tpu.memory_space<vmem>>, vector<64x16xbf16>
    tpu.vector_store %arg7[%c0_40, %c48_41], %75 {strides = array<i32>} : memref<128x128xbf16, #tpu.memory_space<vmem>>, vector<64x16xbf16>,
    %c0_42 = arith.constant 0 : index
    %c64 = arith.constant 64 : index
    %77 = vector.load %arg6[%c0_42, %c64] : memref<128x384xbf16, #tpu.memory_space<vmem>>, vector<64x16xbf16>
    %c0_43 = arith.constant 0 : index
    %c192 = arith.constant 192 : index
    %78 = vector.load %arg6[%c0_43, %c192] : memref<128x384xbf16, #tpu.memory_space<vmem>>, vector<64x16xbf16>
    %c0_44 = arith.constant 0 : index
    %c320 = arith.constant 320 : index
    %79 = vector.load %arg6[%c0_44, %c320] : memref<128x384xbf16, #tpu.memory_space<vmem>>, vector<64x16xbf16>
    %cst_45 = arith.constant dense<0.000000e+00> : vector<64x64xf32>
    %80 = tpu.matmul %77, %78, %cst_45 {dimension_numbers = #tpu.dot_dimension_numbers<[1], [1], [0], [0], [0, 0, 1, 0], [], []>} : vector<64x16xbf16>, vector<64x16xbf16>, vector<64x64xf32> -> vector<64x64xf32>
    %cst_46 = arith.constant dense<0xFF800000> : vector<64xf32>
    %81 = vector.multi_reduction <maximumf>, %80, %cst_46 [1] : vector<64x64xf32> to vector<64xf32>
    %82 = vector.shape_cast %81 : vector<64xf32> to vector<64x1xf32>
    %83 = vector.broadcast %82 : vector<64x1xf32> to vector<64x64xf32>
    %84 = arith.subf %80, %83 : vector<64x64xf32>
    %85 = math.exp %84 : vector<64x64xf32>
    %cst_47 = arith.constant dense<0.000000e+00> : vector<64xf32>
    %86 = vector.multi_reduction <add>, %85, %cst_47 [1] : vector<64x64xf32> to vector<64xf32>
    %87 = vector.shape_cast %86 : vector<64xf32> to vector<64x1xf32>
    %88 = tpu.reciprocal %87 {approx = true} : vector<64x1xf32> -> vector<64x1xf32>
    %89 = vector.broadcast %88 : vector<64x1xf32> to vector<64x64xf32>
    %90 = arith.mulf %85, %89 : vector<64x64xf32>
    %91 = arith.truncf %90 : vector<64x64xf32> to vector<64x64xbf16>
    %cst_48 = arith.constant dense<0.000000e+00> : vector<64x16xf32>
    %92 = tpu.matmul %91, %79, %cst_48 {dimension_numbers = #tpu.dot_dimension_numbers<[1], [0], [0], [1], [0, 0, 1, 1], [], []>} : vector<64x64xbf16>, vector<64x16xbf16>, vector<64x16xf32> -> vector<64x16xf32>
    %93 = arith.truncf %92 : vector<64x16xf32> to vector<64x16xbf16>
    %c0_49 = arith.constant 0 : index
    %c64_50 = arith.constant 64 : index
    %94 = vector.load %arg7[%c0_49, %c64_50] : memref<128x128xbf16, #tpu.memory_space<vmem>>, vector<64x16xbf16>
    tpu.vector_store %arg7[%c0_49, %c64_50], %93 {strides = array<i32>} : memref<128x128xbf16, #tpu.memory_space<vmem>>, vector<64x16xbf16>,
    %c0_51 = arith.constant 0 : index
    %c80 = arith.constant 80 : index
    %95 = vector.load %arg6[%c0_51, %c80] : memref<128x384xbf16, #tpu.memory_space<vmem>>, vector<64x16xbf16>
    %c0_52 = arith.constant 0 : index
    %c208 = arith.constant 208 : index
    %96 = vector.load %arg6[%c0_52, %c208] : memref<128x384xbf16, #tpu.memory_space<vmem>>, vector<64x16xbf16>
    %c0_53 = arith.constant 0 : index
    %c336 = arith.constant 336 : index
    %97 = vector.load %arg6[%c0_53, %c336] : memref<128x384xbf16, #tpu.memory_space<vmem>>, vector<64x16xbf16>
    %cst_54 = arith.constant dense<0.000000e+00> : vector<64x64xf32>
    %98 = tpu.matmul %95, %96, %cst_54 {dimension_numbers = #tpu.dot_dimension_numbers<[1], [1], [0], [0], [0, 0, 1, 0], [], []>} : vector<64x16xbf16>, vector<64x16xbf16>, vector<64x64xf32> -> vector<64x64xf32>
    %cst_55 = arith.constant dense<0xFF800000> : vector<64xf32>
    %99 = vector.multi_reduction <maximumf>, %98, %cst_55 [1] : vector<64x64xf32> to vector<64xf32>
    %100 = vector.shape_cast %99 : vector<64xf32> to vector<64x1xf32>
    %101 = vector.broadcast %100 : vector<64x1xf32> to vector<64x64xf32>
    %102 = arith.subf %98, %101 : vector<64x64xf32>
    %103 = math.exp %102 : vector<64x64xf32>
    %cst_56 = arith.constant dense<0.000000e+00> : vector<64xf32>
    %104 = vector.multi_reduction <add>, %103, %cst_56 [1] : vector<64x64xf32> to vector<64xf32>
    %105 = vector.shape_cast %104 : vector<64xf32> to vector<64x1xf32>
    %106 = tpu.reciprocal %105 {approx = true} : vector<64x1xf32> -> vector<64x1xf32>
    %107 = vector.broadcast %106 : vector<64x1xf32> to vector<64x64xf32>
    %108 = arith.mulf %103, %107 : vector<64x64xf32>
    %109 = arith.truncf %108 : vector<64x64xf32> to vector<64x64xbf16>
    %cst_57 = arith.constant dense<0.000000e+00> : vector<64x16xf32>
    %110 = tpu.matmul %109, %97, %cst_57 {dimension_numbers = #tpu.dot_dimension_numbers<[1], [0], [0], [1], [0, 0, 1, 1], [], []>} : vector<64x64xbf16>, vector<64x16xbf16>, vector<64x16xf32> -> vector<64x16xf32>
    %111 = arith.truncf %110 : vector<64x16xf32> to vector<64x16xbf16>
    %c0_58 = arith.constant 0 : index
    %c80_59 = arith.constant 80 : index
    %112 = vector.load %arg7[%c0_58, %c80_59] : memref<128x128xbf16, #tpu.memory_space<vmem>>, vector<64x16xbf16>
    tpu.vector_store %arg7[%c0_58, %c80_59], %111 {strides = array<i32>} : memref<128x128xbf16, #tpu.memory_space<vmem>>, vector<64x16xbf16>,
    %c0_60 = arith.constant 0 : index
    %c96 = arith.constant 96 : index
    %113 = vector.load %arg6[%c0_60, %c96] : memref<128x384xbf16, #tpu.memory_space<vmem>>, vector<64x16xbf16>
    %c0_61 = arith.constant 0 : index
    %c224 = arith.constant 224 : index
    %114 = vector.load %arg6[%c0_61, %c224] : memref<128x384xbf16, #tpu.memory_space<vmem>>, vector<64x16xbf16>
    %c0_62 = arith.constant 0 : index
    %c352 = arith.constant 352 : index
    %115 = vector.load %arg6[%c0_62, %c352] : memref<128x384xbf16, #tpu.memory_space<vmem>>, vector<64x16xbf16>
    %cst_63 = arith.constant dense<0.000000e+00> : vector<64x64xf32>
    %116 = tpu.matmul %113, %114, %cst_63 {dimension_numbers = #tpu.dot_dimension_numbers<[1], [1], [0], [0], [0, 0, 1, 0], [], []>} : vector<64x16xbf16>, vector<64x16xbf16>, vector<64x64xf32> -> vector<64x64xf32>
    %cst_64 = arith.constant dense<0xFF800000> : vector<64xf32>
    %117 = vector.multi_reduction <maximumf>, %116, %cst_64 [1] : vector<64x64xf32> to vector<64xf32>
    %118 = vector.shape_cast %117 : vector<64xf32> to vector<64x1xf32>
    %119 = vector.broadcast %118 : vector<64x1xf32> to vector<64x64xf32>
    %120 = arith.subf %116, %119 : vector<64x64xf32>
    %121 = math.exp %120 : vector<64x64xf32>
    %cst_65 = arith.constant dense<0.000000e+00> : vector<64xf32>
    %122 = vector.multi_reduction <add>, %121, %cst_65 [1] : vector<64x64xf32> to vector<64xf32>
    %123 = vector.shape_cast %122 : vector<64xf32> to vector<64x1xf32>
    %124 = tpu.reciprocal %123 {approx = true} : vector<64x1xf32> -> vector<64x1xf32>
    %125 = vector.broadcast %124 : vector<64x1xf32> to vector<64x64xf32>
    %126 = arith.mulf %121, %125 : vector<64x64xf32>
    %127 = arith.truncf %126 : vector<64x64xf32> to vector<64x64xbf16>
    %cst_66 = arith.constant dense<0.000000e+00> : vector<64x16xf32>
    %128 = tpu.matmul %127, %115, %cst_66 {dimension_numbers = #tpu.dot_dimension_numbers<[1], [0], [0], [1], [0, 0, 1, 1], [], []>} : vector<64x64xbf16>, vector<64x16xbf16>, vector<64x16xf32> -> vector<64x16xf32>
    %129 = arith.truncf %128 : vector<64x16xf32> to vector<64x16xbf16>
    %c0_67 = arith.constant 0 : index
    %c96_68 = arith.constant 96 : index
    %130 = vector.load %arg7[%c0_67, %c96_68] : memref<128x128xbf16, #tpu.memory_space<vmem>>, vector<64x16xbf16>
    tpu.vector_store %arg7[%c0_67, %c96_68], %129 {strides = array<i32>} : memref<128x128xbf16, #tpu.memory_space<vmem>>, vector<64x16xbf16>,
    %c0_69 = arith.constant 0 : index
    %c112 = arith.constant 112 : index
    %131 = vector.load %arg6[%c0_69, %c112] : memref<128x384xbf16, #tpu.memory_space<vmem>>, vector<64x16xbf16>
    %c0_70 = arith.constant 0 : index
    %c240 = arith.constant 240 : index
    %132 = vector.load %arg6[%c0_70, %c240] : memref<128x384xbf16, #tpu.memory_space<vmem>>, vector<64x16xbf16>
    %c0_71 = arith.constant 0 : index
    %c368 = arith.constant 368 : index
    %133 = vector.load %arg6[%c0_71, %c368] : memref<128x384xbf16, #tpu.memory_space<vmem>>, vector<64x16xbf16>
    %cst_72 = arith.constant dense<0.000000e+00> : vector<64x64xf32>
    %134 = tpu.matmul %131, %132, %cst_72 {dimension_numbers = #tpu.dot_dimension_numbers<[1], [1], [0], [0], [0, 0, 1, 0], [], []>} : vector<64x16xbf16>, vector<64x16xbf16>, vector<64x64xf32> -> vector<64x64xf32>
    %cst_73 = arith.constant dense<0xFF800000> : vector<64xf32>
    %135 = vector.multi_reduction <maximumf>, %134, %cst_73 [1] : vector<64x64xf32> to vector<64xf32>
    %136 = vector.shape_cast %135 : vector<64xf32> to vector<64x1xf32>
    %137 = vector.broadcast %136 : vector<64x1xf32> to vector<64x64xf32>
    %138 = arith.subf %134, %137 : vector<64x64xf32>
    %139 = math.exp %138 : vector<64x64xf32>
    %cst_74 = arith.constant dense<0.000000e+00> : vector<64xf32>
    %140 = vector.multi_reduction <add>, %139, %cst_74 [1] : vector<64x64xf32> to vector<64xf32>
    %141 = vector.shape_cast %140 : vector<64xf32> to vector<64x1xf32>
    %142 = tpu.reciprocal %141 {approx = true} : vector<64x1xf32> -> vector<64x1xf32>
    %143 = vector.broadcast %142 : vector<64x1xf32> to vector<64x64xf32>
    %144 = arith.mulf %139, %143 : vector<64x64xf32>
    %145 = arith.truncf %144 : vector<64x64xf32> to vector<64x64xbf16>
    %cst_75 = arith.constant dense<0.000000e+00> : vector<64x16xf32>
    %146 = tpu.matmul %145, %133, %cst_75 {dimension_numbers = #tpu.dot_dimension_numbers<[1], [0], [0], [1], [0, 0, 1, 1], [], []>} : vector<64x64xbf16>, vector<64x16xbf16>, vector<64x16xf32> -> vector<64x16xf32>
    %147 = arith.truncf %146 : vector<64x16xf32> to vector<64x16xbf16>
    %c0_76 = arith.constant 0 : index
    %c112_77 = arith.constant 112 : index
    %148 = vector.load %arg7[%c0_76, %c112_77] : memref<128x128xbf16, #tpu.memory_space<vmem>>, vector<64x16xbf16>
    tpu.vector_store %arg7[%c0_76, %c112_77], %147 {strides = array<i32>} : memref<128x128xbf16, #tpu.memory_space<vmem>>, vector<64x16xbf16>,
    %c64_78 = arith.constant 64 : index
    %c0_79 = arith.constant 0 : index
    %149 = vector.load %arg6[%c64_78, %c0_79] : memref<128x384xbf16, #tpu.memory_space<vmem>>, vector<64x16xbf16>
    %c64_80 = arith.constant 64 : index
    %c128_81 = arith.constant 128 : index
    %150 = vector.load %arg6[%c64_80, %c128_81] : memref<128x384xbf16, #tpu.memory_space<vmem>>, vector<64x16xbf16>
    %c64_82 = arith.constant 64 : index
    %c256_83 = arith.constant 256 : index
    %151 = vector.load %arg6[%c64_82, %c256_83] : memref<128x384xbf16, #tpu.memory_space<vmem>>, vector<64x16xbf16>
    %cst_84 = arith.constant dense<0.000000e+00> : vector<64x64xf32>
    %152 = tpu.matmul %149, %150, %cst_84 {dimension_numbers = #tpu.dot_dimension_numbers<[1], [1], [0], [0], [0, 0, 1, 0], [], []>} : vector<64x16xbf16>, vector<64x16xbf16>, vector<64x64xf32> -> vector<64x64xf32>
    %cst_85 = arith.constant dense<0xFF800000> : vector<64xf32>
    %153 = vector.multi_reduction <maximumf>, %152, %cst_85 [1] : vector<64x64xf32> to vector<64xf32>
    %154 = vector.shape_cast %153 : vector<64xf32> to vector<64x1xf32>
    %155 = vector.broadcast %154 : vector<64x1xf32> to vector<64x64xf32>
    %156 = arith.subf %152, %155 : vector<64x64xf32>
    %157 = math.exp %156 : vector<64x64xf32>
    %cst_86 = arith.constant dense<0.000000e+00> : vector<64xf32>
    %158 = vector.multi_reduction <add>, %157, %cst_86 [1] : vector<64x64xf32> to vector<64xf32>
    %159 = vector.shape_cast %158 : vector<64xf32> to vector<64x1xf32>
    %160 = tpu.reciprocal %159 {approx = true} : vector<64x1xf32> -> vector<64x1xf32>
    %161 = vector.broadcast %160 : vector<64x1xf32> to vector<64x64xf32>
    %162 = arith.mulf %157, %161 : vector<64x64xf32>
    %163 = arith.truncf %162 : vector<64x64xf32> to vector<64x64xbf16>
    %cst_87 = arith.constant dense<0.000000e+00> : vector<64x16xf32>
    %164 = tpu.matmul %163, %151, %cst_87 {dimension_numbers = #tpu.dot_dimension_numbers<[1], [0], [0], [1], [0, 0, 1, 1], [], []>} : vector<64x64xbf16>, vector<64x16xbf16>, vector<64x16xf32> -> vector<64x16xf32>
    %165 = arith.truncf %164 : vector<64x16xf32> to vector<64x16xbf16>
    %c64_88 = arith.constant 64 : index
    %c0_89 = arith.constant 0 : index
    %166 = vector.load %arg7[%c64_88, %c0_89] : memref<128x128xbf16, #tpu.memory_space<vmem>>, vector<64x16xbf16>
    tpu.vector_store %arg7[%c64_88, %c0_89], %165 {strides = array<i32>} : memref<128x128xbf16, #tpu.memory_space<vmem>>, vector<64x16xbf16>,
    %c64_90 = arith.constant 64 : index
    %c16_91 = arith.constant 16 : index
    %167 = vector.load %arg6[%c64_90, %c16_91] : memref<128x384xbf16, #tpu.memory_space<vmem>>, vector<64x16xbf16>
    %c64_92 = arith.constant 64 : index
    %c144_93 = arith.constant 144 : index
    %168 = vector.load %arg6[%c64_92, %c144_93] : memref<128x384xbf16, #tpu.memory_space<vmem>>, vector<64x16xbf16>
    %c64_94 = arith.constant 64 : index
    %c272_95 = arith.constant 272 : index
    %169 = vector.load %arg6[%c64_94, %c272_95] : memref<128x384xbf16, #tpu.memory_space<vmem>>, vector<64x16xbf16>
    %cst_96 = arith.constant dense<0.000000e+00> : vector<64x64xf32>
    %170 = tpu.matmul %167, %168, %cst_96 {dimension_numbers = #tpu.dot_dimension_numbers<[1], [1], [0], [0], [0, 0, 1, 0], [], []>} : vector<64x16xbf16>, vector<64x16xbf16>, vector<64x64xf32> -> vector<64x64xf32>
    %cst_97 = arith.constant dense<0xFF800000> : vector<64xf32>
    %171 = vector.multi_reduction <maximumf>, %170, %cst_97 [1] : vector<64x64xf32> to vector<64xf32>
    %172 = vector.shape_cast %171 : vector<64xf32> to vector<64x1xf32>
    %173 = vector.broadcast %172 : vector<64x1xf32> to vector<64x64xf32>
    %174 = arith.subf %170, %173 : vector<64x64xf32>
    %175 = math.exp %174 : vector<64x64xf32>
    %cst_98 = arith.constant dense<0.000000e+00> : vector<64xf32>
    %176 = vector.multi_reduction <add>, %175, %cst_98 [1] : vector<64x64xf32> to vector<64xf32>
    %177 = vector.shape_cast %176 : vector<64xf32> to vector<64x1xf32>
    %178 = tpu.reciprocal %177 {approx = true} : vector<64x1xf32> -> vector<64x1xf32>
    %179 = vector.broadcast %178 : vector<64x1xf32> to vector<64x64xf32>
    %180 = arith.mulf %175, %179 : vector<64x64xf32>
    %181 = arith.truncf %180 : vector<64x64xf32> to vector<64x64xbf16>
    %cst_99 = arith.constant dense<0.000000e+00> : vector<64x16xf32>
    %182 = tpu.matmul %181, %169, %cst_99 {dimension_numbers = #tpu.dot_dimension_numbers<[1], [0], [0], [1], [0, 0, 1, 1], [], []>} : vector<64x64xbf16>, vector<64x16xbf16>, vector<64x16xf32> -> vector<64x16xf32>
    %183 = arith.truncf %182 : vector<64x16xf32> to vector<64x16xbf16>
    %c64_100 = arith.constant 64 : index
    %c16_101 = arith.constant 16 : index
    %184 = vector.load %arg7[%c64_100, %c16_101] : memref<128x128xbf16, #tpu.memory_space<vmem>>, vector<64x16xbf16>
    tpu.vector_store %arg7[%c64_100, %c16_101], %183 {strides = array<i32>} : memref<128x128xbf16, #tpu.memory_space<vmem>>, vector<64x16xbf16>,
    %c64_102 = arith.constant 64 : index
    %c32_103 = arith.constant 32 : index
    %185 = vector.load %arg6[%c64_102, %c32_103] : memref<128x384xbf16, #tpu.memory_space<vmem>>, vector<64x16xbf16>
    %c64_104 = arith.constant 64 : index
    %c160_105 = arith.constant 160 : index
    %186 = vector.load %arg6[%c64_104, %c160_105] : memref<128x384xbf16, #tpu.memory_space<vmem>>, vector<64x16xbf16>
    %c64_106 = arith.constant 64 : index
    %c288_107 = arith.constant 288 : index
    %187 = vector.load %arg6[%c64_106, %c288_107] : memref<128x384xbf16, #tpu.memory_space<vmem>>, vector<64x16xbf16>
    %cst_108 = arith.constant dense<0.000000e+00> : vector<64x64xf32>
    %188 = tpu.matmul %185, %186, %cst_108 {dimension_numbers = #tpu.dot_dimension_numbers<[1], [1], [0], [0], [0, 0, 1, 0], [], []>} : vector<64x16xbf16>, vector<64x16xbf16>, vector<64x64xf32> -> vector<64x64xf32>
    %cst_109 = arith.constant dense<0xFF800000> : vector<64xf32>
    %189 = vector.multi_reduction <maximumf>, %188, %cst_109 [1] : vector<64x64xf32> to vector<64xf32>
    %190 = vector.shape_cast %189 : vector<64xf32> to vector<64x1xf32>
    %191 = vector.broadcast %190 : vector<64x1xf32> to vector<64x64xf32>
    %192 = arith.subf %188, %191 : vector<64x64xf32>
    %193 = math.exp %192 : vector<64x64xf32>
    %cst_110 = arith.constant dense<0.000000e+00> : vector<64xf32>
    %194 = vector.multi_reduction <add>, %193, %cst_110 [1] : vector<64x64xf32> to vector<64xf32>
    %195 = vector.shape_cast %194 : vector<64xf32> to vector<64x1xf32>
    %196 = tpu.reciprocal %195 {approx = true} : vector<64x1xf32> -> vector<64x1xf32>
    %197 = vector.broadcast %196 : vector<64x1xf32> to vector<64x64xf32>
    %198 = arith.mulf %193, %197 : vector<64x64xf32>
    %199 = arith.truncf %198 : vector<64x64xf32> to vector<64x64xbf16>
    %cst_111 = arith.constant dense<0.000000e+00> : vector<64x16xf32>
    %200 = tpu.matmul %199, %187, %cst_111 {dimension_numbers = #tpu.dot_dimension_numbers<[1], [0], [0], [1], [0, 0, 1, 1], [], []>} : vector<64x64xbf16>, vector<64x16xbf16>, vector<64x16xf32> -> vector<64x16xf32>
    %201 = arith.truncf %200 : vector<64x16xf32> to vector<64x16xbf16>
    %c64_112 = arith.constant 64 : index
    %c32_113 = arith.constant 32 : index
    %202 = vector.load %arg7[%c64_112, %c32_113] : memref<128x128xbf16, #tpu.memory_space<vmem>>, vector<64x16xbf16>
    tpu.vector_store %arg7[%c64_112, %c32_113], %201 {strides = array<i32>} : memref<128x128xbf16, #tpu.memory_space<vmem>>, vector<64x16xbf16>,
    %c64_114 = arith.constant 64 : index
    %c48_115 = arith.constant 48 : index
    %203 = vector.load %arg6[%c64_114, %c48_115] : memref<128x384xbf16, #tpu.memory_space<vmem>>, vector<64x16xbf16>
    %c64_116 = arith.constant 64 : index
    %c176_117 = arith.constant 176 : index
    %204 = vector.load %arg6[%c64_116, %c176_117] : memref<128x384xbf16, #tpu.memory_space<vmem>>, vector<64x16xbf16>
    %c64_118 = arith.constant 64 : index
    %c304_119 = arith.constant 304 : index
    %205 = vector.load %arg6[%c64_118, %c304_119] : memref<128x384xbf16, #tpu.memory_space<vmem>>, vector<64x16xbf16>
    %cst_120 = arith.constant dense<0.000000e+00> : vector<64x64xf32>
    %206 = tpu.matmul %203, %204, %cst_120 {dimension_numbers = #tpu.dot_dimension_numbers<[1], [1], [0], [0], [0, 0, 1, 0], [], []>} : vector<64x16xbf16>, vector<64x16xbf16>, vector<64x64xf32> -> vector<64x64xf32>
    %cst_121 = arith.constant dense<0xFF800000> : vector<64xf32>
    %207 = vector.multi_reduction <maximumf>, %206, %cst_121 [1] : vector<64x64xf32> to vector<64xf32>
    %208 = vector.shape_cast %207 : vector<64xf32> to vector<64x1xf32>
    %209 = vector.broadcast %208 : vector<64x1xf32> to vector<64x64xf32>
    %210 = arith.subf %206, %209 : vector<64x64xf32>
    %211 = math.exp %210 : vector<64x64xf32>
    %cst_122 = arith.constant dense<0.000000e+00> : vector<64xf32>
    %212 = vector.multi_reduction <add>, %211, %cst_122 [1] : vector<64x64xf32> to vector<64xf32>
    %213 = vector.shape_cast %212 : vector<64xf32> to vector<64x1xf32>
    %214 = tpu.reciprocal %213 {approx = true} : vector<64x1xf32> -> vector<64x1xf32>
    %215 = vector.broadcast %214 : vector<64x1xf32> to vector<64x64xf32>
    %216 = arith.mulf %211, %215 : vector<64x64xf32>
    %217 = arith.truncf %216 : vector<64x64xf32> to vector<64x64xbf16>
    %cst_123 = arith.constant dense<0.000000e+00> : vector<64x16xf32>
    %218 = tpu.matmul %217, %205, %cst_123 {dimension_numbers = #tpu.dot_dimension_numbers<[1], [0], [0], [1], [0, 0, 1, 1], [], []>} : vector<64x64xbf16>, vector<64x16xbf16>, vector<64x16xf32> -> vector<64x16xf32>
    %219 = arith.truncf %218 : vector<64x16xf32> to vector<64x16xbf16>
    %c64_124 = arith.constant 64 : index
    %c48_125 = arith.constant 48 : index
    %220 = vector.load %arg7[%c64_124, %c48_125] : memref<128x128xbf16, #tpu.memory_space<vmem>>, vector<64x16xbf16>
    tpu.vector_store %arg7[%c64_124, %c48_125], %219 {strides = array<i32>} : memref<128x128xbf16, #tpu.memory_space<vmem>>, vector<64x16xbf16>,
    %c64_126 = arith.constant 64 : index
    %c64_127 = arith.constant 64 : index
    %221 = vector.load %arg6[%c64_126, %c64_127] : memref<128x384xbf16, #tpu.memory_space<vmem>>, vector<64x16xbf16>
    %c64_128 = arith.constant 64 : index
    %c192_129 = arith.constant 192 : index
    %222 = vector.load %arg6[%c64_128, %c192_129] : memref<128x384xbf16, #tpu.memory_space<vmem>>, vector<64x16xbf16>
    %c64_130 = arith.constant 64 : index
    %c320_131 = arith.constant 320 : index
    %223 = vector.load %arg6[%c64_130, %c320_131] : memref<128x384xbf16, #tpu.memory_space<vmem>>, vector<64x16xbf16>
    %cst_132 = arith.constant dense<0.000000e+00> : vector<64x64xf32>
    %224 = tpu.matmul %221, %222, %cst_132 {dimension_numbers = #tpu.dot_dimension_numbers<[1], [1], [0], [0], [0, 0, 1, 0], [], []>} : vector<64x16xbf16>, vector<64x16xbf16>, vector<64x64xf32> -> vector<64x64xf32>
    %cst_133 = arith.constant dense<0xFF800000> : vector<64xf32>
    %225 = vector.multi_reduction <maximumf>, %224, %cst_133 [1] : vector<64x64xf32> to vector<64xf32>
    %226 = vector.shape_cast %225 : vector<64xf32> to vector<64x1xf32>
    %227 = vector.broadcast %226 : vector<64x1xf32> to vector<64x64xf32>
    %228 = arith.subf %224, %227 : vector<64x64xf32>
    %229 = math.exp %228 : vector<64x64xf32>
    %cst_134 = arith.constant dense<0.000000e+00> : vector<64xf32>
    %230 = vector.multi_reduction <add>, %229, %cst_134 [1] : vector<64x64xf32> to vector<64xf32>
    %231 = vector.shape_cast %230 : vector<64xf32> to vector<64x1xf32>
    %232 = tpu.reciprocal %231 {approx = true} : vector<64x1xf32> -> vector<64x1xf32>
    %233 = vector.broadcast %232 : vector<64x1xf32> to vector<64x64xf32>
    %234 = arith.mulf %229, %233 : vector<64x64xf32>
    %235 = arith.truncf %234 : vector<64x64xf32> to vector<64x64xbf16>
    %cst_135 = arith.constant dense<0.000000e+00> : vector<64x16xf32>
    %236 = tpu.matmul %235, %223, %cst_135 {dimension_numbers = #tpu.dot_dimension_numbers<[1], [0], [0], [1], [0, 0, 1, 1], [], []>} : vector<64x64xbf16>, vector<64x16xbf16>, vector<64x16xf32> -> vector<64x16xf32>
    %237 = arith.truncf %236 : vector<64x16xf32> to vector<64x16xbf16>
    %c64_136 = arith.constant 64 : index
    %c64_137 = arith.constant 64 : index
    %238 = vector.load %arg7[%c64_136, %c64_137] : memref<128x128xbf16, #tpu.memory_space<vmem>>, vector<64x16xbf16>
    tpu.vector_store %arg7[%c64_136, %c64_137], %237 {strides = array<i32>} : memref<128x128xbf16, #tpu.memory_space<vmem>>, vector<64x16xbf16>,
    %c64_138 = arith.constant 64 : index
    %c80_139 = arith.constant 80 : index
    %239 = vector.load %arg6[%c64_138, %c80_139] : memref<128x384xbf16, #tpu.memory_space<vmem>>, vector<64x16xbf16>
    %c64_140 = arith.constant 64 : index
    %c208_141 = arith.constant 208 : index
    %240 = vector.load %arg6[%c64_140, %c208_141] : memref<128x384xbf16, #tpu.memory_space<vmem>>, vector<64x16xbf16>
    %c64_142 = arith.constant 64 : index
    %c336_143 = arith.constant 336 : index
    %241 = vector.load %arg6[%c64_142, %c336_143] : memref<128x384xbf16, #tpu.memory_space<vmem>>, vector<64x16xbf16>
    %cst_144 = arith.constant dense<0.000000e+00> : vector<64x64xf32>
    %242 = tpu.matmul %239, %240, %cst_144 {dimension_numbers = #tpu.dot_dimension_numbers<[1], [1], [0], [0], [0, 0, 1, 0], [], []>} : vector<64x16xbf16>, vector<64x16xbf16>, vector<64x64xf32> -> vector<64x64xf32>
    %cst_145 = arith.constant dense<0xFF800000> : vector<64xf32>
    %243 = vector.multi_reduction <maximumf>, %242, %cst_145 [1] : vector<64x64xf32> to vector<64xf32>
    %244 = vector.shape_cast %243 : vector<64xf32> to vector<64x1xf32>
    %245 = vector.broadcast %244 : vector<64x1xf32> to vector<64x64xf32>
    %246 = arith.subf %242, %245 : vector<64x64xf32>
    %247 = math.exp %246 : vector<64x64xf32>
    %cst_146 = arith.constant dense<0.000000e+00> : vector<64xf32>
    %248 = vector.multi_reduction <add>, %247, %cst_146 [1] : vector<64x64xf32> to vector<64xf32>
    %249 = vector.shape_cast %248 : vector<64xf32> to vector<64x1xf32>
    %250 = tpu.reciprocal %249 {approx = true} : vector<64x1xf32> -> vector<64x1xf32>
    %251 = vector.broadcast %250 : vector<64x1xf32> to vector<64x64xf32>
    %252 = arith.mulf %247, %251 : vector<64x64xf32>
    %253 = arith.truncf %252 : vector<64x64xf32> to vector<64x64xbf16>
    %cst_147 = arith.constant dense<0.000000e+00> : vector<64x16xf32>
    %254 = tpu.matmul %253, %241, %cst_147 {dimension_numbers = #tpu.dot_dimension_numbers<[1], [0], [0], [1], [0, 0, 1, 1], [], []>} : vector<64x64xbf16>, vector<64x16xbf16>, vector<64x16xf32> -> vector<64x16xf32>
    %255 = arith.truncf %254 : vector<64x16xf32> to vector<64x16xbf16>
    %c64_148 = arith.constant 64 : index
    %c80_149 = arith.constant 80 : index
    %256 = vector.load %arg7[%c64_148, %c80_149] : memref<128x128xbf16, #tpu.memory_space<vmem>>, vector<64x16xbf16>
    tpu.vector_store %arg7[%c64_148, %c80_149], %255 {strides = array<i32>} : memref<128x128xbf16, #tpu.memory_space<vmem>>, vector<64x16xbf16>,
    %c64_150 = arith.constant 64 : index
    %c96_151 = arith.constant 96 : index
    %257 = vector.load %arg6[%c64_150, %c96_151] : memref<128x384xbf16, #tpu.memory_space<vmem>>, vector<64x16xbf16>
    %c64_152 = arith.constant 64 : index
    %c224_153 = arith.constant 224 : index
    %258 = vector.load %arg6[%c64_152, %c224_153] : memref<128x384xbf16, #tpu.memory_space<vmem>>, vector<64x16xbf16>
    %c64_154 = arith.constant 64 : index
    %c352_155 = arith.constant 352 : index
    %259 = vector.load %arg6[%c64_154, %c352_155] : memref<128x384xbf16, #tpu.memory_space<vmem>>, vector<64x16xbf16>
    %cst_156 = arith.constant dense<0.000000e+00> : vector<64x64xf32>
    %260 = tpu.matmul %257, %258, %cst_156 {dimension_numbers = #tpu.dot_dimension_numbers<[1], [1], [0], [0], [0, 0, 1, 0], [], []>} : vector<64x16xbf16>, vector<64x16xbf16>, vector<64x64xf32> -> vector<64x64xf32>
    %cst_157 = arith.constant dense<0xFF800000> : vector<64xf32>
    %261 = vector.multi_reduction <maximumf>, %260, %cst_157 [1] : vector<64x64xf32> to vector<64xf32>
    %262 = vector.shape_cast %261 : vector<64xf32> to vector<64x1xf32>
    %263 = vector.broadcast %262 : vector<64x1xf32> to vector<64x64xf32>
    %264 = arith.subf %260, %263 : vector<64x64xf32>
    %265 = math.exp %264 : vector<64x64xf32>
    %cst_158 = arith.constant dense<0.000000e+00> : vector<64xf32>
    %266 = vector.multi_reduction <add>, %265, %cst_158 [1] : vector<64x64xf32> to vector<64xf32>
    %267 = vector.shape_cast %266 : vector<64xf32> to vector<64x1xf32>
    %268 = tpu.reciprocal %267 {approx = true} : vector<64x1xf32> -> vector<64x1xf32>
    %269 = vector.broadcast %268 : vector<64x1xf32> to vector<64x64xf32>
    %270 = arith.mulf %265, %269 : vector<64x64xf32>
    %271 = arith.truncf %270 : vector<64x64xf32> to vector<64x64xbf16>
    %cst_159 = arith.constant dense<0.000000e+00> : vector<64x16xf32>
    %272 = tpu.matmul %271, %259, %cst_159 {dimension_numbers = #tpu.dot_dimension_numbers<[1], [0], [0], [1], [0, 0, 1, 1], [], []>} : vector<64x64xbf16>, vector<64x16xbf16>, vector<64x16xf32> -> vector<64x16xf32>
    %273 = arith.truncf %272 : vector<64x16xf32> to vector<64x16xbf16>
    %c64_160 = arith.constant 64 : index
    %c96_161 = arith.constant 96 : index
    %274 = vector.load %arg7[%c64_160, %c96_161] : memref<128x128xbf16, #tpu.memory_space<vmem>>, vector<64x16xbf16>
    tpu.vector_store %arg7[%c64_160, %c96_161], %273 {strides = array<i32>} : memref<128x128xbf16, #tpu.memory_space<vmem>>, vector<64x16xbf16>,
    %c64_162 = arith.constant 64 : index
    %c112_163 = arith.constant 112 : index
    %275 = vector.load %arg6[%c64_162, %c112_163] : memref<128x384xbf16, #tpu.memory_space<vmem>>, vector<64x16xbf16>
    %c64_164 = arith.constant 64 : index
    %c240_165 = arith.constant 240 : index
    %276 = vector.load %arg6[%c64_164, %c240_165] : memref<128x384xbf16, #tpu.memory_space<vmem>>, vector<64x16xbf16>
    %c64_166 = arith.constant 64 : index
    %c368_167 = arith.constant 368 : index
    %277 = vector.load %arg6[%c64_166, %c368_167] : memref<128x384xbf16, #tpu.memory_space<vmem>>, vector<64x16xbf16>
    %cst_168 = arith.constant dense<0.000000e+00> : vector<64x64xf32>
    %278 = tpu.matmul %275, %276, %cst_168 {dimension_numbers = #tpu.dot_dimension_numbers<[1], [1], [0], [0], [0, 0, 1, 0], [], []>} : vector<64x16xbf16>, vector<64x16xbf16>, vector<64x64xf32> -> vector<64x64xf32>
    %cst_169 = arith.constant dense<0xFF800000> : vector<64xf32>
    %279 = vector.multi_reduction <maximumf>, %278, %cst_169 [1] : vector<64x64xf32> to vector<64xf32>
    %280 = vector.shape_cast %279 : vector<64xf32> to vector<64x1xf32>
    %281 = vector.broadcast %280 : vector<64x1xf32> to vector<64x64xf32>
    %282 = arith.subf %278, %281 : vector<64x64xf32>
    %283 = math.exp %282 : vector<64x64xf32>
    %cst_170 = arith.constant dense<0.000000e+00> : vector<64xf32>
    %284 = vector.multi_reduction <add>, %283, %cst_170 [1] : vector<64x64xf32> to vector<64xf32>
    %285 = vector.shape_cast %284 : vector<64xf32> to vector<64x1xf32>
    %286 = tpu.reciprocal %285 {approx = true} : vector<64x1xf32> -> vector<64x1xf32>
    %287 = vector.broadcast %286 : vector<64x1xf32> to vector<64x64xf32>
    %288 = arith.mulf %283, %287 : vector<64x64xf32>
    %289 = arith.truncf %288 : vector<64x64xf32> to vector<64x64xbf16>
    %cst_171 = arith.constant dense<0.000000e+00> : vector<64x16xf32>
    %290 = tpu.matmul %289, %277, %cst_171 {dimension_numbers = #tpu.dot_dimension_numbers<[1], [0], [0], [1], [0, 0, 1, 1], [], []>} : vector<64x64xbf16>, vector<64x16xbf16>, vector<64x16xf32> -> vector<64x16xf32>
    %291 = arith.truncf %290 : vector<64x16xf32> to vector<64x16xbf16>
    %c64_172 = arith.constant 64 : index
    %c112_173 = arith.constant 112 : index
    %292 = vector.load %arg7[%c64_172, %c112_173] : memref<128x128xbf16, #tpu.memory_space<vmem>>, vector<64x16xbf16>
    tpu.vector_store %arg7[%c64_172, %c112_173], %291 {strides = array<i32>} : memref<128x128xbf16, #tpu.memory_space<vmem>>, vector<64x16xbf16>,
    %c0_174 = arith.constant 0 : index
    %c0_175 = arith.constant 0 : index
    %293 = vector.load %arg7[%c0_174, %c0_175] : memref<128x128xbf16, #tpu.memory_space<vmem>>, vector<128x128xbf16>
    %c0_176 = arith.constant 0 : index
    %c0_177 = arith.constant 0 : index
    %294 = vector.load %arg3[%c0_176, %c0_177] : memref<128x128xbf16, #tpu.memory_space<vmem>>, vector<128x128xbf16>
    %cst_178 = arith.constant dense<0.000000e+00> : vector<128x128xf32>
    %295 = tpu.matmul %293, %294, %cst_178 {dimension_numbers = #tpu.dot_dimension_numbers<[1], [0], [0], [1], [0, 0, 1, 1], [], []>} : vector<128x128xbf16>, vector<128x128xbf16>, vector<128x128xf32> -> vector<128x128xf32>
    %c0_179 = arith.constant 0 : index
    %c0_180 = arith.constant 0 : index
    %296 = vector.load %arg4[%c0_179, %c0_180] : memref<1x128xf32, #tpu.memory_space<vmem>>, vector<1x128xf32>
    %297 = vector.broadcast %296 : vector<1x128xf32> to vector<128x128xf32>
    %298 = arith.addf %295, %297 : vector<128x128xf32>
    %c0_181 = arith.constant 0 : index
    %c0_182 = arith.constant 0 : index
    %299 = vector.load %arg5[%c0_181, %c0_182] : memref<128x128xf32, #tpu.memory_space<vmem>>, vector<128x128xf32>
    tpu.vector_store %arg5[%c0_181, %c0_182], %298 {strides = array<i32>} : memref<128x128xf32, #tpu.memory_space<vmem>>, vector<128x128xf32>,
    return
  }
  func.func @transform_0(%arg0: i32) -> (i32, i32) {
    %c0_i32 = arith.constant 0 : i32
    %c0_i32_0 = arith.constant 0 : i32
    return %arg0, %c0_i32 : i32, i32
  }
  func.func @transform_1(%arg0: i32) -> (i32, i32) {
    %c0_i32 = arith.constant 0 : i32
    %c0_i32_0 = arith.constant 0 : i32
    %c0_i32_1 = arith.constant 0 : i32
    return %c0_i32, %c0_i32_0 : i32, i32
  }
  func.func @transform_2(%arg0: i32) -> (i32, i32) {
    %c0_i32 = arith.constant 0 : i32
    %c0_i32_0 = arith.constant 0 : i32
    %c0_i32_1 = arith.constant 0 : i32
    return %c0_i32, %c0_i32_0 : i32, i32
  }
  func.func @transform_3(%arg0: i32) -> (i32, i32) {
    %c0_i32 = arith.constant 0 : i32
    %c0_i32_0 = arith.constant 0 : i32
    %c0_i32_1 = arith.constant 0 : i32
    return %c0_i32, %c0_i32_0 : i32, i32
  }
  func.func @transform_4(%arg0: i32) -> (i32, i32) {
    %c0_i32 = arith.constant 0 : i32
    %c0_i32_0 = arith.constant 0 : i32
    return %arg0, %c0_i32 : i32, i32
  }
}

</mosaic_0001>

<bundles_post_ra>
// kernel: attention_forward.1
= control target key start
LH: loop header
LB: loop body
LE: loop exit
PB: predicated region body
PF: predicated region fallthrough
CT: control target
= control target key end

     0   :  { %9 = vsyncpa [#allocation5], 0  ;;  %s10636_s0 = inlined_call_operand.vmem [shape: bf16[128,128], index: 0, kind: input, shape index: {}]   ;;  %s10637_s1 = inlined_call_operand.vmem [shape: bf16[128,384], index: 1, kind: input, shape index: {}]   ;;  %s10638_s2 = inlined_call_operand.hbm [shape: bf16[128,128], index: 2, kind: input, shape index: {}]   ;;  %s10639_s3 = inlined_call_operand.vmem [shape: f32[1,128], index: 3, kind: input, shape index: {}]   ;;  %s10640_s4 = inlined_call_operand.hbm [shape: f32[128,128], index: 4, kind: output, shape index: {}]  }
   0x1   :  { %10 = vsyncpa [#allocation6], 0  ;;  %s19_s17 = sshll.u32 %s10638_s2, 4  ;;  %s8034_s18 = smov [#allocation4]   ;;  %s20_s17 = int_to_ptr.hbm [resolvable:$true] %s19_s17 }
   0x2   :  { %s21_s19 = sshll.u32 %s8034_s18, 4  ;;  %s8035_s20 = smov 64   ;;  %s22_s19 = int_to_ptr.vmem [resolvable:$true] %s21_s19 }
   0x3   :  { %s8036_s21 = smov 4  }
   0x4   :  { %27 = dma.hbm_to_vmem [thread:$0]  %s20_s17, 1024, %s22_s19, [#allocation5], %s8035_s20, %s8035_s20, %s8036_s21  }
   0x5   :  { %8030 = dma.done.wait [#allocation5], 1024  }
   0x6   :  { %8031 = vsyncadd [#allocation5], 4294966272  ;;  %v6238_v0 = vld [vmem:[%s10637_s1 + $0xa8] sm:$0xf]  ;;  %v7238_v1 = vld [vmem:[%s10637_s1 + $0xb0] sm:$0xf0] }
   0x7   :  { %v7237_v2 = vld [vmem:[%s10637_s1 + $0xac] sm:$0xf]  ;;  %v6239_v3 = vor.u32 %v7238_v1, %v6238_v0  ;;  %v6240_v4 = vld [vmem:[%s10637_s1 + $0xb4] sm:$0xf0]  ;;  %v6226_v5 = vld [vmem:[%s10637_s1 + $0x90] sm:$0xf] }
   0x8   :  { %v7235_v6 = vld [vmem:[%s10637_s1 + $0x98] sm:$0xf0]  ;;  %v6243_v7 = vor.u32 %v7237_v2, %v6240_v4  ;;  %v7234_v8 = vld [vmem:[%s10637_s1 + $0x94] sm:$0xf]  ;;  %v6228_v9 = vld [vmem:[%s10637_s1 + $0x9c] sm:$0xf0] }
   0x9   :  { %259 = vmatpush.bf16.msra.mxu0 %v6239_v3  ;;  %v6227_v10 = vor.u32 %v7235_v6, %v6226_v5  ;;  %v6214_v11 = vld [vmem:[%s10637_s1 + $0x78] sm:$0xf]  ;;  %v6231_v12 = vor.u32 %v7234_v8, %v6228_v9  ;;  %v7232_v13 = vld [vmem:[%s10637_s1 + $0x80] sm:$0xf0]  ;;  %v6246_v14 = vld [vmem:[%s10637_s1 + $0xb0] sm:$0xf] }
   0xa   :  { %308 = vmatpush.bf16.msra.mxu1 %v6243_v7  ;;  %v7239_v15 = vld [vmem:[%s10637_s1 + $0xb8] sm:$0xf0]  ;;  %v6216_v17 = vld [vmem:[%s10637_s1 + $0x84] sm:$0xf0]  ;;  %v6234_v19 = vld [vmem:[%s10637_s1 + $0x98] sm:$0xf]  ;;  %v6215_v21 = vor.u32 %v7232_v13, %v6214_v11 }
   0xb   :  { %v7231_v16 = vld [vmem:[%s10637_s1 + $0x7c] sm:$0xf]  ;;  %v6247_v18 = vor.u32 %v7239_v15, %v6246_v14  ;;  %v7236_v20 = vld [vmem:[%s10637_s1 + $0xa0] sm:$0xf0]  ;;  %v6202_v22 = vld [vmem:[%s10637_s1 + $0x60] sm:$0xf] }
   0xc   :  { %v6235_v23 = vor.u32 %v7236_v20, %v6234_v19  ;;  %v6219_v24 = vor.u32 %v7231_v16, %v6216_v17  ;;  %v7229_v25 = vld [vmem:[%s10637_s1 + $0x68] sm:$0xf0]  ;;  %v6222_v26 = vld [vmem:[%s10637_s1 + $0x80] sm:$0xf]  ;;  %v7228_v28 = vld [vmem:[%s10637_s1 + $0x64] sm:$0xf] }
   0xd   :  { %260 = vmatpush.bf16.msra.mxu0 %v6227_v10  ;;  %357 = vmatpush.bf16.msra.mxu2 %v6247_v18  ;;  %v7233_v27 = vld [vmem:[%s10637_s1 + $0x88] sm:$0xf0]  ;;  %v6204_v29 = vld [vmem:[%s10637_s1 + $0x6c] sm:$0xf0]  ;;  %v6203_v30 = vor.u32 %v7229_v25, %v6202_v22  ;;  %v6190_v31 = vld [vmem:[%s10637_s1 + $0x48] sm:$0xf] }
   0xe   :  { %309 = vmatpush.bf16.msra.mxu1 %v6231_v12  ;;  %7448 = vmatpush.bf16.msra.mxu3 %v6247_v18  ;;  %v6223_v32 = vor.u32 %v7233_v27, %v6222_v26  ;;  %v6207_v33 = vor.u32 %v7228_v28, %v6204_v29  ;;  %v7226_v34 = vld [vmem:[%s10637_s1 + $0x50] sm:$0xf0]  ;;  %v6210_v35 = vld [vmem:[%s10637_s1 + $0x68] sm:$0xf]  ;;  %v7225_v37 = vld [vmem:[%s10637_s1 + $0x4c] sm:$0xf] }
   0xf   :  { %v7230_v36 = vld [vmem:[%s10637_s1 + $0x70] sm:$0xf0]  ;;  %v6192_v38 = vld [vmem:[%s10637_s1 + $0x54] sm:$0xf0]  ;;  %v6191_v39 = vor.u32 %v7226_v34, %v6190_v31  ;;  %v6178_v40 = vld [vmem:[%s10637_s1 + $0x30] sm:$0xf] }
  0x10   :  { %v7223_v41 = vld [vmem:[%s10637_s1 + $0x38] sm:$0xf0]  ;;  %v6211_v42 = vor.u32 %v7230_v36, %v6210_v35  ;;  %v6195_v43 = vor.u32 %v7225_v37, %v6192_v38  ;;  %v6198_v44 = vld [vmem:[%s10637_s1 + $0x50] sm:$0xf]  ;;  %v7222_v46 = vld [vmem:[%s10637_s1 + $0x34] sm:$0xf] }
  0x11   :  { %261 = vmatpush.bf16.msra.mxu0 %v6215_v21  ;;  %358 = vmatpush.bf16.msra.mxu2 %v6235_v23  ;;  %v7227_v45 = vld [vmem:[%s10637_s1 + $0x58] sm:$0xf0]  ;;  %v6180_v47 = vld [vmem:[%s10637_s1 + $0x3c] sm:$0xf0]  ;;  %v6179_v48 = vor.u32 %v7223_v41, %v6178_v40  ;;  %v6166_v49 = vld [vmem:[%s10637_s1 + $0x18] sm:$0xf] }
  0x12   :  { %310 = vmatpush.bf16.msra.mxu1 %v6219_v24  ;;  %7449 = vmatpush.bf16.msra.mxu3 %v6235_v23  ;;  %v6199_v50 = vor.u32 %v7227_v45, %v6198_v44  ;;  %v6183_v51 = vor.u32 %v7222_v46, %v6180_v47  ;;  %v7220_v52 = vld [vmem:[%s10637_s1 + $0x20] sm:$0xf0]  ;;  %v6186_v53 = vld [vmem:[%s10637_s1 + $0x38] sm:$0xf]  ;;  %v7219_v55 = vld [vmem:[%s10637_s1 + $0x1c] sm:$0xf] }
  0x13   :  { %v7224_v54 = vld [vmem:[%s10637_s1 + $0x40] sm:$0xf0]  ;;  %v6168_v56 = vld [vmem:[%s10637_s1 + $0x24] sm:$0xf0]  ;;  %v6167_v57 = vor.u32 %v7220_v52, %v6166_v49  ;;  %v6154_v58 = vld [vmem:[%s10637_s1] sm:$0xf] }
  0x14   :  { %v6187_v59 = vor.u32 %v7224_v54, %v6186_v53  ;;  %v6171_v60 = vor.u32 %v7219_v55, %v6168_v56  ;;  %v7217_v61 = vld [vmem:[%s10637_s1 + $0x8] sm:$0xf0]  ;;  %v6174_v62 = vld [vmem:[%s10637_s1 + $0x20] sm:$0xf]  ;;  %v7216_v0 = vld [vmem:[%s10637_s1 + $0x4] sm:$0xf] }
  0x15   :  { %262 = vmatpush.bf16.msra.mxu0 %v6203_v30  ;;  %359 = vmatpush.bf16.msra.mxu2 %v6223_v32  ;;  %v7221_v63 = vld [vmem:[%s10637_s1 + $0x28] sm:$0xf0]  ;;  %v6156_v1 = vld [vmem:[%s10637_s1 + $0xc] sm:$0xf0]  ;;  %v6155_v2 = vor.u32 %v7217_v61, %v6154_v58  ;;  %v6162_v5 = vld [vmem:[%s10637_s1 + $0x8] sm:$0xf] }
  0x16   :  { %311 = vmatpush.bf16.msra.mxu1 %v6207_v33  ;;  %7450 = vmatpush.bf16.msra.mxu3 %v6223_v32  ;;  %v6175_v3 = vor.u32 %v7221_v63, %v6174_v62  ;;  %v6159_v4 = vor.u32 %v7216_v0, %v6156_v1  ;;  %v7218_v6 = vld [vmem:[%s10637_s1 + $0x10] sm:$0xf0]  ;;  %v7208_v7 = vld [vmem:[%s10636_s0] sm:$0xff]  ;;  %v7209_v9 = vld [vmem:[%s10636_s0 + $0x8] sm:$0xff]  ;;  %s8037_s25 = smov 96   ;;  %s8038_s2 = smov 112  }
  0x17   :  { %v6163_v8 = vor.u32 %v7218_v6, %v6162_v5  ;;  %v7210_v10 = vld [vmem:[%s10636_s0 + $0x10] sm:$0xff]  ;;  %v7211_v11 = vld [vmem:[%s10636_s0 + $0x18] sm:$0xff]  ;;  %v7212_v15 = vld [vmem:[%s10636_s0 + $0x20] sm:$0xff]  ;;  %s8039_s26 = smov 80   ;;  %s8040_s29 = smov 48   ;;  %vm534_vm0 = vcmask 130048  }
  0x18   :  { %v7213_v35 = vld [vmem:[%s10636_s0 + $0x28] sm:$0xff]  ;;  %vm588_vm1 = vcmask 523264   ;;  %vm754_vm2 = vcmask 125952   ;;  %s8042_s6 = smov 16   ;;  %vm1101_vm3 = vcmask 257152   ;;  %vm1448_vm4 = vcmask 388352  }
  0x19   :  { %263 = vmatpush.bf16.msra.mxu0 %v6191_v39  ;;  %360 = vmatpush.bf16.msra.mxu2 %v6211_v42  ;;  %vm1795_vm5 = vcmask 519552   ;;  %vm2142_vm6 = vcmask 650752   ;;  %vm2489_vm7 = vcmask 781952   ;;  %vm2836_vm8 = vcmask 913152   ;;  %s6107_s13 = sshll.u32 %s10640_s4, 4  ;;  %s8044_s14 = smov 128   ;;  %s6108_s13 = int_to_ptr.hbm [resolvable:$true] %s6107_s13 }
  0x1a   :  { %312 = vmatpush.bf16.msra.mxu1 %v6195_v43  ;;  %7451 = vmatpush.bf16.msra.mxu3 %v6211_v42  ;;  %vm3183_vm9 = vcmask 1044352   ;;  %s8045_s15 = smov 8  }
  0x1d   :  { %264 = vmatpush.bf16.msra.mxu0 %v6179_v48  ;;  %361 = vmatpush.bf16.msra.mxu2 %v6199_v50 }
  0x1e   :  { %313 = vmatpush.bf16.msra.mxu1 %v6183_v51  ;;  %7452 = vmatpush.bf16.msra.mxu3 %v6199_v50 }
  0x21   :  { %265 = vmatpush.bf16.msra.mxu0 %v6167_v57  ;;  %362 = vmatpush.bf16.msra.mxu2 %v6187_v59 }
  0x22   :  { %314 = vmatpush.bf16.msra.mxu1 %v6171_v60  ;;  %7453 = vmatpush.bf16.msra.mxu3 %v6187_v59  ;;  %v7214_v60 = vld [vmem:[%s10636_s0 + $0x30] sm:$0xff] }
  0x25   :  { %266 = vmatpush.bf16.msra.mxu0 %v6155_v2  ;;  %363 = vmatpush.bf16.msra.mxu2 %v6175_v3 }
  0x26   :  { %315 = vmatpush.bf16.msra.mxu1 %v6159_v4  ;;  %7454 = vmatpush.bf16.msra.mxu3 %v6175_v3 }
  0x28   :  { %267 = vmatmul.bf16.vlgmr.msra.gmra.mxu0 %v7208_v7 }
  0x29   :  { %316 = vmatmul.bf16.vlgmr.msra.gmra.mxu1 %v7208_v7  ;;  %364 = vmatpush.bf16.msra.mxu2 %v6163_v8 }
  0x2a   :  { %7455 = vmatpush.bf16.msra.mxu3 %v6163_v8 }
  0x2c   :  { %365 = vmatmul.bf16.vlgmr.msra.gmra.mxu2 %v7208_v7 }
  0x2d   :  { %385 = vmatmul.bf16.vlgmr.msra.gmra.mxu3 %v7212_v15 }
  0x38   :  { %272 = vmatmul.bf16.gmra.mxu0 %v7209_v9 }
  0x39   :  { %321 = vmatmul.bf16.gmra.mxu1 %v7209_v9 }
  0x3c   :  { %370 = vmatmul.bf16.gmra.mxu2 %v7209_v9 }
  0x3d   :  { %390 = vmatmul.bf16.gmra.mxu3 %v7213_v35 }
  0x48   :  { %277 = vmatmul.bf16.gmra.mxu0 %v7210_v10 }
  0x49   :  { %326 = vmatmul.bf16.gmra.mxu1 %v7210_v10 }
  0x4c   :  { %375 = vmatmul.bf16.gmra.mxu2 %v7210_v10 }
  0x4d   :  { %395 = vmatmul.bf16.gmra.mxu3 %v7214_v60 }
  0x58   :  { %282 = vmatmul.bf16.gmra.mxu0 %v7211_v11 }
  0x59   :  { %331 = vmatmul.bf16.gmra.mxu1 %v7211_v11 }
  0x5c   :  { %380 = vmatmul.bf16.gmra.mxu2 %v7211_v11 }
  0x68   :  { %287 = vmatmul.bf16.gmra.mxu0 %v7212_v15 }
  0x69   :  { %336 = vmatmul.bf16.gmra.mxu1 %v7212_v15 }
  0x78   :  { %292 = vmatmul.bf16.gmra.mxu0 %v7213_v35 }
  0x79   :  { %341 = vmatmul.bf16.gmra.mxu1 %v7213_v35 }
  0x88   :  { %297 = vmatmul.bf16.gmra.mxu0 %v7214_v60 }
  0x89   :  { %346 = vmatmul.bf16.gmra.mxu1 %v7214_v60 }
  0xa5   :  { %v268_v12 = vpop.f32.mrf.mxu0 }
  0xa6   :  { %v317_v13 = vpop.f32.mrf.mxu1 }
  0xa7   :  { %v406_v14 = vpack.c.bf16 %v317_v13, %v268_v12 }
  0xa9   :  { %438 = vst [vmem:[#allocation2] sm:$0xff] %v406_v14 }
  0xad   :  { %v270_v16 = vpop.f32.mrf.mxu0 }
  0xae   :  { %v319_v17 = vpop.f32.mrf.mxu1 }
  0xaf   :  { %v408_v18 = vpack.c.bf16 %v319_v17, %v270_v16  ;;  %v366_v19 = vpop.f32.mrf.mxu2 }
  0xb0   :  { %v407_v20 = vpack.c.bf16 %v366_v19, %v366_v19  ;;  %v6378_v24 = vld [vmem:[#allocation2 + $0x4] sm:$0xf]  ;;  %v6362_v25 = vld [vmem:[#allocation2] sm:$0xf] }
  0xb1   :  { %440 = vst [vmem:[#allocation2 + $0xc] sm:$0xff] %v408_v18  ;;  %v6306_v26 = vld [vmem:[#allocation2] sm:$0xf]  ;;  %v6434_v44 = vld [vmem:[#allocation2 + $0x4] sm:$0xf] }
  0xb2   :  { %439 = vst [vmem:[#allocation2 + $0x8] sm:$0xf] %v407_v20  ;;  %v6418_v43 = vld [vmem:[#allocation2] sm:$0xf]  ;;  %v6322_v48 = vld [vmem:[#allocation2 + $0x4] sm:$0xf] }
  0xb3   :  { %v6530_v57 = vld [vmem:[#allocation2] sm:$0xf]  ;;  %v6490_v58 = vld [vmem:[#allocation2 + $0x4] sm:$0xf] }
  0xb4   :  { %v6474_v63 = vld [vmem:[#allocation2] sm:$0xf]  ;;  %v6546_v10 = vld [vmem:[#allocation2 + $0x4] sm:$0xf] }
  0xb5   :  { %v273_v21 = vpop.f32.mrf.mxu0 }
  0xb6   :  { %v322_v22 = vpop.f32.mrf.mxu1 }
  0xb7   :  { %v410_v23 = vpack.c.bf16 %v322_v22, %v273_v21  ;;  %v368_v27 = vpop.f32.mrf.mxu2 }
  0xb8   :  { %v7268_v28 = vld [vmem:[#allocation2 + $0xc] sm:$0xf0]  ;;  %v7264_v29 = vld [vmem:[#allocation2 + $0x8] sm:$0xf0]  ;;  %v409_v31 = vpack.c.bf16 %v368_v27, %v368_v27 }
  0xb9   :  { %v7252_v30 = vld [vmem:[#allocation2 + $0x8] sm:$0xf0]  ;;  %442 = vst [vmem:[#allocation2 + $0x18] sm:$0xff] %v410_v23  ;;  %v6379_v32 = vor.u32 %v7268_v28, %v6378_v24  ;;  %v6363_v33 = vor.u32 %v7264_v29, %v6362_v25  ;;  %v7280_v39 = vld [vmem:[#allocation2 + $0xc] sm:$0xf0] }
  0xba   :  { %v6307_v34 = vor.u32 %v7252_v30, %v6306_v26  ;;  %441 = vst [vmem:[#allocation2 + $0x14] sm:$0xf] %v409_v31  ;;  %v7276_v38 = vld [vmem:[#allocation2 + $0x8] sm:$0xf0]  ;;  %v7256_v41 = vld [vmem:[#allocation2 + $0xc] sm:$0xf0]  ;;  %v6435_v47 = vor.u32 %v7280_v39, %v6434_v44 }
  0xbb   :  { %1182 = vrot.lane.b32.xlu0 %v6379_v32, %s8037_s25  ;;  %1154 = vrot.lane.b32.xlu2 %v6363_v33, %s8037_s25  ;;  %v6419_v46 = vor.u32 %v7276_v38, %v6418_v43  ;;  %v6323_v49 = vor.u32 %v7256_v41, %v6322_v48  ;;  %v7300_v52 = vld [vmem:[#allocation2 + $0x8] sm:$0xf0]  ;;  %v7292_v53 = vld [vmem:[#allocation2 + $0xc] sm:$0xf0]  ;;  %v6454_v3 = vld [vmem:[#allocation2 + $0x8] sm:$0xf] }
  0xbc   :  { %807 = vrot.lane.b32.xlu1 %v6307_v34, %s8038_s2  ;;  %v7288_v55 = vld [vmem:[#allocation2 + $0x8] sm:$0xf0]  ;;  %v6531_v61 = vor.u32 %v7300_v52, %v6530_v57  ;;  %v6491_v62 = vor.u32 %v7292_v53, %v6490_v58  ;;  %v7304_v5 = vld [vmem:[#allocation2 + $0xc] sm:$0xf0]  ;;  %v6510_v7 = vld [vmem:[#allocation2 + $0x8] sm:$0xf] }
  0xbd   :  { %v275_v36 = vpop.f32.mrf.mxu0  ;;  %v6475_v0 = vor.u32 %v7288_v55, %v6474_v63  ;;  %v6547_v13 = vor.u32 %v7304_v5, %v6546_v10  ;;  %v6342_v16 = vld [vmem:[#allocation2 + $0x8] sm:$0xf]  ;;  %v7215_v26 = vld [vmem:[%s10636_s0 + $0x38] sm:$0xff]  ;;  %s8041_s0 = smov 32  }
  0xbe   :  { %v324_v37 = vpop.f32.mrf.mxu1  ;;  %400 = vmatmul.bf16.gmra.mxu3 %v7215_v26  ;;  %v6398_v31 = vld [vmem:[#allocation2 + $0x8] sm:$0xf]  ;;  %302 = vmatmul.bf16.gmra.mxu0 %v7215_v26 }
  0xbf   :  { %v412_v40 = vpack.c.bf16 %v324_v37, %v275_v36  ;;  %v371_v42 = vpop.f32.mrf.mxu2  ;;  %351 = vmatmul.bf16.gmra.mxu1 %v7215_v26 }
  0xc0   :  { %v411_v45 = vpack.c.bf16 %v371_v42, %v371_v42  ;;  %v6326_v19 = vld [vmem:[#allocation2 + $0x1c] sm:$0xf]  ;;  %v6366_v34 = vld [vmem:[#allocation2 + $0x18] sm:$0xf] }
  0xc1   :  { %444 = vst [vmem:[#allocation2 + $0x24] sm:$0xff] %v412_v40  ;;  %v7284_v4 = vld [vmem:[#allocation2 + $0x10] sm:$0xf0]  ;;  %v6382_v22 = vld [vmem:[#allocation2 + $0x1c] sm:$0xf] }
  0xc2   :  { %443 = vst [vmem:[#allocation2 + $0x20] sm:$0xf] %v411_v45  ;;  %v7296_v8 = vld [vmem:[#allocation2 + $0x10] sm:$0xf0]  ;;  %v6455_v12 = vor.u32 %v7284_v4, %v6454_v3  ;;  %v6438_v37 = vld [vmem:[#allocation2 + $0x1c] sm:$0xf] }
  0xc3   :  { %1501 = vrot.lane.b32.xlu0 %v6419_v46, %s8039_s26  ;;  %1529 = vrot.lane.b32.xlu2 %v6435_v47, %s8039_s26  ;;  %v6511_v14 = vor.u32 %v7296_v8, %v6510_v7  ;;  %v7260_v18 = vld [vmem:[#allocation2 + $0x10] sm:$0xf0]  ;;  %v6494_v44 = vld [vmem:[#allocation2 + $0x1c] sm:$0xf]  ;;  %v6310_v45 = vld [vmem:[#allocation2 + $0x18] sm:$0xf] }
  0xc4   :  { %835 = vrot.lane.b32.xlu1 %v6323_v49, %s8038_s2  ;;  %v6343_v27 = vor.u32 %v7260_v18, %v6342_v16  ;;  %v7272_v33 = vld [vmem:[#allocation2 + $0x10] sm:$0xf0]  ;;  %v6550_v49 = vld [vmem:[#allocation2 + $0x1c] sm:$0xf]  ;;  %v6478_v10 = vld [vmem:[#allocation2 + $0x18] sm:$0xf] }
  0xc5   :  { %v278_v50 = vpop.f32.mrf.mxu0  ;;  %v6399_v41 = vor.u32 %v7272_v33, %v6398_v31  ;;  %v6270_v8 = vld [vmem:[#allocation2 + $0x1c] sm:$0xf] }
  0xc6   :  { %v327_v51 = vpop.f32.mrf.mxu1 }
  0xc7   :  { %v414_v54 = vpack.c.bf16 %v327_v51, %v278_v50  ;;  %v373_v56 = vpop.f32.mrf.mxu2 }
  0xc8   :  { %v413_v59 = vpack.c.bf16 %v373_v56, %v373_v56  ;;  %v7257_v20 = vld [vmem:[#allocation2 + $0x24] sm:$0xf0]  ;;  %v7265_v35 = vld [vmem:[#allocation2 + $0x20] sm:$0xf0] }
  0xc9   :  { %446 = vst [vmem:[#allocation2 + $0x30] sm:$0xff] %v414_v54  ;;  %v7269_v23 = vld [vmem:[#allocation2 + $0x24] sm:$0xf0]  ;;  %v6327_v28 = vor.u32 %v7257_v20, %v6326_v19  ;;  %v6367_v42 = vor.u32 %v7265_v35, %v6366_v34  ;;  %v7253_v47 = vld [vmem:[#allocation2 + $0x20] sm:$0xf0] }
  0xca   :  { %445 = vst [vmem:[#allocation2 + $0x2c] sm:$0xf] %v413_v59  ;;  %v6383_v29 = vor.u32 %v7269_v23, %v6382_v22  ;;  %v7281_v38 = vld [vmem:[#allocation2 + $0x24] sm:$0xf0]  ;;  %v6311_v55 = vor.u32 %v7253_v47, %v6310_v45  ;;  %v6402_v63 = vld [vmem:[#allocation2 + $0x20] sm:$0xf] }
  0xcb   :  { %2195 = vrot.lane.b32.xlu0 %v6531_v61, %s8040_s29  ;;  %1876 = vrot.lane.b32.xlu2 %v6491_v62, %s8035_s20  ;;  %v6439_v43 = vor.u32 %v7281_v38, %v6438_v37  ;;  %v7293_v46 = vld [vmem:[#allocation2 + $0x24] sm:$0xf0]  ;;  %v6422_v61 = vld [vmem:[#allocation2 + $0x18] sm:$0xf]  ;;  %v7244_v22 = vld [vmem:[#allocation2 + $0xc] sm:$0xf0] }
  0xcc   :  { %1848 = vrot.lane.b32.xlu1 %v6475_v0, %s8035_s20  ;;  %v7305_v50 = vld [vmem:[#allocation2 + $0x24] sm:$0xf0]  ;;  %v6495_v54 = vor.u32 %v7293_v46, %v6494_v44  ;;  %v6534_v23 = vld [vmem:[#allocation2 + $0x18] sm:$0xf]  ;;  %v7240_v46 = vld [vmem:[#allocation2 + $0x8] sm:$0xf0] }
  0xcd   :  { %v280_v1 = vpop.f32.mrf.mxu0  ;;  %v6551_v57 = vor.u32 %v7305_v50, %v6550_v49  ;;  %v6290_v47 = vld [vmem:[#allocation2 + $0x20] sm:$0xf] }
  0xce   :  { %v329_v2 = vpop.f32.mrf.mxu1 }
  0xcf   :  { %v416_v6 = vpack.c.bf16 %v329_v2, %v280_v1  ;;  %v376_v9 = vpop.f32.mrf.mxu2  ;;  %v7277_v1 = vld [vmem:[#allocation2 + $0x20] sm:$0xf0]  ;;  %v6346_v2 = vld [vmem:[#allocation2 + $0x20] sm:$0xf] }
  0xd0   :  { %v415_v11 = vpack.c.bf16 %v376_v9, %v376_v9  ;;  %v6274_v58 = vld [vmem:[#allocation2 + $0x34] sm:$0xf]  ;;  %v6423_v5 = vor.u32 %v7277_v1, %v6422_v61  ;;  %v7245_v9 = vld [vmem:[#allocation2 + $0x24] sm:$0xf0] }
  0xd1   :  { %448 = vst [vmem:[#allocation2 + $0x3c] sm:$0xff] %v416_v6  ;;  %v7273_v0 = vld [vmem:[#allocation2 + $0x28] sm:$0xf0]  ;;  %v6271_v16 = vor.u32 %v7245_v9, %v6270_v8  ;;  %v6498_v44 = vld [vmem:[#allocation2 + $0x34] sm:$0xf] }
  0xd2   :  { %447 = vst [vmem:[#allocation2 + $0x38] sm:$0xf] %v415_v11  ;;  %v7261_v3 = vld [vmem:[#allocation2 + $0x28] sm:$0xf0]  ;;  %v6403_v4 = vor.u32 %v7273_v0, %v6402_v63  ;;  %v7289_v11 = vld [vmem:[#allocation2 + $0x20] sm:$0xf0] }
  0xd3   :  { %1702 = vrot.lane.b32.xlu0 %v6455_v12, %s8039_s26  ;;  %2223 = vrot.lane.b32.xlu2 %v6547_v13, %s8040_s29  ;;  %v6347_v7 = vor.u32 %v7261_v3, %v6346_v2  ;;  %v6314_v12 = vld [vmem:[#allocation2 + $0x30] sm:$0xf]  ;;  %v551_v20 = vsel %vm534_vm0, %v6271_v16, 0 }
  0xd4   :  { %2049 = vrot.lane.b32.xlu1 %v6511_v14, %s8035_s20  ;;  %v6370_v14 = vld [vmem:[#allocation2 + $0x30] sm:$0xf] }
  0xd5   :  { %v283_v15 = vpop.f32.mrf.mxu0 }
  0xd6   :  { %v332_v17 = vpop.f32.mrf.mxu1 }
  0xd7   :  { %v418_v21 = vpack.c.bf16 %v332_v17, %v283_v15  ;;  %v378_v24 = vpop.f32.mrf.mxu2  ;;  %v6479_v17 = vor.u32 %v7289_v11, %v6478_v10  ;;  %v7241_v11 = vld [vmem:[#allocation2 + $0x20] sm:$0xf0] }
  0xd8   :  { %v417_v25 = vpack.c.bf16 %v378_v24, %v378_v24  ;;  %v7246_v59 = vld [vmem:[#allocation2 + $0x3c] sm:$0xf0]  ;;  %v7254_v13 = vld [vmem:[#allocation2 + $0x38] sm:$0xf0]  ;;  %v7301_v24 = vld [vmem:[#allocation2 + $0x20] sm:$0xf0] }
  0xd9   :  { %450 = vst [vmem:[#allocation2 + $0x48] sm:$0xff] %v418_v21  ;;  %v6275_v62 = vor.u32 %v7246_v59, %v6274_v58  ;;  %v7266_v15 = vld [vmem:[#allocation2 + $0x38] sm:$0xf0]  ;;  %v6315_v18 = vor.u32 %v7254_v13, %v6314_v12  ;;  %v6266_v21 = vld [vmem:[#allocation2 + $0x4] sm:$0xf] }
  0xda   :  { %449 = vst [vmem:[#allocation2 + $0x44] sm:$0xf] %v417_v25  ;;  %v6371_v19 = vor.u32 %v7266_v15, %v6370_v14  ;;  %v6442_v25 = vld [vmem:[#allocation2 + $0x34] sm:$0xf]  ;;  %v7282_v26 = vld [vmem:[#allocation2 + $0x3c] sm:$0xf0]  ;;  %v6267_v31 = vor.u32 %v7244_v22, %v6266_v21 }
  0xdb   :  { %1008 = vrot.lane.b32.xlu2 %v6343_v27, %s8038_s2  ;;  %837 = vrot.lane.b32.xlu0 %v6327_v28, %s8038_s2  ;;  %v554_v6 = vsel %vm534_vm0, %v6275_v62, 0  ;;  %v6443_v33 = vor.u32 %v7282_v26, %v6442_v25  ;;  %v7294_v45 = vld [vmem:[#allocation2 + $0x3c] sm:$0xf0]  ;;  %v7297_v58 = vld [vmem:[#allocation2 + $0x28] sm:$0xf0] }
  0xdc   :  { %1184 = vrot.lane.b32.xlu1 %v6383_v29, %s8037_s25  ;;  %v6426_v29 = vld [vmem:[#allocation2 + $0x30] sm:$0xf]  ;;  %v548_v38 = vsel %vm534_vm0, %v6267_v31, 0  ;;  %v6554_v59 = vld [vmem:[#allocation2 + $0x34] sm:$0xf] }
  0xdd   :  { %v285_v30 = vpop.f32.mrf.mxu0  ;;  %v6538_v62 = vld [vmem:[#allocation2 + $0x30] sm:$0xf]  ;;  %v7302_v63 = vld [vmem:[#allocation2 + $0x38] sm:$0xf0]  ;;  %v6406_v9 = vld [vmem:[#allocation2 + $0x38] sm:$0xf] }
  0xde   :  { %v334_v32 = vpop.f32.mrf.mxu1  ;;  %v6539_v2 = vor.u32 %v7302_v63, %v6538_v62  ;;  %v6462_v21 = vld [vmem:[#allocation2 + $0x38] sm:$0xf] }
  0xdf   :  { %v420_v36 = vpack.c.bf16 %v334_v32, %v285_v30  ;;  %v381_v39 = vpop.f32.mrf.mxu2  ;;  %v7278_v30 = vld [vmem:[#allocation2 + $0x38] sm:$0xf0]  ;;  %v6535_v32 = vor.u32 %v7301_v24, %v6534_v23 }
  0xe0   :  { %v419_v40 = vpack.c.bf16 %v381_v39, %v381_v39  ;;  %v6278_v48 = vld [vmem:[#allocation2 + $0x4c] sm:$0xf]  ;;  %v6427_v35 = vor.u32 %v7278_v30, %v6426_v29  ;;  %v6318_v30 = vld [vmem:[#allocation2 + $0x48] sm:$0xf] }
  0xe1   :  { %452 = vst [vmem:[#allocation2 + $0x54] sm:$0xff] %v420_v36  ;;  %v6294_v36 = vld [vmem:[#allocation2 + $0x38] sm:$0xf]  ;;  %v7250_v37 = vld [vmem:[#allocation2 + $0x40] sm:$0xf0] }
  0xe2   :  { %451 = vst [vmem:[#allocation2 + $0x50] sm:$0xf] %v419_v40  ;;  %v6295_v39 = vor.u32 %v7250_v37, %v6294_v36  ;;  %v6458_v40 = vld [vmem:[#allocation2 + $0x20] sm:$0xf]  ;;  %v7262_v8 = vld [vmem:[#allocation2 + $0x40] sm:$0xf0] }
  0xe3   :  { %1355 = vrot.lane.b32.xlu2 %v6399_v41, %s8037_s25  ;;  %1156 = vrot.lane.b32.xlu0 %v6367_v42, %s8037_s25  ;;  %v7285_v41 = vld [vmem:[#allocation2 + $0x28] sm:$0xf0]  ;;  %v6482_v42 = vld [vmem:[#allocation2 + $0x30] sm:$0xf]  ;;  %v7274_v10 = vld [vmem:[#allocation2 + $0x40] sm:$0xf0] }
  0xe4   :  { %1531 = vrot.lane.b32.xlu1 %v6439_v43, %s8039_s26  ;;  %v7290_v43 = vld [vmem:[#allocation2 + $0x38] sm:$0xf0]  ;;  %v6459_v49 = vor.u32 %v7285_v41, %v6458_v40  ;;  %v6407_v14 = vor.u32 %v7274_v10, %v6406_v9  ;;  %v7286_v22 = vld [vmem:[#allocation2 + $0x40] sm:$0xf0]  ;;  %v6430_v41 = vld [vmem:[#allocation2 + $0x48] sm:$0xf] }
  0xe5   :  { %v6483_v50 = vor.u32 %v7290_v43, %v6482_v42  ;;  %v6463_v25 = vor.u32 %v7286_v22, %v6462_v21  ;;  %v7310_v62 = vld [vmem:[#allocation2 + $0x40] sm:$0xf0]  ;;  %v6262_v63 = vld [vmem:[#allocation2 + $0x48] sm:$0xf]  ;;  %v6570_v9 = vld [vmem:[#allocation2 + $0x20] sm:$0xf] }
  0xe7   :  { %v383_v51 = vpop.f32.mrf.mxu2 }
  0xe8   :  { %v7247_v52 = vld [vmem:[#allocation2 + $0x54] sm:$0xf0]  ;;  %v421_v53 = vpack.c.bf16 %v383_v51, %v383_v51  ;;  %v6250_v51 = vld [vmem:[#allocation2] sm:$0xf]  ;;  %v7255_v31 = vld [vmem:[#allocation2 + $0x50] sm:$0xf0] }
  0xe9   :  { %v6279_v56 = vor.u32 %v7247_v52, %v6278_v48  ;;  %v6298_v27 = vld [vmem:[#allocation2 + $0x50] sm:$0xf]  ;;  %v7249_v48 = vld [vmem:[#allocation2 + $0x28] sm:$0xf0]  ;;  %v6499_v52 = vor.u32 %v7294_v45, %v6498_v44  ;;  %v7271_v29 = vld [vmem:[#allocation2 + $0x54] sm:$0xf0]  ;;  %v6319_v36 = vor.u32 %v7255_v31, %v6318_v30 }
  0xea   :  { %453 = vst [vmem:[#allocation2 + $0x5c] sm:$0xf] %v421_v53  ;;  %v6251_v53 = vor.u32 %v7240_v46, %v6250_v51  ;;  %v7279_v43 = vld [vmem:[#allocation2 + $0x50] sm:$0xf0]  ;;  %v6374_v44 = vld [vmem:[#allocation2 + $0x48] sm:$0xf]  ;;  %v386_v46 = vpop.f32.mrf.mxu3 }
  0xeb   :  { %1878 = vrot.lane.b32.xlu0 %v6495_v54, %s8035_s20  ;;  %809 = vrot.lane.b32.xlu2 %v6311_v55, %s8038_s2  ;;  %v557_v60 = vsel %vm534_vm0, %v6279_v56, 0  ;;  %v6291_v54 = vor.u32 %v7249_v48, %v6290_v47  ;;  %v6286_v55 = vld [vmem:[#allocation2 + $0x8] sm:$0xf]  ;;  %v7248_v56 = vld [vmem:[#allocation2 + $0x10] sm:$0xf0] }
  0xec   :  { %2225 = vrot.lane.b32.xlu1 %v6551_v57, %s8040_s29  ;;  %563 = vmatpush.bf16.xpose.msrb.mxu3 %v557_v60  ;;  %v6514_v57 = vld [vmem:[#allocation2 + $0x20] sm:$0xf]  ;;  %v6287_v61 = vor.u32 %v7248_v56, %v6286_v55  ;;  %v7267_v45 = vld [vmem:[#allocation2 + $0x50] sm:$0xf0]  ;;  %v6486_v47 = vld [vmem:[#allocation2 + $0x48] sm:$0xf] }
  0xed   :  { %v7306_v60 = vld [vmem:[#allocation2 + $0x3c] sm:$0xf0]  ;;  %v6515_v0 = vor.u32 %v7297_v58, %v6514_v57  ;;  %v7291_v48 = vld [vmem:[#allocation2 + $0x50] sm:$0xf0]  ;;  %v6375_v51 = vor.u32 %v7267_v45, %v6374_v44  ;;  %v6542_v55 = vld [vmem:[#allocation2 + $0x48] sm:$0xf] }
  0xee   :  { %v6555_v1 = vor.u32 %v7306_v60, %v6554_v59  ;;  %v6574_v56 = vld [vmem:[#allocation2 + $0x38] sm:$0xf]  ;;  %v7303_v58 = vld [vmem:[#allocation2 + $0x50] sm:$0xf0]  ;;  %v6446_v59 = vld [vmem:[#allocation2 + $0x4c] sm:$0xf] }
  0xef   :  { %v7283_v60 = vld [vmem:[#allocation2 + $0x54] sm:$0xf0]  ;;  %v6410_v22 = vld [vmem:[#allocation2 + $0x50] sm:$0xf]  ;;  %v6606_v31 = vld [vmem:[#allocation2 + $0x1c] sm:$0xf] }
  0xf1   :  { %v7251_v28 = vld [vmem:[#allocation2 + $0x58] sm:$0xf0] }
  0xf2   :  { %v6299_v34 = vor.u32 %v7251_v28, %v6298_v27  ;;  %v6390_v27 = vld [vmem:[#allocation2 + $0x4c] sm:$0xf]  ;;  %v6258_v28 = vld [vmem:[#allocation2 + $0x30] sm:$0xf] }
  0xf3   :  { %1357 = vrot.lane.b32.xlu0 %v6403_v4, %s8037_s25  ;;  %1503 = vrot.lane.b32.xlu2 %v6423_v5, %s8039_s26  ;;  %v6330_v4 = vld [vmem:[#allocation2 + $0x34] sm:$0xf]  ;;  %v6254_v5 = vld [vmem:[#allocation2 + $0x18] sm:$0xf] }
  0xf4   :  { %1010 = vrot.lane.b32.xlu1 %v6347_v7, %s8038_s2  ;;  %564 = vmatpush.bf16.xpose.msrb.mxu3 %v554_v6  ;;  %v7258_v6 = vld [vmem:[#allocation2 + $0x3c] sm:$0xf0]  ;;  %v6350_v7 = vld [vmem:[#allocation2 + $0x38] sm:$0xf]  ;;  %v6255_v15 = vor.u32 %v7241_v11, %v6254_v5  ;;  %v6575_v5 = vor.u32 %v7310_v62, %v6574_v56  ;;  %v7309_v11 = vld [vmem:[#allocation2 + $0x28] sm:$0xf0] }
  0xf5   :  { %v6331_v12 = vor.u32 %v7258_v6, %v6330_v4  ;;  %v6351_v13 = vor.u32 %v7262_v8, %v6350_v7  ;;  %v6447_v4 = vor.u32 %v7283_v60, %v6446_v59  ;;  %v6566_v59 = vld [vmem:[#allocation2 + $0x8] sm:$0xf]  ;;  %v7308_v60 = vld [vmem:[#allocation2 + $0x10] sm:$0xf0] }
  0xfb   :  { %1850 = vrot.lane.b32.xlu2 %v6479_v17, %s8035_s20  ;;  %811 = vrot.lane.b32.xlu0 %v6315_v18, %s8038_s2  ;;  %v6386_v17 = vld [vmem:[#allocation2 + $0x34] sm:$0xf]  ;;  %v7270_v18 = vld [vmem:[#allocation2 + $0x3c] sm:$0xf0] }
  0xfc   :  { %1158 = vrot.lane.b32.xlu1 %v6371_v19, %s8037_s25  ;;  %565 = vmatpush.bf16.xpose.msrb.mxu3 %v551_v20  ;;  %v6518_v19 = vld [vmem:[#allocation2 + $0x38] sm:$0xf]  ;;  %v7298_v20 = vld [vmem:[#allocation2 + $0x40] sm:$0xf0]  ;;  %v6387_v23 = vor.u32 %v7270_v18, %v6386_v17 }
  0xfd   :  { %v6519_v24 = vor.u32 %v7298_v20, %v6518_v19  ;;  %v6571_v19 = vor.u32 %v7309_v11, %v6570_v9  ;;  %v6590_v9 = vld [vmem:[#allocation2 + $0x18] sm:$0xf]  ;;  %v7313_v11 = vld [vmem:[#allocation2 + $0x20] sm:$0xf0] }
 0x103   :  { %2197 = vrot.lane.b32.xlu2 %v6535_v32, %s8040_s29  ;;  %1533 = vrot.lane.b32.xlu0 %v6443_v33, %s8039_s26  ;;  %v6334_v32 = vld [vmem:[#allocation2 + $0x4c] sm:$0xf]  ;;  %v7259_v33 = vld [vmem:[#allocation2 + $0x54] sm:$0xf0] }
 0x104   :  { %1505 = vrot.lane.b32.xlu1 %v6427_v35, %s8039_s26  ;;  %566 = vmatpush.bf16.xpose.msrb.mxu3 %v548_v38  ;;  %v6391_v35 = vor.u32 %v7271_v29, %v6390_v27  ;;  %v6335_v37 = vor.u32 %v7259_v33, %v6334_v32  ;;  %v7307_v29 = vld [vmem:[#allocation2 + $0x54] sm:$0xf0]  ;;  %v7317_v32 = vld [vmem:[#allocation2 + $0x24] sm:$0xf0] }
 0x10b   :  { %1704 = vrot.lane.b32.xlu2 %v6459_v49, %s8039_s26  ;;  %1852 = vrot.lane.b32.xlu0 %v6483_v50, %s8035_s20  ;;  %v423_v49 = vpack.c.bf16 %v386_v46, %v386_v46  ;;  %v6431_v50 = vor.u32 %v7279_v43, %v6430_v41  ;;  %v6354_v41 = vld [vmem:[#allocation2 + $0x50] sm:$0xf]  ;;  %v7263_v43 = vld [vmem:[#allocation2 + $0x58] sm:$0xf0] }
 0x10c   :  { %721 = vmatpush.bf16.msra.mxu3 %v6299_v34  ;;  %1880 = vrot.lane.b32.xlu1 %v6499_v52, %s8035_s20  ;;  %v7242_v34 = vld [vmem:[#allocation2 + $0x38] sm:$0xf0]  ;;  %v6487_v52 = vor.u32 %v7291_v48, %v6486_v47  ;;  %v6355_v48 = vor.u32 %v7263_v43, %v6354_v41 }
 0x10d   :  { %6280 = vmatmul.msk.bf16.vlgmr.msrb.gmra.mxu3 %vm534_vm0, %v6251_v53  ;;  %v6259_v38 = vor.u32 %v7242_v34, %v6258_v28  ;;  %455 = vst [vmem:[#allocation2 + $0x68] sm:$0xf] %v423_v49  ;;  %v6558_v28 = vld [vmem:[#allocation2 + $0x4c] sm:$0xf] }
 0x110   :  { %722 = vmatpush.bf16.msra.mxu3 %v6295_v39 }
 0x113   :  { %2051 = vrot.lane.b32.xlu2 %v6515_v0, %s8035_s20  ;;  %2227 = vrot.lane.b32.xlu0 %v6555_v1, %s8040_s29  ;;  %v7243_v0 = vld [vmem:[#allocation2 + $0x50] sm:$0xf0] }
 0x114   :  { %723 = vmatpush.bf16.msra.mxu3 %v6291_v54  ;;  %2199 = vrot.lane.b32.xlu1 %v6539_v2, %s8040_s29  ;;  %v6543_v2 = vor.u32 %v7303_v58, %v6542_v55  ;;  %v6263_v6 = vor.u32 %v7243_v0, %v6262_v63  ;;  %v6567_v0 = vor.u32 %v7308_v60, %v6566_v59 }
 0x115   :  { %v8285_v3 = vpop.permute.xlu2 %1154 }
 0x118   :  { %724 = vmatpush.bf16.msra.mxu3 %v6287_v61  ;;  %v388_v61 = vpop.f32.mrf.mxu3 }
 0x119   :  { %v425_v1 = vpack.c.bf16 %v388_v61, %v388_v61 }
 0x11b   :  { %839 = vrot.lane.b32.xlu2 %v6331_v12, %s8038_s2  ;;  %1012 = vrot.lane.b32.xlu0 %v6351_v13, %s8038_s2  ;;  %457 = vst [vmem:[#allocation2 + $0x74] sm:$0xf] %v425_v1  ;;  %v6502_v12 = vld [vmem:[#allocation2 + $0x4c] sm:$0xf]  ;;  %v7295_v13 = vld [vmem:[#allocation2 + $0x54] sm:$0xf0] }
 0x11c   :  { %1359 = vrot.lane.b32.xlu1 %v6407_v14, %s8037_s25  ;;  %v6594_v14 = vld [vmem:[#allocation2 + $0x30] sm:$0xf]  ;;  %v6503_v20 = vor.u32 %v7295_v13, %v6502_v12 }
 0x11d   :  { %6281 = vmatmul.msk.bf16.gmra.mxu3 %vm534_vm0, %v6255_v15  ;;  %v8291_v16 = vpop.permute.xlu2 %1529  ;;  %v7314_v15 = vld [vmem:[#allocation2 + $0x38] sm:$0xf0]  ;;  %v6578_v1 = vld [vmem:[#allocation2 + $0x50] sm:$0xf] }
 0x11e   :  { %v6595_v21 = vor.u32 %v7314_v15, %v6594_v14  ;;  %v6591_v15 = vor.u32 %v7313_v11, %v6590_v9 }
 0x120   :  { %v391_v17 = vpop.f32.mrf.mxu3 }
 0x121   :  { %v427_v18 = vpack.c.bf16 %v391_v17, %v391_v17 }
 0x123   :  { %1186 = vrot.lane.b32.xlu2 %v6387_v23, %s8037_s25  ;;  %2053 = vrot.lane.b32.xlu0 %v6519_v24, %s8035_s20  ;;  %459 = vst [vmem:[#allocation2 + $0x80] sm:$0xf] %v427_v18  ;;  %v7275_v23 = vld [vmem:[#allocation2 + $0x58] sm:$0xf0] }
 0x124   :  { %1706 = vrot.lane.b32.xlu1 %v6463_v25, %s8039_s26  ;;  %v6411_v30 = vor.u32 %v7275_v23, %v6410_v22  ;;  %v6586_v23 = vld [vmem:[#allocation2] sm:$0xf] }
 0x125   :  { %v8296_v26 = vpop.permute.xlu2 %1876 }
 0x128   :  { %v393_v33 = vpop.f32.mrf.mxu3 }
 0x129   :  { %v429_v34 = vpack.c.bf16 %v393_v33, %v393_v33 }
 0x12b   :  { %1188 = vrot.lane.b32.xlu0 %v6391_v35, %s8037_s25  ;;  %813 = vrot.lane.b32.xlu2 %v6319_v36, %s8038_s2  ;;  %v6559_v35 = vor.u32 %v7307_v29, %v6558_v28  ;;  %v6607_v36 = vor.u32 %v7317_v32, %v6606_v31  ;;  %461 = vst [vmem:[#allocation2 + $0x8c] sm:$0xf] %v429_v34  ;;  %v6602_v28 = vld [vmem:[#allocation2 + $0x4] sm:$0xf]  ;;  %v6598_v34 = vld [vmem:[#allocation2 + $0x48] sm:$0xf] }
 0x12c   :  { %841 = vrot.lane.b32.xlu1 %v6335_v37, %s8038_s2  ;;  %v6466_v37 = vld [vmem:[#allocation2 + $0x50] sm:$0xf] }
 0x12d   :  { %6282 = vmatmul.msk.bf16.gmra.mxu3 %vm534_vm0, %v6259_v38  ;;  %v8302_v39 = vpop.permute.xlu0 %1182  ;;  %v8304_v40 = vpop.permute.xlu2 %2223  ;;  %v7287_v38 = vld [vmem:[#allocation2 + $0x58] sm:$0xf0] }
 0x12e   :  { %v8306_v42 = vpop.permute.xlu1 %807  ;;  %v6467_v47 = vor.u32 %v7287_v38, %v6466_v37  ;;  %v6614_v37 = vld [vmem:[#allocation2 + $0x4c] sm:$0xf]  ;;  %v7319_v38 = vld [vmem:[#allocation2 + $0x54] sm:$0xf0] }
 0x12f   :  { %v6615_v43 = vor.u32 %v7319_v38, %v6614_v37 }
 0x130   :  { %v396_v49 = vpop.f32.mrf.mxu3 }
 0x133   :  { %1507 = vrot.lane.b32.xlu0 %v6431_v50, %s8039_s26  ;;  %1160 = vrot.lane.b32.xlu2 %v6375_v51, %s8037_s25  ;;  %v431_v50 = vpack.c.bf16 %v396_v49, %v396_v49  ;;  %v6522_v51 = vld [vmem:[#allocation2 + $0x50] sm:$0xf] }
 0x134   :  { %1854 = vrot.lane.b32.xlu1 %v6487_v52, %s8035_s20  ;;  %v7299_v52 = vld [vmem:[#allocation2 + $0x58] sm:$0xf0] }
 0x135   :  { %v8311_v53 = vpop.permute.xlu0 %1501  ;;  %v8313_v54 = vpop.permute.xlu2 %1008  ;;  %463 = vst [vmem:[#allocation2 + $0x98] sm:$0xf] %v431_v50  ;;  %v6523_v61 = vor.u32 %v7299_v52, %v6522_v51  ;;  %v6610_v50 = vld [vmem:[#allocation2 + $0x34] sm:$0xf]  ;;  %v7318_v51 = vld [vmem:[#allocation2 + $0x3c] sm:$0xf0] }
 0x136   :  { %v8315_v57 = vpop.permute.xlu1 %835  ;;  %v6611_v52 = vor.u32 %v7318_v51, %v6610_v50 }
 0x138   :  { %v398_v62 = vpop.f32.mrf.mxu3 }
 0x139   :  { %v433_v63 = vpack.c.bf16 %v398_v62, %v398_v62 }
 0x13b   :  { %2201 = vrot.lane.b32.xlu0 %v6543_v2, %s8040_s29  ;;  %1535 = vrot.lane.b32.xlu2 %v6447_v4, %s8039_s26  ;;  %465 = vst [vmem:[#allocation2 + $0xa4] sm:$0xf] %v433_v63  ;;  %v7311_v2 = vld [vmem:[#allocation2 + $0x58] sm:$0xf0] }
 0x13c   :  { %2400 = vrot.lane.b32.xlu1 %v6575_v5, %s8040_s29  ;;  %v6579_v12 = vor.u32 %v7311_v2, %v6578_v1 }
 0x13d   :  { %6283 = vmatmul.msk.bf16.gmra.mxu3 %vm534_vm0, %v6263_v6  ;;  %v8321_v7 = vpop.permute.xlu0 %2195  ;;  %v8323_v8 = vpop.permute.xlu2 %1355 }
 0x13e   :  { %v8325_v10 = vpop.permute.xlu1 %1848 }
 0x141   :  { %v401_v13 = vpop.f32.mrf.mxu3 }
 0x142   :  { %v435_v14 = vpack.c.bf16 %v401_v13, %v401_v13 }
 0x143   :  { %2398 = vrot.lane.b32.xlu0 %v6571_v19, %s8040_s29  ;;  %1882 = vrot.lane.b32.xlu2 %v6503_v20, %s8035_s20  ;;  %v7312_v20 = vld [vmem:[#allocation2 + $0x8] sm:$0xf0] }
 0x144   :  { %2546 = vrot.lane.b32.xlu1 %v6595_v21, %s8041_s0  ;;  %467 = vst [vmem:[#allocation2 + $0xb0] sm:$0xf] %v435_v14  ;;  %v7316_v21 = vld [vmem:[#allocation2 + $0xc] sm:$0xf0] }
 0x145   :  { %v8330_v24 = vpop.permute.xlu0 %1702  ;;  %v8332_v25 = vpop.permute.xlu2 %809  ;;  %v6603_v31 = vor.u32 %v7316_v21, %v6602_v28 }
 0x146   :  { %v8334_v27 = vpop.permute.xlu1 %2049 }
 0x149   :  { %v403_v22 = vpop.f32.mrf.mxu3 }
 0x14a   :  { %v437_v29 = vpack.c.bf16 %v403_v22, %v403_v22 }
 0x14b   :  { %1361 = vrot.lane.b32.xlu0 %v6411_v30, %s8037_s25  ;;  %2229 = vrot.lane.b32.xlu2 %v6559_v35, %s8040_s29  ;;  %v6587_v30 = vor.u32 %v7312_v20, %v6586_v23 }
 0x14c   :  { %2572 = vrot.lane.b32.xlu1 %v6607_v36, %s8041_s0  ;;  %469 = vst [vmem:[#allocation2 + $0xbc] sm:$0xf] %v437_v29  ;;  %v7315_v36 = vld [vmem:[#allocation2 + $0x50] sm:$0xf0] }
 0x14d   :  { %v8339_v44 = vpop.permute.xlu0 %837  ;;  %v8341_v45 = vpop.permute.xlu2 %1503  ;;  %v6599_v41 = vor.u32 %v7315_v36, %v6598_v34 }
 0x14e   :  { %v8343_v46 = vpop.permute.xlu1 %1184  ;;  %v337_v34 = vpop.f32.mrf.mxu1 }
 0x153   :  { %1708 = vrot.lane.b32.xlu0 %v6467_v47, %s8039_s26  ;;  %1014 = vrot.lane.b32.xlu2 %v6355_v48, %s8038_s2 }
 0x155   :  { %v8347_v55 = vpop.permute.xlu0 %1156  ;;  %v8349_v56 = vpop.permute.xlu2 %1850 }
 0x156   :  { %v8351_v58 = vpop.permute.xlu1 %1531 }
 0x15b   :  { %2055 = vrot.lane.b32.xlu0 %v6523_v61, %s8035_s20  ;;  %2396 = vrot.lane.b32.xlu2 %v6567_v0, %s8040_s29 }
 0x15d   :  { %v8355_v4 = vpop.permute.xlu0 %1878  ;;  %v8357_v5 = vpop.permute.xlu2 %2197 }
 0x15e   :  { %v8359_v6 = vpop.permute.xlu1 %2225 }
 0x163   :  { %2402 = vrot.lane.b32.xlu0 %v6579_v12, %s8040_s29  ;;  %2544 = vrot.lane.b32.xlu2 %v6591_v15, %s8041_s0 }
 0x165   :  { %v8363_v17 = vpop.permute.xlu0 %1357  ;;  %v8365_v18 = vpop.permute.xlu2 %1704 }
 0x166   :  { %v8367_v19 = vpop.permute.xlu1 %1010 }
 0x16b   :  { %2542 = vrot.lane.b32.xlu0 %v6587_v30, %s8041_s0  ;;  %2570 = vrot.lane.b32.xlu2 %v6603_v31, %s8041_s0  ;;  %v288_v31 = vpop.f32.mrf.mxu0 }
 0x16d   :  { %v8371_v32 = vpop.permute.xlu2 %2051  ;;  %v8373_v33 = vpop.permute.xlu0 %811 }
 0x16e   :  { %v8375_v35 = vpop.permute.xlu1 %1158 }
 0x173   :  { %2548 = vrot.lane.b32.xlu0 %v6599_v41, %s8041_s0  ;;  %2576 = vrot.lane.b32.xlu2 %v6615_v43, %s8041_s0 }
 0x175   :  { %v840_v47 = vpop.permute.xlu2 %839  ;;  %v8379_v48 = vpop.permute.xlu0 %1533 }
 0x176   :  { %v8381_v49 = vpop.permute.xlu1 %1505  ;;  %v862_v50 = vsel %vm534_vm0, %v840_v47, 0 }
 0x17b   :  { %2574 = vrot.lane.b32.xlu0 %v6611_v52, %s8041_s0  ;;  %v290_v52 = vpop.f32.mrf.mxu0 }
 0x17d   :  { %v1187_v59 = vpop.permute.xlu2 %1186  ;;  %v8384_v60 = vpop.permute.xlu0 %1852 }
 0x17e   :  { %v8386_v61 = vpop.permute.xlu1 %1880  ;;  %v1209_v41 = vsel %vm534_vm0, %v1187_v59, 0  ;;  %v1206_v59 = vsel %vm534_vm0, %v8343_v46, 0  ;;  %v1203_v46 = vsel %vm534_vm0, %v8302_v39, 0  ;;  %v422_v39 = vpack.c.bf16 %v337_v34, %v288_v31 }
 0x180   :  { %454 = vst [vmem:[#allocation2 + $0x60] sm:$0xff] %v422_v39 }
 0x185   :  { %v8388_v62 = vpop.permute.xlu0 %2227  ;;  %v8390_v63 = vpop.permute.xlu2 %813 }
 0x186   :  { %v8392_v0 = vpop.permute.xlu1 %2199 }
 0x18d   :  { %v1013_v1 = vpop.permute.xlu0 %1012  ;;  %v8394_v2 = vpop.permute.xlu2 %1160 }
 0x18e   :  { %v8396_v9 = vpop.permute.xlu1 %1359 }
 0x190   :  { %v8398_v11 = vpop.f32.mrf.mxu3 }
 0x191   :  { %v589_v36 = vsel %vm588_vm1, %v8398_v11, -inf }
 0x195   :  { %v8400_v12 = vpop.permute.xlu0 %2053  ;;  %v1536_v13 = vpop.permute.xlu2 %1535 }
 0x196   :  { %v8402_v14 = vpop.permute.xlu1 %1706 }
 0x198   :  { %v8404_v15 = vpop.f32.mrf.mxu3 }
 0x19d   :  { %v1189_v20 = vpop.permute.xlu0 %1188  ;;  %v1883_v21 = vpop.permute.xlu2 %1882 }
 0x19e   :  { %v842_v22 = vpop.permute.xlu1 %841  ;;  %v1212_v23 = vsel %vm534_vm0, %v1189_v20, 0  ;;  %v339_v20 = vpop.f32.mrf.mxu1 }
 0x19f   :  { %v865_v29 = vsel %vm534_vm0, %v842_v22, 0  ;;  %1218 = vmatpush.bf16.xpose.msrb.mxu2 %v1212_v23  ;;  %v592_v22 = vsel %vm588_vm1, %v8404_v15, -inf }
 0x1a0   :  { %v8407_v28 = vpop.f32.mrf.mxu3  ;;  %871 = vmatpush.bf16.xpose.msrb.mxu0 %v865_v29 }
 0x1a1   :  { %v595_v30 = vsel %vm588_vm1, %v8407_v28, -inf }
 0x1a2   :  { %596 = vmax.xlane.f32.xlu1 %v595_v30  ;;  %v859_v30 = vsel %vm534_vm0, %v8339_v44, 0  ;;  %v1906_v44 = vsel %vm534_vm0, %v1883_v21, 0 }
 0x1a5   :  { %v8414_v37 = vpop.permute.xlu0 %1507  ;;  %v8416_v38 = vpop.permute.xlu2 %2229  ;;  %590 = vmax.xlane.f32.xlu0 %v589_v36 }
 0x1a7   :  { %1219 = vmatpush.bf16.xpose.msrb.mxu2 %v1209_v41  ;;  %v293_v41 = vpop.f32.mrf.mxu0 }
 0x1a8   :  { %v8419_v43 = vpop.f32.mrf.mxu3  ;;  %872 = vmatpush.bf16.xpose.msrb.mxu0 %v862_v50  ;;  %v342_v50 = vpop.f32.mrf.mxu1 }
 0x1a9   :  { %v598_v51 = vsel %vm588_vm1, %v8419_v43, -inf }
 0x1aa   :  { %599 = vmax.xlane.f32.xlu1 %v598_v51 }
 0x1ad   :  { %v8426_v23 = vpop.permute.xlu0 %2201  ;;  %v1015_v29 = vpop.permute.xlu2 %1014  ;;  %593 = vmax.xlane.f32.xlu0 %v592_v22 }
 0x1ae   :  { %1036 = vmatpush.bf16.msrb.mxu1 %v1015_v29 }
 0x1af   :  { %1220 = vmatpush.bf16.xpose.msrb.mxu2 %v1206_v59  ;;  %v856_v59 = vsel %vm534_vm0, %v8315_v57, 0 }
 0x1b0   :  { %v8430_v47 = vpop.f32.mrf.mxu3  ;;  %873 = vmatpush.bf16.xpose.msrb.mxu0 %v859_v30  ;;  %v1559_v30 = vsel %vm534_vm0, %v1536_v13, 0  ;;  %v1903_v13 = vsel %vm534_vm0, %v8386_v61, 0 }
 0x1b1   :  { %v601_v36 = vsel %vm588_vm1, %v8430_v47, -inf }
 0x1b2   :  { %602 = vmax.xlane.f32.xlu2 %v601_v36  ;;  %1037 = vmatpush.bf16.msrb.mxu1 %v1013_v1  ;;  %v344_v36 = vpop.f32.mrf.mxu1 }
 0x1b5   :  { %v8436_v51 = vpop.permute.xlu0 %2398  ;;  %v8438_v22 = vpop.permute.xlu2 %2396 }
 0x1b6   :  { %10652 = vst [vmem:[#allocation10_spill] sm:$0xff] %v8438_v22  ;;  %1038 = vmatpush.bf16.msrb.mxu1 %v8367_v19  ;;  %v295_v19 = vpop.f32.mrf.mxu0 }
 0x1b7   :  { %1221 = vmatpush.bf16.xpose.msrb.mxu2 %v1203_v46  ;;  %v424_v46 = vpack.c.bf16 %v339_v20, %v290_v52 }
 0x1b8   :  { %v8444_v29 = vpop.f32.mrf.mxu3  ;;  %874 = vmatpush.bf16.xpose.msrb.mxu0 %v856_v59  ;;  %v1553_v59 = vsel %vm534_vm0, %v8351_v58, 0  ;;  %v1897_v58 = vsel %vm534_vm0, %v8296_v26, 0 }
 0x1b9   :  { %v604_v1 = vsel %vm588_vm1, %v8444_v29, -inf  ;;  %456 = vst [vmem:[#allocation2 + $0x6c] sm:$0xff] %v424_v46 }
 0x1ba   :  { %605 = vmax.xlane.f32.xlu2 %v604_v1  ;;  %1039 = vmatpush.bf16.msrb.mxu1 %v8313_v54  ;;  %v1556_v54 = vsel %vm534_vm0, %v8379_v48, 0  ;;  %v1900_v48 = vsel %vm534_vm0, %v8355_v4, 0  ;;  %v428_v1 = vpack.c.bf16 %v344_v36, %v295_v19  ;;  %v2250_v19 = vsel %vm534_vm0, %v8388_v62, 0 }
 0x1bb   :  { %v2247_v62 = vsel %vm534_vm0, %v8359_v6, 0 }
 0x1bc   :  { %460 = vst [vmem:[#allocation2 + $0x84] sm:$0xff] %v428_v1 }
 0x1bd   :  { %v1362_v21 = vpop.permute.xlu0 %1361  ;;  %v8452_v22 = vpop.permute.xlu2 %2544 }
 0x1be   :  { %6392 = vmatmul.msk.bf16.vlgmr.msrb.gmra.mxu2 %vm534_vm0, %v8285_v3  ;;  %1383 = vmatpush.bf16.msrb.mxu3 %v1362_v21  ;;  %v298_v34 = vpop.f32.mrf.mxu0  ;;  %v347_v3 = vpop.f32.mrf.mxu1 }
 0x1bf   :  { %1912 = vmatpush.bf16.xpose.msra.mxu2 %v1906_v44  ;;  %6336 = vmatmul.msk.bf16.vlgmr.msrb.gmra.mxu0 %vm534_vm0, %v8306_v42 }
 0x1c0   :  { %1565 = vmatpush.bf16.xpose.msra.mxu0 %v1559_v30  ;;  %v8456_v57 = vpop.f32.mrf.mxu3 }
 0x1c1   :  { %v607_v31 = vsel %vm588_vm1, %v8456_v57, -inf }
 0x1c2   :  { %608 = vmax.xlane.f32.xlu0 %v607_v31  ;;  %1384 = vmatpush.bf16.msrb.mxu3 %v8396_v9 }
 0x1c5   :  { %v1709_v44 = vpop.permute.xlu0 %1708  ;;  %v8467_v42 = vpop.permute.xlu2 %2570 }
 0x1c6   :  { %1385 = vmatpush.bf16.msrb.mxu3 %v8363_v17  ;;  %1730 = vmatpush.bf16.msra.mxu1 %v1709_v44  ;;  %v300_v52 = vpop.f32.mrf.mxu0  ;;  %v349_v20 = vpop.f32.mrf.mxu1  ;;  %v426_v17 = vpack.c.bf16 %v342_v50, %v293_v41  ;;  %v2253_v41 = vsel %vm534_vm0, %v8416_v38, 0  ;;  %v430_v50 = vpack.c.bf16 %v347_v3, %v298_v34  ;;  %v2244_v34 = vsel %vm534_vm0, %v8304_v40, 0 }
 0x1c7   :  { %1913 = vmatpush.bf16.xpose.msra.mxu2 %v1903_v13  ;;  %v432_v13 = vpack.c.bf16 %v349_v20, %v300_v52 }
 0x1c8   :  { %1566 = vmatpush.bf16.xpose.msra.mxu0 %v1556_v54  ;;  %v8470_v61 = vpop.f32.mrf.mxu3  ;;  %458 = vst [vmem:[#allocation2 + $0x78] sm:$0xff] %v426_v17  ;;  %v7341_v17 = vld [vmem:[#allocation2 + $0x84] sm:$0xf0] }
 0x1c9   :  { %v610_v9 = vsel %vm588_vm1, %v8470_v61, -inf  ;;  %462 = vst [vmem:[#allocation2 + $0x90] sm:$0xff] %v430_v50 }
 0x1ca   :  { %611 = vmax.xlane.f32.xlu1 %v610_v9  ;;  %1386 = vmatpush.bf16.msrb.mxu3 %v8323_v8  ;;  %464 = vst [vmem:[#allocation2 + $0x9c] sm:$0xff] %v432_v13 }
 0x1cb   :  { %1731 = vmatpush.bf16.msra.mxu1 %v8402_v14  ;;  %v1550_v14 = vsel %vm534_vm0, %v8291_v16, 0 }
 0x1cd   :  { %v8480_v30 = vpop.permute.xlu0 %2055  ;;  %v2577_v4 = vpop.permute.xlu2 %2576 }
 0x1ce   :  { %6393 = vmatmul.msk.bf16.gmra.mxu2 %vm534_vm0, %v8347_v55  ;;  %v2600_v8 = vsel %vm534_vm0, %v2577_v4, 0  ;;  %v303_v55 = vpop.f32.mrf.mxu0 }
 0x1cf   :  { %1914 = vmatpush.bf16.xpose.msra.mxu2 %v1900_v48  ;;  %1732 = vmatpush.bf16.msra.mxu1 %v8365_v18  ;;  %v352_v18 = vpop.f32.mrf.mxu1  ;;  %v6718_v20 = vld [vmem:[#allocation2 + $0x7c] sm:$0xf] }
 0x1d0   :  { %1567 = vmatpush.bf16.xpose.msra.mxu0 %v1553_v59  ;;  %v434_v38 = vpack.c.bf16 %v352_v18, %v303_v55  ;;  %v6722_v59 = vld [vmem:[#allocation2 + $0x94] sm:$0xf]  ;;  %v6719_v4 = vor.u32 %v7341_v17, %v6718_v20 }
 0x1d1   :  { %6337 = vmatmul.msk.bf16.gmra.mxu0 %vm534_vm0, %v8332_v25  ;;  %v1855_v25 = vpop.permute.xlu1 %1854  ;;  %v7342_v9 = vld [vmem:[#allocation2 + $0x9c] sm:$0xf0] }
 0x1d2   :  { %466 = vst [vmem:[#allocation2 + $0xa8] sm:$0xff] %v434_v38 }
 0x1d3   :  { %1733 = vmatpush.bf16.msra.mxu1 %v8330_v24 }
 0x1d5   :  { %v8495_v26 = vpop.permute.xlu0 %2402 }
 0x1d6   :  { %v305_v36 = vpop.f32.mrf.mxu0 }
 0x1d7   :  { %1915 = vmatpush.bf16.xpose.msra.mxu2 %v1897_v58  ;;  %v354_v16 = vpop.f32.mrf.mxu1  ;;  %v3272_v58 = vsel %vm534_vm0, %v6719_v4, 0 }
 0x1d8   :  { %1568 = vmatpush.bf16.xpose.msra.mxu0 %v1550_v14  ;;  %v436_v39 = vpack.c.bf16 %v354_v16, %v305_v36 }
 0x1d9   :  { %v8501_v24 = vpop.permute.xlu1 %2400  ;;  %v6726_v46 = vld [vmem:[#allocation2 + $0xac] sm:$0xf] }
 0x1da   :  { %468 = vst [vmem:[#allocation2 + $0xb4] sm:$0xff] %v436_v39 }
 0x1dd   :  { %v2543_v21 = vpop.permute.xlu0 %2542 }
 0x1de   :  { %6394 = vmatmul.msk.bf16.gmra.mxu2 %vm534_vm0, %v8375_v35 }
 0x1df   :  { %2606 = vmatpush.bf16.xpose.msrb.mxu2 %v2600_v8 }
 0x1e0   :  { %2259 = vmatpush.bf16.xpose.msrb.mxu0 %v2253_v41 }
 0x1e1   :  { %6338 = vmatmul.msk.bf16.gmra.mxu0 %vm534_vm0, %v8373_v33  ;;  %v8509_v31 = vpop.permute.xlu1 %2546  ;;  %v7343_v44 = vld [vmem:[#allocation2 + $0xb4] sm:$0xf0] }
 0x1e2   :  { %v6727_v48 = vor.u32 %v7343_v44, %v6726_v46 }
 0x1e4   :  { %v3278_v40 = vsel %vm534_vm0, %v6727_v48, 0 }
 0x1e5   :  { %v8507_v54 = vpop.permute.xlu0 %2548 }
 0x1e8   :  { %2260 = vmatpush.bf16.xpose.msrb.mxu0 %v2250_v19 }
 0x1e9   :  { %v2573_v6 = vpop.permute.xlu1 %2572 }
 0x1ea   :  { %v2594_v3 = vsel %vm534_vm0, %v2573_v6, 0 }
 0x1ed   :  { %v2575_v35 = vpop.permute.xlu0 %2574 }
 0x1ee   :  { %6395 = vmatmul.msk.bf16.gmra.mxu2 %vm534_vm0, %v8394_v2  ;;  %v2597_v33 = vsel %vm534_vm0, %v2575_v35, 0  ;;  %v2591_v2 = vsel %vm534_vm0, %v8467_v42, 0 }
 0x1ef   :  { %2607 = vmatpush.bf16.xpose.msrb.mxu2 %v2597_v33 }
 0x1f0   :  { %2261 = vmatpush.bf16.xpose.msrb.mxu0 %v2247_v62 }
 0x1f1   :  { %6339 = vmatmul.msk.bf16.gmra.mxu0 %vm534_vm0, %v8390_v63  ;;  %v6723_v63 = vor.u32 %v7342_v9, %v6722_v59 }
 0x1f3   :  { %v3275_v52 = vsel %vm534_vm0, %v6723_v63, 0 }
 0x1f7   :  { %2608 = vmatpush.bf16.xpose.msrb.mxu2 %v2594_v3 }
 0x1f8   :  { %2262 = vmatpush.bf16.xpose.msrb.mxu0 %v2244_v34 }
 0x1fe   :  { %6504 = vmatmul.msk.bf16.vlgmr.msra.gmra.mxu2 %vm534_vm0, %v8325_v10  ;;  %v6714_v10 = vld [vmem:[#allocation2 + $0x64] sm:$0xf] }
 0x1ff   :  { %2609 = vmatpush.bf16.xpose.msrb.mxu2 %v2591_v2 }
 0x201   :  { %6448 = vmatmul.msk.bf16.vlgmr.msra.gmra.mxu0 %vm534_vm0, %v8311_v53  ;;  %v7340_v53 = vld [vmem:[#allocation2 + $0x6c] sm:$0xf0] }
 0x202   :  { %v6715_v42 = vor.u32 %v7340_v53, %v6714_v10 }
 0x204   :  { %v3269_v1 = vsel %vm534_vm0, %v6715_v42, 0 }
 0x207   :  { %3284 = vmatpush.bf16.xpose.msra.mxu2 %v3278_v40 }
 0x20e   :  { %6505 = vmatmul.msk.bf16.gmra.mxu2 %vm534_vm0, %v8349_v56 }
 0x20f   :  { %3285 = vmatpush.bf16.xpose.msra.mxu2 %v3275_v52 }
 0x211   :  { %6449 = vmatmul.msk.bf16.gmra.mxu0 %vm534_vm0, %v8341_v45 }
 0x217   :  { %3286 = vmatpush.bf16.xpose.msra.mxu2 %v3272_v58 }
 0x21e   :  { %6506 = vmatmul.msk.bf16.gmra.mxu2 %vm534_vm0, %v8384_v60  ;;  %v591_v60 = vpop.xlane.xlu0 %590 }
 0x21f   :  { %3287 = vmatpush.bf16.xpose.msra.mxu2 %v3269_v1 }
 0x221   :  { %6450 = vmatmul.msk.bf16.gmra.mxu0 %vm534_vm0, %v8381_v49 }
 0x225   :  { %v603_v6 = vpop.xlane.xlu2 %602 }
 0x22d   :  { %v606_v63 = vpop.xlane.xlu2 %605 }
 0x22e   :  { %6507 = vmatmul.msk.bf16.gmra.mxu2 %vm534_vm0, %v1855_v25  ;;  %v597_v25 = vpop.xlane.xlu1 %596  ;;  %v618_v52 = vsub.f32 %v8444_v29, %v606_v63 }
 0x22f   :  { %v615_v16 = vsub.f32 %v8407_v28, %v597_v25 }
 0x230   :  { %v631_v42 = vmul.f32 1.442695, %v618_v52 }
 0x231   :  { %6451 = vmatmul.msk.bf16.gmra.mxu0 %vm534_vm0, %v8414_v37  ;;  %v613_v37 = vsub.f32 %v8398_v11, %v591_v60  ;;  %v594_v11 = vpop.xlane.xlu0 %593  ;;  %v625_v13 = vmul.f32 1.442695, %v615_v16 }
 0x232   :  { %v614_v36 = vsub.f32 %v8404_v15, %v594_v11  ;;  %v7336_v11 = vld [vmem:[#allocation2 + $0x68] sm:$0xf0] }
 0x233   :  { %v621_v55 = vmul.f32 1.442695, %v613_v37 }
 0x234   :  { %v623_v34 = vmul.f32 1.442695, %v614_v36 }
 0x235   :  { %7469 = vpow2.f32 %v621_v55 }
 0x236   :  { %7471 = vpow2.f32 %v625_v13  ;;  %v600_v28 = vpop.xlane.xlu1 %599 }
 0x237   :  { %7473 = vpow2.f32 %v623_v34  ;;  %v616_v33 = vsub.f32 %v8419_v43, %v600_v28 }
 0x239   :  { %v627_v40 = vmul.f32 1.442695, %v616_v33  ;;  %v609_v29 = vpop.xlane.xlu0 %608 }
 0x23b   :  { %v8572_v39 = vpop.eup %7469  ;;  %7475 = vpow2.f32 %v627_v40 }
 0x23c   :  { %v8540_v56 = vpop.f32.mrf.mxu0  ;;  %v8591_v44 = vpop.eup %7471 }
 0x23d   :  { %v896_v45 = vsel %vm588_vm1, %v8540_v56, -inf  ;;  %v8593_v48 = vpop.eup %7473  ;;  %v643_v43 = vsel %vm588_vm1, %v8591_v44, 0.0 }
 0x23e   :  { %897 = vmax.xlane.f32.xlu0 %v896_v45  ;;  %6616 = vmatmul.msk.bf16.vlgmr.msrb.gmra.mxu2 %vm534_vm0, %v2543_v21  ;;  %v640_v59 = vsel %vm588_vm1, %v8593_v48, 0.0  ;;  %v612_v13 = vpop.xlane.xlu1 %611 }
 0x23f   :  { %v620_v34 = vsub.f32 %v8470_v61, %v612_v13 }
 0x241   :  { %6560 = vmatmul.msk.bf16.vlgmr.msrb.gmra.mxu0 %vm534_vm0, %v8321_v7  ;;  %v8547_v8 = vpop.f32.mrf.mxu2  ;;  %v8613_v17 = vpop.eup %7475 }
 0x242   :  { %v1243_v49 = vsel %vm588_vm1, %v8547_v8, -inf }
 0x243   :  { %1244 = vmax.xlane.f32.xlu1 %v1243_v49  ;;  %v619_v49 = vsub.f32 %v8456_v57, %v609_v29  ;;  %v6698_v57 = vld [vmem:[#allocation2 + $0x60] sm:$0xf] }
 0x244   :  { %v8552_v14 = vpop.f32.mrf.mxu0 }
 0x245   :  { %v899_v41 = vsel %vm588_vm1, %v8552_v14, -inf  ;;  %v633_v55 = vmul.f32 1.442695, %v619_v49  ;;  %v6706_v49 = vld [vmem:[#allocation2 + $0x90] sm:$0xf] }
 0x246   :  { %900 = vmax.xlane.f32.xlu2 %v899_v41 }
 0x249   :  { %v8556_v18 = vpop.f32.mrf.mxu2 }
 0x24a   :  { %v1246_v50 = vsel %vm588_vm1, %v8556_v18, -inf }
 0x24e   :  { %v8558_v7 = vpop.f32.mrf.mxu0  ;;  %1247 = vmax.xlane.f32.xlu2 %v1246_v50  ;;  %6617 = vmatmul.msk.bf16.gmra.mxu2 %vm534_vm0, %v8452_v22 }
 0x24f   :  { %v902_v19 = vsel %vm588_vm1, %v8558_v7, -inf }
 0x250   :  { %903 = vmax.xlane.f32.xlu1 %v902_v19 }
 0x251   :  { %6561 = vmatmul.msk.bf16.gmra.mxu0 %vm534_vm0, %v8357_v5  ;;  %v8570_v38 = vpop.f32.mrf.mxu2  ;;  %v637_v5 = vsel %vm588_vm1, %v8572_v39, 0.0 }
 0x252   :  { %v1249_v21 = vsel %vm588_vm1, %v8570_v38, -inf }
 0x253   :  { %1250 = vmax.xlane.f32.xlu0 %v1249_v21  ;;  %v6699_v21 = vor.u32 %v7336_v11, %v6698_v57 }
 0x256   :  { %v8576_v62 = vpop.f32.mrf.mxu0  ;;  %638 = vadd.xlane.f32.xlu2 %v637_v5 }
 0x257   :  { %v905_v35 = vsel %vm588_vm1, %v8576_v62, -inf }
 0x259   :  { %v8580_v15 = vpop.f32.mrf.mxu2 }
 0x25a   :  { %v1252_v22 = vsel %vm588_vm1, %v8580_v15, -inf }
 0x25b   :  { %1253 = vmax.xlane.f32.xlu1 %v1252_v22  ;;  %906 = vmax.xlane.f32.xlu0 %v905_v35 }
 0x25e   :  { %v8587_v3 = vpop.f32.mrf.mxu0  ;;  %6618 = vmatmul.msk.bf16.gmra.mxu2 %vm534_vm0, %v8509_v31  ;;  %v617_v31 = vsub.f32 %v8430_v47, %v603_v6  ;;  %v646_v47 = vsel %vm588_vm1, %v8613_v17, 0.0  ;;  %v635_v6 = vmul.f32 1.442695, %v620_v34  ;;  %v6710_v34 = vld [vmem:[#allocation2 + $0xa8] sm:$0xf] }
 0x25f   :  { %v908_v46 = vsel %vm588_vm1, %v8587_v3, -inf }
 0x260   :  { %909 = vmax.xlane.f32.xlu2 %v908_v46  ;;  %v629_v10 = vmul.f32 1.442695, %v617_v31 }
 0x261   :  { %6562 = vmatmul.msk.bf16.gmra.mxu0 %vm534_vm0, %v8392_v0  ;;  %v8599_v2 = vpop.f32.mrf.mxu2 }
 0x262   :  { %v1255_v0 = vsel %vm588_vm1, %v8599_v2, -inf  ;;  %7477 = vpow2.f32 %v629_v10 }
 0x263   :  { %644 = vadd.xlane.f32.xlu1 %v643_v43  ;;  %641 = vadd.xlane.f32.xlu0 %v640_v59  ;;  %7479 = vpow2.f32 %v631_v42  ;;  %v6702_v59 = vld [vmem:[#allocation2 + $0x78] sm:$0xf] }
 0x264   :  { %7481 = vpow2.f32 %v633_v55 }
 0x265   :  { %7483 = vpow2.f32 %v635_v6 }
 0x266   :  { %v8605_v9 = vpop.f32.mrf.mxu0 }
 0x267   :  { %v911_v58 = vsel %vm588_vm1, %v8605_v9, -inf }
 0x268   :  { %1256 = vmax.xlane.f32.xlu2 %v1255_v0  ;;  %v7337_v0 = vld [vmem:[#allocation2 + $0x80] sm:$0xf0] }
 0x269   :  { %v8611_v20 = vpop.f32.mrf.mxu2  ;;  %v6703_v52 = vor.u32 %v7337_v0, %v6702_v59 }
 0x26a   :  { %v1258_v4 = vsel %vm588_vm1, %v8611_v20, -inf }
 0x26b   :  { %1259 = vmax.xlane.f32.xlu0 %v1258_v4  ;;  %912 = vmax.xlane.f32.xlu1 %v911_v58 }
 0x26e   :  { %v8619_v53 = vpop.f32.mrf.mxu0  ;;  %6619 = vmatmul.msk.bf16.gmra.mxu2 %vm534_vm0, %v8507_v54  ;;  %v8638_v54 = vpop.eup %7477 }
 0x26f   :  { %v914_v60 = vsel %vm588_vm1, %v8619_v53, -inf  ;;  %v8640_v41 = vpop.eup %7479  ;;  %v649_v19 = vsel %vm588_vm1, %v8638_v54, 0.0 }
 0x270   :  { %647 = vadd.xlane.f32.xlu2 %v646_v47  ;;  %v652_v50 = vsel %vm588_vm1, %v8640_v41, 0.0  ;;  %v8656_v28 = vpop.eup %7481 }
 0x271   :  { %6563 = vmatmul.msk.bf16.gmra.mxu0 %vm534_vm0, %v8426_v23  ;;  %v8627_v1 = vpop.f32.mrf.mxu2  ;;  %v655_v46 = vsel %vm588_vm1, %v8656_v28, 0.0  ;;  %v8676_v4 = vpop.eup %7483 }
 0x272   :  { %v1261_v45 = vsel %vm588_vm1, %v8627_v1, -inf  ;;  %v658_v10 = vsel %vm588_vm1, %v8676_v4, 0.0 }
 0x273   :  { %1262 = vmax.xlane.f32.xlu1 %v1261_v45  ;;  %915 = vmax.xlane.f32.xlu0 %v914_v60 }
 0x276   :  { %v8634_v37 = vpop.f32.mrf.mxu0 }
 0x277   :  { %v917_v23 = vsel %vm588_vm1, %v8634_v37, -inf }
 0x278   :  { %918 = vmax.xlane.f32.xlu2 %v917_v23  ;;  %v7338_v23 = vld [vmem:[#allocation2 + $0x98] sm:$0xf0] }
 0x279   :  { %v8642_v25 = vpop.f32.mrf.mxu2 }
 0x27a   :  { %v1264_v36 = vsel %vm588_vm1, %v8642_v25, -inf }
 0x27b   :  { %653 = vadd.xlane.f32.xlu1 %v652_v50  ;;  %650 = vadd.xlane.f32.xlu0 %v649_v19  ;;  %v6707_v50 = vor.u32 %v7338_v23, %v6706_v49 }
 0x27e   :  { %v8648_v16 = vpop.f32.mrf.mxu0  ;;  %6728 = vmatmul.msk.bf16.vlgmr.msra.gmra.mxu2 %vm534_vm0, %v6699_v21 }
 0x27f   :  { %v1590_v35 = vsel %vm588_vm1, %v8648_v16, -inf }
 0x280   :  { %1265 = vmax.xlane.f32.xlu2 %v1264_v36 }
 0x281   :  { %v8654_v5 = vpop.f32.mrf.mxu2 }
 0x282   :  { %v1937_v22 = vsel %vm588_vm1, %v8654_v5, -inf }
 0x283   :  { %1938 = vmax.xlane.f32.xlu0 %v1937_v22  ;;  %1591 = vmax.xlane.f32.xlu1 %v1590_v35  ;;  %v7339_v22 = vld [vmem:[#allocation2 + $0xb0] sm:$0xf0] }
 0x286   :  { %v8662_v33 = vpop.f32.mrf.mxu0 }
 0x287   :  { %v1593_v43 = vsel %vm588_vm1, %v8662_v33, -inf }
 0x288   :  { %656 = vadd.xlane.f32.xlu2 %v655_v46 }
 0x289   :  { %v8666_v61 = vpop.f32.mrf.mxu2 }
 0x28a   :  { %v1940_v40 = vsel %vm588_vm1, %v8666_v61, -inf }
 0x28b   :  { %1941 = vmax.xlane.f32.xlu1 %v1940_v40  ;;  %1594 = vmax.xlane.f32.xlu0 %v1593_v43  ;;  %v6711_v40 = vor.u32 %v7339_v22, %v6710_v34 }
 0x28e   :  { %v8672_v63 = vpop.f32.mrf.mxu0  ;;  %6729 = vmatmul.msk.bf16.gmra.mxu2 %vm534_vm0, %v6703_v52 }
 0x28f   :  { %v1596_v31 = vsel %vm588_vm1, %v8672_v63, -inf }
 0x290   :  { %1597 = vmax.xlane.f32.xlu2 %v1596_v31 }
 0x291   :  { %v8679_v58 = vpop.f32.mrf.mxu2 }
 0x292   :  { %v1943_v29 = vsel %vm588_vm1, %v8679_v58, -inf }
 0x293   :  { %659 = vadd.xlane.f32.xlu0 %v658_v10 }
 0x296   :  { %v8683_v42 = vpop.f32.mrf.mxu0 }
 0x297   :  { %v1599_v47 = vsel %vm588_vm1, %v8683_v42, -inf }
 0x298   :  { %1600 = vmax.xlane.f32.xlu1 %v1599_v47  ;;  %1944 = vmax.xlane.f32.xlu2 %v1943_v29 }
 0x299   :  { %v8689_v45 = vpop.f32.mrf.mxu2 }
 0x29a   :  { %v1946_v60 = vsel %vm588_vm1, %v8689_v45, -inf }
 0x29b   :  { %1947 = vmax.xlane.f32.xlu0 %v1946_v60 }
 0x29e   :  { %v8693_v55 = vpop.f32.mrf.mxu0  ;;  %6730 = vmatmul.msk.bf16.gmra.mxu2 %vm534_vm0, %v6707_v50 }
 0x29f   :  { %v1602_v11 = vsel %vm588_vm1, %v8693_v55, -inf }
 0x2a1   :  { %v8696_v19 = vpop.f32.mrf.mxu2 }
 0x2a2   :  { %v1949_v57 = vsel %vm588_vm1, %v8696_v19, -inf }
 0x2a3   :  { %1950 = vmax.xlane.f32.xlu1 %v1949_v57  ;;  %1603 = vmax.xlane.f32.xlu0 %v1602_v11 }
 0x2a6   :  { %v8702_v36 = vpop.f32.mrf.mxu0 }
 0x2a7   :  { %v1605_v21 = vsel %vm588_vm1, %v8702_v36, -inf }
 0x2a8   :  { %1606 = vmax.xlane.f32.xlu2 %v1605_v21 }
 0x2a9   :  { %v8706_v13 = vpop.f32.mrf.mxu2 }
 0x2aa   :  { %v1952_v46 = vsel %vm588_vm1, %v8706_v13, -inf }
 0x2ae   :  { %v8708_v35 = vpop.f32.mrf.mxu0  ;;  %6731 = vmatmul.msk.bf16.gmra.mxu2 %vm534_vm0, %v6711_v40 }
 0x2af   :  { %v1608_v6 = vsel %vm588_vm1, %v8708_v35, -inf }
 0x2b0   :  { %1609 = vmax.xlane.f32.xlu1 %v1608_v6  ;;  %1953 = vmax.xlane.f32.xlu2 %v1952_v46 }
 0x2b1   :  { %v898_v43 = vpop.xlane.xlu0 %897  ;;  %v8715_v59 = vpop.f32.mrf.mxu2 }
 0x2b2   :  { %v920_v0 = vsub.f32 %v8540_v56, %v898_v43  ;;  %v1955_v31 = vsel %vm588_vm1, %v8715_v59, -inf }
 0x2b3   :  { %1956 = vmax.xlane.f32.xlu0 %v1955_v31 }
 0x2b4   :  { %v928_v52 = vmul.f32 1.442695, %v920_v0 }
 0x2b6   :  { %v8720_v10 = vpop.f32.mrf.mxu0  ;;  %v1245_v47 = vpop.xlane.xlu1 %1244  ;;  %7485 = vpow2.f32 %v928_v52 }
 0x2b7   :  { %v1267_v29 = vsub.f32 %v8547_v8, %v1245_v47  ;;  %v1611_v57 = vsel %vm588_vm1, %v8720_v10, -inf }
 0x2b9   :  { %v1275_v60 = vmul.f32 1.442695, %v1267_v29  ;;  %v901_v49 = vpop.xlane.xlu2 %900  ;;  %v8723_v23 = vpop.f32.mrf.mxu2 }
 0x2ba   :  { %v921_v50 = vsub.f32 %v8552_v14, %v901_v49  ;;  %v1958_v56 = vsel %vm588_vm1, %v8723_v23, -inf }
 0x2bb   :  { %7487 = vpow2.f32 %v1275_v60  ;;  %1959 = vmax.xlane.f32.xlu1 %v1958_v56  ;;  %1612 = vmax.xlane.f32.xlu0 %v1611_v57 }
 0x2bc   :  { %v930_v11 = vmul.f32 1.442695, %v921_v50  ;;  %v8730_v21 = vpop.eup %7485 }
 0x2bd   :  { %v944_v46 = vsel %vm588_vm1, %v8730_v21, 0.0 }
 0x2be   :  { %v8732_v8 = vpop.f32.mrf.mxu0  ;;  %7489 = vpow2.f32 %v930_v11 }
 0x2bf   :  { %v2284_v60 = vsel %vm588_vm1, %v8732_v8, -inf }
 0x2c1   :  { %v8734_v34 = vpop.eup %7487  ;;  %v1248_v22 = vpop.xlane.xlu2 %1247 }
 0x2c2   :  { %v1291_v40 = vsel %vm588_vm1, %v8734_v34, 0.0  ;;  %v8743_v52 = vpop.f32.mrf.mxu2  ;;  %v1268_v47 = vsub.f32 %v8556_v18, %v1248_v22 }
 0x2c3   :  { %v904_v6 = vpop.xlane.xlu1 %903  ;;  %945 = vadd.xlane.f32.xlu1 %v944_v46  ;;  %1292 = vadd.xlane.f32.xlu0 %v1291_v40 }
 0x2c4   :  { %v922_v14 = vsub.f32 %v8558_v7, %v904_v6  ;;  %v8741_v31 = vpop.eup %7489  ;;  %v1277_v56 = vmul.f32 1.442695, %v1268_v47  ;;  %v2631_v47 = vsel %vm588_vm1, %v8743_v52, -inf }
 0x2c5   :  { %v947_v49 = vsel %vm588_vm1, %v8741_v31, 0.0 }
 0x2c6   :  { %v932_v43 = vmul.f32 1.442695, %v922_v14  ;;  %v1251_v0 = vpop.xlane.xlu0 %1250  ;;  %v8746_v29 = vpop.f32.mrf.mxu0 }
 0x2c7   :  { %10653 = vst [vmem:[#allocation11_spill] sm:$0xff] %v8746_v29  ;;  %v1269_v57 = vsub.f32 %v8570_v38, %v1251_v0  ;;  %v2287_v38 = vsel %vm588_vm1, %v8746_v29, -inf }
 0x2c8   :  { %7491 = vpow2.f32 %v932_v43 }
 0x2c9   :  { %v639_v7 = vpop.xlane.xlu2 %638  ;;  %7493 = vpow2.f32 %v1277_v56  ;;  %v1279_v6 = vmul.f32 1.442695, %v1269_v57 }
 0x2ca   :  { %v8757_v14 = vpop.f32.mrf.mxu2 }
 0x2cb   :  { %2285 = vmax.xlane.f32.xlu1 %v2284_v60  ;;  %948 = vadd.xlane.f32.xlu0 %v947_v49  ;;  %10654 = vst [vmem:[#allocation12_spill] sm:$0xff] %v8757_v14  ;;  %7495 = vpow2.f32 %v1279_v6 }
 0x2cc   :  { %7497 = vrcp.f32 %v639_v7  ;;  %v2634_v7 = vsel %vm588_vm1, %v8757_v14, -inf }
 0x2ce   :  { %v8752_v50 = vpop.eup %7491  ;;  %v1254_v18 = vpop.xlane.xlu1 %1253 }
 0x2cf   :  { %v950_v11 = vsel %vm588_vm1, %v8752_v50, 0.0  ;;  %v907_v22 = vpop.xlane.xlu0 %906  ;;  %v1270_v43 = vsub.f32 %v8580_v15, %v1254_v18  ;;  %v8765_v0 = vpop.f32.mrf.mxu0 }
 0x2d0   :  { %951 = vadd.xlane.f32.xlu2 %v950_v11  ;;  %v923_v46 = vsub.f32 %v8576_v62, %v907_v22  ;;  %10655 = vst [vmem:[#allocation13_spill] sm:$0xff] %v8765_v0  ;;  %v2290_v62 = vsel %vm588_vm1, %v8765_v0, -inf  ;;  %v8769_v15 = vpop.eup %7493 }
 0x2d1   :  { %v1281_v49 = vmul.f32 1.442695, %v1270_v43  ;;  %v1294_v22 = vsel %vm588_vm1, %v8769_v15, 0.0  ;;  %v8776_v6 = vpop.eup %7495 }
 0x2d2   :  { %v934_v60 = vmul.f32 1.442695, %v923_v46  ;;  %v8778_v46 = vpop.f32.mrf.mxu2  ;;  %v7498_v43 = vpop.eup %7497 }
 0x2d3   :  { %v910_v40 = vpop.xlane.xlu2 %909  ;;  %2632 = vmax.xlane.f32.xlu1 %v2631_v47  ;;  %2288 = vmax.xlane.f32.xlu0 %v2287_v38 }
 0x2d4   :  { %v924_v18 = vsub.f32 %v8587_v3, %v910_v40 }
 0x2d6   :  { %v645_v56 = vpop.xlane.xlu1 %644  ;;  %v936_v38 = vmul.f32 1.442695, %v924_v18 }
 0x2d7   :  { %v642_v57 = vpop.xlane.xlu0 %641  ;;  %v8788_v0 = vpop.f32.mrf.mxu0 }
 0x2d8   :  { %2291 = vmax.xlane.f32.xlu2 %v2290_v62  ;;  %7499 = vrcp.f32 %v642_v57  ;;  %v669_v62 = vmul.f32 %v7498_v43, %v8572_v39  ;;  %v2637_v43 = vsel %vm588_vm1, %v8778_v46, -inf }
 0x2d9   :  { %7501 = vpow2.f32 %v934_v60  ;;  %v1297_v60 = vsel %vm588_vm1, %v8776_v6, 0.0 }
 0x2da   :  { %7503 = vpow2.f32 %v1281_v49  ;;  %v8796_v39 = vpop.f32.mrf.mxu2 }
 0x2db   :  { %v1257_v11 = vpop.xlane.xlu2 %1256  ;;  %1295 = vadd.xlane.f32.xlu1 %v1294_v22  ;;  %2635 = vmax.xlane.f32.xlu0 %v2634_v7  ;;  %7505 = vpow2.f32 %v936_v38 }
 0x2de   :  { %v7500_v47 = vpop.eup %7499  ;;  %v913_v3 = vpop.xlane.xlu1 %912 }
 0x2df   :  { %v1260_v49 = vpop.xlane.xlu0 %1259  ;;  %v8782_v40 = vpop.eup %7501  ;;  %v670_v57 = vmul.f32 %v7500_v47, %v8593_v48  ;;  %v925_v48 = vsub.f32 %v8605_v9, %v913_v3 }
 0x2e0   :  { %1298 = vadd.xlane.f32.xlu2 %v1297_v60  ;;  %v8786_v14 = vpop.eup %7503  ;;  %v953_v18 = vsel %vm588_vm1, %v8782_v40, 0.0 }
 0x2e1   :  { %v677_v22 = vpack.c.bf16 %v670_v57, %v669_v62  ;;  %v1300_v29 = vsel %vm588_vm1, %v8786_v14, 0.0  ;;  %v8801_v60 = vpop.eup %7505  ;;  %v1271_v62 = vsub.f32 %v8599_v2, %v1257_v11  ;;  %v938_v57 = vmul.f32 1.442695, %v925_v48 }
 0x2e2   :  { %v956_v9 = vsel %vm588_vm1, %v8801_v60, 0.0 }
 0x2e3   :  { %v648_v7 = vpop.xlane.xlu2 %647  ;;  %6300 = vmatmul.msk.bf16.vlgmr.msra.gmra.mxu3 %vm588_vm1, %v677_v22  ;;  %954 = vadd.xlane.f32.xlu1 %v953_v18  ;;  %v8807_v22 = vpop.f32.mrf.mxu0  ;;  %v1283_v3 = vmul.f32 1.442695, %v1271_v62 }
 0x2e4   :  { %7507 = vrcp.f32 %v648_v7  ;;  %2077 = vmatpush.bf16.msra.mxu3 %v8480_v30  ;;  %1301 = vadd.xlane.f32.xlu0 %v1300_v29  ;;  %v2293_v29 = vsel %vm588_vm1, %v8788_v0, -inf  ;;  %10656 = vst [vmem:[#allocation14_spill] sm:$0xff] %v8807_v22  ;;  %v2296_v7 = vsel %vm588_vm1, %v8807_v22, -inf }
 0x2e5   :  { %7509 = vrcp.f32 %v645_v56 }
 0x2e6   :  { %v1263_v47 = vpop.xlane.xlu1 %1262  ;;  %7511 = vpow2.f32 %v938_v57  ;;  %v2640_v57 = vsel %vm588_vm1, %v8796_v39, -inf }
 0x2e7   :  { %v916_v38 = vpop.xlane.xlu0 %915  ;;  %7513 = vpow2.f32 %v1283_v3 }
 0x2e8   :  { %2638 = vmax.xlane.f32.xlu2 %v2637_v43  ;;  %2078 = vmatpush.bf16.msra.mxu3 %v8400_v12  ;;  %v1272_v12 = vsub.f32 %v8611_v20, %v1260_v49  ;;  %v8817_v43 = vpop.f32.mrf.mxu2  ;;  %v926_v20 = vsub.f32 %v8619_v53, %v916_v38 }
 0x2e9   :  { %10657 = vst [vmem:[#allocation15_spill] sm:$0xff] %v8817_v43 }
 0x2ea   :  { %v7508_v30 = vpop.eup %7507  ;;  %v1285_v62 = vmul.f32 1.442695, %v1272_v12 }
 0x2eb   :  { %2294 = vmax.xlane.f32.xlu1 %v2293_v29  ;;  %v7510_v56 = vpop.eup %7509  ;;  %v672_v2 = vmul.f32 %v7508_v30, %v8613_v17  ;;  %v919_v11 = vpop.xlane.xlu2 %918  ;;  %v1273_v17 = vsub.f32 %v8627_v1, %v1263_v47 }
 0x2ec   :  { %2079 = vmatpush.bf16.msra.mxu3 %v8371_v32  ;;  %957 = vadd.xlane.f32.xlu0 %v956_v9  ;;  %v671_v48 = vmul.f32 %v7510_v56, %v8591_v44  ;;  %v8824_v30 = vpop.eup %7511  ;;  %v940_v44 = vmul.f32 1.442695, %v926_v20  ;;  %v8835_v29 = vpop.f32.mrf.mxu0  ;;  %v927_v12 = vsub.f32 %v8634_v37, %v919_v11 }
 0x2ed   :  { %v1287_v53 = vmul.f32 1.442695, %v1273_v17  ;;  %v959_v1 = vsel %vm588_vm1, %v8824_v30, 0.0  ;;  %v8833_v38 = vpop.eup %7513  ;;  %10658 = vst [vmem:[#allocation16_spill] sm:$0xff] %v8835_v29 }
 0x2ee   :  { %v654_v32 = vpop.xlane.xlu1 %653  ;;  %v678_v49 = vpack.c.bf16 %v672_v2, %v671_v48  ;;  %v1303_v2 = vsel %vm588_vm1, %v8833_v38, 0.0 }
 0x2ef   :  { %v651_v18 = vpop.xlane.xlu0 %650  ;;  %7515 = vrcp.f32 %v654_v32 }
 0x2f0   :  { %2297 = vmax.xlane.f32.xlu2 %v2296_v7  ;;  %2080 = vmatpush.bf16.msra.mxu3 %v8334_v27  ;;  %v2643_v27 = vsel %vm588_vm1, %v8817_v43, -inf  ;;  %7517 = vrcp.f32 %v651_v18  ;;  %v2299_v18 = vsel %vm588_vm1, %v8835_v29, -inf  ;;  %v8844_v48 = vpop.f32.mrf.mxu2  ;;  %v7322_v29 = vld [vmem:[#allocation2 + $0x40] sm:$0xf0] }
 0x2f1   :  { %7519 = vpow2.f32 %v1285_v62 }
 0x2f2   :  { %7521 = vpow2.f32 %v940_v44 }
 0x2f3   :  { %6301 = vmatmul.msk.bf16.gmra.mxu3 %vm588_vm1, %v678_v49  ;;  %2641 = vmax.xlane.f32.xlu1 %v2640_v57  ;;  %v1266_v9 = vpop.xlane.xlu2 %1265  ;;  %7523 = vpow2.f32 %v1287_v53  ;;  %v942_v49 = vmul.f32 1.442695, %v927_v12 }
 0x2f4   :  { %2644 = vmax.xlane.f32.xlu0 %v2643_v27  ;;  %v8854_v27 = vpop.f32.mrf.mxu0 }
 0x2f5   :  { %v7516_v56 = vpop.eup %7515  ;;  %10659 = vst [vmem:[#allocation17_spill] sm:$0xff] %v8854_v27  ;;  %7525 = vpow2.f32 %v942_v49 }
 0x2f6   :  { %v7518_v3 = vpop.eup %7517  ;;  %v1592_v32 = vpop.xlane.xlu1 %1591  ;;  %v674_v20 = vmul.f32 %v7516_v56, %v8640_v41 }
 0x2f7   :  { %v8831_v47 = vpop.xlane.xlu0 %1938  ;;  %v8840_v7 = vpop.eup %7519  ;;  %v673_v62 = vmul.f32 %v7518_v3, %v8638_v54  ;;  %v2646_v3 = vsel %vm588_vm1, %v8844_v48, -inf }
 0x2f8   :  { %960 = vadd.xlane.f32.xlu2 %v959_v1  ;;  %v1306_v37 = vsel %vm588_vm1, %v8840_v7, 0.0  ;;  %v8850_v17 = vpop.eup %7521  ;;  %v1614_v1 = vsub.f32 %v8648_v16, %v1592_v32  ;;  %v8862_v56 = vpop.f32.mrf.mxu2  ;;  %v2302_v16 = vsel %vm588_vm1, %v8854_v27, -inf }
 0x2f9   :  { %v8852_v57 = vpop.eup %7523  ;;  %v679_v44 = vpack.c.bf16 %v674_v20, %v673_v62  ;;  %v962_v54 = vsel %vm588_vm1, %v8850_v17, 0.0  ;;  %10660 = vst [vmem:[#allocation18_spill] sm:$0xff] %v8862_v56  ;;  %v1274_v62 = vsub.f32 %v8642_v25, %v1266_v9  ;;  %v1961_v25 = vsub.f32 %v8654_v5, %v8831_v47 }
 0x2fa   :  { %v1309_v41 = vsel %vm588_vm1, %v8852_v57, 0.0  ;;  %v1622_v20 = vmul.f32 1.442695, %v1614_v1  ;;  %v2649_v47 = vsel %vm588_vm1, %v8862_v56, -inf }
 0x2fb   :  { %1304 = vadd.xlane.f32.xlu1 %v1303_v2  ;;  %v657_v53 = vpop.xlane.xlu2 %656 }
 0x2fc   :  { %2300 = vmax.xlane.f32.xlu0 %v2299_v18  ;;  %7527 = vrcp.f32 %v657_v53  ;;  %v8866_v18 = vpop.eup %7525 }
 0x2fe   :  { %v1942_v2 = vpop.xlane.xlu1 %1941 }
 0x2ff   :  { %v1595_v11 = vpop.xlane.xlu0 %1594  ;;  %v1962_v49 = vsub.f32 %v8666_v61, %v1942_v2 }
 0x300   :  { %1307 = vadd.xlane.f32.xlu2 %v1306_v37  ;;  %v8872_v37 = vpop.f32.mrf.mxu0  ;;  %v8882_v2 = vpop.f32.mrf.mxu2 }
 0x301   :  { %10661 = vst [vmem:[#allocation19_spill] sm:$0xff] %v8872_v37  ;;  %v1971_v9 = vmul.f32 1.442695, %v1962_v49  ;;  %v2305_v61 = vsel %vm588_vm1, %v8872_v37, -inf }
 0x302   :  { %v7528_v32 = vpop.eup %7527  ;;  %10662 = vst [vmem:[#allocation20_spill] sm:$0xff] %v8882_v2 }
 0x303   :  { %6302 = vmatmul.msk.bf16.gmra.mxu3 %vm588_vm1, %v679_v44  ;;  %963 = vadd.xlane.f32.xlu1 %v962_v54  ;;  %v965_v44 = vsel %vm588_vm1, %v8866_v18, 0.0  ;;  %v1598_v53 = vpop.xlane.xlu2 %1597  ;;  %v675_v1 = vmul.f32 %v7528_v32, %v8656_v28  ;;  %v2652_v28 = vsel %vm588_vm1, %v8882_v2, -inf  ;;  %v7320_v2 = vld [vmem:[#allocation2 + $0x10] sm:$0xf0] }
 0x304   :  { %1310 = vadd.xlane.f32.xlu0 %v1309_v41  ;;  %v1289_v41 = vmul.f32 1.442695, %v1274_v62  ;;  %v1615_v62 = vsub.f32 %v8662_v33, %v1595_v11  ;;  %v1616_v5 = vsub.f32 %v8672_v63, %v1598_v53 }
 0x306   :  { %v1624_v49 = vmul.f32 1.442695, %v1615_v62  ;;  %v1626_v11 = vmul.f32 1.442695, %v1616_v5 }
 0x307   :  { %v660_v12 = vpop.xlane.xlu0 %659 }
 0x308   :  { %2647 = vmax.xlane.f32.xlu2 %v2646_v3  ;;  %7529 = vrcp.f32 %v660_v12 }
 0x309   :  { %7531 = vpow2.f32 %v1622_v20 }
 0x30a   :  { %7533 = vpow2.f32 %v1289_v41 }
 0x30b   :  { %2303 = vmax.xlane.f32.xlu1 %v2302_v16  ;;  %v1601_v12 = vpop.xlane.xlu1 %1600  ;;  %7535 = vpow2.f32 %v1971_v9  ;;  %v1945_v32 = vpop.xlane.xlu2 %1944 }
 0x30c   :  { %966 = vadd.xlane.f32.xlu0 %v965_v44  ;;  %v1969_v44 = vmul.f32 1.442695, %v1961_v25  ;;  %v1617_v33 = vsub.f32 %v8683_v42, %v1601_v12  ;;  %v1963_v9 = vsub.f32 %v8679_v58, %v1945_v32 }
 0x30e   :  { %v7530_v54 = vpop.eup %7529  ;;  %7537 = vpow2.f32 %v1969_v44  ;;  %v1628_v25 = vmul.f32 1.442695, %v1617_v33  ;;  %v1973_v12 = vmul.f32 1.442695, %v1963_v9 }
 0x30f   :  { %v676_v3 = vmul.f32 %v7530_v54, %v8676_v4  ;;  %v8888_v20 = vpop.eup %7531  ;;  %v1948_v4 = vpop.xlane.xlu0 %1947  ;;  %7539 = vpow2.f32 %v1624_v49 }
 0x310   :  { %2306 = vmax.xlane.f32.xlu2 %v2305_v61  ;;  %v1638_v63 = vsel %vm588_vm1, %v8888_v20, 0.0  ;;  %v8896_v53 = vpop.eup %7533  ;;  %7541 = vpow2.f32 %v1626_v11 }
 0x311   :  { %v680_v16 = vpack.c.bf16 %v676_v3, %v675_v1  ;;  %v8898_v41 = vpop.eup %7535  ;;  %v1312_v42 = vsel %vm588_vm1, %v8896_v53, 0.0  ;;  %7543 = vpow2.f32 %v1628_v25 }
 0x312   :  { %v1988_v3 = vsel %vm588_vm1, %v8898_v41, 0.0  ;;  %7545 = vpow2.f32 %v1973_v12 }
 0x313   :  { %6303 = vmatmul.msk.bf16.gmra.mxu3 %vm588_vm1, %v680_v16  ;;  %2650 = vmax.xlane.f32.xlu1 %v2649_v47  ;;  %v1964_v16 = vsub.f32 %v8689_v45, %v1948_v4 }
 0x314   :  { %2653 = vmax.xlane.f32.xlu0 %v2652_v28  ;;  %v8904_v1 = vpop.eup %7537 }
 0x315   :  { %v1985_v58 = vsel %vm588_vm1, %v8904_v1, 0.0  ;;  %v1975_v28 = vmul.f32 1.442695, %v1964_v16 }
 0x316   :  { %v1951_v54 = vpop.xlane.xlu1 %1950 }
 0x317   :  { %v1965_v61 = vsub.f32 %v8696_v19, %v1951_v54  ;;  %v1604_v62 = vpop.xlane.xlu0 %1603  ;;  %v8911_v19 = vpop.eup %7539 }
 0x318   :  { %1639 = vadd.xlane.f32.xlu2 %v1638_v63  ;;  %v8913_v47 = vpop.eup %7541  ;;  %v1618_v49 = vsub.f32 %v8693_v55, %v1604_v62  ;;  %v1641_v45 = vsel %vm588_vm1, %v8911_v19, 0.0 }
 0x319   :  { %v1977_v44 = vmul.f32 1.442695, %v1965_v61  ;;  %v8919_v4 = vpop.eup %7543  ;;  %v1644_v11 = vsel %vm588_vm1, %v8913_v47, 0.0 }
 0x31a   :  { %v1630_v32 = vmul.f32 1.442695, %v1618_v49  ;;  %v1647_v55 = vsel %vm588_vm1, %v8919_v4, 0.0 }
 0x31b   :  { %1313 = vadd.xlane.f32.xlu1 %v1312_v42  ;;  %v1607_v5 = vpop.xlane.xlu2 %1606  ;;  %7547 = vpow2.f32 %v1977_v44 }
 0x31c   :  { %1989 = vadd.xlane.f32.xlu0 %v1988_v3  ;;  %v1619_v33 = vsub.f32 %v8702_v36, %v1607_v5  ;;  %7549 = vpow2.f32 %v1975_v28  ;;  %v8929_v36 = vpop.eup %7545 }
 0x31d   :  { %7551 = vpow2.f32 %v1630_v32  ;;  %v1991_v61 = vsel %vm588_vm1, %v8929_v36, 0.0 }
 0x31e   :  { %v1632_v63 = vmul.f32 1.442695, %v1619_v33 }
 0x320   :  { %1986 = vadd.xlane.f32.xlu2 %v1985_v58  ;;  %7553 = vpow2.f32 %v1632_v63 }
 0x321   :  { %v8931_v9 = vpop.eup %7547 }
 0x322   :  { %10663 = vst [vmem:[#allocation21_spill] sm:$0xff] %v8931_v9  ;;  %v8935_v42 = vpop.eup %7549  ;;  %v1997_v3 = vsel %vm588_vm1, %v8931_v9, 0.0 }
 0x323   :  { %1642 = vadd.xlane.f32.xlu1 %v1641_v45  ;;  %v8923_v54 = vpop.xlane.xlu1 %1609  ;;  %v1994_v12 = vsel %vm588_vm1, %v8935_v42, 0.0  ;;  %v8945_v62 = vpop.eup %7551 }
 0x324   :  { %1645 = vadd.xlane.f32.xlu0 %v1644_v11  ;;  %v1650_v5 = vsel %vm588_vm1, %v8945_v62, 0.0  ;;  %v8953_v45 = vpop.xlane.xlu2 %1953 }
 0x326   :  { %v8927_v25 = vpop.xlane.xlu0 %1956  ;;  %v8947_v58 = vpop.eup %7553 }
 0x327   :  { %v1653_v28 = vsel %vm588_vm1, %v8947_v58, 0.0 }
 0x328   :  { %1648 = vadd.xlane.f32.xlu2 %v1647_v55  ;;  %v6626_v55 = vld [vmem:[#allocation2 + $0x20] sm:$0xf] }
 0x32b   :  { %1992 = vadd.xlane.f32.xlu1 %v1991_v61  ;;  %v7321_v61 = vld [vmem:[#allocation2 + $0x28] sm:$0xf0] }
 0x32c   :  { %1998 = vadd.xlane.f32.xlu0 %v1997_v3  ;;  %v6627_v37 = vor.u32 %v7321_v61, %v6626_v55 }
 0x32e   :  { %v8941_v16 = vpop.xlane.xlu1 %1959  ;;  %v8943_v44 = vpop.xlane.xlu0 %1612 }
 0x330   :  { %1995 = vadd.xlane.f32.xlu2 %v1994_v12  ;;  %v6622_v12 = vld [vmem:[#allocation2 + $0x8] sm:$0xf] }
 0x333   :  { %1651 = vadd.xlane.f32.xlu1 %v1650_v5 }
 0x334   :  { %1654 = vadd.xlane.f32.xlu0 %v1653_v28 }
 0x336   :  { %v946_v49 = vpop.xlane.xlu1 %945  ;;  %v1293_v33 = vpop.xlane.xlu0 %1292 }
 0x337   :  { %7555 = vrcp.f32 %v946_v49  ;;  %v6623_v49 = vor.u32 %v7320_v2, %v6622_v12 }
 0x33d   :  { %v7556_v3 = vpop.eup %7555 }
 0x33e   :  { %v8955_v11 = vpop.xlane.xlu1 %2285  ;;  %v949_v32 = vpop.xlane.xlu0 %948  ;;  %v976_v56 = vmul.f32 %v7556_v3, %v8730_v21 }
 0x33f   :  { %7557 = vrcp.f32 %v949_v32  ;;  %v6630_v32 = vld [vmem:[#allocation2 + $0x38] sm:$0xf] }
 0x340   :  { %v6631_v55 = vor.u32 %v7322_v29, %v6630_v32  ;;  %7559 = vrcp.f32 %v1293_v33 }
 0x343   :  { %v952_v63 = vpop.xlane.xlu2 %951 }
 0x345   :  { %v7558_v5 = vpop.eup %7557 }
 0x346   :  { %v977_v28 = vmul.f32 %v7558_v5, %v8741_v31  ;;  %v8959_v43 = vpop.xlane.xlu1 %2632  ;;  %v8961_v22 = vpop.xlane.xlu0 %2288 }
 0x348   :  { %2745 = vrot.lane.b32.xlu2 %v6627_v37, %s8041_s0  ;;  %2743 = vrot.lane.b32.xlu0 %v6623_v49, %s8041_s0  ;;  %v984_v27 = vpack.c.bf16 %v977_v28, %v976_v56  ;;  %v7560_v56 = vpop.eup %7559  ;;  %v1968_v49 = vsub.f32 %v8723_v23, %v8941_v16 }
 0x349   :  { %v1323_v29 = vmul.f32 %v7560_v56, %v8734_v34 }
 0x34a   :  { %6356 = vmatmul.msk.bf16.vlgmr.msrb.gmra.mxu1 %vm588_vm1, %v984_v27  ;;  %v10664_v27 = vld [vmem:[#allocation10_spill] sm:$0xff] }
 0x34b   :  { %v8965_v9 = vpop.xlane.xlu2 %2291  ;;  %2424 = vmatpush.bf16.msrb.mxu1 %v8495_v26 }
 0x34c   :  { %2747 = vrot.lane.b32.xlu1 %v6631_v55, %s8041_s0 }
 0x34e   :  { %v1296_v21 = vpop.xlane.xlu1 %1295  ;;  %v8970_v31 = vpop.xlane.xlu0 %2635 }
 0x34f   :  { %2425 = vmatpush.bf16.msrb.mxu1 %v8501_v24  ;;  %7561 = vrcp.f32 %v1296_v21 }
 0x350   :  { %7563 = vrcp.f32 %v952_v63  ;;  %v1620_v63 = vsub.f32 %v8708_v35, %v8923_v54  ;;  %v1966_v35 = vsub.f32 %v8706_v13, %v8953_v45  ;;  %v1983_v54 = vmul.f32 1.442695, %v1968_v49 }
 0x351   :  { %v2308_v13 = vsub.f32 %v8732_v8, %v8955_v11 }
 0x352   :  { %v1634_v21 = vmul.f32 1.442695, %v1620_v63 }
 0x353   :  { %v1299_v37 = vpop.xlane.xlu2 %1298  ;;  %2426 = vmatpush.bf16.msrb.mxu1 %v8436_v51 }
 0x355   :  { %v7562_v2 = vpop.eup %7561 }
 0x356   :  { %v955_v61 = vpop.xlane.xlu1 %954  ;;  %v1324_v26 = vmul.f32 %v7562_v2, %v8769_v15  ;;  %v7564_v24 = vpop.eup %7563 }
 0x357   :  { %7565 = vrcp.f32 %v955_v61  ;;  %2427 = vmatpush.bf16.msrb.mxu1 %v10664_v27  ;;  %v1302_v33 = vpop.xlane.xlu0 %1301  ;;  %v978_v34 = vmul.f32 %v7564_v24, %v8752_v50 }
 0x358   :  { %v1331_v3 = vpack.c.bf16 %v1324_v26, %v1323_v29  ;;  %7567 = vrcp.f32 %v1302_v33  ;;  %v1979_v26 = vmul.f32 1.442695, %v1966_v35 }
 0x359   :  { %7569 = vrcp.f32 %v1299_v37 }
 0x35a   :  { %6412 = vmatmul.msk.bf16.vlgmr.msrb.gmra.mxu3 %vm588_vm1, %v1331_v3  ;;  %7571 = vpow2.f32 %v1634_v21 }
 0x35b   :  { %v8977_v12 = vpop.xlane.xlu2 %2638  ;;  %7573 = vpow2.f32 %v1983_v54 }
 0x35d   :  { %v7566_v51 = vpop.eup %7565 }
 0x35e   :  { %v8982_v5 = vpop.xlane.xlu1 %2294  ;;  %v979_v15 = vmul.f32 %v7566_v51, %v8782_v40  ;;  %v7568_v55 = vpop.eup %7567  ;;  %v1967_v40 = vsub.f32 %v8715_v59, %v8927_v25  ;;  %v2316_v25 = vmul.f32 1.442695, %v2308_v13 }
 0x35f   :  { %v958_v28 = vpop.xlane.xlu0 %957  ;;  %v7570_v2 = vpop.eup %7569  ;;  %v1326_v50 = vmul.f32 %v7568_v55, %v8786_v14 }
 0x360   :  { %v985_v32 = vpack.c.bf16 %v979_v15, %v978_v34  ;;  %v1325_v16 = vmul.f32 %v7570_v2, %v8776_v6  ;;  %v1981_v45 = vmul.f32 1.442695, %v1967_v40  ;;  %7575 = vrcp.f32 %v958_v28  ;;  %v9005_v59 = vpop.eup %7571 }
 0x361   :  { %7577 = vpow2.f32 %v1979_v26  ;;  %v1621_v6 = vsub.f32 %v8720_v10, %v8943_v44  ;;  %v9009_v33 = vpop.eup %7573  ;;  %v1656_v51 = vsel %vm588_vm1, %v9005_v59, 0.0 }
 0x362   :  { %6357 = vmatmul.msk.bf16.gmra.mxu1 %vm588_vm1, %v985_v32  ;;  %v1332_v14 = vpack.c.bf16 %v1326_v50, %v1325_v16  ;;  %v2006_v10 = vsel %vm588_vm1, %v9009_v33, 0.0 }
 0x363   :  { %v8988_v56 = vpop.xlane.xlu2 %2297  ;;  %v1636_v63 = vmul.f32 1.442695, %v1621_v6 }
 0x366   :  { %v726_v37 = vpop.f32.mrf.mxu3  ;;  %v8996_v23 = vpop.xlane.xlu1 %2641 }
 0x367   :  { %v746_v61 = vpack.c.bf16 %v726_v37, %v726_v37  ;;  %v8999_v29 = vpop.xlane.xlu0 %2644  ;;  %v7576_v34 = vpop.eup %7575 }
 0x368   :  { %v9018_v44 = vpop.eup %7577  ;;  %v980_v32 = vmul.f32 %v7576_v34, %v8801_v60 }
 0x369   :  { %755 = vst.msk [vmem:[#allocation3] sm:$0xf] %vm754_vm2, %v746_v61  ;;  %v2000_v21 = vsel %vm588_vm1, %v9018_v44, 0.0 }
 0x36a   :  { %6413 = vmatmul.msk.bf16.gmra.mxu3 %vm588_vm1, %v1332_v14 }
 0x36b   :  { %v961_v27 = vpop.xlane.xlu2 %960 }
 0x36c   :  { %7579 = vrcp.f32 %v961_v27 }
 0x36d   :  { %7581 = vpow2.f32 %v1981_v45 }
 0x36e   :  { %v728_v8 = vpop.f32.mrf.mxu3  ;;  %v1305_v11 = vpop.xlane.xlu1 %1304  ;;  %7583 = vpow2.f32 %v2316_v25 }
 0x36f   :  { %v747_v3 = vpack.c.bf16 %v728_v8, %v728_v8  ;;  %v9011_v24 = vpop.xlane.xlu0 %2300  ;;  %7585 = vrcp.f32 %v1305_v11 }
 0x371   :  { %1657 = vadd.xlane.f32.xlu2 %v1656_v51  ;;  %756 = vst.msk [vmem:[#allocation3 + $0x4] sm:$0xf] %vm754_vm2, %v747_v3 }
 0x372   :  { %2007 = vadd.xlane.f32.xlu0 %v2006_v10  ;;  %v7580_v28 = vpop.eup %7579 }
 0x373   :  { %v1308_v15 = vpop.xlane.xlu2 %1307  ;;  %v9020_v49 = vpop.eup %7581  ;;  %v981_v55 = vmul.f32 %v7580_v28, %v8824_v30 }
 0x374   :  { %7587 = vrcp.f32 %v1308_v15  ;;  %v9026_v2 = vpop.eup %7583  ;;  %v2003_v61 = vsel %vm588_vm1, %v9020_v49, 0.0 }
 0x375   :  { %7589 = vpow2.f32 %v1636_v63  ;;  %v986_v35 = vpack.c.bf16 %v981_v55, %v980_v32  ;;  %v7586_v40 = vpop.eup %7585  ;;  %v2332_v30 = vsel %vm588_vm1, %v9026_v2, 0.0 }
 0x376   :  { %v731_v54 = vpop.f32.mrf.mxu3  ;;  %v964_v50 = vpop.xlane.xlu1 %963  ;;  %2001 = vadd.xlane.f32.xlu1 %v2000_v21  ;;  %v1327_v13 = vmul.f32 %v7586_v40, %v8833_v38  ;;  %v6634_v21 = vld [vmem:[#allocation2 + $0x50] sm:$0xf]  ;;  %v7325_v40 = vld [vmem:[#allocation2 + $0x20] sm:$0xf0] }
 0x377   :  { %v748_v37 = vpack.c.bf16 %v731_v54, %v731_v54  ;;  %v1311_v16 = vpop.xlane.xlu0 %1310  ;;  %6358 = vmatmul.msk.bf16.gmra.mxu1 %vm588_vm1, %v986_v35  ;;  %7591 = vrcp.f32 %v964_v50  ;;  %v7323_v35 = vld [vmem:[#allocation2 + $0x58] sm:$0xf0]  ;;  %v6646_v50 = vld [vmem:[#allocation2 + $0x18] sm:$0xf] }
 0x379   :  { %2004 = vadd.xlane.f32.xlu2 %v2003_v61  ;;  %757 = vst.msk [vmem:[#allocation3 + $0x8] sm:$0xf] %vm754_vm2, %v748_v37  ;;  %v6635_v37 = vor.u32 %v7323_v35, %v6634_v21 }
 0x37a   :  { %v7588_v60 = vpop.eup %7587  ;;  %2333 = vadd.xlane.f32.xlu0 %v2332_v30 }
 0x37b   :  { %v9034_v26 = vpop.eup %7589  ;;  %v1328_v14 = vmul.f32 %v7588_v60, %v8840_v7  ;;  %v9038_v45 = vpop.xlane.xlu2 %2647 }
 0x37c   :  { %v1659_v6 = vsel %vm588_vm1, %v9034_v26, 0.0 }
 0x37d   :  { %v1333_v27 = vpack.c.bf16 %v1328_v14, %v1327_v13  ;;  %v7592_v7 = vpop.eup %7591  ;;  %v7324_v13 = vld [vmem:[#allocation2 + $0x8] sm:$0xf0] }
 0x37e   :  { %v733_v25 = vpop.f32.mrf.mxu3  ;;  %v9043_v8 = vpop.xlane.xlu1 %2303  ;;  %1660 = vadd.xlane.f32.xlu1 %v1659_v6  ;;  %v982_v15 = vmul.f32 %v7592_v7, %v8850_v17  ;;  %v6647_v17 = vor.u32 %v7325_v40, %v6646_v50  ;;  %v6642_v6 = vld [vmem:[#allocation2] sm:$0xf] }
 0x37f   :  { %6414 = vmatmul.msk.bf16.gmra.mxu3 %vm588_vm1, %v1333_v27  ;;  %v749_v11 = vpack.c.bf16 %v733_v25, %v733_v25  ;;  %v967_v3 = vpop.xlane.xlu0 %966 }
 0x380   :  { %7593 = vrcp.f32 %v967_v3 }
 0x381   :  { %758 = vst.msk [vmem:[#allocation3 + $0xc] sm:$0xf] %vm754_vm2, %v749_v11  ;;  %7595 = vrcp.f32 %v1311_v16  ;;  %v6643_v16 = vor.u32 %v7324_v13, %v6642_v6 }
 0x383   :  { %v9046_v38 = vpop.xlane.xlu2 %2306 }
 0x386   :  { %v7594_v51 = vpop.eup %7593  ;;  %v736_v63 = vpop.f32.mrf.mxu3 }
 0x387   :  { %v9048_v34 = vpop.xlane.xlu1 %2650  ;;  %v750_v10 = vpack.c.bf16 %v736_v63, %v736_v63  ;;  %v983_v28 = vmul.f32 %v7594_v51, %v8866_v18  ;;  %v9052_v32 = vpop.xlane.xlu0 %2653 }
 0x388   :  { %v7596_v14 = vpop.eup %7595 }
 0x389   :  { %759 = vst.msk [vmem:[#allocation3 + $0x10] sm:$0xf] %vm754_vm2, %v750_v10  ;;  %v987_v55 = vpack.c.bf16 %v983_v28, %v982_v15  ;;  %v1329_v11 = vmul.f32 %v7596_v14, %v8852_v57 }
 0x38b   :  { %v1640_v54 = vpop.xlane.xlu2 %1639  ;;  %6359 = vmatmul.msk.bf16.gmra.mxu1 %vm588_vm1, %v987_v55 }
 0x38e   :  { %v738_v61 = vpop.f32.mrf.mxu3  ;;  %2749 = vrot.lane.b32.xlu0 %v6635_v37, %s8041_s0 }
 0x38f   :  { %v1314_v60 = vpop.xlane.xlu1 %1313  ;;  %v751_v18 = vpack.c.bf16 %v738_v61, %v738_v61  ;;  %v1990_v30 = vpop.xlane.xlu0 %1989 }
 0x390   :  { %7597 = vrcp.f32 %v1314_v60 }
 0x391   :  { %2891 = vrot.lane.b32.xlu2 %v6647_v17, %s8042_s6  ;;  %760 = vst.msk [vmem:[#allocation3 + $0x14] sm:$0xf] %vm754_vm2, %v751_v18  ;;  %7599 = vrcp.f32 %v1640_v54  ;;  %v2655_v18 = vsub.f32 %v8743_v52, %v8959_v43  ;;  %v10666_v43 = vld [vmem:[#allocation13_spill] sm:$0xff] }
 0x393   :  { %v1987_v27 = vpop.xlane.xlu2 %1986 }
 0x396   :  { %v7598_v25 = vpop.eup %7597  ;;  %v741_v7 = vpop.f32.mrf.mxu3 }
 0x397   :  { %v1330_v3 = vmul.f32 %v7598_v25, %v8896_v53  ;;  %v1643_v51 = vpop.xlane.xlu1 %1642  ;;  %v752_v63 = vpack.c.bf16 %v741_v7, %v741_v7  ;;  %2889 = vrot.lane.b32.xlu1 %v6643_v16, %s8042_s6  ;;  %v7600_v15 = vpop.eup %7599  ;;  %v2310_v16 = vsub.f32 %v10666_v43, %v8965_v9 }
 0x398   :  { %7601 = vrcp.f32 %v1643_v51  ;;  %v1646_v28 = vpop.xlane.xlu0 %1645  ;;  %v1670_v57 = vmul.f32 %v7600_v15, %v8888_v20  ;;  %v2657_v20 = vsub.f32 %v8778_v46, %v8977_v12  ;;  %v10665_v46 = vld [vmem:[#allocation11_spill] sm:$0xff] }
 0x399   :  { %v1334_v10 = vpack.c.bf16 %v1330_v3, %v1329_v11  ;;  %761 = vst.msk [vmem:[#allocation3 + $0x18] sm:$0xf] %vm754_vm2, %v752_v63  ;;  %7603 = vrcp.f32 %v1987_v27  ;;  %v2309_v12 = vsub.f32 %v10665_v46, %v8961_v22 }
 0x39a   :  { %7605 = vrcp.f32 %v1990_v30  ;;  %v2667_v27 = vmul.f32 1.442695, %v2657_v20 }
 0x39b   :  { %6415 = vmatmul.msk.bf16.gmra.mxu3 %vm588_vm1, %v1334_v10  ;;  %v1649_v21 = vpop.xlane.xlu2 %1648  ;;  %v2318_v63 = vmul.f32 1.442695, %v2309_v12  ;;  %v2320_v10 = vmul.f32 1.442695, %v2310_v16  ;;  %v2660_v16 = vsub.f32 %v8844_v48, %v9038_v45 }
 0x39c   :  { %7607 = vrcp.f32 %v1649_v21 }
 0x39d   :  { %7609 = vrcp.f32 %v1646_v28 }
 0x39e   :  { %v7602_v55 = vpop.eup %7601  ;;  %v743_v35 = vpop.f32.mrf.mxu3 }
 0x39f   :  { %v1671_v53 = vmul.f32 %v7602_v55, %v8911_v19  ;;  %v753_v54 = vpack.c.bf16 %v743_v35, %v743_v35  ;;  %v7604_v40 = vpop.eup %7603  ;;  %v1993_v17 = vpop.xlane.xlu1 %1992 }
 0x3a0   :  { %v7606_v37 = vpop.eup %7605  ;;  %v2017_v61 = vmul.f32 %v7604_v40, %v8904_v1  ;;  %v9072_v60 = vpop.xlane.xlu0 %1998  ;;  %v2663_v1 = vmul.f32 1.442695, %v2655_v18  ;;  %v7326_v18 = vld [vmem:[#allocation2 + $0x38] sm:$0xf0] }
 0x3a1   :  { %v1678_v50 = vpack.c.bf16 %v1671_v53, %v1670_v57  ;;  %762 = vst.msk [vmem:[#allocation3 + $0x1c] sm:$0xf] %vm754_vm2, %v753_v54  ;;  %v2018_v19 = vmul.f32 %v7606_v37, %v8898_v41  ;;  %v2311_v41 = vsub.f32 %v8788_v0, %v8982_v5  ;;  %v10667_v5 = vld [vmem:[#allocation12_spill] sm:$0xff] }
 0x3a2   :  { %v7608_v14 = vpop.eup %7607  ;;  %v2656_v28 = vsub.f32 %v10667_v5, %v8970_v31  ;;  %v10669_v5 = vld [vmem:[#allocation17_spill] sm:$0xff] }
 0x3a3   :  { %6468 = vmatmul.msk.bf16.vlgmr.msra.gmra.mxu1 %vm588_vm1, %v1678_v50  ;;  %v2025_v30 = vpack.c.bf16 %v2018_v19, %v2017_v61  ;;  %v1996_v13 = vpop.xlane.xlu2 %1995  ;;  %v7610_v6 = vpop.eup %7609  ;;  %v1673_v25 = vmul.f32 %v7608_v14, %v8919_v4  ;;  %v2322_v4 = vmul.f32 1.442695, %v2311_v41  ;;  %v6650_v19 = vld [vmem:[#allocation2 + $0x30] sm:$0xf]  ;;  %v6658_v14 = vld [vmem:[#allocation2 + $0x4] sm:$0xf]  ;;  %v2314_v48 = vsub.f32 %v10669_v5, %v9043_v8 }
 0x3a4   :  { %7611 = vrcp.f32 %v1996_v13  ;;  %v1672_v52 = vmul.f32 %v7610_v6, %v8913_v47  ;;  %v7328_v13 = vld [vmem:[#allocation2 + $0xc] sm:$0xf0]  ;;  %v6654_v6 = vld [vmem:[#allocation2 + $0x48] sm:$0xf]  ;;  %v10671_v8 = vld [vmem:[#allocation14_spill] sm:$0xff] }
 0x3a5   :  { %7613 = vrcp.f32 %v1993_v17 }
 0x3a6   :  { %7615 = vpow2.f32 %v2667_v27  ;;  %v1679_v7 = vpack.c.bf16 %v1673_v25, %v1672_v52  ;;  %v6659_v27 = vor.u32 %v7328_v13, %v6658_v14 }
 0x3a7   :  { %7617 = vpow2.f32 %v2663_v1  ;;  %v1652_v11 = vpop.xlane.xlu1 %1651  ;;  %v7327_v1 = vld [vmem:[#allocation2 + $0x50] sm:$0xf0] }
 0x3a8   :  { %v1655_v3 = vpop.xlane.xlu0 %1654  ;;  %7619 = vrcp.f32 %v1652_v11  ;;  %v6655_v25 = vor.u32 %v7327_v1, %v6654_v6 }
 0x3a9   :  { %7621 = vrcp.f32 %v1655_v3 }
 0x3aa   :  { %v7612_v51 = vpop.eup %7611  ;;  %7623 = vpow2.f32 %v2318_v63  ;;  %v2673_v63 = vmul.f32 1.442695, %v2660_v16 }
 0x3ab   :  { %6524 = vmatmul.msk.bf16.vlgmr.msra.gmra.mxu3 %vm588_vm1, %v2025_v30  ;;  %v7614_v22 = vpop.eup %7613  ;;  %v2020_v0 = vmul.f32 %v7612_v51, %v8935_v42  ;;  %7625 = vpow2.f32 %v2322_v4  ;;  %v6651_v30 = vor.u32 %v7326_v18, %v6650_v19  ;;  %v9120_v12 = vpop.permute.xlu2 %2745  ;;  %v2658_v51 = vsub.f32 %v8796_v39, %v8996_v23  ;;  %v10668_v4 = vld [vmem:[#allocation21_spill] sm:$0xff]  ;;  %v10670_v23 = vld [vmem:[#allocation16_spill] sm:$0xff]  ;;  %v10672_v19 = vld [vmem:[#allocation15_spill] sm:$0xff] }
 0x3ac   :  { %v9086_v15 = vpop.eup %7615  ;;  %v2019_v9 = vmul.f32 %v7614_v22, %v8929_v36  ;;  %7627 = vpow2.f32 %v2320_v10  ;;  %v2665_v36 = vmul.f32 1.442695, %v2656_v28  ;;  %v2659_v18 = vsub.f32 %v10672_v19, %v8999_v29  ;;  %v6746_v29 = vld [vmem:[#allocation2 + $0xb0] sm:$0xf] }
 0x3ad   :  { %v9089_v47 = vpop.eup %7617  ;;  %v2685_v55 = vsel %vm588_vm1, %v9086_v15, 0.0 }
 0x3ae   :  { %v7620_v57 = vpop.eup %7619  ;;  %v2679_v53 = vsel %vm588_vm1, %v9089_v47, 0.0  ;;  %v2026_v21 = vpack.c.bf16 %v2020_v0, %v2019_v9  ;;  %7629 = vpow2.f32 %v2665_v36  ;;  %v2669_v9 = vmul.f32 1.442695, %v2658_v51 }
 0x3af   :  { %v7622_v42 = vpop.eup %7621  ;;  %v1674_v31 = vmul.f32 %v7620_v57, %v8945_v62  ;;  %7631 = vrcp.f32 %v9072_v60  ;;  %v2328_v57 = vmul.f32 1.442695, %v2314_v48  ;;  %v2312_v36 = vsub.f32 %v10671_v8, %v8988_v56  ;;  %v6666_v48 = vld [vmem:[#allocation2 + $0x34] sm:$0xf] }
 0x3b0   :  { %v9099_v35 = vpop.eup %7623  ;;  %v1675_v50 = vmul.f32 %v7622_v42, %v8947_v58 }
 0x3b1   :  { %v9101_v54 = vpop.eup %7625  ;;  %v2335_v17 = vsel %vm588_vm1, %v9099_v35, 0.0 }
 0x3b2   :  { %v9105_v40 = vpop.eup %7627  ;;  %v2341_v37 = vsel %vm588_vm1, %v9101_v54, 0.0  ;;  %v1680_v20 = vpack.c.bf16 %v1675_v50, %v1674_v31 }
 0x3b3   :  { %6469 = vmatmul.msk.bf16.gmra.mxu1 %vm588_vm1, %v1679_v7  ;;  %v2338_v61 = vsel %vm588_vm1, %v9105_v40, 0.0 }
 0x3b4   :  { %v9114_v62 = vpop.eup %7629 }
 0x3b5   :  { %v2682_v58 = vsel %vm588_vm1, %v9114_v62, 0.0  ;;  %v7632_v11 = vpop.eup %7631 }
 0x3b6   :  { %v2021_v22 = vmul.f32 %v7632_v11, %v10668_v4  ;;  %v7329_v4 = vld [vmem:[#allocation2 + $0x24] sm:$0xf0] }
 0x3b8   :  { %2686 = vadd.xlane.f32.xlu0 %v2685_v55  ;;  %v2313_v55 = vsub.f32 %v10670_v23, %v9011_v24 }
 0x3ba   :  { %2680 = vadd.xlane.f32.xlu2 %v2679_v53  ;;  %v9123_v41 = vpop.permute.xlu0 %2743  ;;  %v2326_v50 = vmul.f32 1.442695, %v2313_v55 }
 0x3bb   :  { %6525 = vmatmul.msk.bf16.gmra.mxu3 %vm588_vm1, %v2026_v21 }
 0x3be   :  { %v2748_v46 = vpop.permute.xlu1 %2747 }
 0x3c0   :  { %2342 = vadd.xlane.f32.xlu0 %v2341_v37 }
 0x3c1   :  { %2336 = vadd.xlane.f32.xlu1 %v2335_v17 }
 0x3c2   :  { %2339 = vadd.xlane.f32.xlu2 %v2338_v61 }
 0x3c3   :  { %6470 = vmatmul.msk.bf16.gmra.mxu1 %vm588_vm1, %v1680_v20 }
 0x3c9   :  { %2683 = vadd.xlane.f32.xlu1 %v2682_v58 }
 0x3d4   :  { %2893 = vrot.lane.b32.xlu0 %v6651_v30, %s8042_s6 }
 0x3da   :  { %2917 = vrot.lane.b32.xlu2 %v6659_v27, %s8042_s6  ;;  %v2671_v27 = vmul.f32 1.442695, %v2659_v18  ;;  %v10674_v18 = vld [vmem:[#allocation19_spill] sm:$0xff] }
 0x3e2   :  { %2895 = vrot.lane.b32.xlu1 %v6655_v25, %s8042_s6 }
 0x3e4   :  { %v1658_v43 = vpop.xlane.xlu2 %1657 }
 0x3e5   :  { %v2008_v3 = vpop.xlane.xlu0 %2007 }
 0x3e9   :  { %v2002_v52 = vpop.xlane.xlu1 %2001 }
 0x3ea   :  { %7633 = vrcp.f32 %v2002_v52  ;;  %v6742_v52 = vld [vmem:[#allocation2 + $0x98] sm:$0xf] }
 0x3eb   :  { %7635 = vrcp.f32 %v1658_v43  ;;  %v7346_v43 = vld [vmem:[#allocation2 + $0xa0] sm:$0xf0] }
 0x3ec   :  { %v2005_v45 = vpop.xlane.xlu2 %2004  ;;  %v6743_v11 = vor.u32 %v7346_v43, %v6742_v52 }
 0x3f0   :  { %v7634_v7 = vpop.eup %7633 }
 0x3f1   :  { %v2022_v10 = vmul.f32 %v7634_v7, %v9018_v44  ;;  %v1661_v0 = vpop.xlane.xlu1 %1660  ;;  %v7636_v28 = vpop.eup %7635  ;;  %v7345_v7 = vld [vmem:[#allocation2 + $0x88] sm:$0xf0] }
 0x3f2   :  { %7637 = vrcp.f32 %v1661_v0  ;;  %v9137_v44 = vpop.xlane.xlu0 %2333  ;;  %v1676_v53 = vmul.f32 %v7636_v28, %v9005_v59  ;;  %v2324_v59 = vmul.f32 1.442695, %v2312_v36 }
 0x3f3   :  { %v2027_v60 = vpack.c.bf16 %v2022_v10, %v2021_v22  ;;  %7639 = vpow2.f32 %v2673_v63  ;;  %v6662_v63 = vld [vmem:[#allocation2 + $0x1c] sm:$0xf]  ;;  %v6734_v22 = vld [vmem:[#allocation2 + $0x68] sm:$0xf]  ;;  %v7344_v10 = vld [vmem:[#allocation2 + $0x70] sm:$0xf0] }
 0x3f4   :  { %7641 = vrcp.f32 %v2005_v45  ;;  %v6735_v0 = vor.u32 %v7344_v10, %v6734_v22  ;;  %v7330_v45 = vld [vmem:[#allocation2 + $0x3c] sm:$0xf0]  ;;  %v9179_v23 = vpop.permute.xlu2 %2891 }
 0x3f5   :  { %6526 = vmatmul.msk.bf16.gmra.mxu3 %vm588_vm1, %v2027_v60  ;;  %7643 = vpow2.f32 %v2669_v9  ;;  %v6670_v60 = vld [vmem:[#allocation2 + $0x4c] sm:$0xf]  ;;  %v7331_v9 = vld [vmem:[#allocation2 + $0x54] sm:$0xf0]  ;;  %v6667_v28 = vor.u32 %v7330_v45, %v6666_v48 }
 0x3f6   :  { %7645 = vrcp.f32 %v2008_v3  ;;  %v6738_v3 = vld [vmem:[#allocation2 + $0x80] sm:$0xf]  ;;  %v6671_v5 = vor.u32 %v7331_v9, %v6670_v60 }
 0x3f7   :  { %7647 = vpow2.f32 %v2328_v57  ;;  %v6739_v51 = vor.u32 %v7345_v7, %v6738_v3 }
 0x3f8   :  { %v7638_v39 = vpop.eup %7637  ;;  %7649 = vpow2.f32 %v2326_v50 }
 0x3f9   :  { %v1677_v21 = vmul.f32 %v7638_v39, %v9034_v26  ;;  %v9141_v42 = vpop.eup %7639  ;;  %7651 = vpow2.f32 %v2324_v59 }
 0x3fa   :  { %v7642_v37 = vpop.eup %7641  ;;  %v2694_v24 = vsel %vm588_vm1, %v9141_v42, 0.0  ;;  %7653 = vpow2.f32 %v2671_v27 }
 0x3fb   :  { %v1681_v31 = vpack.c.bf16 %v1677_v21, %v1676_v53  ;;  %v9148_v61 = vpop.eup %7643  ;;  %v2023_v26 = vmul.f32 %v7642_v37, %v9020_v49  ;;  %7655 = vrcp.f32 %v9137_v44  ;;  %v10673_v21 = vld [vmem:[#allocation18_spill] sm:$0xff] }
 0x3fc   :  { %v7646_v17 = vpop.eup %7645  ;;  %v2688_v56 = vsel %vm588_vm1, %v9148_v61, 0.0  ;;  %v2661_v8 = vsub.f32 %v10673_v21, %v9048_v34 }
 0x3fd   :  { %6471 = vmatmul.msk.bf16.gmra.mxu1 %vm588_vm1, %v1681_v31  ;;  %v9153_v58 = vpop.eup %7647  ;;  %v2024_v30 = vmul.f32 %v7646_v17, %v9009_v33  ;;  %v7347_v33 = vld [vmem:[#allocation2 + $0xb8] sm:$0xf0] }
 0x3fe   :  { %2695 = vadd.xlane.f32.xlu0 %v2694_v24  ;;  %v2350_v14 = vsel %vm588_vm1, %v9153_v58, 0.0  ;;  %v9160_v49 = vpop.eup %7649  ;;  %v2675_v50 = vmul.f32 1.442695, %v2661_v8 }
 0x3ff   :  { %v2028_v13 = vpack.c.bf16 %v2024_v30, %v2023_v26  ;;  %v9163_v6 = vpop.eup %7651  ;;  %v2347_v1 = vsel %vm588_vm1, %v9160_v49, 0.0 }
 0x400   :  { %v2750_v20 = vpop.permute.xlu0 %2749  ;;  %v2344_v25 = vsel %vm588_vm1, %v9163_v6, 0.0  ;;  %v9171_v16 = vpop.eup %7653 }
 0x401   :  { %2771 = vmatpush.bf16.msrb.mxu3 %v2750_v20  ;;  %v7656_v36 = vpop.eup %7655 }
 0x402   :  { %v2364_v24 = vmul.f32 %v7656_v36, %v9026_v2  ;;  %v2315_v2 = vsub.f32 %v10674_v18, %v9046_v38 }
 0x403   :  { %2689 = vadd.xlane.f32.xlu2 %v2688_v56 }
 0x404   :  { %v2330_v27 = vmul.f32 1.442695, %v2315_v2 }
 0x405   :  { %2772 = vmatpush.bf16.msrb.mxu3 %v2748_v46  ;;  %v6747_v46 = vor.u32 %v7347_v33, %v6746_v29 }
 0x406   :  { %2351 = vadd.xlane.f32.xlu0 %v2350_v14  ;;  %6527 = vmatmul.msk.bf16.gmra.mxu3 %vm588_vm1, %v2028_v13 }
 0x409   :  { %2773 = vmatpush.bf16.msrb.mxu3 %v9120_v12  ;;  %v2691_v12 = vsel %vm588_vm1, %v9171_v16, 0.0  ;;  %v9177_v39 = vpop.permute.xlu1 %2889 }
 0x40b   :  { %2348 = vadd.xlane.f32.xlu2 %v2347_v1 }
 0x40c   :  { %2345 = vadd.xlane.f32.xlu1 %v2344_v25 }
 0x40d   :  { %2774 = vmatpush.bf16.msrb.mxu3 %v9123_v41  ;;  %v6663_v41 = vor.u32 %v7329_v4, %v6662_v63 }
 0x411   :  { %3441 = vmatpush.bf16.msra.mxu3 %v6747_v46 }
 0x414   :  { %2692 = vadd.xlane.f32.xlu1 %v2691_v12 }
 0x415   :  { %3442 = vmatpush.bf16.msra.mxu3 %v6743_v11 }
 0x419   :  { %3443 = vmatpush.bf16.msra.mxu3 %v6739_v51 }
 0x41a   :  { %2919 = vrot.lane.b32.xlu0 %v6663_v41, %s8042_s6 }
 0x41d   :  { %3444 = vmatpush.bf16.msra.mxu3 %v6735_v0 }
 0x423   :  { %2923 = vrot.lane.b32.xlu2 %v6671_v5, %s8042_s6 }
 0x42b   :  { %v2687_v55 = vpop.xlane.xlu0 %2686 }
 0x42d   :  { %2921 = vrot.lane.b32.xlu1 %v6667_v28, %s8042_s6  ;;  %v2681_v53 = vpop.xlane.xlu2 %2680 }
 0x433   :  { %v2343_v17 = vpop.xlane.xlu0 %2342 }
 0x434   :  { %v2337_v57 = vpop.xlane.xlu1 %2336 }
 0x435   :  { %7657 = vrcp.f32 %v2337_v57  ;;  %v2340_v26 = vpop.xlane.xlu2 %2339 }
 0x436   :  { %7659 = vrcp.f32 %v2681_v53 }
 0x43b   :  { %v7658_v31 = vpop.eup %7657 }
 0x43c   :  { %v2684_v37 = vpop.xlane.xlu1 %2683  ;;  %v2365_v59 = vmul.f32 %v7658_v31, %v9099_v35  ;;  %v7660_v20 = vpop.eup %7659 }
 0x43d   :  { %7661 = vrcp.f32 %v2684_v37  ;;  %v2711_v56 = vmul.f32 %v7660_v20, %v9089_v47 }
 0x43e   :  { %v2372_v44 = vpack.c.bf16 %v2365_v59, %v2364_v24  ;;  %7663 = vpow2.f32 %v2675_v50 }
 0x43f   :  { %7665 = vrcp.f32 %v2343_v17 }
 0x440   :  { %6580 = vmatmul.msk.bf16.vlgmr.msrb.gmra.mxu1 %vm588_vm1, %v2372_v44  ;;  %7667 = vrcp.f32 %v2340_v26 }
 0x441   :  { %7669 = vpow2.f32 %v2330_v27 }
 0x443   :  { %v7662_v34 = vpop.eup %7661 }
 0x444   :  { %v2712_v19 = vmul.f32 %v7662_v34, %v9114_v62  ;;  %v9192_v30 = vpop.eup %7663  ;;  %v10675_v62 = vld [vmem:[#allocation20_spill] sm:$0xff] }
 0x445   :  { %v7666_v13 = vpop.eup %7665  ;;  %v2697_v1 = vsel %vm588_vm1, %v9192_v30, 0.0  ;;  %v2662_v38 = vsub.f32 %v10675_v62, %v9052_v32 }
 0x446   :  { %v2719_v35 = vpack.c.bf16 %v2712_v19, %v2711_v56  ;;  %v7668_v14 = vpop.eup %7667  ;;  %v2367_v29 = vmul.f32 %v7666_v13, %v9101_v54  ;;  %v2894_v7 = vpop.permute.xlu0 %2893 }
 0x447   :  { %v2366_v47 = vmul.f32 %v7668_v14, %v9105_v40  ;;  %v2677_v25 = vmul.f32 1.442695, %v2662_v38  ;;  %v7670_v46 = vpop.eup %7669  ;;  %v2918_v40 = vpop.permute.xlu2 %2917 }
 0x448   :  { %6636 = vmatmul.msk.bf16.vlgmr.msrb.gmra.mxu3 %vm588_vm1, %v2719_v35  ;;  %v2353_v52 = vsel %vm588_vm1, %v7670_v46, 0.0  ;;  %v2938_v50 = vsel %vm534_vm0, %v2918_v40, 0  ;;  %v9244_v40 = vpop.f32.mrf.mxu3 }
 0x449   :  { %v2373_v33 = vpack.c.bf16 %v2367_v29, %v2366_v47  ;;  %7671 = vpow2.f32 %v2677_v25 }
 0x44a   :  { %7673 = vrcp.f32 %v2687_v55 }
 0x44c   :  { %2698 = vadd.xlane.f32.xlu2 %v2697_v1 }
 0x44f   :  { %v9203_v43 = vpop.eup %7671 }
 0x450   :  { %6581 = vmatmul.msk.bf16.gmra.mxu1 %vm588_vm1, %v2373_v33  ;;  %v2700_v54 = vsel %vm588_vm1, %v9203_v43, 0.0  ;;  %v7674_v3 = vpop.eup %7673 }
 0x451   :  { %v2713_v51 = vmul.f32 %v7674_v3, %v9086_v15 }
 0x454   :  { %v2896_v32 = vpop.permute.xlu1 %2895 }
 0x457   :  { %2354 = vadd.xlane.f32.xlu1 %v2353_v52 }
 0x45f   :  { %2701 = vadd.xlane.f32.xlu1 %v2700_v54 }
 0x471   :  { %v2696_v41 = vpop.xlane.xlu0 %2695 }
 0x476   :  { %v2690_v11 = vpop.xlane.xlu2 %2689 }
 0x477   :  { %7675 = vrcp.f32 %v2690_v11 }
 0x479   :  { %v2352_v8 = vpop.xlane.xlu0 %2351 }
 0x47d   :  { %v7676_v12 = vpop.eup %7675 }
 0x47e   :  { %v2714_v63 = vmul.f32 %v7676_v12, %v9148_v61  ;;  %v2349_v4 = vpop.xlane.xlu2 %2348 }
 0x47f   :  { %7677 = vrcp.f32 %v2349_v4  ;;  %v2346_v22 = vpop.xlane.xlu1 %2345 }
 0x480   :  { %v2720_v10 = vpack.c.bf16 %v2714_v63, %v2713_v51  ;;  %7679 = vrcp.f32 %v2346_v22  ;;  %v1390_v22 = vpop.f32.mrf.mxu3 }
 0x481   :  { %7681 = vrcp.f32 %v2696_v41 }
 0x482   :  { %6637 = vmatmul.msk.bf16.gmra.mxu3 %vm588_vm1, %v2720_v10 }
 0x485   :  { %v7678_v0 = vpop.eup %7677 }
 0x486   :  { %v2924_v60 = vpop.permute.xlu2 %2923  ;;  %v7680_v9 = vpop.eup %7679  ;;  %v2369_v48 = vmul.f32 %v7678_v0, %v9160_v49 }
 0x487   :  { %v2947_v5 = vsel %vm534_vm0, %v2924_v60, 0  ;;  %v2368_v15 = vmul.f32 %v7680_v9, %v9163_v6  ;;  %v2693_v61 = vpop.xlane.xlu1 %2692  ;;  %v7682_v28 = vpop.eup %7681 }
 0x488   :  { %2953 = vmatpush.bf16.xpose.msra.mxu0 %v2947_v5  ;;  %7683 = vrcp.f32 %v2693_v61  ;;  %v2716_v57 = vmul.f32 %v7682_v28, %v9141_v42  ;;  %v9260_v61 = vpop.f32.mrf.mxu3 }
 0x489   :  { %v2374_v45 = vpack.c.bf16 %v2369_v48, %v2368_v15  ;;  %7685 = vrcp.f32 %v2352_v8 }
 0x48b   :  { %6582 = vmatmul.msk.bf16.gmra.mxu1 %vm588_vm1, %v2374_v45 }
 0x48c   :  { %v2920_v6 = vpop.permute.xlu0 %2919 }
 0x48d   :  { %v2941_v31 = vsel %vm534_vm0, %v2920_v6, 0 }
 0x48e   :  { %v7684_v55 = vpop.eup %7683 }
 0x48f   :  { %v2715_v53 = vmul.f32 %v7684_v55, %v9171_v16  ;;  %v7686_v37 = vpop.eup %7685 }
 0x490   :  { %v2370_v59 = vmul.f32 %v7686_v37, %v9153_v58 }
 0x491   :  { %v2721_v21 = vpack.c.bf16 %v2716_v57, %v2715_v53 }
 0x493   :  { %6638 = vmatmul.msk.bf16.gmra.mxu3 %vm588_vm1, %v2721_v21 }
 0x49f   :  { %v2922_v36 = vpop.permute.xlu1 %2921 }
 0x4a0   :  { %v2944_v49 = vsel %vm534_vm0, %v2922_v36, 0 }
 0x4a1   :  { %2954 = vmatpush.bf16.xpose.msra.mxu0 %v2944_v49  ;;  %v9268_v49 = vpop.f32.mrf.mxu3 }
 0x4a9   :  { %2955 = vmatpush.bf16.xpose.msra.mxu0 %v2941_v31 }
 0x4b1   :  { %2956 = vmatpush.bf16.xpose.msra.mxu0 %v2938_v50 }
 0x4b8   :  { %6672 = vmatmul.msk.bf16.vlgmr.msra.gmra.mxu0 %vm534_vm0, %v9177_v39 }
 0x4bf   :  { %v2699_v16 = vpop.xlane.xlu2 %2698 }
 0x4c8   :  { %6673 = vmatmul.msk.bf16.gmra.mxu0 %vm534_vm0, %v9179_v23 }
 0x4ca   :  { %v2355_v42 = vpop.xlane.xlu1 %2354 }
 0x4cb   :  { %7687 = vrcp.f32 %v2355_v42 }
 0x4cc   :  { %7689 = vrcp.f32 %v2699_v16 }
 0x4d1   :  { %v7688_v24 = vpop.eup %7687 }
 0x4d2   :  { %v2371_v17 = vmul.f32 %v7688_v24, %v7670_v46  ;;  %v2702_v26 = vpop.xlane.xlu1 %2701  ;;  %v7690_v20 = vpop.eup %7689 }
 0x4d3   :  { %7691 = vrcp.f32 %v2702_v26  ;;  %v2717_v23 = vmul.f32 %v7690_v20, %v9192_v30  ;;  %v9242_v46 = vpop.f32.mrf.mxu1  ;;  %v1398_v24 = vpop.f32.mrf.mxu3 }
 0x4d4   :  { %v2375_v44 = vpack.c.bf16 %v2371_v17, %v2370_v59 }
 0x4d6   :  { %6583 = vmatmul.msk.bf16.gmra.mxu1 %vm588_vm1, %v2375_v44 }
 0x4d8   :  { %6674 = vmatmul.msk.bf16.gmra.mxu0 %vm534_vm0, %v2894_v7 }
 0x4d9   :  { %v7692_v39 = vpop.eup %7691 }
 0x4da   :  { %v2718_v34 = vmul.f32 %v7692_v39, %v9203_v43 }
 0x4dc   :  { %v2722_v56 = vpack.c.bf16 %v2718_v34, %v2717_v23  ;;  %v9280_v23 = vpop.f32.mrf.mxu3 }
 0x4de   :  { %6639 = vmatmul.msk.bf16.gmra.mxu3 %vm588_vm1, %v2722_v56 }
 0x4e8   :  { %6675 = vmatmul.msk.bf16.gmra.mxu0 %vm534_vm0, %v2896_v32  ;;  %v1043_v32 = vpop.f32.mrf.mxu1 }
 0x4f0   :  { %v9250_v4 = vpop.f32.mrf.mxu1 }
 0x4f8   :  { %v9258_v15 = vpop.f32.mrf.mxu1 }
 0x500   :  { %v1051_v21 = vpop.f32.mrf.mxu1 }
 0x508   :  { %v1053_v37 = vpop.f32.mrf.mxu1 }
 0x510   :  { %v9278_v39 = vpop.f32.mrf.mxu1 }
 0x535   :  { %v2958_v58 = vpop.f32.mrf.mxu0 }
 0x536   :  { %v2978_v19 = vsel %vm588_vm1, %v2958_v58, -inf }
 0x537   :  { %2979 = vmax.xlane.f32.xlu0 %v2978_v19  ;;  %v1058_v19 = vpop.f32.mrf.mxu1 }
 0x53d   :  { %v2960_v18 = vpop.f32.mrf.mxu0 }
 0x53e   :  { %v2981_v2 = vsel %vm588_vm1, %v2960_v18, -inf }
 0x53f   :  { %2982 = vmax.xlane.f32.xlu1 %v2981_v2  ;;  %v1735_v2 = vpop.f32.mrf.mxu1 }
 0x545   :  { %v2963_v35 = vpop.f32.mrf.mxu0 }
 0x546   :  { %v2984_v13 = vsel %vm588_vm1, %v2963_v35, -inf }
 0x547   :  { %2985 = vmax.xlane.f32.xlu2 %v2984_v13  ;;  %v1062_v13 = vpack.c.bf16 %v1043_v32, %v1043_v32 }
 0x54d   :  { %v2965_v30 = vpop.f32.mrf.mxu0 }
 0x54e   :  { %v2987_v14 = vsel %vm588_vm1, %v2965_v30, -inf }
 0x54f   :  { %2988 = vmax.xlane.f32.xlu0 %v2987_v14  ;;  %v1408_v14 = vpack.c.bf16 %v9244_v40, %v9244_v40  ;;  %v6678_v40 = vld [vmem:[#allocation2 + $0x8] sm:$0xf] }
 0x555   :  { %v2968_v27 = vpop.f32.mrf.mxu0 }
 0x556   :  { %v2990_v1 = vsel %vm588_vm1, %v2968_v27, -inf }
 0x557   :  { %2991 = vmax.xlane.f32.xlu1 %v2990_v1  ;;  %v1409_v1 = vpack.c.bf16 %v1390_v22, %v1390_v22  ;;  %v1412_v22 = vpack.c.bf16 %v1398_v24, %v1398_v24 }
 0x55d   :  { %v2970_v29 = vpop.f32.mrf.mxu0 }
 0x55e   :  { %v2993_v47 = vsel %vm588_vm1, %v2970_v29, -inf }
 0x55f   :  { %2994 = vmax.xlane.f32.xlu2 %v2993_v47 }
 0x565   :  { %v2973_v62 = vpop.f32.mrf.mxu0 }
 0x566   :  { %v2996_v38 = vsel %vm588_vm1, %v2973_v62, -inf }
 0x567   :  { %2997 = vmax.xlane.f32.xlu0 %v2996_v38 }
 0x56d   :  { %v9238_v33 = vpop.f32.mrf.mxu0 }
 0x56e   :  { %v2999_v25 = vsel %vm588_vm1, %v9238_v33, -inf }
 0x56f   :  { %3000 = vmax.xlane.f32.xlu1 %v2999_v25  ;;  %v1065_v25 = vpack.c.bf16 %v1051_v21, %v1051_v21 }
 0x5aa   :  { %v2980_v52 = vpop.xlane.xlu0 %2979 }
 0x5ab   :  { %v3002_v43 = vsub.f32 %v2958_v58, %v2980_v52  ;;  %v1061_v58 = vpack.c.bf16 %v9242_v46, %v9242_v46 }
 0x5ad   :  { %v3010_v54 = vmul.f32 1.442695, %v3002_v43  ;;  %v6682_v43 = vld [vmem:[#allocation2 + $0x20] sm:$0xf] }
 0x5af   :  { %7693 = vpow2.f32 %v3010_v54  ;;  %v7333_v54 = vld [vmem:[#allocation2 + $0x28] sm:$0xf0] }
 0x5b0   :  { %v6683_v32 = vor.u32 %v7333_v54, %v6682_v43 }
 0x5b2   :  { %v2983_v11 = vpop.xlane.xlu1 %2982 }
 0x5b3   :  { %v3003_v3 = vsub.f32 %v2960_v18, %v2983_v11  ;;  %v1403_v18 = vpop.f32.mrf.mxu3  ;;  %v7332_v11 = vld [vmem:[#allocation2 + $0x10] sm:$0xf0] }
 0x5b5   :  { %v9246_v7 = vpop.eup %7693  ;;  %v3012_v12 = vmul.f32 1.442695, %v3003_v3  ;;  %v6679_v3 = vor.u32 %v7332_v11, %v6678_v40 }
 0x5b6   :  { %v3026_v51 = vsel %vm588_vm1, %v9246_v7, 0.0 }
 0x5b7   :  { %7695 = vpow2.f32 %v3012_v12  ;;  %3027 = vadd.xlane.f32.xlu2 %v3026_v51 }
 0x5ba   :  { %v2986_v63 = vpop.xlane.xlu2 %2985 }
 0x5bb   :  { %v3004_v10 = vsub.f32 %v2963_v35, %v2986_v63  ;;  %v1405_v35 = vpop.f32.mrf.mxu3 }
 0x5bd   :  { %v9252_v41 = vpop.eup %7695  ;;  %v3014_v0 = vmul.f32 1.442695, %v3004_v10 }
 0x5be   :  { %v3029_v60 = vsel %vm588_vm1, %v9252_v41, 0.0 }
 0x5bf   :  { %7697 = vpow2.f32 %v3014_v0  ;;  %3030 = vadd.xlane.f32.xlu0 %v3029_v60  ;;  %v1066_v60 = vpack.c.bf16 %v1053_v37, %v1053_v37 }
 0x5c2   :  { %v2989_v9 = vpop.xlane.xlu0 %2988 }
 0x5c3   :  { %v3005_v5 = vsub.f32 %v2965_v30, %v2989_v9  ;;  %v9290_v30 = vpop.f32.mrf.mxu1  ;;  %v1068_v9 = vpack.c.bf16 %v1058_v19, %v1058_v19 }
 0x5c5   :  { %v9256_v48 = vpop.eup %7697  ;;  %v3016_v45 = vmul.f32 1.442695, %v3005_v5 }
 0x5c6   :  { %v3032_v28 = vsel %vm588_vm1, %v9256_v48, 0.0 }
 0x5c7   :  { %7699 = vpow2.f32 %v3016_v45  ;;  %3033 = vadd.xlane.f32.xlu1 %v3032_v28  ;;  %v1414_v28 = vpack.c.bf16 %v1403_v18, %v1403_v18 }
 0x5ca   :  { %v2992_v55 = vpop.xlane.xlu1 %2991 }
 0x5cb   :  { %v3006_v57 = vsub.f32 %v2968_v27, %v2992_v55  ;;  %v2082_v27 = vpop.f32.mrf.mxu3  ;;  %v1740_v38 = vpop.f32.mrf.mxu1  ;;  %v1415_v55 = vpack.c.bf16 %v1405_v35, %v1405_v35 }
 0x5cd   :  { %v9264_v53 = vpop.eup %7699  ;;  %v3018_v8 = vmul.f32 1.442695, %v3006_v57  ;;  %v1064_v57 = vpack.c.bf16 %v9258_v15, %v9258_v15  ;;  %v2102_v15 = vpack.c.bf16 %v2082_v27, %v2082_v27  ;;  %v1756_v27 = vpack.c.bf16 %v9290_v30, %v9290_v30 }
 0x5ce   :  { %v3035_v36 = vsel %vm588_vm1, %v9264_v53, 0.0 }
 0x5cf   :  { %7701 = vpow2.f32 %v3018_v8  ;;  %3036 = vadd.xlane.f32.xlu2 %v3035_v36  ;;  %v1755_v8 = vpack.c.bf16 %v1735_v2, %v1735_v2 }
 0x5d2   :  { %v2995_v6 = vpop.xlane.xlu2 %2994 }
 0x5d3   :  { %v3007_v31 = vsub.f32 %v2970_v29, %v2995_v6  ;;  %v2084_v46 = vpop.f32.mrf.mxu3  ;;  %v1742_v12 = vpop.f32.mrf.mxu1  ;;  %v1410_v6 = vpack.c.bf16 %v9260_v61, %v9260_v61 }
 0x5d4   :  { %v1758_v61 = vpack.c.bf16 %v1742_v12, %v1742_v12 }
 0x5d5   :  { %v9270_v50 = vpop.eup %7701  ;;  %v3020_v42 = vmul.f32 1.442695, %v3007_v31 }
 0x5d6   :  { %v3038_v16 = vsel %vm588_vm1, %v9270_v50, 0.0 }
 0x5d7   :  { %7703 = vpow2.f32 %v3020_v42  ;;  %3039 = vadd.xlane.f32.xlu0 %v3038_v16  ;;  %v2103_v42 = vpack.c.bf16 %v2084_v46, %v2084_v46  ;;  %v1067_v16 = vpack.c.bf16 %v9278_v39, %v9278_v39  ;;  %v7334_v39 = vld [vmem:[#allocation2 + $0x40] sm:$0xf0] }
 0x5da   :  { %v2998_v59 = vpop.xlane.xlu0 %2997 }
 0x5db   :  { %v3008_v17 = vsub.f32 %v2973_v62, %v2998_v59  ;;  %v1063_v62 = vpack.c.bf16 %v9250_v4, %v9250_v4  ;;  %v9305_v51 = vpop.f32.mrf.mxu3  ;;  %v1411_v4 = vpack.c.bf16 %v9268_v49, %v9268_v49  ;;  %v9313_v10 = vpop.f32.mrf.mxu1  ;;  %v1757_v49 = vpack.c.bf16 %v1740_v38, %v1740_v38  ;;  %v7335_v38 = vld [vmem:[#allocation2 + $0x58] sm:$0xf0] }
 0x5dd   :  { %v9274_v26 = vpop.eup %7703  ;;  %v3022_v44 = vmul.f32 1.442695, %v3008_v17  ;;  %v1413_v17 = vpack.c.bf16 %v9280_v23, %v9280_v23 }
 0x5de   :  { %v3041_v20 = vsel %vm588_vm1, %v9274_v26, 0.0 }
 0x5df   :  { %7705 = vpow2.f32 %v3022_v44  ;;  %3042 = vadd.xlane.f32.xlu1 %v3041_v20  ;;  %v6686_v20 = vld [vmem:[#allocation2 + $0x38] sm:$0xf] }
 0x5e0   :  { %v6687_v18 = vor.u32 %v7334_v39, %v6686_v20 }
 0x5e2   :  { %v3001_v29 = vpop.xlane.xlu1 %3000 }
 0x5e3   :  { %v3009_v47 = vsub.f32 %v9238_v33, %v3001_v29  ;;  %v2089_v0 = vpop.f32.mrf.mxu3  ;;  %v1747_v5 = vpop.f32.mrf.mxu1 }
 0x5e4   :  { %v1760_v59 = vpack.c.bf16 %v1747_v5, %v1747_v5  ;;  %v1759_v5 = vpack.c.bf16 %v9313_v10, %v9313_v10 }
 0x5e5   :  { %v9282_v34 = vpop.eup %7705  ;;  %v3024_v52 = vmul.f32 1.442695, %v3009_v47 }
 0x5e6   :  { %v3044_v56 = vsel %vm588_vm1, %v9282_v34, 0.0 }
 0x5e7   :  { %3045 = vadd.xlane.f32.xlu2 %v3044_v56  ;;  %7707 = vpow2.f32 %v3024_v52  ;;  %v2105_v56 = vpack.c.bf16 %v2089_v0, %v2089_v0 }
 0x5eb   :  { %1077 = vrot.lane.b32.xlu0 %v1061_v58, %s8042_s6  ;;  %v2092_v45 = vpop.f32.mrf.mxu3  ;;  %v1750_v21 = vpop.f32.mrf.mxu1 }
 0x5ec   :  { %v2106_v58 = vpack.c.bf16 %v2092_v45, %v2092_v45  ;;  %v1761_v35 = vpack.c.bf16 %v1750_v21, %v1750_v21 }
 0x5ed   :  { %v9303_v33 = vpop.eup %7707 }
 0x5ee   :  { %v3047_v63 = vsel %vm588_vm1, %v9303_v33, 0.0 }
 0x5f3   :  { %v9322_v36 = vpop.f32.mrf.mxu3  ;;  %v9329_v31 = vpop.f32.mrf.mxu1 }
 0x5f8   :  { %1079 = vrot.lane.b32.xlu1 %v1062_v13, %s8042_s6 }
 0x5fb   :  { %v2097_v37 = vpop.f32.mrf.mxu3  ;;  %v2429_v24 = vpop.f32.mrf.mxu1 }
 0x5ff   :  { %1424 = vrot.lane.b32.xlu2 %v1408_v14, %s8041_s0 }
 0x600   :  { %1426 = vrot.lane.b32.xlu1 %v1409_v1, %s8041_s0 }
 0x603   :  { %v2099_v44 = vpop.f32.mrf.mxu3  ;;  %v2431_v19 = vpop.f32.mrf.mxu1 }
 0x604   :  { %v2109_v14 = vpack.c.bf16 %v2099_v44, %v2099_v44  ;;  %v2450_v52 = vpack.c.bf16 %v2431_v19, %v2431_v19 }
 0x607   :  { %1081 = vrot.lane.b32.xlu2 %v1063_v62, %s8042_s6  ;;  %v6690_v62 = vld [vmem:[#allocation2 + $0x50] sm:$0xf] }
 0x608   :  { %1085 = vrot.lane.b32.xlu1 %v1065_v25, %s8042_s6  ;;  %v2108_v25 = vpack.c.bf16 %v2097_v37, %v2097_v37  ;;  %v6691_v43 = vor.u32 %v7335_v38, %v6690_v62  ;;  %v9396_v37 = vpop.f32.mrf.mxu2 }
 0x60b   :  { %v2776_v2 = vpop.f32.mrf.mxu3  ;;  %v2434_v1 = vpop.f32.mrf.mxu1 }
 0x60f   :  { %3092 = vrot.lane.b32.xlu2 %v6683_v32, %s8042_s6  ;;  %v2449_v32 = vpack.c.bf16 %v2429_v24, %v2429_v24 }
 0x610   :  { %3090 = vrot.lane.b32.xlu1 %v6679_v3, %s8042_s6 }
 0x613   :  { %v2778_v47 = vpop.f32.mrf.mxu3  ;;  %v2436_v40 = vpop.f32.mrf.mxu1 }
 0x615   :  { %3048 = vadd.xlane.f32.xlu0 %v3047_v63  ;;  %v2104_v63 = vpack.c.bf16 %v9305_v51, %v9305_v51 }
 0x617   :  { %1430 = vrot.lane.b32.xlu2 %v1411_v4, %s8041_s0 }
 0x618   :  { %1432 = vrot.lane.b32.xlu1 %v1412_v22, %s8041_s0 }
 0x61b   :  { %v2781_v11 = vpop.f32.mrf.mxu3  ;;  %v2439_v0 = vpop.f32.mrf.mxu1 }
 0x61c   :  { %v2798_v12 = vpack.c.bf16 %v2781_v11, %v2781_v11 }
 0x61f   :  { %1087 = vrot.lane.b32.xlu2 %v1066_v60, %s8042_s6  ;;  %v2796_v60 = vpack.c.bf16 %v2776_v2, %v2776_v2 }
 0x620   :  { %1091 = vrot.lane.b32.xlu1 %v1068_v9, %s8042_s6  ;;  %v2453_v9 = vpack.c.bf16 %v2439_v0, %v2439_v0 }
 0x627   :  { %1436 = vrot.lane.b32.xlu2 %v1414_v28, %s8041_s0  ;;  %v2452_v28 = vpack.c.bf16 %v2436_v40, %v2436_v40 }
 0x628   :  { %1438 = vrot.lane.b32.xlu1 %v1415_v55, %s8041_s0  ;;  %v2107_v55 = vpack.c.bf16 %v9322_v36, %v9322_v36 }
 0x629   :  { %1083 = vrot.lane.b32.xlu0 %v1064_v57, %s8042_s6  ;;  %v2783_v57 = vpop.f32.mrf.mxu3 }
 0x62a   :  { %v9344_v23 = vpop.xlane.xlu2 %3027 }
 0x62f   :  { %1771 = vrot.lane.b32.xlu2 %v1755_v8, %s8040_s29  ;;  %v2799_v8 = vpack.c.bf16 %v2783_v57, %v2783_v57 }
 0x630   :  { %1775 = vrot.lane.b32.xlu1 %v1757_v49, %s8040_s29  ;;  %v1762_v49 = vpack.c.bf16 %v9329_v31, %v9329_v31 }
 0x631   :  { %1428 = vrot.lane.b32.xlu0 %v1410_v6, %s8041_s0  ;;  %v2786_v19 = vpop.f32.mrf.mxu3 }
 0x632   :  { %v9346_v13 = vpop.xlane.xlu0 %3030 }
 0x633   :  { %7709 = vrcp.f32 %v9346_v13 }
 0x634   :  { %7711 = vrcp.f32 %v9344_v23 }
 0x637   :  { %2118 = vrot.lane.b32.xlu2 %v2102_v15, %s8035_s20  ;;  %v2451_v15 = vpack.c.bf16 %v2434_v1, %v2434_v1 }
 0x638   :  { %2120 = vrot.lane.b32.xlu1 %v2103_v42, %s8035_s20 }
 0x639   :  { %1089 = vrot.lane.b32.xlu0 %v1067_v16, %s8042_s6 }
 0x63a   :  { %v9360_v30 = vpop.xlane.xlu1 %3033 }
 0x63f   :  { %1777 = vrot.lane.b32.xlu2 %v1758_v61, %s8040_s29  ;;  %v2797_v61 = vpack.c.bf16 %v2778_v47, %v2778_v47 }
 0x640   :  { %1781 = vrot.lane.b32.xlu1 %v1760_v59, %s8040_s29  ;;  %v2441_v59 = vpop.f32.mrf.mxu1 }
 0x641   :  { %1434 = vrot.lane.b32.xlu0 %v1413_v17, %s8041_s0  ;;  %v9400_v17 = vpop.f32.mrf.mxu2  ;;  %v2454_v44 = vpack.c.bf16 %v2441_v59, %v2441_v59 }
 0x642   :  { %v9353_v29 = vpop.xlane.xlu2 %3036  ;;  %v3312_v20 = vsel %vm588_vm1, %v9400_v17, -inf }
 0x643   :  { %7713 = vrcp.f32 %v9353_v29 }
 0x644   :  { %7715 = vrcp.f32 %v9360_v30 }
 0x647   :  { %2124 = vrot.lane.b32.xlu2 %v2105_v56, %s8035_s20 }
 0x648   :  { %2126 = vrot.lane.b32.xlu1 %v2106_v58, %s8035_s20 }
 0x649   :  { %3094 = vrot.lane.b32.xlu0 %v6687_v18, %s8042_s6  ;;  %v2800_v18 = vpack.c.bf16 %v2786_v19, %v2786_v19 }
 0x64a   :  { %v9355_v46 = vpop.xlane.xlu0 %3039 }
 0x64f   :  { %1783 = vrot.lane.b32.xlu2 %v1761_v35, %s8040_s29 }
 0x650   :  { %2132 = vrot.lane.b32.xlu1 %v2109_v14, %s8035_s20 }
 0x651   :  { %1773 = vrot.lane.b32.xlu0 %v1756_v27, %s8040_s29  ;;  %v9411_v27 = vpop.f32.mrf.mxu2 }
 0x652   :  { %v9370_v4 = vpop.xlane.xlu1 %3042  ;;  %v3315_v1 = vsel %vm588_vm1, %v9411_v27, -inf }
 0x653   :  { %7717 = vrcp.f32 %v9370_v4 }
 0x654   :  { %7719 = vrcp.f32 %v9355_v46 }
 0x657   :  { %2130 = vrot.lane.b32.xlu2 %v2108_v25, %s8035_s20  ;;  %v2444_v25 = vpop.f32.mrf.mxu1 }
 0x658   :  { %2467 = vrot.lane.b32.xlu1 %v2450_v52, %s8039_s26  ;;  %v2788_v52 = vpop.f32.mrf.mxu3 }
 0x659   :  { %3096 = vrot.lane.b32.xlu0 %v6691_v43, %s8042_s6  ;;  %v2801_v43 = vpack.c.bf16 %v2788_v52, %v2788_v52 }
 0x65a   :  { %v9362_v54 = vpop.xlane.xlu2 %3045 }
 0x65d   :  { %v1078_v3 = vpop.permute.xlu0 %1077 }
 0x65e   :  { %1102 = vst.msk [vmem:[#allocation3] sm:$0xf] %vm1101_vm3, %v1078_v3 }
 0x65f   :  { %2465 = vrot.lane.b32.xlu2 %v2449_v32, %s8039_s26  ;;  %v2446_v3 = vpop.f32.mrf.mxu1 }
 0x660   :  { %2816 = vrot.lane.b32.xlu1 %v2798_v12, %s8037_s25  ;;  %v2456_v12 = vpack.c.bf16 %v2446_v3, %v2446_v3 }
 0x661   :  { %2122 = vrot.lane.b32.xlu0 %v2104_v63, %s8035_s20 }
 0x662   :  { %v1425_v22 = vpop.permute.xlu2 %1424 }
 0x663   :  { %1449 = vst.msk [vmem:[#allocation3] sm:$0xf] %vm1448_vm4, %v1425_v22 }
 0x667   :  { %2812 = vrot.lane.b32.xlu2 %v2796_v60, %s8037_s25  ;;  %v2455_v60 = vpack.c.bf16 %v2444_v25, %v2444_v25 }
 0x668   :  { %2473 = vrot.lane.b32.xlu1 %v2453_v9, %s8039_s26 }
 0x669   :  { %1779 = vrot.lane.b32.xlu0 %v1759_v5, %s8040_s29 }
 0x66a   :  { %v1080_v51 = vpop.permute.xlu1 %1079  ;;  %v1082_v45 = vpop.permute.xlu2 %1081 }
 0x66b   :  { %1103 = vst.msk [vmem:[#allocation3 + $0x4] sm:$0xf] %vm1101_vm3, %v1080_v51  ;;  %v2791_v51 = vpop.f32.mrf.mxu3 }
 0x66c   :  { %1104 = vst.msk [vmem:[#allocation3 + $0x8] sm:$0xf] %vm1101_vm3, %v1082_v45 }
 0x66f   :  { %2471 = vrot.lane.b32.xlu2 %v2452_v28, %s8039_s26  ;;  %v2802_v28 = vpack.c.bf16 %v2791_v51, %v2791_v51 }
 0x671   :  { %2128 = vrot.lane.b32.xlu0 %v2107_v55, %s8035_s20 }
 0x672   :  { %v1427_v10 = vpop.permute.xlu1 %1426  ;;  %v9384_v21 = vpop.permute.xlu2 %3092 }
 0x673   :  { %1450 = vst.msk [vmem:[#allocation3 + $0x4] sm:$0xf] %vm1448_vm4, %v1427_v10  ;;  %v3309_v10 = vsel %vm588_vm1, %v9396_v37, -inf  ;;  %v2793_v23 = vpop.f32.mrf.mxu3 }
 0x677   :  { %2818 = vrot.lane.b32.xlu2 %v2799_v8, %s8037_s25 }
 0x679   :  { %1785 = vrot.lane.b32.xlu0 %v1762_v49, %s8040_s29  ;;  %v9437_v49 = vpop.f32.mrf.mxu2 }
 0x67a   :  { %v1086_v6 = vpop.permute.xlu1 %1085  ;;  %v1431_v36 = vpop.permute.xlu2 %1430 }
 0x67b   :  { %1106 = vst.msk [vmem:[#allocation3 + $0x10] sm:$0xf] %vm1101_vm3, %v1086_v6 }
 0x681   :  { %2469 = vrot.lane.b32.xlu0 %v2451_v15, %s8039_s26  ;;  %v3318_v15 = vsel %vm588_vm1, %v9437_v49, -inf  ;;  %v9451_v19 = vpop.f32.mrf.mxu2 }
 0x682   :  { %v9393_v42 = vpop.permute.xlu1 %3090  ;;  %v1088_v16 = vpop.permute.xlu2 %1087 }
 0x683   :  { %1107 = vst.msk [vmem:[#allocation3 + $0x14] sm:$0xf] %vm1101_vm3, %v1088_v16 }
 0x688   :  { %v9405_v58 = vpop.xlane.xlu0 %3048 }
 0x689   :  { %2814 = vrot.lane.b32.xlu0 %v2797_v61, %s8037_s25  ;;  %v7710_v61 = vpop.eup %7709  ;;  %7721 = vrcp.f32 %v9405_v58 }
 0x68a   :  { %v1433_v31 = vpop.permute.xlu1 %1432  ;;  %v1437_v24 = vpop.permute.xlu2 %1436  ;;  %7723 = vrcp.f32 %v9362_v54 }
 0x68b   :  { %1453 = vst.msk [vmem:[#allocation3 + $0x10] sm:$0xf] %vm1448_vm4, %v1433_v31 }
 0x691   :  { %2475 = vrot.lane.b32.xlu0 %v2454_v44, %s8039_s26  ;;  %v7712_v44 = vpop.eup %7711 }
 0x692   :  { %v1092_v39 = vpop.permute.xlu1 %1091  ;;  %v1772_v56 = vpop.permute.xlu2 %1771  ;;  %3313 = vmax.xlane.f32.xlu1 %v3312_v20  ;;  %v3059_v20 = vmul.f32 %v7710_v61, %v9252_v41  ;;  %v3058_v13 = vmul.f32 %v7712_v44, %v9246_v7 }
 0x693   :  { %1109 = vst.msk [vmem:[#allocation3 + $0x1c] sm:$0xf] %vm1101_vm3, %v1092_v39  ;;  %v7714_v7 = vpop.eup %7713 }
 0x694   :  { %1796 = vst.msk [vmem:[#allocation3] sm:$0xf] %vm1795_vm5, %v1772_v56  ;;  %v3066_v39 = vpack.c.bf16 %v3059_v20, %v3058_v13  ;;  %v3061_v29 = vmul.f32 %v7714_v7, %v9264_v53 }
 0x699   :  { %2820 = vrot.lane.b32.xlu0 %v2800_v18, %s8037_s25 }
 0x69a   :  { %v1439_v2 = vpop.permute.xlu1 %1438  ;;  %v2119_v35 = vpop.permute.xlu2 %2118 }
 0x69b   :  { %1456 = vst.msk [vmem:[#allocation3 + $0x1c] sm:$0xf] %vm1448_vm4, %v1439_v2  ;;  %v1084_v14 = vpop.permute.xlu0 %1083  ;;  %v7716_v2 = vpop.eup %7715 }
 0x69c   :  { %2143 = vst.msk [vmem:[#allocation3] sm:$0xf] %vm2142_vm6, %v2119_v35  ;;  %v9462_v35 = vpop.f32.mrf.mxu2 }
 0x69d   :  { %1105 = vst.msk [vmem:[#allocation3 + $0xc] sm:$0xf] %vm1101_vm3, %v1084_v14  ;;  %v3060_v14 = vmul.f32 %v7716_v2, %v9256_v48  ;;  %v6782_v2 = vld [vmem:[#allocation2 + $0xac] sm:$0xf] }
 0x69e   :  { %1452 = vst.msk [vmem:[#allocation3 + $0xc] sm:$0xf] %vm1448_vm4, %v1431_v36 }
 0x69f   :  { %v3067_v30 = vpack.c.bf16 %v3061_v29, %v3060_v14  ;;  %v7355_v29 = vld [vmem:[#allocation2 + $0xb4] sm:$0xf0] }
 0x6a0   :  { %3316 = vmax.xlane.f32.xlu2 %v3315_v1  ;;  %v3324_v1 = vsel %vm588_vm1, %v9462_v35, -inf }
 0x6a2   :  { %v1776_v47 = vpop.permute.xlu1 %1775  ;;  %v1778_v62 = vpop.permute.xlu2 %1777 }
 0x6a3   :  { %1799 = vst.msk [vmem:[#allocation3 + $0xc] sm:$0xf] %vm1795_vm5, %v1778_v62  ;;  %v1429_v38 = vpop.permute.xlu0 %1428  ;;  %v7718_v62 = vpop.eup %7717 }
 0x6a4   :  { %1451 = vst.msk [vmem:[#allocation3 + $0x8] sm:$0xf] %vm1448_vm4, %v1429_v38  ;;  %v7720_v38 = vpop.eup %7719  ;;  %v3063_v48 = vmul.f32 %v7718_v62, %v9274_v26 }
 0x6a5   :  { %1798 = vst.msk [vmem:[#allocation3 + $0x8] sm:$0xf] %vm1795_vm5, %v1776_v47  ;;  %v3062_v25 = vmul.f32 %v7720_v38, %v9270_v50  ;;  %v7722_v46 = vpop.eup %7721  ;;  %v7352_v38 = vld [vmem:[#allocation2 + $0x6c] sm:$0xf0] }
 0x6a6   :  { %v3065_v26 = vmul.f32 %v7722_v46, %v9303_v33  ;;  %v7348_v46 = vld [vmem:[#allocation2 + $0x68] sm:$0xf0] }
 0x6a7   :  { %v3068_v52 = vpack.c.bf16 %v3063_v48, %v3062_v25 }
 0x6aa   :  { %v2121_v40 = vpop.permute.xlu1 %2120  ;;  %v2125_v11 = vpop.permute.xlu2 %2124 }
 0x6ab   :  { %2146 = vst.msk [vmem:[#allocation3 + $0xc] sm:$0xf] %vm2142_vm6, %v2125_v11  ;;  %v1090_v32 = vpop.permute.xlu0 %1089  ;;  %2822 = vrot.lane.b32.xlu1 %v2801_v43, %s8037_s25 }
 0x6ac   :  { %1108 = vst.msk [vmem:[#allocation3 + $0x18] sm:$0xf] %vm1101_vm3, %v1090_v32 }
 0x6ad   :  { %1455 = vst.msk [vmem:[#allocation3 + $0x18] sm:$0xf] %vm1448_vm4, %v1437_v24 }
 0x6b2   :  { %v1782_v63 = vpop.permute.xlu1 %1781  ;;  %v1784_v22 = vpop.permute.xlu2 %1783 }
 0x6b3   :  { %1802 = vst.msk [vmem:[#allocation3 + $0x18] sm:$0xf] %vm1795_vm5, %v1784_v22  ;;  %v1435_v0 = vpop.permute.xlu0 %1434  ;;  %2479 = vrot.lane.b32.xlu1 %v2456_v12, %s8039_s26 }
 0x6b4   :  { %1454 = vst.msk [vmem:[#allocation3 + $0x14] sm:$0xf] %vm1448_vm4, %v1435_v0 }
 0x6b5   :  { %1801 = vst.msk [vmem:[#allocation3 + $0x14] sm:$0xf] %vm1795_vm5, %v1782_v63 }
 0x6b8   :  { %2477 = vrot.lane.b32.xlu2 %v2455_v60, %s8039_s26 }
 0x6ba   :  { %v2127_v9 = vpop.permute.xlu1 %2126  ;;  %v2131_v5 = vpop.permute.xlu2 %2130 }
 0x6bb   :  { %2149 = vst.msk [vmem:[#allocation3 + $0x18] sm:$0xf] %vm2142_vm6, %v2131_v5  ;;  %v3095_v45 = vpop.permute.xlu0 %3094 }
 0x6c0   :  { %2824 = vrot.lane.b32.xlu2 %v2802_v28, %s8037_s25 }
 0x6c2   :  { %v2133_v55 = vpop.permute.xlu1 %2132  ;;  %v2466_v57 = vpop.permute.xlu2 %2465 }
 0x6c3   :  { %2490 = vst.msk [vmem:[#allocation3] sm:$0xf] %vm2489_vm7, %v2466_v57  ;;  %v1774_v8 = vpop.permute.xlu0 %1773  ;;  %3310 = vmax.xlane.f32.xlu0 %v3309_v10  ;;  %v9497_v10 = vpop.f32.mrf.mxu2 }
 0x6c4   :  { %1797 = vst.msk [vmem:[#allocation3 + $0x4] sm:$0xf] %vm1795_vm5, %v1774_v8 }
 0x6c5   :  { %2144 = vst.msk [vmem:[#allocation3 + $0x4] sm:$0xf] %vm2142_vm6, %v2121_v40  ;;  %v7724_v40 = vpop.eup %7723 }
 0x6c6   :  { %v3064_v11 = vmul.f32 %v7724_v40, %v9282_v34 }
 0x6c8   :  { %v3069_v50 = vpack.c.bf16 %v3065_v26, %v3064_v11  ;;  %v6758_v26 = vld [vmem:[#allocation2 + $0x78] sm:$0xf]  ;;  %v7349_v11 = vld [vmem:[#allocation2 + $0x80] sm:$0xf0] }
 0x6ca   :  { %v2468_v6 = vpop.permute.xlu1 %2467  ;;  %v2813_v36 = vpop.permute.xlu2 %2812 }
 0x6cb   :  { %2491 = vst.msk [vmem:[#allocation3 + $0x4] sm:$0xf] %vm2489_vm7, %v2468_v6  ;;  %v3097_v16 = vpop.permute.xlu0 %3096  ;;  %3319 = vmax.xlane.f32.xlu0 %v3318_v15  ;;  %v3321_v6 = vsel %vm588_vm1, %v9451_v19, -inf  ;;  %v9504_v61 = vpop.f32.mrf.mxu2 }
 0x6cc   :  { %2837 = vst.msk [vmem:[#allocation3] sm:$0xf] %vm2836_vm8, %v2813_v36  ;;  %3118 = vmatpush.bf16.msra.mxu1 %v3097_v16 }
 0x6d0   :  { %3119 = vmatpush.bf16.msra.mxu1 %v3095_v45 }
 0x6d2   :  { %v2472_v31 = vpop.permute.xlu2 %2471  ;;  %v2817_v24 = vpop.permute.xlu1 %2816 }
 0x6d3   :  { %2493 = vst.msk [vmem:[#allocation3 + $0xc] sm:$0xf] %vm2489_vm7, %v2472_v31  ;;  %v2123_v59 = vpop.permute.xlu0 %2122 }
 0x6d4   :  { %2145 = vst.msk [vmem:[#allocation3 + $0x8] sm:$0xf] %vm2142_vm6, %v2123_v59  ;;  %3120 = vmatpush.bf16.msra.mxu1 %v9384_v21  ;;  %v2803_v21 = vpack.c.bf16 %v2793_v23, %v2793_v23 }
 0x6d8   :  { %3121 = vmatpush.bf16.msra.mxu1 %v9393_v42 }
 0x6da   :  { %v2819_v56 = vpop.permute.xlu2 %2818  ;;  %v2474_v41 = vpop.permute.xlu1 %2473 }
 0x6db   :  { %2840 = vst.msk [vmem:[#allocation3 + $0xc] sm:$0xf] %vm2836_vm8, %v2819_v56  ;;  %v1780_v18 = vpop.permute.xlu0 %1779  ;;  %6692 = vmatmul.msk.bf16.vlgmr.msra.gmra.mxu1 %vm588_vm1, %v3066_v39 }
 0x6dc   :  { %1800 = vst.msk [vmem:[#allocation3 + $0x10] sm:$0xf] %vm1795_vm5, %v1780_v18 }
 0x6dd   :  { %2147 = vst.msk [vmem:[#allocation3 + $0x10] sm:$0xf] %vm2142_vm6, %v2127_v9 }
 0x6de   :  { %2494 = vst.msk [vmem:[#allocation3 + $0x10] sm:$0xf] %vm2489_vm7, %v2474_v41 }
 0x6df   :  { %2826 = vrot.lane.b32.xlu0 %v2803_v21, %s8037_s25 }
 0x6e3   :  { %v2129_v42 = vpop.permute.xlu0 %2128 }
 0x6e4   :  { %2148 = vst.msk [vmem:[#allocation3 + $0x14] sm:$0xf] %vm2142_vm6, %v2129_v42 }
 0x6e9   :  { %3325 = vmax.xlane.f32.xlu2 %v3324_v1  ;;  %v6783_v1 = vor.u32 %v7355_v29, %v6782_v2 }
 0x6eb   :  { %v1786_v47 = vpop.permute.xlu0 %1785  ;;  %6693 = vmatmul.msk.bf16.gmra.mxu1 %vm588_vm1, %v3067_v30  ;;  %v6778_v30 = vld [vmem:[#allocation2 + $0x94] sm:$0xf] }
 0x6ec   :  { %1803 = vst.msk [vmem:[#allocation3 + $0x1c] sm:$0xf] %vm1795_vm5, %v1786_v47  ;;  %v7354_v47 = vld [vmem:[#allocation2 + $0x9c] sm:$0xf0] }
 0x6ed   :  { %2150 = vst.msk [vmem:[#allocation3 + $0x1c] sm:$0xf] %vm2142_vm6, %v2133_v55  ;;  %v6779_v62 = vor.u32 %v7354_v47, %v6778_v30 }
 0x6f3   :  { %v2470_v53 = vpop.permute.xlu0 %2469 }
 0x6f4   :  { %2492 = vst.msk [vmem:[#allocation3 + $0x8] sm:$0xf] %vm2489_vm7, %v2470_v53  ;;  %v6770_v53 = vld [vmem:[#allocation2 + $0x64] sm:$0xf] }
 0x6f5   :  { %2839 = vst.msk [vmem:[#allocation3 + $0x8] sm:$0xf] %vm2836_vm8, %v2817_v24 }
 0x6fb   :  { %v2815_v43 = vpop.permute.xlu0 %2814  ;;  %6694 = vmatmul.msk.bf16.gmra.mxu1 %vm588_vm1, %v3068_v52  ;;  %v6771_v52 = vor.u32 %v7352_v38, %v6770_v53 }
 0x6fc   :  { %2838 = vst.msk [vmem:[#allocation3 + $0x4] sm:$0xf] %vm2836_vm8, %v2815_v43  ;;  %v6754_v43 = vld [vmem:[#allocation2 + $0x60] sm:$0xf] }
 0x6fd   :  { %v6755_v40 = vor.u32 %v7348_v46, %v6754_v43  ;;  %v6946_v43 = vld [vmem:[#allocation2 + $0x94] sm:$0xf]  ;;  %v7390_v46 = vld [vmem:[#allocation2 + $0x9c] sm:$0xf0] }
 0x703   :  { %v2476_v4 = vpop.permute.xlu0 %2475 }
 0x704   :  { %2495 = vst.msk [vmem:[#allocation3 + $0x14] sm:$0xf] %vm2489_vm7, %v2476_v4 }
 0x705   :  { %v3314_v3 = vpop.xlane.xlu1 %3313 }
 0x706   :  { %v3334_v31 = vsub.f32 %v9400_v17, %v3314_v3  ;;  %v3327_v17 = vsel %vm588_vm1, %v9497_v10, -inf  ;;  %v6834_v3 = vld [vmem:[#allocation2 + $0x94] sm:$0xf] }
 0x708   :  { %v3343_v24 = vmul.f32 1.442695, %v3334_v31  ;;  %v6814_v31 = vld [vmem:[#allocation2 + $0x78] sm:$0xf] }
 0x70b   :  { %v2821_v32 = vpop.permute.xlu0 %2820  ;;  %6695 = vmatmul.msk.bf16.gmra.mxu1 %vm588_vm1, %v3069_v50  ;;  %v6759_v50 = vor.u32 %v7349_v11, %v6758_v26  ;;  %v6947_v11 = vor.u32 %v7390_v46, %v6946_v43 }
 0x70c   :  { %2841 = vst.msk [vmem:[#allocation3 + $0x10] sm:$0xf] %vm2836_vm8, %v2821_v32 }
 0x713   :  { %v9486_v58 = vpop.xlane.xlu2 %3316 }
 0x714   :  { %v3335_v25 = vsub.f32 %v9411_v27, %v9486_v58 }
 0x716   :  { %v3345_v4 = vmul.f32 1.442695, %v3335_v25  ;;  %v7353_v25 = vld [vmem:[#allocation2 + $0x84] sm:$0xf0] }
 0x71b   :  { %v2478_v12 = vpop.permute.xlu2 %2477 }
 0x71c   :  { %2496 = vst.msk [vmem:[#allocation3 + $0x18] sm:$0xf] %vm2489_vm7, %v2478_v12  ;;  %v7366_v12 = vld [vmem:[#allocation2 + $0x9c] sm:$0xf0] }
 0x71d   :  { %v2823_v54 = vpop.permute.xlu1 %2822 }
 0x71e   :  { %2842 = vst.msk [vmem:[#allocation3 + $0x14] sm:$0xf] %vm2836_vm8, %v2823_v54  ;;  %v6835_v54 = vor.u32 %v7366_v12, %v6834_v3  ;;  %v7389_v3 = vld [vmem:[#allocation2 + $0x84] sm:$0xf0] }
 0x723   :  { %v2825_v63 = vpop.permute.xlu2 %2824 }
 0x724   :  { %2843 = vst.msk [vmem:[#allocation3 + $0x18] sm:$0xf] %vm2836_vm8, %v2825_v63  ;;  %v6894_v63 = vld [vmem:[#allocation2 + $0xac] sm:$0xf] }
 0x725   :  { %v2480_v33 = vpop.permute.xlu1 %2479 }
 0x726   :  { %2497 = vst.msk [vmem:[#allocation3 + $0x1c] sm:$0xf] %vm2489_vm7, %v2480_v33  ;;  %v7379_v33 = vld [vmem:[#allocation2 + $0xb4] sm:$0xf0] }
 0x736   :  { %v3311_v34 = vpop.xlane.xlu0 %3310 }
 0x737   :  { %v3333_v55 = vsub.f32 %v9396_v37, %v3311_v34 }
 0x739   :  { %v3341_v57 = vmul.f32 1.442695, %v3333_v55 }
 0x73b   :  { %7725 = vpow2.f32 %v3341_v57  ;;  %v6886_v57 = vld [vmem:[#allocation2 + $0x7c] sm:$0xf] }
 0x73e   :  { %v3320_v22 = vpop.xlane.xlu0 %3319 }
 0x73f   :  { %v3336_v8 = vsub.f32 %v9437_v49, %v3320_v22  ;;  %v3330_v49 = vsel %vm588_vm1, %v9504_v61, -inf  ;;  %v6895_v22 = vor.u32 %v7379_v33, %v6894_v63 }
 0x741   :  { %v3347_v36 = vmul.f32 1.442695, %v3336_v8  ;;  %v9502_v16 = vpop.eup %7725  ;;  %v7377_v8 = vld [vmem:[#allocation2 + $0x84] sm:$0xf0] }
 0x742   :  { %v3357_v37 = vsel %vm588_vm1, %v9502_v16, 0.0 }
 0x743   :  { %7727 = vpow2.f32 %v3347_v36  ;;  %v6887_v36 = vor.u32 %v7377_v8, %v6886_v57  ;;  %v7401_v57 = vld [vmem:[#allocation2 + $0x84] sm:$0xf0]  ;;  %v6826_v8 = vld [vmem:[#allocation2 + $0x64] sm:$0xf] }
 0x744   :  { %7729 = vpow2.f32 %v3343_v24 }
 0x745   :  { %7731 = vpow2.f32 %v3345_v4  ;;  %v6838_v4 = vld [vmem:[#allocation2 + $0xac] sm:$0xf] }
 0x749   :  { %v9511_v59 = vpop.eup %7727 }
 0x74a   :  { %v3366_v20 = vsel %vm588_vm1, %v9511_v59, 0.0  ;;  %v9517_v13 = vpop.eup %7729 }
 0x74b   :  { %v3360_v23 = vsel %vm588_vm1, %v9517_v13, 0.0  ;;  %v9534_v32 = vpop.eup %7731 }
 0x74c   :  { %v3363_v58 = vsel %vm588_vm1, %v9534_v32, 0.0 }
 0x751   :  { %v2827_v0 = vpop.permute.xlu0 %2826 }
 0x752   :  { %2844 = vst.msk [vmem:[#allocation3 + $0x1c] sm:$0xf] %vm2836_vm8, %v2827_v0 }
 0x758   :  { %v3123_v60 = vpop.f32.mrf.mxu1 }
 0x759   :  { %v3143_v9 = vpack.c.bf16 %v3123_v60, %v3123_v60 }
 0x75b   :  { %3159 = vrot.lane.b32.xlu1 %v3143_v9, %s8038_s2  ;;  %v6890_v9 = vld [vmem:[#allocation2 + $0x94] sm:$0xf] }
 0x75c   :  { %v3326_v14 = vpop.xlane.xlu2 %3325 }
 0x75d   :  { %v3338_v34 = vsub.f32 %v9462_v35, %v3326_v14 }
 0x75f   :  { %v3351_v0 = vmul.f32 1.442695, %v3338_v34 }
 0x760   :  { %v3125_v5 = vpop.f32.mrf.mxu1 }
 0x761   :  { %v3144_v51 = vpack.c.bf16 %v3125_v5, %v3125_v5  ;;  %v7378_v5 = vld [vmem:[#allocation2 + $0x9c] sm:$0xf0]  ;;  %7733 = vpow2.f32 %v3351_v0 }
 0x763   :  { %3161 = vrot.lane.b32.xlu2 %v3144_v51, %s8038_s2  ;;  %v6891_v51 = vor.u32 %v7378_v5, %v6890_v9  ;;  %v7388_v9 = vld [vmem:[#allocation2 + $0x6c] sm:$0xf0]  ;;  %v6830_v5 = vld [vmem:[#allocation2 + $0x7c] sm:$0xf] }
 0x768   :  { %v3128_v45 = vpop.f32.mrf.mxu1 }
 0x769   :  { %v3145_v28 = vpack.c.bf16 %v3128_v45, %v3128_v45  ;;  %v9545_v45 = vpop.eup %7733 }
 0x76b   :  { %3163 = vrot.lane.b32.xlu0 %v3145_v28, %s8038_s2  ;;  %v3372_v28 = vsel %vm588_vm1, %v9545_v45, 0.0 }
 0x770   :  { %v3130_v15 = vpop.f32.mrf.mxu1 }
 0x771   :  { %v3146_v56 = vpack.c.bf16 %v3130_v15, %v3130_v15 }
 0x778   :  { %v3133_v44 = vpop.f32.mrf.mxu1 }
 0x779   :  { %v3147_v21 = vpack.c.bf16 %v3133_v44, %v3133_v44 }
 0x780   :  { %v3135_v39 = vpop.f32.mrf.mxu1 }
 0x781   :  { %v3148_v41 = vpack.c.bf16 %v3135_v39, %v3135_v39  ;;  %v6818_v39 = vld [vmem:[#allocation2 + $0x90] sm:$0xf] }
 0x785   :  { %3322 = vmax.xlane.f32.xlu1 %v3321_v6 }
 0x788   :  { %v9521_v18 = vpop.f32.mrf.mxu1 }
 0x789   :  { %v3149_v38 = vpack.c.bf16 %v9521_v18, %v9521_v18 }
 0x78c   :  { %3358 = vadd.xlane.f32.xlu2 %v3357_v37  ;;  %v7361_v37 = vld [vmem:[#allocation2 + $0x80] sm:$0xf0] }
 0x78d   :  { %3331 = vmax.xlane.f32.xlu1 %v3330_v49  ;;  %v6815_v44 = vor.u32 %v7361_v37, %v6814_v31  ;;  %v6978_v37 = vld [vmem:[#allocation2 + $0x60] sm:$0xf] }
 0x790   :  { %v3140_v7 = vpop.f32.mrf.mxu1 }
 0x791   :  { %v3150_v42 = vpack.c.bf16 %v3140_v7, %v3140_v7 }
 0x794   :  { %3367 = vadd.xlane.f32.xlu2 %v3366_v20 }
 0x795   :  { %3328 = vmax.xlane.f32.xlu0 %v3327_v17 }
 0x79d   :  { %3361 = vadd.xlane.f32.xlu0 %v3360_v23  ;;  %v7362_v23 = vld [vmem:[#allocation2 + $0x98] sm:$0xf0] }
 0x7a6   :  { %3165 = vrot.lane.b32.xlu1 %v3146_v56, %s8038_s2 }
 0x7ac   :  { %3167 = vrot.lane.b32.xlu2 %v3147_v21, %s8038_s2  ;;  %v6819_v21 = vor.u32 %v7362_v23, %v6818_v39  ;;  %v6766_v39 = vld [vmem:[#allocation2 + $0xa8] sm:$0xf]  ;;  %v7351_v23 = vld [vmem:[#allocation2 + $0xb0] sm:$0xf0] }
 0x7b1   :  { %3169 = vrot.lane.b32.xlu0 %v3148_v41, %s8038_s2 }
 0x7b4   :  { %3173 = vrot.lane.b32.xlu2 %v3150_v42, %s8038_s2 }
 0x7b9   :  { %3560 = vrot.lane.b32.xlu0 %v6783_v1, %s8038_s2 }
 0x7bc   :  { %3558 = vrot.lane.b32.xlu2 %v6779_v62, %s8038_s2 }
 0x7bd   :  { %v3162_v48 = vpop.permute.xlu2 %3161 }
 0x7be   :  { %3185 = vst.msk [vmem:[#allocation3 + $0x4] sm:$0xf] %vm3183_vm9, %v3162_v48  ;;  %v6774_v48 = vld [vmem:[#allocation2 + $0x7c] sm:$0xf] }
 0x7c1   :  { %3554 = vrot.lane.b32.xlu0 %v6771_v52, %s8038_s2 }
 0x7c4   :  { %3526 = vrot.lane.b32.xlu2 %v6755_v40, %s8038_s2  ;;  %v7367_v40 = vld [vmem:[#allocation2 + $0xb4] sm:$0xf0] }
 0x7cc   :  { %3528 = vrot.lane.b32.xlu2 %v6759_v50, %s8038_s2 }
 0x7cd   :  { %v3160_v27 = vpop.permute.xlu1 %3159 }
 0x7ce   :  { %3184 = vst.msk [vmem:[#allocation3] sm:$0xf] %vm3183_vm9, %v3160_v27  ;;  %v6839_v27 = vor.u32 %v7367_v40, %v6838_v4  ;;  %v7054_v40 = vld [vmem:[#allocation2 + $0x7c] sm:$0xf] }
 0x7d0   :  { %3364 = vadd.xlane.f32.xlu1 %v3363_v58  ;;  %v6942_v58 = vld [vmem:[#allocation2 + $0x7c] sm:$0xf] }
 0x7d1   :  { %v6943_v63 = vor.u32 %v7389_v3, %v6942_v58 }
 0x7d4   :  { %3904 = vrot.lane.b32.xlu2 %v6835_v54, %s8037_s25  ;;  %v7350_v54 = vld [vmem:[#allocation2 + $0x98] sm:$0xf0] }
 0x7dc   :  { %4252 = vrot.lane.b32.xlu2 %v6895_v22, %s8039_s26 }
 0x7dd   :  { %v3164_v60 = vpop.permute.xlu0 %3163 }
 0x7de   :  { %3186 = vst.msk [vmem:[#allocation3 + $0x8] sm:$0xf] %vm3183_vm9, %v3164_v60  ;;  %v6938_v60 = vld [vmem:[#allocation2 + $0x64] sm:$0xf] }
 0x7e4   :  { %4250 = vrot.lane.b32.xlu2 %v6891_v51, %s8039_s26  ;;  %v7365_v51 = vld [vmem:[#allocation2 + $0x84] sm:$0xf0] }
 0x7eb   :  { %3373 = vadd.xlane.f32.xlu0 %v3372_v28  ;;  %v6939_v28 = vor.u32 %v7388_v9, %v6938_v60  ;;  %v6990_v9 = vld [vmem:[#allocation2 + $0xa8] sm:$0xf] }
 0x7f8   :  { %v3323_v35 = vpop.xlane.xlu1 %3322 }
 0x7f9   :  { %v3337_v55 = vsub.f32 %v9451_v19, %v3323_v35  ;;  %v6831_v35 = vor.u32 %v7365_v51, %v6830_v5  ;;  %v7399_v5 = vld [vmem:[#allocation2 + $0xb0] sm:$0xf0]  ;;  %v6950_v51 = vld [vmem:[#allocation2 + $0xac] sm:$0xf] }
 0x7fb   :  { %v3349_v6 = vmul.f32 1.442695, %v3337_v55  ;;  %v6998_v55 = vld [vmem:[#allocation2 + $0x7c] sm:$0xf] }
 0x7fd   :  { %7735 = vpow2.f32 %v3349_v6  ;;  %v7364_v6 = vld [vmem:[#allocation2 + $0x6c] sm:$0xf0] }
 0x7fe   :  { %v6827_v31 = vor.u32 %v7364_v6, %v6826_v8 }
 0x7ff   :  { %v3359_v15 = vpop.xlane.xlu2 %3358  ;;  %4248 = vrot.lane.b32.xlu0 %v6887_v36, %s8039_s26 }
 0x800   :  { %v3332_v7 = vpop.xlane.xlu1 %3331 }
 0x803   :  { %v9551_v49 = vpop.eup %7735 }
 0x804   :  { %v3369_v24 = vsel %vm588_vm1, %v9551_v49, 0.0 }
 0x805   :  { %3370 = vadd.xlane.f32.xlu1 %v3369_v24 }
 0x807   :  { %v9555_v20 = vpop.xlane.xlu2 %3367  ;;  %3874 = vrot.lane.b32.xlu0 %v6815_v44, %s8037_s25  ;;  %v7396_v44 = vld [vmem:[#allocation2 + $0x68] sm:$0xf0] }
 0x808   :  { %v3329_v19 = vpop.xlane.xlu0 %3328 }
 0x809   :  { %v3339_v17 = vsub.f32 %v9497_v10, %v3329_v19  ;;  %v6922_v19 = vld [vmem:[#allocation2 + $0x60] sm:$0xf] }
 0x80b   :  { %v3353_v56 = vmul.f32 1.442695, %v3339_v17  ;;  %v7384_v17 = vld [vmem:[#allocation2 + $0x68] sm:$0xf0] }
 0x80d   :  { %7737 = vpow2.f32 %v3353_v56 }
 0x80e   :  { %7739 = vrcp.f32 %v3359_v15  ;;  %v6999_v15 = vor.u32 %v7401_v57, %v6998_v55 }
 0x80f   :  { %v3168_v41 = vpop.permute.xlu2 %3167  ;;  %3876 = vrot.lane.b32.xlu0 %v6819_v21, %s8037_s25 }
 0x810   :  { %3188 = vst.msk [vmem:[#allocation3 + $0x10] sm:$0xf] %vm3183_vm9, %v3168_v41  ;;  %v3362_v42 = vpop.xlane.xlu0 %3361  ;;  %v6979_v41 = vor.u32 %v7396_v44, %v6978_v37  ;;  %v7374_v37 = vld [vmem:[#allocation2 + $0x98] sm:$0xf0] }
 0x811   :  { %7741 = vrcp.f32 %v3362_v42  ;;  %v6767_v42 = vor.u32 %v7351_v23, %v6766_v39 }
 0x813   :  { %v9561_v2 = vpop.eup %7737 }
 0x814   :  { %v3375_v29 = vsel %vm588_vm1, %v9561_v2, 0.0  ;;  %v7740_v10 = vpop.eup %7739 }
 0x815   :  { %3376 = vadd.xlane.f32.xlu2 %v3375_v29  ;;  %v3389_v30 = vmul.f32 %v7740_v10, %v9502_v16  ;;  %v6775_v16 = vor.u32 %v7353_v25, %v6774_v48  ;;  %v6982_v10 = vld [vmem:[#allocation2 + $0x78] sm:$0xf]  ;;  %v7414_v48 = vld [vmem:[#allocation2 + $0x9c] sm:$0xf0]  ;;  %v6986_v25 = vld [vmem:[#allocation2 + $0x90] sm:$0xf] }
 0x817   :  { %v7742_v14 = vpop.eup %7741  ;;  %v3174_v1 = vpop.permute.xlu2 %3173 }
 0x818   :  { %v3390_v47 = vmul.f32 %v7742_v14, %v9517_v13  ;;  %3191 = vst.msk [vmem:[#allocation3 + $0x1c] sm:$0xf] %vm3183_vm9, %v3174_v1  ;;  %v3166_v62 = vpop.permute.xlu1 %3165  ;;  %v3340_v13 = vsub.f32 %v9504_v61, %v3332_v7  ;;  %v6762_v61 = vld [vmem:[#allocation2 + $0x90] sm:$0xf]  ;;  %v6923_v7 = vor.u32 %v7384_v17, %v6922_v19  ;;  %v7397_v14 = vld [vmem:[#allocation2 + $0x80] sm:$0xf0] }
 0x819   :  { %3187 = vst.msk [vmem:[#allocation3 + $0xc] sm:$0xf] %vm3183_vm9, %v3166_v62  ;;  %v6763_v34 = vor.u32 %v7350_v54, %v6762_v61  ;;  %v6930_v1 = vld [vmem:[#allocation2 + $0x90] sm:$0xf]  ;;  %v6983_v62 = vor.u32 %v7397_v14, %v6982_v10  ;;  %v7050_v61 = vld [vmem:[#allocation2 + $0x64] sm:$0xf] }
 0x81a   :  { %v3397_v53 = vpack.c.bf16 %v3390_v47, %v3389_v30  ;;  %v3355_v26 = vmul.f32 1.442695, %v3340_v13  ;;  %v7386_v30 = vld [vmem:[#allocation2 + $0x98] sm:$0xf0]  ;;  %v6810_v47 = vld [vmem:[#allocation2 + $0x60] sm:$0xf] }
 0x81b   :  { %v7376_v13 = vld [vmem:[#allocation2 + $0x6c] sm:$0xf0]  ;;  %v7106_v14 = vld [vmem:[#allocation2 + $0x64] sm:$0xf] }
 0x81c   :  { %6748 = vmatmul.msk.bf16.vlgmr.msra.gmra.mxu3 %vm588_vm1, %v3397_v53  ;;  %7743 = vpow2.f32 %v3355_v26  ;;  %v6934_v26 = vld [vmem:[#allocation2 + $0xa8] sm:$0xf]  ;;  %v7412_v54 = vld [vmem:[#allocation2 + $0x6c] sm:$0xf0] }
 0x81d   :  { %7745 = vrcp.f32 %v9555_v20 }
 0x81e   :  { %3171 = vrot.lane.b32.xlu1 %v3149_v38, %s8038_s2  ;;  %v7058_v38 = vld [vmem:[#allocation2 + $0x94] sm:$0xf] }
 0x81f   :  { %v3559_v12 = vpop.permute.xlu2 %3558  ;;  %v7059_v43 = vor.u32 %v7414_v48, %v7058_v38  ;;  %v7402_v38 = vld [vmem:[#allocation2 + $0x9c] sm:$0xf0] }
 0x820   :  { %v3581_v33 = vsel %vm534_vm0, %v3559_v12, 0 }
 0x822   :  { %v9580_v22 = vpop.eup %7743 }
 0x823   :  { %v3170_v52 = vpop.permute.xlu0 %3169  ;;  %v3378_v0 = vsel %vm588_vm1, %v9580_v22, 0.0  ;;  %v7746_v24 = vpop.eup %7745 }
 0x824   :  { %3189 = vst.msk [vmem:[#allocation3 + $0x14] sm:$0xf] %vm3183_vm9, %v3170_v52  ;;  %v3392_v21 = vmul.f32 %v7746_v24, %v9511_v59  ;;  %v7360_v59 = vld [vmem:[#allocation2 + $0x68] sm:$0xf0]  ;;  %v7398_v52 = vld [vmem:[#allocation2 + $0x98] sm:$0xf0] }
 0x825   :  { %v6811_v53 = vor.u32 %v7360_v59, %v6810_v47  ;;  %v6987_v46 = vor.u32 %v7398_v52, %v6986_v25 }
 0x826   :  { %3556 = vrot.lane.b32.xlu1 %v6775_v16, %s8038_s2  ;;  %v6882_v16 = vld [vmem:[#allocation2 + $0x64] sm:$0xf] }
 0x827   :  { %v6883_v4 = vor.u32 %v7376_v13, %v6882_v16  ;;  %v9612_v8 = vpop.permute.xlu2 %3526  ;;  %v6878_v13 = vld [vmem:[#allocation2 + $0xa8] sm:$0xf] }
 0x82b   :  { %v3561_v18 = vpop.permute.xlu0 %3560 }
 0x82c   :  { %v3584_v50 = vsel %vm534_vm0, %v3561_v18, 0  ;;  %v7387_v18 = vld [vmem:[#allocation2 + $0xb0] sm:$0xf0] }
 0x82d   :  { %4596 = vrot.lane.b32.xlu2 %v6947_v11, %s8035_s20  ;;  %3590 = vmatpush.bf16.xpose.msrb.mxu0 %v3584_v50  ;;  %v7413_v11 = vld [vmem:[#allocation2 + $0x84] sm:$0xf0]  ;;  %v6866_v50 = vld [vmem:[#allocation2 + $0x60] sm:$0xf]  ;;  %v6935_v58 = vor.u32 %v7387_v18, %v6934_v26 }
 0x82e   :  { %3906 = vrot.lane.b32.xlu1 %v6839_v27, %s8037_s25  ;;  %v7372_v27 = vld [vmem:[#allocation2 + $0x68] sm:$0xf0]  ;;  %v7055_v3 = vor.u32 %v7413_v11, %v7054_v40 }
 0x82f   :  { %v6867_v12 = vor.u32 %v7372_v27, %v6866_v50 }
 0x835   :  { %4594 = vrot.lane.b32.xlu2 %v6943_v63, %s8035_s20  ;;  %3591 = vmatpush.bf16.xpose.msrb.mxu0 %v3581_v33  ;;  %v6870_v63 = vld [vmem:[#allocation2 + $0x78] sm:$0xf]  ;;  %v7373_v33 = vld [vmem:[#allocation2 + $0x80] sm:$0xf0] }
 0x836   :  { %3530 = vrot.lane.b32.xlu1 %v6763_v34, %s8038_s2  ;;  %v7051_v34 = vor.u32 %v7412_v54, %v7050_v61  ;;  %v6871_v60 = vor.u32 %v7373_v33, %v6870_v63 }
 0x839   :  { %3379 = vadd.xlane.f32.xlu0 %v3378_v0  ;;  %v9606_v0 = vpop.permute.xlu0 %3554 }
 0x83a   :  { %v3575_v27 = vsel %vm534_vm0, %v9606_v0, 0 }
 0x83d   :  { %4592 = vrot.lane.b32.xlu2 %v6939_v28, %s8035_s20  ;;  %v7391_v28 = vld [vmem:[#allocation2 + $0xb4] sm:$0xf0] }
 0x83e   :  { %3902 = vrot.lane.b32.xlu1 %v6831_v35, %s8037_s25  ;;  %v6991_v35 = vor.u32 %v7399_v5, %v6990_v9  ;;  %v6951_v57 = vor.u32 %v7391_v28, %v6950_v51  ;;  %v6926_v9 = vld [vmem:[#allocation2 + $0x78] sm:$0xf]  ;;  %v7385_v5 = vld [vmem:[#allocation2 + $0x80] sm:$0xf0] }
 0x843   :  { %v3365_v36 = vpop.xlane.xlu1 %3364 }
 0x844   :  { %7747 = vrcp.f32 %v3365_v36  ;;  %v7110_v36 = vld [vmem:[#allocation2 + $0x7c] sm:$0xf] }
 0x845   :  { %4940 = vrot.lane.b32.xlu2 %v6999_v15, %s8040_s29  ;;  %v7425_v15 = vld [vmem:[#allocation2 + $0x84] sm:$0xf0] }
 0x846   :  { %3900 = vrot.lane.b32.xlu1 %v6827_v31, %s8037_s25  ;;  %v6874_v31 = vld [vmem:[#allocation2 + $0x90] sm:$0xf]  ;;  %v7111_v24 = vor.u32 %v7425_v15, %v7110_v36  ;;  %v7415_v36 = vld [vmem:[#allocation2 + $0xb4] sm:$0xf0] }
 0x847   :  { %v6875_v44 = vor.u32 %v7374_v37, %v6874_v31 }
 0x84a   :  { %v7748_v56 = vpop.eup %7747 }
 0x84b   :  { %v3391_v20 = vmul.f32 %v7748_v56, %v9534_v32  ;;  %v6931_v32 = vor.u32 %v7386_v30, %v6930_v1  ;;  %v7034_v56 = vld [vmem:[#allocation2 + $0x60] sm:$0xf]  ;;  %v7424_v1 = vld [vmem:[#allocation2 + $0x6c] sm:$0xf0]  ;;  %v7363_v30 = vld [vmem:[#allocation2 + $0xb0] sm:$0xf0] }
 0x84d   :  { %4910 = vrot.lane.b32.xlu2 %v6979_v41, %s8040_s29  ;;  %4564 = vrot.lane.b32.xlu0 %v6923_v7, %s8035_s20  ;;  %v3398_v29 = vpack.c.bf16 %v3392_v21, %v3391_v20  ;;  %v7408_v21 = vld [vmem:[#allocation2 + $0x68] sm:$0xf0]  ;;  %v7403_v41 = vld [vmem:[#allocation2 + $0xb4] sm:$0xf0]  ;;  %v9618_v7 = vpop.permute.xlu2 %3528 }
 0x84e   :  { %3532 = vrot.lane.b32.xlu1 %v6767_v42, %s8038_s2  ;;  %v7006_v20 = vld [vmem:[#allocation2 + $0xac] sm:$0xf] }
 0x84f   :  { %6749 = vmatmul.msk.bf16.gmra.mxu3 %vm588_vm1, %v3398_v29  ;;  %v7035_v29 = vor.u32 %v7408_v21, %v7034_v56  ;;  %v7007_v10 = vor.u32 %v7403_v41, %v7006_v20  ;;  %v7427_v56 = vld [vmem:[#allocation2 + $0xb4] sm:$0xf0]  ;;  %v7426_v20 = vld [vmem:[#allocation2 + $0x9c] sm:$0xf0] }
 0x855   :  { %4912 = vrot.lane.b32.xlu2 %v6983_v62, %s8040_s29  ;;  %4568 = vrot.lane.b32.xlu0 %v6931_v32, %s8035_s20  ;;  %v3905_v47 = vpop.permute.xlu2 %3904 }
 0x856   :  { %3872 = vrot.lane.b32.xlu1 %v6811_v53, %s8037_s25  ;;  %v7002_v53 = vld [vmem:[#allocation2 + $0x94] sm:$0xf]  ;;  %v3927_v0 = vsel %vm534_vm0, %v3905_v47, 0 }
 0x857   :  { %v7003_v48 = vor.u32 %v7402_v38, %v7002_v53 }
 0x85d   :  { %5288 = vrot.lane.b32.xlu2 %v7059_v43, %s8041_s0  ;;  %4914 = vrot.lane.b32.xlu0 %v6987_v46, %s8040_s29  ;;  %v4253_v25 = vpop.permute.xlu2 %4252  ;;  %v7375_v43 = vld [vmem:[#allocation2 + $0xb0] sm:$0xf0] }
 0x85e   :  { %4246 = vrot.lane.b32.xlu1 %v6883_v4, %s8039_s26  ;;  %v3374_v55 = vpop.xlane.xlu0 %3373  ;;  %v6879_v4 = vor.u32 %v7375_v43, %v6878_v13 }
 0x85f   :  { %7749 = vrcp.f32 %v3374_v55 }
 0x865   :  { %4570 = vrot.lane.b32.xlu2 %v6935_v58, %s8035_s20  ;;  %5286 = vrot.lane.b32.xlu0 %v7055_v3, %s8041_s0  ;;  %v7750_v19 = vpop.eup %7749  ;;  %v4251_v26 = vpop.permute.xlu2 %4250  ;;  %v6994_v58 = vld [vmem:[#allocation2 + $0x64] sm:$0xf]  ;;  %v7400_v3 = vld [vmem:[#allocation2 + $0x6c] sm:$0xf0] }
 0x866   :  { %4218 = vrot.lane.b32.xlu1 %v6867_v12, %s8039_s26  ;;  %v3394_v39 = vmul.f32 %v7750_v19, %v9545_v45  ;;  %v6822_v45 = vld [vmem:[#allocation2 + $0xa8] sm:$0xf]  ;;  %v4276_v12 = vsel %vm534_vm0, %v4253_v25, 0  ;;  %v6995_v54 = vor.u32 %v7400_v3, %v6994_v58  ;;  %v4273_v51 = vsel %vm534_vm0, %v4251_v26, 0 }
 0x867   :  { %v6823_v59 = vor.u32 %v7363_v30, %v6822_v45 }
 0x86d   :  { %5284 = vrot.lane.b32.xlu2 %v7051_v34, %s8041_s0 }
 0x86e   :  { %4220 = vrot.lane.b32.xlu1 %v6871_v60, %s8039_s26 }
 0x871   :  { %v4249_v62 = vpop.permute.xlu0 %4248 }
 0x872   :  { %v4270_v15 = vsel %vm534_vm0, %v4249_v62, 0 }
 0x875   :  { %4916 = vrot.lane.b32.xlu2 %v6991_v35, %s8040_s29  ;;  %v6927_v35 = vor.u32 %v7385_v5, %v6926_v9 }
 0x876   :  { %4598 = vrot.lane.b32.xlu1 %v6951_v57, %s8035_s20 }
 0x878   :  { %v3371_v6 = vpop.xlane.xlu1 %3370 }
 0x879   :  { %7751 = vrcp.f32 %v3371_v6  ;;  %v9628_v46 = vpop.permute.xlu0 %3874  ;;  %v7062_v6 = vld [vmem:[#allocation2 + $0xac] sm:$0xf] }
 0x87d   :  { %5632 = vrot.lane.b32.xlu2 %v7111_v24, %s8042_s6 }
 0x87e   :  { %4222 = vrot.lane.b32.xlu1 %v6875_v44, %s8039_s26  ;;  %v7063_v44 = vor.u32 %v7415_v36, %v7062_v6 }
 0x87f   :  { %v7752_v17 = vpop.eup %7751 }
 0x880   :  { %v3393_v23 = vmul.f32 %v7752_v17, %v9551_v49  ;;  %v7107_v49 = vor.u32 %v7424_v1, %v7106_v14 }
 0x881   :  { %v9636_v61 = vpop.permute.xlu0 %3876 }
 0x882   :  { %v3399_v42 = vpack.c.bf16 %v3394_v39, %v3393_v23  ;;  %v7118_v23 = vld [vmem:[#allocation2 + $0xac] sm:$0xf] }
 0x883   :  { %v7119_v21 = vor.u32 %v7427_v56, %v7118_v23 }
 0x884   :  { %6750 = vmatmul.msk.bf16.gmra.mxu3 %vm588_vm1, %v3399_v42 }
 0x885   :  { %5256 = vrot.lane.b32.xlu2 %v7035_v29, %s8041_s0 }
 0x886   :  { %4944 = vrot.lane.b32.xlu1 %v7007_v10, %s8040_s29 }
 0x888   :  { %v3377_v33 = vpop.xlane.xlu2 %3376 }
 0x889   :  { %7753 = vrcp.f32 %v3377_v33 }
 0x88d   :  { %5630 = vrot.lane.b32.xlu2 %v7107_v49, %s8042_s6 }
 0x88e   :  { %3878 = vrot.lane.b32.xlu1 %v6823_v59, %s8037_s25 }
 0x88f   :  { %v7754_v57 = vpop.eup %7753 }
 0x890   :  { %v3172_v32 = vpop.permute.xlu1 %3171  ;;  %v3395_v37 = vmul.f32 %v7754_v57, %v9561_v2 }
 0x891   :  { %3190 = vst.msk [vmem:[#allocation3 + $0x18] sm:$0xf] %vm3183_vm9, %v3172_v32 }
 0x896   :  { %4942 = vrot.lane.b32.xlu1 %v7003_v48, %s8040_s29 }
 0x898   :  { %v3557_v52 = vpop.permute.xlu1 %3556 }
 0x899   :  { %v3578_v16 = vsel %vm534_vm0, %v3557_v52, 0 }
 0x89a   :  { %3592 = vmatpush.bf16.xpose.msrb.mxu0 %v3578_v16 }
 0x89e   :  { %4224 = vrot.lane.b32.xlu1 %v6879_v4, %s8039_s26 }
 0x89f   :  { %v3446_v40 = vpop.f32.mrf.mxu3 }
 0x8a0   :  { %v3466_v18 = vpack.c.bf16 %v3446_v40, %v3446_v40  ;;  %v3907_v11 = vpop.permute.xlu1 %3906 }
 0x8a1   :  { %v3930_v50 = vsel %vm534_vm0, %v3907_v11, 0 }
 0x8a2   :  { %3474 = vst.msk [vmem:[#allocation3 + $0x20] sm:$0xf] %vm754_vm2, %v3466_v18  ;;  %3593 = vmatpush.bf16.xpose.msrb.mxu0 %v3575_v27  ;;  %3936 = vmatpush.bf16.xpose.msrb.mxu2 %v3930_v50 }
 0x8a6   :  { %4938 = vrot.lane.b32.xlu1 %v6995_v54, %s8040_s29 }
 0x8a7   :  { %v3448_v63 = vpop.f32.mrf.mxu3 }
 0x8a8   :  { %v3467_v34 = vpack.c.bf16 %v3448_v63, %v3448_v63  ;;  %v3531_v60 = vpop.permute.xlu1 %3530 }
 0x8a9   :  { %6784 = vmatmul.msk.bf16.vlgmr.msrb.gmra.mxu0 %vm534_vm0, %v9612_v8 }
 0x8aa   :  { %4282 = vmatpush.bf16.xpose.msra.mxu0 %v4276_v12  ;;  %3475 = vst.msk [vmem:[#allocation3 + $0x24] sm:$0xf] %vm754_vm2, %v3467_v34  ;;  %3937 = vmatpush.bf16.xpose.msrb.mxu2 %v3927_v0 }
 0x8ac   :  { %v3380_v28 = vpop.xlane.xlu0 %3379 }
 0x8ad   :  { %7755 = vrcp.f32 %v3380_v28 }
 0x8ae   :  { %4566 = vrot.lane.b32.xlu1 %v6927_v35, %s8035_s20 }
 0x8b0   :  { %v3903_v55 = vpop.permute.xlu1 %3902 }
 0x8b1   :  { %v3924_v8 = vsel %vm534_vm0, %v3903_v55, 0 }
 0x8b2   :  { %4283 = vmatpush.bf16.xpose.msra.mxu0 %v4273_v51  ;;  %3938 = vmatpush.bf16.xpose.msrb.mxu2 %v3924_v8 }
 0x8b3   :  { %v7756_v31 = vpop.eup %7755 }
 0x8b4   :  { %v3396_v24 = vmul.f32 %v7756_v31, %v9580_v22  ;;  %v7114_v22 = vld [vmem:[#allocation2 + $0x94] sm:$0xf] }
 0x8b5   :  { %v7115_v41 = vor.u32 %v7426_v20, %v7114_v22 }
 0x8b6   :  { %5290 = vrot.lane.b32.xlu1 %v7063_v44, %s8041_s0  ;;  %v3400_v19 = vpack.c.bf16 %v3396_v24, %v3395_v37 }
 0x8b8   :  { %6751 = vmatmul.msk.bf16.gmra.mxu3 %vm588_vm1, %v3400_v19  ;;  %v3901_v17 = vpop.permute.xlu1 %3900 }
 0x8b9   :  { %6785 = vmatmul.msk.bf16.gmra.mxu0 %vm534_vm0, %v9618_v7  ;;  %v3921_v39 = vsel %vm534_vm0, %v3901_v17, 0  ;;  %v4597_v7 = vpop.permute.xlu2 %4596 }
 0x8ba   :  { %4284 = vmatpush.bf16.xpose.msra.mxu0 %v4270_v15  ;;  %3939 = vmatpush.bf16.xpose.msrb.mxu2 %v3921_v39  ;;  %v4619_v25 = vsel %vm534_vm0, %v4597_v7, 0 }
 0x8be   :  { %5636 = vrot.lane.b32.xlu1 %v7119_v21, %s8042_s6 }
 0x8bf   :  { %v4565_v3 = vpop.permute.xlu0 %4564 }
 0x8c0   :  { %v3533_v2 = vpop.permute.xlu1 %3532 }
 0x8c1   :  { %v4595_v45 = vpop.permute.xlu2 %4594 }
 0x8c2   :  { %v4616_v43 = vsel %vm534_vm0, %v4595_v45, 0 }
 0x8c6   :  { %5634 = vrot.lane.b32.xlu1 %v7115_v41, %s8042_s6 }
 0x8c7   :  { %v4569_v9 = vpop.permute.xlu0 %4568 }
 0x8c8   :  { %v3873_v42 = vpop.permute.xlu1 %3872 }
 0x8c9   :  { %6786 = vmatmul.msk.bf16.gmra.mxu0 %vm534_vm0, %v3531_v60  ;;  %6840 = vmatmul.msk.bf16.vlgmr.msrb.gmra.mxu2 %vm534_vm0, %v3873_v42  ;;  %v4593_v62 = vpop.permute.xlu2 %4592 }
 0x8ca   :  { %v4613_v40 = vsel %vm534_vm0, %v4593_v62, 0  ;;  %v7038_v62 = vld [vmem:[#allocation2 + $0x78] sm:$0xf] }
 0x8cf   :  { %v4915_v57 = vpop.permute.xlu0 %4914 }
 0x8d0   :  { %v4247_v29 = vpop.permute.xlu1 %4246 }
 0x8d1   :  { %v4267_v10 = vsel %vm534_vm0, %v4247_v29, 0  ;;  %v4941_v38 = vpop.permute.xlu2 %4940 }
 0x8d2   :  { %v3451_v14 = vpop.f32.mrf.mxu3  ;;  %4285 = vmatpush.bf16.xpose.msra.mxu0 %v4267_v10  ;;  %v4962_v54 = vsel %vm534_vm0, %v4941_v38, 0  ;;  %v7090_v10 = vld [vmem:[#allocation2 + $0x60] sm:$0xf]  ;;  %v7042_v38 = vld [vmem:[#allocation2 + $0x90] sm:$0xf] }
 0x8d3   :  { %v3468_v1 = vpack.c.bf16 %v3451_v14, %v3451_v14  ;;  %v7420_v14 = vld [vmem:[#allocation2 + $0x68] sm:$0xf0] }
 0x8d4   :  { %v7091_v45 = vor.u32 %v7420_v14, %v7090_v10  ;;  %v7356_v10 = vld [vmem:[#allocation2 + $0x70] sm:$0xf0] }
 0x8d5   :  { %3476 = vst.msk [vmem:[#allocation3 + $0x28] sm:$0xf] %vm754_vm2, %v3468_v1  ;;  %v7446_v14 = vld [vmem:[#allocation4 + $0x30] sm:$0xff] }
 0x8d7   :  { %v5287_v24 = vpop.permute.xlu0 %5286 }
 0x8d8   :  { %v4219_v30 = vpop.permute.xlu1 %4218  ;;  %v5308_v39 = vsel %vm534_vm0, %v5287_v24, 0 }
 0x8d9   :  { %6787 = vmatmul.msk.bf16.gmra.mxu0 %vm534_vm0, %v3533_v2  ;;  %6841 = vmatmul.msk.bf16.gmra.mxu2 %vm534_vm0, %v9628_v46  ;;  %v4911_v52 = vpop.permute.xlu2 %4910 }
 0x8da   :  { %v3453_v49 = vpop.f32.mrf.mxu3 }
 0x8db   :  { %v3469_v47 = vpack.c.bf16 %v3453_v49, %v3453_v49  ;;  %v7094_v49 = vld [vmem:[#allocation2 + $0x78] sm:$0xf] }
 0x8dd   :  { %3477 = vst.msk [vmem:[#allocation3 + $0x2c] sm:$0xf] %vm754_vm2, %v3469_v47  ;;  %v7421_v47 = vld [vmem:[#allocation2 + $0x80] sm:$0xf0] }
 0x8e0   :  { %v4221_v59 = vpop.permute.xlu1 %4220 }
 0x8e1   :  { %v4913_v46 = vpop.permute.xlu2 %4912 }
 0x8e8   :  { %v4599_v32 = vpop.permute.xlu1 %4598 }
 0x8e9   :  { %v4622_v53 = vsel %vm534_vm0, %v4599_v32, 0  ;;  %6842 = vmatmul.msk.bf16.gmra.mxu2 %vm534_vm0, %v9636_v61  ;;  %6896 = vmatmul.msk.bf16.vlgmr.msra.gmra.mxu0 %vm534_vm0, %v4219_v30  ;;  %v5289_v27 = vpop.permute.xlu2 %5288  ;;  %v7409_v32 = vld [vmem:[#allocation2 + $0x80] sm:$0xf0] }
 0x8ea   :  { %4628 = vmatpush.bf16.xpose.msra.mxu2 %v4622_v53  ;;  %v5311_v31 = vsel %vm534_vm0, %v5289_v27, 0  ;;  %v7039_v53 = vor.u32 %v7409_v32, %v7038_v62  ;;  %v7422_v27 = vld [vmem:[#allocation2 + $0x98] sm:$0xf0] }
 0x8eb   :  { %v7443_v32 = vld [vmem:[#allocation4 + $0x18] sm:$0xff] }
 0x8f0   :  { %v4223_v48 = vpop.permute.xlu1 %4222 }
 0x8f1   :  { %v4571_v63 = vpop.permute.xlu2 %4570 }
 0x8f2   :  { %4629 = vmatpush.bf16.xpose.msra.mxu2 %v4619_v25 }
 0x8f8   :  { %v4945_v16 = vpop.permute.xlu1 %4944 }
 0x8f9   :  { %v4968_v13 = vsel %vm534_vm0, %v4945_v16, 0  ;;  %6897 = vmatmul.msk.bf16.gmra.mxu0 %vm534_vm0, %v4221_v59  ;;  %v5285_v60 = vpop.permute.xlu2 %5284  ;;  %v7095_v59 = vor.u32 %v7421_v47, %v7094_v49  ;;  %v7445_v49 = vld [vmem:[#allocation4 + $0x28] sm:$0xff] }
 0x8fa   :  { %4630 = vmatpush.bf16.xpose.msra.mxu2 %v4616_v43  ;;  %4974 = vmatpush.bf16.xpose.msrb.mxu0 %v4968_v13  ;;  %v5305_v41 = vsel %vm534_vm0, %v5285_v60, 0 }
 0x900   :  { %v3879_v4 = vpop.permute.xlu1 %3878 }
 0x901   :  { %6843 = vmatmul.msk.bf16.gmra.mxu2 %vm534_vm0, %v3879_v4  ;;  %v9687_v28 = vpop.permute.xlu2 %4916 }
 0x902   :  { %4631 = vmatpush.bf16.xpose.msra.mxu2 %v4613_v40 }
 0x907   :  { %v3456_v26 = vpop.f32.mrf.mxu3 }
 0x908   :  { %v3470_v18 = vpack.c.bf16 %v3456_v26, %v3456_v26  ;;  %v4943_v11 = vpop.permute.xlu1 %4942 }
 0x909   :  { %6898 = vmatmul.msk.bf16.gmra.mxu0 %vm534_vm0, %v4223_v48  ;;  %v4965_v50 = vsel %vm534_vm0, %v4943_v11, 0  ;;  %v5633_v37 = vpop.permute.xlu2 %5632  ;;  %v7410_v48 = vld [vmem:[#allocation2 + $0x98] sm:$0xf0] }
 0x90a   :  { %3478 = vst.msk [vmem:[#allocation3 + $0x30] sm:$0xf] %vm754_vm2, %v3470_v18  ;;  %4975 = vmatpush.bf16.xpose.msrb.mxu0 %v4965_v50  ;;  %v5654_v42 = vsel %vm534_vm0, %v5633_v37, 0  ;;  %v7043_v25 = vor.u32 %v7410_v48, %v7042_v38  ;;  %v6802_v18 = vld [vmem:[#allocation2 + $0xb0] sm:$0xf] }
 0x90b   :  { %v7359_v11 = vld [vmem:[#allocation2 + $0xb8] sm:$0xf0]  ;;  %v7098_v50 = vld [vmem:[#allocation2 + $0x90] sm:$0xf] }
 0x90f   :  { %v3458_v58 = vpop.f32.mrf.mxu3 }
 0x910   :  { %v3471_v12 = vpack.c.bf16 %v3458_v58, %v3458_v58  ;;  %v4225_v61 = vpop.permute.xlu1 %4224  ;;  %v6803_v58 = vor.u32 %v7359_v11, %v6802_v18 }
 0x911   :  { %6952 = vmatmul.msk.bf16.vlgmr.msra.gmra.mxu2 %vm534_vm0, %v4565_v3  ;;  %v5257_v21 = vpop.permute.xlu2 %5256  ;;  %v7099_v3 = vor.u32 %v7422_v27, %v7098_v50 }
 0x912   :  { %3479 = vst.msk [vmem:[#allocation3 + $0x34] sm:$0xf] %vm754_vm2, %v3471_v12  ;;  %4976 = vmatpush.bf16.xpose.msrb.mxu0 %v4962_v54  ;;  %v6798_v12 = vld [vmem:[#allocation2 + $0x98] sm:$0xf] }
 0x918   :  { %v4939_v33 = vpop.permute.xlu1 %4938 }
 0x919   :  { %6899 = vmatmul.msk.bf16.gmra.mxu0 %vm534_vm0, %v4225_v61  ;;  %v4959_v34 = vsel %vm534_vm0, %v4939_v33, 0  ;;  %v5631_v1 = vpop.permute.xlu2 %5630  ;;  %v7358_v61 = vld [vmem:[#allocation2 + $0xa0] sm:$0xf0]  ;;  %v7411_v33 = vld [vmem:[#allocation2 + $0xb0] sm:$0xf0] }
 0x91a   :  { %4977 = vmatpush.bf16.xpose.msrb.mxu0 %v4959_v34  ;;  %v5651_v30 = vsel %vm534_vm0, %v5631_v1, 0  ;;  %v6799_v54 = vor.u32 %v7358_v61, %v6798_v12 }
 0x920   :  { %v4567_v0 = vpop.permute.xlu1 %4566 }
 0x921   :  { %6953 = vmatmul.msk.bf16.gmra.mxu2 %vm534_vm0, %v4567_v0 }
 0x926   :  { %v9683_v5 = vpop.f32.mrf.mxu0 }
 0x927   :  { %v3615_v51 = vsel %vm588_vm1, %v9683_v5, -inf }
 0x928   :  { %3616 = vmax.xlane.f32.xlu0 %v3615_v51  ;;  %v5291_v35 = vpop.permute.xlu1 %5290 }
 0x929   :  { %v5314_v55 = vsel %vm534_vm0, %v5291_v35, 0  ;;  %7008 = vmatmul.msk.bf16.vlgmr.msrb.gmra.mxu0 %vm534_vm0, %v4911_v52 }
 0x92a   :  { %5320 = vmatpush.bf16.xpose.msrb.mxu2 %v5314_v55 }
 0x92e   :  { %v9691_v8 = vpop.f32.mrf.mxu0 }
 0x92f   :  { %v3618_v6 = vsel %vm588_vm1, %v9691_v8, -inf }
 0x930   :  { %3619 = vmax.xlane.f32.xlu1 %v3618_v6  ;;  %v5637_v36 = vpop.permute.xlu1 %5636 }
 0x931   :  { %v5660_v15 = vsel %vm534_vm0, %v5637_v36, 0  ;;  %6954 = vmatmul.msk.bf16.gmra.mxu2 %vm534_vm0, %v4569_v9 }
 0x932   :  { %5321 = vmatpush.bf16.xpose.msrb.mxu2 %v5311_v31  ;;  %5666 = vmatpush.bf16.xpose.msra.mxu0 %v5660_v15 }
 0x936   :  { %v9698_v44 = vpop.f32.mrf.mxu0 }
 0x937   :  { %v3621_v19 = vsel %vm588_vm1, %v9698_v44, -inf }
 0x938   :  { %3622 = vmax.xlane.f32.xlu2 %v3621_v19  ;;  %v5635_v17 = vpop.permute.xlu1 %5634 }
 0x939   :  { %7009 = vmatmul.msk.bf16.gmra.mxu0 %vm534_vm0, %v4913_v46  ;;  %v5657_v23 = vsel %vm534_vm0, %v5635_v17, 0 }
 0x93a   :  { %5322 = vmatpush.bf16.xpose.msrb.mxu2 %v5308_v39  ;;  %5667 = vmatpush.bf16.xpose.msra.mxu0 %v5657_v23 }
 0x93b   :  { %v3461_v56 = vpop.f32.mrf.mxu3 }
 0x93c   :  { %v3472_v2 = vpack.c.bf16 %v3461_v56, %v3461_v56  ;;  %v6794_v56 = vld [vmem:[#allocation2 + $0x80] sm:$0xf] }
 0x93e   :  { %3480 = vst.msk [vmem:[#allocation3 + $0x38] sm:$0xf] %vm754_vm2, %v3472_v2  ;;  %v9706_v22 = vpop.f32.mrf.mxu0 }
 0x93f   :  { %v3624_v20 = vsel %vm588_vm1, %v9706_v22, -inf }
 0x940   :  { %3625 = vmax.xlane.f32.xlu0 %v3624_v20 }
 0x941   :  { %6955 = vmatmul.msk.bf16.gmra.mxu2 %vm534_vm0, %v4571_v63  ;;  %v7046_v63 = vld [vmem:[#allocation2 + $0xa8] sm:$0xf] }
 0x942   :  { %5323 = vmatpush.bf16.xpose.msrb.mxu2 %v5305_v41  ;;  %5668 = vmatpush.bf16.xpose.msra.mxu0 %v5654_v42  ;;  %v7047_v34 = vor.u32 %v7411_v33, %v7046_v63  ;;  %v7447_v42 = vld [vmem:[#allocation4 + $0x38] sm:$0xff] }
 0x943   :  { %v3463_v7 = vpop.f32.mrf.mxu3 }
 0x944   :  { %v3473_v29 = vpack.c.bf16 %v3463_v7, %v3463_v7 }
 0x946   :  { %3481 = vst.msk [vmem:[#allocation3 + $0x3c] sm:$0xf] %vm754_vm2, %v3473_v29  ;;  %v9721_v52 = vpop.f32.mrf.mxu0  ;;  %v6790_v29 = vld [vmem:[#allocation2 + $0x68] sm:$0xf] }
 0x947   :  { %v3627_v43 = vsel %vm588_vm1, %v9721_v52, -inf  ;;  %v6791_v1 = vor.u32 %v7356_v10, %v6790_v29 }
 0x949   :  { %5602 = vrot.lane.b32.xlu1 %v7091_v45, %s8042_s6  ;;  %7010 = vmatmul.msk.bf16.gmra.mxu0 %vm534_vm0, %v4915_v57  ;;  %v7102_v45 = vld [vmem:[#allocation2 + $0xa8] sm:$0xf] }
 0x94a   :  { %5669 = vmatpush.bf16.xpose.msra.mxu0 %v5651_v30  ;;  %6036 = vmatpush.bf16.msra.mxu2 %v7447_v42  ;;  %v7423_v30 = vld [vmem:[#allocation2 + $0xb0] sm:$0xf0] }
 0x94b   :  { %v7103_v47 = vor.u32 %v7423_v30, %v7102_v45 }
 0x94c   :  { %v9745_v55 = vpop.f32.mrf.mxu2 }
 0x94d   :  { %v3961_v39 = vsel %vm588_vm1, %v9745_v55, -inf }
 0x94e   :  { %v9725_v16 = vpop.f32.mrf.mxu0  ;;  %6037 = vmatpush.bf16.msra.mxu2 %v7446_v14 }
 0x94f   :  { %v3630_v40 = vsel %vm588_vm1, %v9725_v16, -inf }
 0x950   :  { %5604 = vrot.lane.b32.xlu2 %v7095_v59, %s8042_s6  ;;  %v7444_v59 = vld [vmem:[#allocation4 + $0x20] sm:$0xff] }
 0x951   :  { %7064 = vmatmul.msk.bf16.vlgmr.msrb.gmra.mxu2 %vm534_vm0, %v5257_v21  ;;  %v7357_v21 = vld [vmem:[#allocation2 + $0x88] sm:$0xf0] }
 0x952   :  { %v6795_v2 = vor.u32 %v7357_v21, %v6794_v56  ;;  %6038 = vmatpush.bf16.msra.mxu2 %v7445_v49  ;;  %v7432_v56 = vld [vmem:[#allocation3] sm:$0xff]  ;;  %v7433_v49 = vld [vmem:[#allocation3 + $0x8] sm:$0xff] }
 0x954   :  { %5258 = vrot.lane.b32.xlu0 %v7039_v53, %s8041_s0  ;;  %v9753_v31 = vpop.f32.mrf.mxu2  ;;  %v7442_v53 = vld [vmem:[#allocation4 + $0x10] sm:$0xff] }
 0x955   :  { %v3964_v24 = vsel %vm588_vm1, %v9753_v31, -inf }
 0x956   :  { %v9727_v13 = vpop.f32.mrf.mxu0  ;;  %6039 = vmatpush.bf16.msra.mxu2 %v7444_v59 }
 0x957   :  { %v3633_v26 = vsel %vm588_vm1, %v9727_v13, -inf }
 0x958   :  { %5260 = vrot.lane.b32.xlu2 %v7043_v25, %s8041_s0  ;;  %v7441_v25 = vld [vmem:[#allocation4 + $0x8] sm:$0xff] }
 0x959   :  { %7011 = vmatmul.msk.bf16.gmra.mxu0 %vm534_vm0, %v9687_v28 }
 0x95a   :  { %6040 = vmatpush.bf16.msra.mxu2 %v7443_v32 }
 0x95c   :  { %v9760_v19 = vpop.f32.mrf.mxu2 }
 0x95e   :  { %v9731_v46 = vpop.f32.mrf.mxu0  ;;  %6041 = vmatpush.bf16.msra.mxu2 %v7442_v53 }
 0x95f   :  { %v3636_v4 = vsel %vm588_vm1, %v9731_v46, -inf }
 0x962   :  { %6042 = vmatpush.bf16.msra.mxu2 %v7441_v25 }
 0x964   :  { %v9766_v20 = vpop.f32.mrf.mxu2 }
 0x966   :  { %v9778_v48 = vpop.f32.mrf.mxu0 }
 0x96c   :  { %v9770_v7 = vpop.f32.mrf.mxu2 }
 0x96d   :  { %v3973_v25 = vsel %vm588_vm1, %v9770_v7, -inf }
 0x96e   :  { %v9784_v27 = vpop.f32.mrf.mxu0 }
 0x973   :  { %3628 = vmax.xlane.f32.xlu1 %v3627_v43 }
 0x974   :  { %v9774_v62 = vpop.f32.mrf.mxu2 }
 0x975   :  { %v3976_v45 = vsel %vm588_vm1, %v9774_v62, -inf }
 0x97b   :  { %3637 = vmax.xlane.f32.xlu1 %v3636_v4  ;;  %v7440_v4 = vld [vmem:[#allocation4] sm:$0xff] }
 0x97c   :  { %6043 = vmatpush.bf16.msra.mxu2 %v7440_v4 }
 0x97e   :  { %3631 = vmax.xlane.f32.xlu0 %v3630_v40 }
 0x981   :  { %3634 = vmax.xlane.f32.xlu2 %v3633_v26 }
 0x984   :  { %v9776_v38 = vpop.f32.mrf.mxu2 }
 0x985   :  { %v3979_v4 = vsel %vm588_vm1, %v9776_v38, -inf }
 0x98c   :  { %v9781_v11 = vpop.f32.mrf.mxu2 }
 0x98d   :  { %v3982_v29 = vsel %vm588_vm1, %v9781_v11, -inf }
 0x992   :  { %3733 = vrot.lane.b32.xlu0 %v6803_v58, %s8038_s2  ;;  %v4307_v58 = vsel %vm588_vm1, %v9778_v48, -inf }
 0x994   :  { %5606 = vrot.lane.b32.xlu1 %v7099_v3, %s8042_s6  ;;  %v9792_v63 = vpop.f32.mrf.mxu2 }
 0x999   :  { %3731 = vrot.lane.b32.xlu2 %v6799_v54, %s8038_s2 }
 0x99b   :  { %v3617_v60 = vpop.xlane.xlu0 %3616 }
 0x99c   :  { %v3639_v9 = vsub.f32 %v9683_v5, %v3617_v60 }
 0x99e   :  { %v3647_v28 = vmul.f32 1.442695, %v3639_v9 }
 0x9a0   :  { %7757 = vpow2.f32 %v3647_v28 }
 0x9a1   :  { %5262 = vrot.lane.b32.xlu2 %v7047_v34, %s8041_s0  ;;  %v9797_v34 = vpop.f32.mrf.mxu0 }
 0x9a2   :  { %v4313_v42 = vsel %vm588_vm1, %v9797_v34, -inf }
 0x9a3   :  { %v3620_v0 = vpop.xlane.xlu1 %3619 }
 0x9a4   :  { %v3640_v51 = vsub.f32 %v9691_v8, %v3620_v0 }
 0x9a6   :  { %v3649_v35 = vmul.f32 1.442695, %v3640_v51  ;;  %v9747_v57 = vpop.eup %7757 }
 0x9a7   :  { %v3663_v15 = vsel %vm588_vm1, %v9747_v57, 0.0 }
 0x9a8   :  { %7759 = vpow2.f32 %v3649_v35 }
 0x9ab   :  { %v3623_v37 = vpop.xlane.xlu2 %3622 }
 0x9ac   :  { %v3641_v43 = vsub.f32 %v9698_v44, %v3623_v37 }
 0x9ae   :  { %v9749_v6 = vpop.eup %7759  ;;  %v3651_v40 = vmul.f32 1.442695, %v3641_v43 }
 0x9af   :  { %v3666_v5 = vsel %vm588_vm1, %v9749_v6, 0.0 }
 0x9b0   :  { %7761 = vpow2.f32 %v3651_v40 }
 0x9b3   :  { %v3626_v8 = vpop.xlane.xlu0 %3625  ;;  %v5605_v23 = vpop.permute.xlu2 %5604 }
 0x9b4   :  { %v3642_v50 = vsub.f32 %v9706_v22, %v3626_v8 }
 0x9b6   :  { %v3653_v3 = vmul.f32 1.442695, %v3642_v50  ;;  %v9788_v61 = vpop.eup %7761 }
 0x9b7   :  { %v3669_v22 = vsel %vm588_vm1, %v9788_v61, 0.0 }
 0x9b8   :  { %7763 = vpow2.f32 %v3653_v3 }
 0x9bb   :  { %v5603_v36 = vpop.permute.xlu1 %5602  ;;  %v5261_v41 = vpop.permute.xlu2 %5260 }
 0x9bc   :  { %3664 = vadd.xlane.f32.xlu0 %v3663_v15  ;;  %7120 = vmatmul.msk.bf16.vlgmr.msra.gmra.mxu0 %vm534_vm0, %v5603_v36  ;;  %v9808_v15 = vpop.f32.mrf.mxu2 }
 0x9be   :  { %3667 = vadd.xlane.f32.xlu1 %v3666_v5  ;;  %v9800_v51 = vpop.eup %7763  ;;  %v3967_v5 = vsel %vm588_vm1, %v9760_v19, -inf }
 0x9bf   :  { %v3672_v36 = vsel %vm588_vm1, %v9800_v51, 0.0 }
 0x9c4   :  { %v9823_v21 = vpop.f32.mrf.mxu2 }
 0x9c6   :  { %v5259_v17 = vpop.permute.xlu0 %5258  ;;  %3965 = vmax.xlane.f32.xlu1 %v3964_v24 }
 0x9c7   :  { %7065 = vmatmul.msk.bf16.gmra.mxu2 %vm534_vm0, %v5259_v17 }
 0x9ca   :  { %3962 = vmax.xlane.f32.xlu2 %v3961_v39  ;;  %v3970_v39 = vsel %vm588_vm1, %v9766_v20, -inf }
 0x9cc   :  { %7121 = vmatmul.msk.bf16.gmra.mxu0 %vm534_vm0, %v5605_v23 }
 0x9d0   :  { %3729 = vrot.lane.b32.xlu0 %v6795_v2, %s8038_s2 }
 0x9d7   :  { %7066 = vmatmul.msk.bf16.gmra.mxu2 %vm534_vm0, %v5261_v41 }
 0x9df   :  { %3727 = vrot.lane.b32.xlu1 %v6791_v1, %s8038_s2  ;;  %v9837_v1 = vpop.f32.mrf.mxu2 }
 0x9e2   :  { %5608 = vrot.lane.b32.xlu2 %v7103_v47, %s8042_s6 }
 0x9e6   :  { %v3629_v26 = vpop.xlane.xlu1 %3628 }
 0x9e7   :  { %v3643_v24 = vsub.f32 %v9721_v52, %v3629_v26  ;;  %v9845_v59 = vpop.f32.mrf.mxu2 }
 0x9e9   :  { %v3655_v2 = vmul.f32 1.442695, %v3643_v24  ;;  %v6858_v24 = vld [vmem:[#allocation2 + $0xb0] sm:$0xf] }
 0x9ee   :  { %v9790_v54 = vpop.xlane.xlu1 %3637 }
 0x9ef   :  { %v3646_v32 = vsub.f32 %v9731_v46, %v9790_v54  ;;  %v7434_v46 = vld [vmem:[#allocation3 + $0x10] sm:$0xff] }
 0x9f1   :  { %v3632_v12 = vpop.xlane.xlu0 %3631  ;;  %v3661_v43 = vmul.f32 1.442695, %v3646_v32 }
 0x9f2   :  { %v3644_v35 = vsub.f32 %v9725_v16, %v3632_v12  ;;  %v9812_v16 = vpop.f32.mrf.mxu0 }
 0x9f3   :  { %v4316_v17 = vsel %vm588_vm1, %v9812_v16, -inf }
 0x9f4   :  { %v3635_v18 = vpop.xlane.xlu2 %3634  ;;  %v3657_v8 = vmul.f32 1.442695, %v3644_v35 }
 0x9f5   :  { %v3645_v33 = vsub.f32 %v9727_v13, %v3635_v18  ;;  %v4310_v13 = vsel %vm588_vm1, %v9784_v27, -inf  ;;  %v9857_v18 = vpop.f32.mrf.mxu2 }
 0x9f7   :  { %v3659_v9 = vmul.f32 1.442695, %v3645_v33 }
 0x9f9   :  { %7765 = vpow2.f32 %v3659_v9 }
 0x9fa   :  { %4308 = vmax.xlane.f32.xlu0 %v4307_v58  ;;  %7767 = vpow2.f32 %v3657_v8  ;;  %v9833_v10 = vpop.f32.mrf.mxu0 }
 0x9fb   :  { %7769 = vpow2.f32 %v3655_v2  ;;  %v4319_v26 = vsel %vm588_vm1, %v9833_v10, -inf }
 0x9fc   :  { %v3732_v44 = vpop.permute.xlu2 %3731  ;;  %7771 = vpow2.f32 %v3661_v43 }
 0x9fd   :  { %v9864_v54 = vpop.f32.mrf.mxu2 }
 0x9ff   :  { %v9814_v37 = vpop.eup %7765 }
 0xa00   :  { %v3681_v23 = vsel %vm588_vm1, %v9814_v37, 0.0  ;;  %v9825_v41 = vpop.eup %7767 }
 0xa01   :  { %v3678_v52 = vsel %vm588_vm1, %v9825_v41, 0.0  ;;  %v9835_v14 = vpop.eup %7769 }
 0xa02   :  { %3670 = vadd.xlane.f32.xlu0 %v3669_v22  ;;  %v3675_v30 = vsel %vm588_vm1, %v9835_v14, 0.0  ;;  %v9843_v47 = vpop.f32.mrf.mxu0  ;;  %v9859_v50 = vpop.eup %7771 }
 0xa03   :  { %v4322_v53 = vsel %vm588_vm1, %v9843_v47, -inf  ;;  %v3684_v3 = vsel %vm588_vm1, %v9859_v50, 0.0 }
 0xa04   :  { %v3734_v60 = vpop.permute.xlu0 %3733  ;;  %v5263_v0 = vpop.permute.xlu2 %5262 }
 0xa05   :  { %3755 = vmatpush.bf16.msrb.mxu1 %v3734_v60  ;;  %7067 = vmatmul.msk.bf16.gmra.mxu2 %vm534_vm0, %v5263_v0 }
 0xa06   :  { %v5607_v28 = vpop.permute.xlu1 %5606 }
 0xa07   :  { %7122 = vmatmul.msk.bf16.gmra.mxu0 %vm534_vm0, %v5607_v28  ;;  %v7435_v28 = vld [vmem:[#allocation3 + $0x18] sm:$0xff] }
 0xa09   :  { %3756 = vmatpush.bf16.msrb.mxu1 %v3732_v44  ;;  %4311 = vmax.xlane.f32.xlu1 %v4310_v13 }
 0xa0a   :  { %3673 = vadd.xlane.f32.xlu0 %v3672_v36  ;;  %v9871_v36 = vpop.f32.mrf.mxu2 }
 0xa0b   :  { %3968 = vmax.xlane.f32.xlu2 %v3967_v5 }
 0xa11   :  { %4317 = vmax.xlane.f32.xlu1 %v4316_v17  ;;  %v7371_v17 = vld [vmem:[#allocation2 + $0xb8] sm:$0xf0] }
 0xa12   :  { %3971 = vmax.xlane.f32.xlu0 %v3970_v39 }
 0xa13   :  { %3682 = vadd.xlane.f32.xlu2 %v3681_v23  ;;  %v6859_v23 = vor.u32 %v7371_v17, %v6858_v24 }
 0xa15   :  { %6044 = vmatmul.bf16.vlgmr.msra.gmra.mxu2 %v7432_v56 }
 0xa19   :  { %3679 = vadd.xlane.f32.xlu1 %v3678_v52 }
 0xa1a   :  { %4314 = vmax.xlane.f32.xlu0 %v4313_v42  ;;  %v9884_v42 = vpop.f32.mrf.mxu2 }
 0xa1b   :  { %3983 = vmax.xlane.f32.xlu2 %v3982_v29 }
 0xa21   :  { %3977 = vmax.xlane.f32.xlu1 %v3976_v45 }
 0xa22   :  { %3676 = vadd.xlane.f32.xlu0 %v3675_v30  ;;  %v6914_v30 = vld [vmem:[#allocation2 + $0xb0] sm:$0xf] }
 0xa25   :  { %6049 = vmatmul.bf16.gmra.mxu2 %v7433_v49  ;;  %v7383_v49 = vld [vmem:[#allocation2 + $0xb8] sm:$0xf0] }
 0xa29   :  { %4323 = vmax.xlane.f32.xlu1 %v4322_v53 }
 0xa2a   :  { %3974 = vmax.xlane.f32.xlu0 %v3973_v25  ;;  %v6915_v25 = vor.u32 %v7383_v49, %v6914_v30  ;;  %v7381_v30 = vld [vmem:[#allocation2 + $0x88] sm:$0xf0] }
 0xa2f   :  { %v3665_v12 = vpop.xlane.xlu0 %3664 }
 0xa31   :  { %3980 = vmax.xlane.f32.xlu1 %v3979_v4  ;;  %v3668_v40 = vpop.xlane.xlu1 %3667  ;;  %v6854_v4 = vld [vmem:[#allocation2 + $0x98] sm:$0xf] }
 0xa32   :  { %4320 = vmax.xlane.f32.xlu0 %v4319_v26 }
 0xa35   :  { %6054 = vmatmul.bf16.gmra.mxu2 %v7434_v46  ;;  %v6850_v46 = vld [vmem:[#allocation2 + $0x80] sm:$0xf] }
 0xa39   :  { %v3966_v58 = vpop.xlane.xlu1 %3965 }
 0xa3a   :  { %v3986_v44 = vsub.f32 %v9753_v31, %v3966_v58  ;;  %3685 = vadd.xlane.f32.xlu0 %v3684_v3  ;;  %v7369_v58 = vld [vmem:[#allocation2 + $0x88] sm:$0xf0] }
 0xa3c   :  { %v3995_v33 = vmul.f32 1.442695, %v3986_v44 }
 0xa3d   :  { %v3963_v22 = vpop.xlane.xlu2 %3962 }
 0xa3e   :  { %7773 = vpow2.f32 %v3995_v33  ;;  %v3985_v60 = vsub.f32 %v9745_v55, %v3963_v22  ;;  %v9876_v55 = vpop.f32.mrf.mxu0  ;;  %v6910_v22 = vld [vmem:[#allocation2 + $0x98] sm:$0xf] }
 0xa3f   :  { %v4325_v56 = vsel %vm588_vm1, %v9876_v55, -inf }
 0xa40   :  { %v3993_v0 = vmul.f32 1.442695, %v3985_v60  ;;  %v7382_v60 = vld [vmem:[#allocation2 + $0xa0] sm:$0xf0] }
 0xa42   :  { %7775 = vpow2.f32 %v3993_v0  ;;  %v3730_v9 = vpop.permute.xlu0 %3729 }
 0xa43   :  { %3757 = vmatpush.bf16.msrb.mxu1 %v3730_v9  ;;  %7777 = vrcp.f32 %v3668_v40  ;;  %v6911_v9 = vor.u32 %v7382_v60, %v6910_v22 }
 0xa44   :  { %v9867_v35 = vpop.eup %7773  ;;  %7779 = vrcp.f32 %v3665_v12  ;;  %v6851_v12 = vor.u32 %v7369_v58, %v6850_v46 }
 0xa45   :  { %v5609_v13 = vpop.permute.xlu2 %5608  ;;  %6059 = vmatmul.bf16.gmra.mxu2 %v7435_v28  ;;  %v4012_v31 = vsel %vm588_vm1, %v9867_v35, 0.0 }
 0xa46   :  { %7123 = vmatmul.msk.bf16.gmra.mxu0 %vm534_vm0, %v5609_v13  ;;  %4013 = vadd.xlane.f32.xlu2 %v4012_v31  ;;  %v9887_v32 = vpop.f32.mrf.mxu0  ;;  %v6846_v31 = vld [vmem:[#allocation2 + $0x68] sm:$0xf] }
 0xa47   :  { %v4328_v43 = vsel %vm588_vm1, %v9887_v32, -inf }
 0xa48   :  { %v9874_v5 = vpop.eup %7775 }
 0xa49   :  { %v4009_v8 = vsel %vm588_vm1, %v9874_v5, 0.0  ;;  %v7778_v39 = vpop.eup %7777 }
 0xa4a   :  { %4010 = vadd.xlane.f32.xlu1 %v4009_v8  ;;  %v7780_v2 = vpop.eup %7779  ;;  %v3696_v52 = vmul.f32 %v7778_v39, %v9749_v6  ;;  %v9893_v6 = vpop.f32.mrf.mxu2  ;;  %v7368_v8 = vld [vmem:[#allocation2 + $0x70] sm:$0xf0] }
 0xa4b   :  { %v3695_v29 = vmul.f32 %v7780_v2, %v9747_v57  ;;  %v7370_v57 = vld [vmem:[#allocation2 + $0xa0] sm:$0xf0]  ;;  %v6847_v39 = vor.u32 %v7368_v8, %v6846_v31 }
 0xa4c   :  { %v6855_v40 = vor.u32 %v7370_v57, %v6854_v4 }
 0xa4d   :  { %v3703_v53 = vpack.c.bf16 %v3696_v52, %v3695_v29 }
 0xa4e   :  { %4079 = vrot.lane.b32.xlu0 %v6859_v23, %s8037_s25  ;;  %4326 = vmax.xlane.f32.xlu2 %v4325_v56  ;;  %v9937_v31 = vpop.f32.mrf.mxu0 }
 0xa51   :  { %v3728_v45 = vpop.permute.xlu1 %3727 }
 0xa52   :  { %3758 = vmatpush.bf16.msrb.mxu1 %v3728_v45  ;;  %v9895_v26 = vpop.f32.mrf.mxu2  ;;  %v6906_v45 = vld [vmem:[#allocation2 + $0x80] sm:$0xf] }
 0xa55   :  { %6804 = vmatmul.msk.bf16.vlgmr.msrb.gmra.mxu1 %vm588_vm1, %v3703_v53 }
 0xa56   :  { %4425 = vrot.lane.b32.xlu0 %v6915_v25, %s8039_s26  ;;  %4329 = vmax.xlane.f32.xlu2 %v4328_v43 }
 0xa5a   :  { %v9898_v3 = vpop.f32.mrf.mxu2 }
 0xa62   :  { %v9902_v13 = vpop.f32.mrf.mxu2 }
 0xa63   :  { %4077 = vrot.lane.b32.xlu1 %v6855_v40, %s8037_s25 }
 0xa6a   :  { %v9911_v52 = vpop.f32.mrf.mxu2 }
 0xa6d   :  { %v4309_v44 = vpop.xlane.xlu0 %4308 }
 0xa6e   :  { %v4331_v33 = vsub.f32 %v9778_v48, %v4309_v44  ;;  %4075 = vrot.lane.b32.xlu2 %v6851_v12, %s8037_s25  ;;  %v4653_v12 = vsel %vm588_vm1, %v9792_v63, -inf }
 0xa70   :  { %v4339_v0 = vmul.f32 1.442695, %v4331_v33 }
 0xa72   :  { %7781 = vpow2.f32 %v4339_v0 }
 0xa75   :  { %v3671_v28 = vpop.xlane.xlu0 %3670 }
 0xa76   :  { %4423 = vrot.lane.b32.xlu2 %v6911_v9, %s8039_s26  ;;  %7783 = vrcp.f32 %v3671_v28 }
 0xa78   :  { %v9905_v24 = vpop.eup %7781 }
 0xa79   :  { %v4355_v2 = vsel %vm588_vm1, %v9905_v24, 0.0 }
 0xa7c   :  { %v4312_v17 = vpop.xlane.xlu1 %4311  ;;  %v7784_v49 = vpop.eup %7783 }
 0xa7d   :  { %v4332_v48 = vsub.f32 %v9784_v27, %v4312_v17  ;;  %v3674_v23 = vpop.xlane.xlu0 %3673  ;;  %v6907_v27 = vor.u32 %v7381_v30, %v6906_v45  ;;  %v3697_v43 = vmul.f32 %v7784_v49, %v9788_v61 }
 0xa7e   :  { %7785 = vrcp.f32 %v3674_v23  ;;  %4073 = vrot.lane.b32.xlu2 %v6847_v39, %s8037_s25  ;;  %v3969_v29 = vpop.xlane.xlu2 %3968  ;;  %v9944_v39 = vld [vmem:[%s10639_s3] ss:$0 sm:$0xff] }
 0xa7f   :  { %v4341_v56 = vmul.f32 1.442695, %v4332_v48  ;;  %v3987_v53 = vsub.f32 %v9760_v19, %v3969_v29 }
 0xa80   :  { %4356 = vadd.xlane.f32.xlu0 %v4355_v2  ;;  %v4999_v2 = vsel %vm588_vm1, %v9937_v31, -inf }
 0xa81   :  { %7787 = vpow2.f32 %v4341_v56  ;;  %v3997_v46 = vmul.f32 1.442695, %v3987_v53 }
 0xa84   :  { %v7786_v25 = vpop.eup %7785  ;;  %v9918_v58 = vpop.xlane.xlu1 %4317 }
 0xa85   :  { %v3698_v4 = vmul.f32 %v7786_v25, %v9800_v51  ;;  %v3972_v57 = vpop.xlane.xlu0 %3971 }
 0xa86   :  { %v3988_v40 = vsub.f32 %v9766_v20, %v3972_v57  ;;  %4421 = vrot.lane.b32.xlu2 %v6907_v27, %s8039_s26  ;;  %v9952_v27 = vpop.f32.mrf.mxu0 }
 0xa87   :  { %v3704_v44 = vpack.c.bf16 %v3698_v4, %v3697_v43  ;;  %v9924_v22 = vpop.eup %7787  ;;  %v5002_v57 = vsel %vm588_vm1, %v9952_v27, -inf }
 0xa88   :  { %v3999_v33 = vmul.f32 1.442695, %v3988_v40  ;;  %v9922_v19 = vpop.f32.mrf.mxu2  ;;  %4654 = vmax.xlane.f32.xlu0 %v4653_v12  ;;  %v4358_v20 = vsel %vm588_vm1, %v9924_v22, 0.0 }
 0xa89   :  { %6805 = vmatmul.msk.bf16.gmra.mxu1 %vm588_vm1, %v3704_v44 }
 0xa8a   :  { %7789 = vpow2.f32 %v3999_v33 }
 0xa8b   :  { %7791 = vpow2.f32 %v3997_v46 }
 0xa8c   :  { %v3680_v9 = vpop.xlane.xlu1 %3679 }
 0xa8d   :  { %v4315_v61 = vpop.xlane.xlu0 %4314  ;;  %4359 = vadd.xlane.f32.xlu1 %v4358_v20  ;;  %7793 = vrcp.f32 %v3680_v9  ;;  %v6902_v20 = vld [vmem:[#allocation2 + $0x68] sm:$0xf] }
 0xa8e   :  { %v4333_v48 = vsub.f32 %v9797_v34, %v4315_v61  ;;  %v7380_v61 = vld [vmem:[#allocation2 + $0x70] sm:$0xf0] }
 0xa90   :  { %v9929_v51 = vpop.eup %7789  ;;  %v9931_v60 = vpop.f32.mrf.mxu2  ;;  %v4343_v30 = vmul.f32 1.442695, %v4333_v48 }
 0xa91   :  { %v9933_v0 = vpop.eup %7791  ;;  %v4018_v28 = vsel %vm588_vm1, %v9929_v51, 0.0 }
 0xa92   :  { %4019 = vadd.xlane.f32.xlu0 %v4018_v28  ;;  %v4015_v8 = vsel %vm588_vm1, %v9933_v0, 0.0 }
 0xa93   :  { %v7794_v29 = vpop.eup %7793 }
 0xa94   :  { %v3700_v49 = vmul.f32 %v7794_v29, %v9825_v41  ;;  %v3683_v41 = vpop.xlane.xlu2 %3682  ;;  %v3978_v9 = vpop.xlane.xlu1 %3977 }
 0xa95   :  { %v3677_v17 = vpop.xlane.xlu0 %3676  ;;  %4016 = vadd.xlane.f32.xlu1 %v4015_v8  ;;  %v6903_v8 = vor.u32 %v7380_v61, %v6902_v20 }
 0xa96   :  { %7795 = vrcp.f32 %v3677_v17  ;;  %v3990_v17 = vsub.f32 %v9774_v62, %v3978_v9 }
 0xa97   :  { %7797 = vpow2.f32 %v4343_v30 }
 0xa98   :  { %v6045_v23 = vpop.f32.mrf.mxu2  ;;  %7799 = vrcp.f32 %v3683_v41  ;;  %v9980_v41 = vpop.f32.mrf.mxu0 }
 0xa99   :  { %v6046_v56 = vadd.f32 %v9944_v39, %v6045_v23 }
 0xa9a   :  { %5000 = vmax.xlane.f32.xlu0 %v4999_v2  ;;  %v4003_v2 = vmul.f32 1.442695, %v3990_v17  ;;  %v5005_v17 = vsel %vm588_vm1, %v9980_v41, -inf }
 0xa9b   :  { %6085 = vst [vmem:[#allocation7] sm:$0xff] %v6046_v56 }
 0xa9c   :  { %v7796_v45 = vpop.eup %7795  ;;  %v9968_v56 = vpop.xlane.xlu2 %3983 }
 0xa9d   :  { %v3699_v53 = vmul.f32 %v7796_v45, %v9835_v14  ;;  %v3975_v25 = vpop.xlane.xlu0 %3974  ;;  %v9958_v46 = vpop.eup %7797  ;;  %v4659_v45 = vsel %vm588_vm1, %v9823_v21, -inf }
 0xa9e   :  { %v3989_v14 = vsub.f32 %v9770_v7, %v3975_v25  ;;  %v4361_v33 = vsel %vm588_vm1, %v9958_v46, 0.0  ;;  %v4656_v7 = vsel %vm588_vm1, %v9808_v15, -inf  ;;  %v7800_v30 = vpop.eup %7799 }
 0xa9f   :  { %v3705_v43 = vpack.c.bf16 %v3700_v49, %v3699_v53  ;;  %v3701_v49 = vmul.f32 %v7800_v30, %v9814_v37 }
 0xaa0   :  { %v6047_v34 = vpop.f32.mrf.mxu2  ;;  %v4001_v28 = vmul.f32 1.442695, %v3989_v14 }
 0xaa1   :  { %v6048_v4 = vadd.f32 %v9944_v39, %v6047_v34  ;;  %6806 = vmatmul.msk.bf16.gmra.mxu1 %vm588_vm1, %v3705_v43  ;;  %v4662_v43 = vsel %vm588_vm1, %v9837_v1, -inf }
 0xaa2   :  { %5003 = vmax.xlane.f32.xlu0 %v5002_v57 }
 0xaa3   :  { %6086 = vst [vmem:[#allocation7 + $0x8] sm:$0xff] %v6048_v4 }
 0xaa5   :  { %v4321_v40 = vpop.xlane.xlu0 %4320 }
 0xaa6   :  { %v4335_v4 = vsub.f32 %v9833_v10, %v4321_v40 }
 0xaa8   :  { %v6050_v12 = vpop.f32.mrf.mxu2 }
 0xaa9   :  { %v6051_v44 = vadd.f32 %v9944_v39, %v6050_v12 }
 0xaaa   :  { %4362 = vadd.xlane.f32.xlu0 %v4361_v33  ;;  %v4347_v33 = vmul.f32 1.442695, %v4335_v4 }
 0xaab   :  { %6087 = vst [vmem:[#allocation7 + $0x10] sm:$0xff] %v6051_v44 }
 0xaad   :  { %v3686_v48 = vpop.xlane.xlu0 %3685 }
 0xaae   :  { %7801 = vrcp.f32 %v3686_v48  ;;  %4419 = vrot.lane.b32.xlu1 %v6903_v8, %s8039_s26  ;;  %v9996_v48 = vpop.f32.mrf.mxu0 }
 0xaaf   :  { %4657 = vmax.xlane.f32.xlu2 %v4656_v7  ;;  %7803 = vpow2.f32 %v4001_v28 }
 0xab0   :  { %v6052_v23 = vpop.f32.mrf.mxu2  ;;  %7805 = vpow2.f32 %v4003_v2  ;;  %v5008_v2 = vsel %vm588_vm1, %v9996_v48, -inf }
 0xab1   :  { %v6053_v29 = vadd.f32 %v9944_v39, %v6052_v23  ;;  %7807 = vpow2.f32 %v4347_v33  ;;  %v4334_v23 = vsub.f32 %v9812_v16, %v9918_v58  ;;  %v3992_v58 = vsub.f32 %v9781_v11, %v9968_v56 }
 0xab2   :  { %4660 = vmax.xlane.f32.xlu0 %v4659_v45  ;;  %v4665_v33 = vsel %vm588_vm1, %v9845_v59, -inf }
 0xab3   :  { %6088 = vst [vmem:[#allocation7 + $0x18] sm:$0xff] %v6053_v29 }
 0xab4   :  { %v7802_v62 = vpop.eup %7801 }
 0xab5   :  { %v3702_v53 = vmul.f32 %v7802_v62, %v9859_v50  ;;  %v9975_v25 = vpop.eup %7803  ;;  %v4324_v50 = vpop.xlane.xlu1 %4323 }
 0xab6   :  { %v4021_v37 = vsel %vm588_vm1, %v9975_v25, 0.0  ;;  %v9988_v44 = vpop.eup %7805  ;;  %v4336_v10 = vsub.f32 %v9843_v47, %v4324_v50  ;;  %v10019_v11 = vpop.f32.mrf.mxu0 }
 0xab7   :  { %4663 = vmax.xlane.f32.xlu2 %v4662_v43  ;;  %v3706_v34 = vpack.c.bf16 %v3702_v53, %v3701_v49  ;;  %v4024_v40 = vsel %vm588_vm1, %v9988_v44, 0.0  ;;  %v9998_v7 = vpop.eup %7807  ;;  %v4345_v43 = vmul.f32 1.442695, %v4334_v23 }
 0xab8   :  { %v6055_v57 = vpop.f32.mrf.mxu2  ;;  %v4349_v9 = vmul.f32 1.442695, %v4336_v10  ;;  %v4367_v53 = vsel %vm588_vm1, %v9998_v7, 0.0 }
 0xab9   :  { %v6056_v14 = vadd.f32 %v9944_v39, %v6055_v57  ;;  %v9983_v12 = vpop.xlane.xlu2 %4013  ;;  %6807 = vmatmul.msk.bf16.gmra.mxu1 %vm588_vm1, %v3706_v34 }
 0xaba   :  { %4022 = vadd.xlane.f32.xlu0 %v4021_v37  ;;  %7809 = vpow2.f32 %v4349_v9 }
 0xabb   :  { %6089 = vst [vmem:[#allocation7 + $0x20] sm:$0xff] %v6056_v14  ;;  %7811 = vpow2.f32 %v4345_v43  ;;  %v4007_v14 = vmul.f32 1.442695, %v3992_v58 }
 0xabd   :  { %v3981_v47 = vpop.xlane.xlu1 %3980 }
 0xabe   :  { %v3991_v29 = vsub.f32 %v9776_v38, %v3981_v47 }
 0xabf   :  { %4025 = vadd.xlane.f32.xlu2 %v4024_v40 }
 0xac0   :  { %v6057_v20 = vpop.f32.mrf.mxu2  ;;  %v4080_v61 = vpop.permute.xlu0 %4079  ;;  %v4005_v16 = vmul.f32 1.442695, %v3991_v29 }
 0xac1   :  { %v6058_v28 = vadd.f32 %v9944_v39, %v6057_v20  ;;  %4101 = vmatpush.bf16.msrb.mxu3 %v4080_v61  ;;  %v4327_v8 = vpop.xlane.xlu2 %4326  ;;  %v10008_v34 = vpop.eup %7809 }
 0xac2   :  { %5006 = vmax.xlane.f32.xlu0 %v5005_v17  ;;  %v4370_v38 = vsel %vm588_vm1, %v10008_v34, 0.0  ;;  %7813 = vpow2.f32 %v4005_v16  ;;  %v10017_v10 = vpop.eup %7811  ;;  %v4337_v61 = vsub.f32 %v9876_v55, %v4327_v8 }
 0xac3   :  { %6090 = vst [vmem:[#allocation7 + $0x28] sm:$0xff] %v6058_v28  ;;  %7815 = vpow2.f32 %v4007_v14  ;;  %v4364_v9 = vsel %vm588_vm1, %v10017_v10, 0.0  ;;  %v6970_v14 = vld [vmem:[#allocation2 + $0xb0] sm:$0xf] }
 0xac4   :  { %v4351_v47 = vmul.f32 1.442695, %v4337_v61 }
 0xac5   :  { %v4011_v4 = vpop.xlane.xlu1 %4010 }
 0xac6   :  { %7817 = vrcp.f32 %v4011_v4  ;;  %v4671_v4 = vsel %vm588_vm1, %v9864_v54, -inf }
 0xac7   :  { %5009 = vmax.xlane.f32.xlu2 %v5008_v2  ;;  %7819 = vrcp.f32 %v9983_v12  ;;  %v10034_v2 = vpop.f32.mrf.mxu0  ;;  %v5011_v12 = vsel %vm588_vm1, %v10019_v11, -inf }
 0xac8   :  { %v6060_v45 = vpop.f32.mrf.mxu2  ;;  %v4426_v30 = vpop.permute.xlu0 %4425 }
 0xac9   :  { %v6061_v62 = vadd.f32 %v9944_v39, %v6060_v45  ;;  %v4330_v49 = vpop.xlane.xlu2 %4329  ;;  %4447 = vmatpush.bf16.msra.mxu1 %v4426_v30  ;;  %v10022_v20 = vpop.eup %7813 }
 0xaca   :  { %4368 = vadd.xlane.f32.xlu0 %v4367_v53  ;;  %v4338_v56 = vsub.f32 %v9887_v32, %v4330_v49  ;;  %v4027_v32 = vsel %vm588_vm1, %v10022_v20, 0.0  ;;  %v10032_v55 = vpop.eup %7815  ;;  %v5014_v49 = vsel %vm588_vm1, %v10034_v2, -inf }
 0xacb   :  { %6091 = vst [vmem:[#allocation7 + $0x30] sm:$0xff] %v6061_v62  ;;  %v4030_v45 = vsel %vm588_vm1, %v10032_v55, 0.0 }
 0xacc   :  { %v4353_v28 = vmul.f32 1.442695, %v4338_v56  ;;  %v7818_v8 = vpop.eup %7817 }
 0xacd   :  { %v7820_v23 = vpop.eup %7819  ;;  %v4041_v29 = vmul.f32 %v7818_v8, %v9874_v5 }
 0xace   :  { %7821 = vpow2.f32 %v4353_v28  ;;  %v4042_v30 = vmul.f32 %v7820_v23, %v9867_v35 }
 0xacf   :  { %4371 = vadd.xlane.f32.xlu2 %v4370_v38  ;;  %7823 = vpow2.f32 %v4351_v47  ;;  %v4674_v38 = vsel %vm588_vm1, %v9871_v36, -inf }
 0xad0   :  { %v6062_v57 = vpop.f32.mrf.mxu2  ;;  %v4049_v43 = vpack.c.bf16 %v4042_v30, %v4041_v29 }
 0xad1   :  { %v6063_v37 = vadd.f32 %v9944_v39, %v6062_v57  ;;  %v4076_v50 = vpop.permute.xlu2 %4075  ;;  %v4668_v39 = vsel %vm588_vm1, %v9857_v18, -inf }
 0xad2   :  { %4666 = vmax.xlane.f32.xlu0 %v4665_v33 }
 0xad3   :  { %6092 = vst [vmem:[#allocation7 + $0x38] sm:$0xff] %v6063_v37  ;;  %v7395_v37 = vld [vmem:[#allocation2 + $0xb8] sm:$0xf0] }
 0xad4   :  { %v10044_v53 = vpop.eup %7821  ;;  %v6971_v56 = vor.u32 %v7395_v37, %v6970_v14 }
 0xad5   :  { %v4078_v40 = vpop.permute.xlu1 %4077  ;;  %v10046_v16 = vpop.eup %7823  ;;  %v4376_v5 = vsel %vm588_vm1, %v10044_v53, 0.0 }
 0xad6   :  { %4102 = vmatpush.bf16.msrb.mxu3 %v4078_v40  ;;  %v4373_v35 = vsel %vm588_vm1, %v10046_v16, 0.0 }
 0xad7   :  { %4669 = vmax.xlane.f32.xlu2 %v4668_v39  ;;  %v7026_v39 = vld [vmem:[#allocation2 + $0xb0] sm:$0xf] }
 0xad8   :  { %4365 = vadd.xlane.f32.xlu1 %v4364_v9  ;;  %v7407_v9 = vld [vmem:[#allocation2 + $0xb8] sm:$0xf0] }
 0xad9   :  { %v4424_v17 = vpop.permute.xlu2 %4423 }
 0xada   :  { %4448 = vmatpush.bf16.msra.mxu1 %v4424_v17  ;;  %4028 = vadd.xlane.f32.xlu0 %v4027_v32  ;;  %v7027_v17 = vor.u32 %v7407_v9, %v7026_v39 }
 0xadb   :  { %4103 = vmatpush.bf16.msrb.mxu3 %v4076_v50 }
 0xadf   :  { %5012 = vmax.xlane.f32.xlu2 %v5011_v12 }
 0xae0   :  { %4031 = vadd.xlane.f32.xlu1 %v4030_v45 }
 0xae1   :  { %v4074_v62 = vpop.permute.xlu2 %4073 }
 0xae2   :  { %5015 = vmax.xlane.f32.xlu0 %v5014_v49  ;;  %4104 = vmatpush.bf16.msrb.mxu3 %v4074_v62  ;;  %v6966_v49 = vld [vmem:[#allocation2 + $0x98] sm:$0xf] }
 0xae5   :  { %6860 = vmatmul.msk.bf16.vlgmr.msrb.gmra.mxu3 %vm588_vm1, %v4049_v43  ;;  %v7394_v43 = vld [vmem:[#allocation2 + $0xa0] sm:$0xf0] }
 0xae7   :  { %4377 = vadd.xlane.f32.xlu2 %v4376_v5  ;;  %v6967_v5 = vor.u32 %v7394_v43, %v6966_v49 }
 0xae8   :  { %4374 = vadd.xlane.f32.xlu1 %v4373_v35 }
 0xae9   :  { %v4422_v58 = vpop.permute.xlu2 %4421 }
 0xaea   :  { %4449 = vmatpush.bf16.msra.mxu1 %v4422_v58  ;;  %4672 = vmax.xlane.f32.xlu0 %v4671_v4 }
 0xaf0   :  { %4675 = vmax.xlane.f32.xlu1 %v4674_v38 }
 0xaf3   :  { %v4357_v57 = vpop.xlane.xlu0 %4356 }
 0xafb   :  { %v4655_v50 = vpop.xlane.xlu0 %4654 }
 0xafc   :  { %v4677_v33 = vsub.f32 %v9792_v63, %v4655_v50 }
 0xafe   :  { %v4685_v40 = vmul.f32 1.442695, %v4677_v33 }
 0xaff   :  { %4771 = vrot.lane.b32.xlu2 %v6971_v56, %s8035_s20 }
 0xb00   :  { %7825 = vpow2.f32 %v4685_v40  ;;  %v4360_v61 = vpop.xlane.xlu1 %4359 }
 0xb05   :  { %v4020_v28 = vpop.xlane.xlu0 %4019 }
 0xb06   :  { %v10059_v32 = vpop.eup %7825  ;;  %7827 = vrcp.f32 %v4020_v28  ;;  %v10084_v28 = vpop.f32.mrf.mxu0 }
 0xb07   :  { %5117 = vrot.lane.b32.xlu2 %v7027_v17, %s8040_s29  ;;  %v4701_v47 = vsel %vm588_vm1, %v10059_v32, 0.0 }
 0xb08   :  { %4702 = vadd.xlane.f32.xlu0 %v4701_v47  ;;  %v4017_v63 = vpop.xlane.xlu1 %4016 }
 0xb09   :  { %7829 = vrcp.f32 %v4017_v63 }
 0xb0a   :  { %7831 = vrcp.f32 %v4360_v61 }
 0xb0b   :  { %7833 = vrcp.f32 %v4357_v57 }
 0xb0c   :  { %v7828_v8 = vpop.eup %7827 }
 0xb0d   :  { %v5001_v23 = vpop.xlane.xlu0 %5000  ;;  %v4044_v29 = vmul.f32 %v7828_v8, %v9929_v51 }
 0xb0e   :  { %v5023_v63 = vsub.f32 %v9937_v31, %v5001_v23 }
 0xb0f   :  { %v7830_v12 = vpop.eup %7829 }
 0xb10   :  { %v4043_v45 = vmul.f32 %v7830_v12, %v9933_v0  ;;  %v7832_v35 = vpop.eup %7831 }
 0xb11   :  { %v7834_v58 = vpop.eup %7833  ;;  %v4388_v38 = vmul.f32 %v7832_v35, %v9924_v22 }
 0xb12   :  { %v4050_v30 = vpack.c.bf16 %v4044_v29, %v4043_v45  ;;  %v4387_v0 = vmul.f32 %v7834_v58, %v9905_v24  ;;  %v5345_v29 = vsel %vm588_vm1, %v9884_v42, -inf  ;;  %v5031_v45 = vmul.f32 1.442695, %v5023_v63 }
 0xb14   :  { %6861 = vmatmul.msk.bf16.gmra.mxu3 %vm588_vm1, %v4050_v30  ;;  %v4395_v37 = vpack.c.bf16 %v4388_v38, %v4387_v0 }
 0xb15   :  { %v5004_v62 = vpop.xlane.xlu0 %5003 }
 0xb16   :  { %v5024_v51 = vsub.f32 %v9952_v27, %v5004_v62  ;;  %v10093_v62 = vpop.f32.mrf.mxu0 }
 0xb17   :  { %v5020_v58 = vsel %vm588_vm1, %v10093_v62, -inf }
 0xb18   :  { %v5033_v50 = vmul.f32 1.442695, %v5024_v51 }
 0xb1a   :  { %7835 = vpow2.f32 %v5033_v50 }
 0xb1c   :  { %4769 = vrot.lane.b32.xlu0 %v6967_v5, %s8035_s20 }
 0xb1d   :  { %v4363_v4 = vpop.xlane.xlu0 %4362 }
 0xb20   :  { %v4420_v14 = vpop.permute.xlu1 %4419  ;;  %v10075_v22 = vpop.eup %7835 }
 0xb21   :  { %4450 = vmatpush.bf16.msra.mxu1 %v4420_v14 }
 0xb22   :  { %v4658_v33 = vpop.xlane.xlu2 %4657 }
 0xb23   :  { %v4678_v57 = vsub.f32 %v9808_v15, %v4658_v33  ;;  %v5050_v15 = vsel %vm588_vm1, %v10075_v22, 0.0 }
 0xb24   :  { %6916 = vmatmul.msk.bf16.vlgmr.msra.gmra.mxu1 %vm588_vm1, %v4395_v37 }
 0xb25   :  { %v4687_v56 = vmul.f32 1.442695, %v4678_v57  ;;  %v10073_v40 = vpop.xlane.xlu0 %4660 }
 0xb27   :  { %7837 = vpow2.f32 %v4687_v56 }
 0xb2a   :  { %v4664_v61 = vpop.xlane.xlu2 %4663 }
 0xb2b   :  { %v4680_v39 = vsub.f32 %v9837_v1, %v4664_v61  ;;  %v5017_v1 = vsel %vm588_vm1, %v10084_v28, -inf }
 0xb2d   :  { %v10077_v27 = vpop.eup %7837  ;;  %v4023_v24 = vpop.xlane.xlu0 %4022  ;;  %v4691_v17 = vmul.f32 1.442695, %v4680_v39 }
 0xb2e   :  { %v4704_v9 = vsel %vm588_vm1, %v10077_v27, 0.0  ;;  %7839 = vrcp.f32 %v4023_v24  ;;  %v5348_v24 = vsel %vm588_vm1, %v9893_v6, -inf }
 0xb2f   :  { %4705 = vadd.xlane.f32.xlu1 %v4704_v9 }
 0xb30   :  { %5051 = vadd.xlane.f32.xlu2 %v5050_v15 }
 0xb32   :  { %v4026_v47 = vpop.xlane.xlu2 %4025 }
 0xb33   :  { %7841 = vrcp.f32 %v4026_v47 }
 0xb34   :  { %7843 = vpow2.f32 %v4691_v17  ;;  %v7840_v12 = vpop.eup %7839 }
 0xb35   :  { %v10087_v8 = vpop.xlane.xlu0 %5006  ;;  %v4045_v49 = vmul.f32 %v7840_v12, %v9975_v25  ;;  %7845 = vpow2.f32 %v5031_v45  ;;  %v10106_v25 = vpop.f32.mrf.mxu0  ;;  %v7393_v12 = vld [vmem:[#allocation2 + $0x88] sm:$0xf0] }
 0xb36   :  { %v5691_v50 = vsel %vm588_vm1, %v10106_v25, -inf  ;;  %7847 = vrcp.f32 %v4363_v4 }
 0xb37   :  { %5018 = vmax.xlane.f32.xlu1 %v5017_v1  ;;  %v6962_v1 = vld [vmem:[#allocation2 + $0x80] sm:$0xf] }
 0xb38   :  { %5346 = vmax.xlane.f32.xlu2 %v5345_v29 }
 0xb39   :  { %v7842_v30 = vpop.eup %7841 }
 0xb3a   :  { %v4046_v31 = vmul.f32 %v7842_v30, %v9988_v44  ;;  %v5010_v23 = vpop.xlane.xlu2 %5009  ;;  %v10097_v43 = vpop.eup %7843 }
 0xb3b   :  { %v4710_v38 = vsel %vm588_vm1, %v10097_v43, 0.0  ;;  %v10104_v51 = vpop.eup %7845  ;;  %v5026_v37 = vsub.f32 %v9996_v48, %v5010_v23 }
 0xb3c   :  { %v4051_v5 = vpack.c.bf16 %v4046_v31, %v4045_v49  ;;  %v5047_v14 = vsel %vm588_vm1, %v10104_v51, 0.0  ;;  %v7848_v9 = vpop.eup %7847  ;;  %v6963_v49 = vor.u32 %v7393_v12, %v6962_v1 }
 0xb3d   :  { %v4369_v35 = vpop.xlane.xlu0 %4368  ;;  %v5037_v33 = vmul.f32 1.442695, %v5026_v37  ;;  %v10115_v61 = vpop.f32.mrf.mxu0  ;;  %v4389_v17 = vmul.f32 %v7848_v9, %v9958_v46  ;;  %v7014_v37 = vld [vmem:[#allocation2 + $0x68] sm:$0xf]  ;;  %v7392_v9 = vld [vmem:[#allocation2 + $0x70] sm:$0xf0] }
 0xb3e   :  { %6862 = vmatmul.msk.bf16.gmra.mxu3 %vm588_vm1, %v4051_v5  ;;  %v5694_v48 = vsel %vm588_vm1, %v10115_v61, -inf }
 0xb3f   :  { %5021 = vmax.xlane.f32.xlu1 %v5020_v58 }
 0xb40   :  { %4711 = vadd.xlane.f32.xlu2 %v4710_v38 }
 0xb42   :  { %v4372_v44 = vpop.xlane.xlu2 %4371 }
 0xb45   :  { %v4667_v0 = vpop.xlane.xlu0 %4666 }
 0xb46   :  { %5048 = vadd.xlane.f32.xlu0 %v5047_v14  ;;  %v4681_v30 = vsub.f32 %v9845_v59, %v4667_v0  ;;  %v7022_v59 = vld [vmem:[#allocation2 + $0x98] sm:$0xf]  ;;  %v7406_v0 = vld [vmem:[#allocation2 + $0xa0] sm:$0xf0] }
 0xb48   :  { %5692 = vmax.xlane.f32.xlu2 %v5691_v50  ;;  %v7404_v50 = vld [vmem:[#allocation2 + $0x70] sm:$0xf0] }
 0xb4a   :  { %v10113_v57 = vpop.xlane.xlu2 %4669 }
 0xb4b   :  { %v4366_v56 = vpop.xlane.xlu1 %4365 }
 0xb4c   :  { %7849 = vrcp.f32 %v4366_v56  ;;  %v7023_v56 = vor.u32 %v7406_v0, %v7022_v59  ;;  %v5025_v0 = vsub.f32 %v9980_v41, %v10087_v8  ;;  %v4679_v41 = vsub.f32 %v9823_v21, %v10073_v40 }
 0xb4d   :  { %7851 = vpow2.f32 %v5037_v33  ;;  %v4029_v39 = vpop.xlane.xlu0 %4028 }
 0xb4e   :  { %5349 = vmax.xlane.f32.xlu0 %v5348_v24  ;;  %7853 = vrcp.f32 %v4029_v39 }
 0xb50   :  { %5695 = vmax.xlane.f32.xlu2 %v5694_v48  ;;  %v6958_v48 = vld [vmem:[#allocation2 + $0x68] sm:$0xf] }
 0xb51   :  { %v6959_v1 = vor.u32 %v7392_v9, %v6958_v48  ;;  %v5357_v48 = vsel %vm588_vm1, %v9902_v13, -inf }
 0xb52   :  { %v7850_v15 = vpop.eup %7849  ;;  %v5013_v4 = vpop.xlane.xlu2 %5012 }
 0xb53   :  { %v4390_v47 = vmul.f32 %v7850_v15, %v10017_v10  ;;  %v4032_v63 = vpop.xlane.xlu1 %4031  ;;  %v10123_v29 = vpop.eup %7851  ;;  %v4693_v10 = vmul.f32 1.442695, %v4681_v30  ;;  %v7405_v30 = vld [vmem:[#allocation2 + $0x88] sm:$0xf0] }
 0xb54   :  { %7855 = vrcp.f32 %v4032_v63  ;;  %v5056_v31 = vsel %vm588_vm1, %v10123_v29, 0.0  ;;  %v7854_v23 = vpop.eup %7853  ;;  %v5027_v63 = vsub.f32 %v10019_v11, %v5013_v4 }
 0xb55   :  { %v4396_v45 = vpack.c.bf16 %v4390_v47, %v4389_v17  ;;  %7857 = vrcp.f32 %v4372_v44  ;;  %v4047_v58 = vmul.f32 %v7854_v23, %v10022_v20  ;;  %v5351_v44 = vsel %vm588_vm1, %v9895_v26, -inf }
 0xb56   :  { %7859 = vrcp.f32 %v4369_v35  ;;  %v7015_v20 = vor.u32 %v7404_v50, %v7014_v37  ;;  %v5035_v37 = vmul.f32 1.442695, %v5025_v0 }
 0xb57   :  { %6917 = vmatmul.msk.bf16.gmra.mxu1 %vm588_vm1, %v4396_v45  ;;  %7861 = vpow2.f32 %v4693_v10  ;;  %v7018_v45 = vld [vmem:[#allocation2 + $0x80] sm:$0xf] }
 0xb58   :  { %4767 = vrot.lane.b32.xlu1 %v6963_v49, %s8035_s20  ;;  %5057 = vadd.xlane.f32.xlu2 %v5056_v31  ;;  %v10146_v49 = vpop.f32.mrf.mxu0  ;;  %v7019_v4 = vor.u32 %v7405_v30, %v7018_v45 }
 0xb59   :  { %v5697_v23 = vsel %vm588_vm1, %v10146_v49, -inf }
 0xb5a   :  { %v7856_v46 = vpop.eup %7855  ;;  %v4378_v5 = vpop.xlane.xlu2 %4377 }
 0xb5b   :  { %v4048_v38 = vmul.f32 %v7856_v46, %v10032_v55  ;;  %v7858_v33 = vpop.eup %7857  ;;  %v4375_v17 = vpop.xlane.xlu1 %4374  ;;  %7863 = vrcp.f32 %v4378_v5 }
 0xb5c   :  { %v7860_v35 = vpop.eup %7859  ;;  %v4392_v55 = vmul.f32 %v7858_v33, %v10008_v34  ;;  %7865 = vrcp.f32 %v4375_v17 }
 0xb5d   :  { %v4052_v14 = vpack.c.bf16 %v4048_v38, %v4047_v58  ;;  %v4391_v39 = vmul.f32 %v7860_v35, %v9998_v7  ;;  %v10139_v15 = vpop.eup %7861  ;;  %v5039_v7 = vmul.f32 1.442695, %v5027_v63  ;;  %v5016_v58 = vpop.xlane.xlu0 %5015  ;;  %v5354_v63 = vsel %vm588_vm1, %v9898_v3, -inf }
 0xb5e   :  { %v4713_v34 = vsel %vm588_vm1, %v10139_v15, 0.0 }
 0xb5f   :  { %6863 = vmatmul.msk.bf16.gmra.mxu3 %vm588_vm1, %v4052_v14  ;;  %v4397_v47 = vpack.c.bf16 %v4392_v55, %v4391_v39  ;;  %7867 = vpow2.f32 %v5039_v7  ;;  %v4689_v55 = vmul.f32 1.442695, %v4679_v41  ;;  %v5028_v7 = vsub.f32 %v10034_v2, %v5016_v58 }
 0xb60   :  { %5115 = vrot.lane.b32.xlu1 %v7023_v56, %s8040_s29  ;;  %5352 = vmax.xlane.f32.xlu2 %v5351_v44  ;;  %v10160_v14 = vpop.f32.mrf.mxu0  ;;  %7869 = vpow2.f32 %v5035_v37 }
 0xb61   :  { %v7864_v31 = vpop.eup %7863  ;;  %7871 = vpow2.f32 %v4689_v55  ;;  %v5041_v45 = vmul.f32 1.442695, %v5028_v7  ;;  %v7082_v7 = vld [vmem:[#allocation2 + $0xb0] sm:$0xf] }
 0xb62   :  { %v4772_v24 = vpop.permute.xlu2 %4771  ;;  %5111 = vrot.lane.b32.xlu0 %v7015_v20, %s8040_s29  ;;  %v7866_v11 = vpop.eup %7865  ;;  %v4394_v46 = vmul.f32 %v7864_v31, %v10044_v53  ;;  %v5360_v53 = vsel %vm588_vm1, %v9911_v52, -inf }
 0xb63   :  { %4793 = vmatpush.bf16.msra.mxu3 %v4772_v24  ;;  %v4393_v10 = vmul.f32 %v7866_v11, %v10046_v16  ;;  %v4676_v56 = vpop.xlane.xlu1 %4675  ;;  %v5700_v11 = vsel %vm588_vm1, %v10160_v14, -inf }
 0xb64   :  { %v4684_v8 = vsub.f32 %v9871_v36, %v4676_v56  ;;  %v4682_v36 = vsub.f32 %v9857_v18, %v10113_v57 }
 0xb65   :  { %v10153_v5 = vpop.eup %7867  ;;  %v4398_v38 = vpack.c.bf16 %v4394_v46, %v4393_v10  ;;  %v4673_v50 = vpop.xlane.xlu0 %4672 }
 0xb66   :  { %v5059_v59 = vsel %vm588_vm1, %v10153_v5, 0.0  ;;  %v10170_v35 = vpop.eup %7869  ;;  %v4699_v24 = vmul.f32 1.442695, %v4684_v8  ;;  %v4683_v31 = vsub.f32 %v9864_v54, %v4673_v50  ;;  %v5366_v50 = vsel %vm588_vm1, %v9931_v60, -inf }
 0xb67   :  { %6918 = vmatmul.msk.bf16.gmra.mxu1 %vm588_vm1, %v4397_v47  ;;  %v5053_v20 = vsel %vm588_vm1, %v10170_v35, 0.0  ;;  %v10179_v9 = vpop.eup %7871  ;;  %v4695_v47 = vmul.f32 1.442695, %v4682_v36 }
 0xb68   :  { %4765 = vrot.lane.b32.xlu1 %v6959_v1, %s8035_s20  ;;  %4714 = vadd.xlane.f32.xlu2 %v4713_v34  ;;  %v10164_v16 = vpop.f32.mrf.mxu0  ;;  %7873 = vpow2.f32 %v4699_v24  ;;  %v4707_v40 = vsel %vm588_vm1, %v10179_v9, 0.0  ;;  %v4697_v46 = vmul.f32 1.442695, %v4683_v31 }
 0xb69   :  { %v5703_v44 = vsel %vm588_vm1, %v10164_v16, -inf  ;;  %7875 = vpow2.f32 %v4695_v47 }
 0xb6a   :  { %v5118_v12 = vpop.permute.xlu2 %5117 }
 0xb6b   :  { %5139 = vmatpush.bf16.msrb.mxu1 %v5118_v12 }
 0xb6e   :  { %v10181_v21 = vpop.eup %7873 }
 0xb6f   :  { %v4722_v17 = vsel %vm588_vm1, %v10181_v21, 0.0  ;;  %v10191_v34 = vpop.eup %7875 }
 0xb70   :  { %5113 = vrot.lane.b32.xlu1 %v7019_v4, %s8040_s29  ;;  %5698 = vmax.xlane.f32.xlu2 %v5697_v23  ;;  %v4716_v18 = vsel %vm588_vm1, %v10191_v34, 0.0 }
 0xb77   :  { %6919 = vmatmul.msk.bf16.gmra.mxu1 %vm588_vm1, %v4398_v38 }
 0xb78   :  { %5060 = vadd.xlane.f32.xlu2 %v5059_v59 }
 0xb7b   :  { %v10166_v33 = vpop.xlane.xlu0 %4702 }
 0xb80   :  { %5361 = vmax.xlane.f32.xlu2 %v5360_v53 }
 0xb88   :  { %5704 = vmax.xlane.f32.xlu2 %v5703_v44 }
 0xb8c   :  { %5054 = vadd.xlane.f32.xlu0 %v5053_v20  ;;  %v10222_v20 = vpop.f32.mrf.mxu0 }
 0xb8e   :  { %v4770_v39 = vpop.permute.xlu0 %4769 }
 0xb8f   :  { %4794 = vmatpush.bf16.msra.mxu3 %v4770_v39  ;;  %v5706_v39 = vsel %vm588_vm1, %v10222_v20, -inf }
 0xb94   :  { %5358 = vmax.xlane.f32.xlu0 %v5357_v48 }
 0xb9a   :  { %4708 = vadd.xlane.f32.xlu1 %v4707_v40 }
 0xb9c   :  { %4723 = vadd.xlane.f32.xlu0 %v4722_v17  ;;  %v10233_v17 = vpop.f32.mrf.mxu0 }
 0xba2   :  { %5355 = vmax.xlane.f32.xlu1 %v5354_v63  ;;  %v4706_v1 = vpop.xlane.xlu1 %4705 }
 0xba3   :  { %v10200_v4 = vpop.xlane.xlu2 %5051 }
 0xba4   :  { %v10244_v31 = vpop.f32.mrf.mxu0 }
 0xbaa   :  { %4717 = vadd.xlane.f32.xlu1 %v4716_v18  ;;  %v5019_v57 = vpop.xlane.xlu1 %5018  ;;  %v7419_v18 = vld [vmem:[#allocation2 + $0xb8] sm:$0xf0] }
 0xbab   :  { %v5029_v12 = vsub.f32 %v10084_v28, %v5019_v57  ;;  %v5347_v0 = vpop.xlane.xlu2 %5346 }
 0xbac   :  { %v5369_v24 = vsub.f32 %v9884_v42, %v5347_v0  ;;  %v5363_v42 = vsel %vm588_vm1, %v9922_v19, -inf  ;;  %v5712_v0 = vsel %vm588_vm1, %v10244_v31, -inf }
 0xbad   :  { %v5043_v30 = vmul.f32 1.442695, %v5029_v12  ;;  %v5709_v12 = vsel %vm588_vm1, %v10233_v17, -inf }
 0xbae   :  { %v5377_v40 = vmul.f32 1.442695, %v5369_v24  ;;  %v7074_v24 = vld [vmem:[#allocation2 + $0x80] sm:$0xf] }
 0xbaf   :  { %7877 = vpow2.f32 %v5043_v30 }
 0xbb0   :  { %7879 = vpow2.f32 %v5041_v45  ;;  %v7083_v45 = vor.u32 %v7419_v18, %v7082_v7 }
 0xbb2   :  { %5701 = vmax.xlane.f32.xlu1 %v5700_v11  ;;  %v5022_v2 = vpop.xlane.xlu1 %5021 }
 0xbb3   :  { %v5030_v23 = vsub.f32 %v10093_v62, %v5022_v2  ;;  %v10224_v55 = vpop.xlane.xlu2 %4711 }
 0xbb5   :  { %v10203_v10 = vpop.eup %7877  ;;  %v5045_v58 = vmul.f32 1.442695, %v5030_v23 }
 0xbb6   :  { %v10205_v28 = vpop.eup %7879  ;;  %v5065_v38 = vsel %vm588_vm1, %v10203_v10, 0.0 }
 0xbb7   :  { %7881 = vpow2.f32 %v5045_v58  ;;  %5066 = vadd.xlane.f32.xlu0 %v5065_v38  ;;  %v5062_v59 = vsel %vm588_vm1, %v10205_v28, 0.0  ;;  %v7138_v58 = vld [vmem:[#allocation2 + $0xb0] sm:$0xf]  ;;  %v7431_v38 = vld [vmem:[#allocation2 + $0xb8] sm:$0xf0] }
 0xbb8   :  { %7883 = vpow2.f32 %v4697_v46 }
 0xbb9   :  { %v5049_v54 = vpop.xlane.xlu0 %5048 }
 0xbba   :  { %5063 = vadd.xlane.f32.xlu1 %v5062_v59 }
 0xbbb   :  { %v5693_v47 = vpop.xlane.xlu2 %5692 }
 0xbbc   :  { %v5715_v18 = vsub.f32 %v10106_v25, %v5693_v47 }
 0xbbd   :  { %v10211_v37 = vpop.eup %7881 }
 0xbbe   :  { %v10213_v62 = vpop.eup %7883  ;;  %v5068_v53 = vsel %vm588_vm1, %v10211_v37, 0.0 }
 0xbbf   :  { %5367 = vmax.xlane.f32.xlu0 %v5366_v50  ;;  %5069 = vadd.xlane.f32.xlu2 %v5068_v53  ;;  %v4719_v44 = vsel %vm588_vm1, %v10213_v62, 0.0 }
 0xbc1   :  { %v5350_v56 = vpop.xlane.xlu0 %5349 }
 0xbc2   :  { %v5370_v41 = vsub.f32 %v9893_v6, %v5350_v56  ;;  %4720 = vadd.xlane.f32.xlu1 %v4719_v44 }
 0xbc3   :  { %v10249_v23 = vpop.xlane.xlu2 %5695 }
 0xbc4   :  { %v5379_v8 = vmul.f32 1.442695, %v5370_v41 }
 0xbc6   :  { %7885 = vpow2.f32 %v5379_v8  ;;  %v10258_v8 = vpop.f32.mrf.mxu1 }
 0xbc7   :  { %7887 = vrcp.f32 %v4706_v1 }
 0xbc8   :  { %7889 = vpow2.f32 %v5377_v40  ;;  %v7078_v40 = vld [vmem:[#allocation2 + $0x98] sm:$0xf] }
 0xbc9   :  { %7891 = vrcp.f32 %v10166_v33 }
 0xbca   :  { %5707 = vmax.xlane.f32.xlu1 %v5706_v39  ;;  %v4768_v48 = vpop.permute.xlu1 %4767  ;;  %7893 = vrcp.f32 %v5049_v54  ;;  %v7417_v39 = vld [vmem:[#allocation2 + $0x88] sm:$0xf0] }
 0xbcb   :  { %4795 = vmatpush.bf16.msra.mxu3 %v4768_v48  ;;  %7895 = vrcp.f32 %v10200_v4  ;;  %v5058_v54 = vpop.xlane.xlu2 %5057 }
 0xbcc   :  { %v10229_v36 = vpop.eup %7885 }
 0xbcd   :  { %v5396_v6 = vsel %vm588_vm1, %v10229_v36, 0.0  ;;  %v7888_v57 = vpop.eup %7887 }
 0xbce   :  { %5397 = vadd.xlane.f32.xlu0 %v5396_v6  ;;  %v10240_v30 = vpop.eup %7889  ;;  %v4734_v33 = vmul.f32 %v7888_v57, %v10077_v27  ;;  %v7139_v27 = vor.u32 %v7431_v38, %v7138_v58  ;;  %v7418_v6 = vld [vmem:[#allocation2 + $0xa0] sm:$0xf0]  ;;  %v10261_v7 = vpop.f32.mrf.mxu1 }
 0xbcf   :  { %v7892_v1 = vpop.eup %7891  ;;  %v5393_v11 = vsel %vm588_vm1, %v10240_v30, 0.0 }
 0xbd0   :  { %v4733_v2 = vmul.f32 %v7892_v1, %v10059_v32  ;;  %v7894_v32 = vpop.eup %7893  ;;  %v5723_v1 = vmul.f32 1.442695, %v5715_v18 }
 0xbd1   :  { %v7896_v53 = vpop.eup %7895  ;;  %v5079_v56 = vmul.f32 %v7894_v32, %v10104_v51  ;;  %v7430_v51 = vld [vmem:[#allocation2 + $0xa0] sm:$0xf0]  ;;  %v7130_v32 = vld [vmem:[#allocation2 + $0x80] sm:$0xf] }
 0xbd2   :  { %5364 = vmax.xlane.f32.xlu1 %v5363_v42  ;;  %v5116_v63 = vpop.permute.xlu1 %5115  ;;  %v4741_v59 = vpack.c.bf16 %v4734_v33, %v4733_v2  ;;  %v5080_v44 = vmul.f32 %v7896_v53, %v10075_v22  ;;  %v7075_v42 = vor.u32 %v7417_v39, %v7074_v24  ;;  %v7134_v22 = vld [vmem:[#allocation2 + $0x98] sm:$0xf]  ;;  %v7070_v33 = vld [vmem:[#allocation2 + $0x68] sm:$0xf]  ;;  %7897 = vpow2.f32 %v5723_v1 }
 0xbd3   :  { %5140 = vmatpush.bf16.msrb.mxu1 %v5116_v63  ;;  %v5353_v48 = vpop.xlane.xlu2 %5352  ;;  %v7079_v63 = vor.u32 %v7418_v6, %v7078_v40  ;;  %7899 = vrcp.f32 %v5058_v54 }
 0xbd4   :  { %v5112_v41 = vpop.permute.xlu0 %5111  ;;  %v5087_v4 = vpack.c.bf16 %v5080_v44, %v5079_v56  ;;  %v5371_v2 = vsub.f32 %v9895_v26, %v5353_v48 }
 0xbd6   :  { %5710 = vmax.xlane.f32.xlu0 %v5709_v12  ;;  %v7135_v12 = vor.u32 %v7430_v51, %v7134_v22  ;;  %v5381_v38 = vmul.f32 1.442695, %v5371_v2 }
 0xbd7   :  { %5463 = vrot.lane.b32.xlu2 %v7083_v45, %s8041_s0  ;;  %v10266_v45 = vpop.f32.mrf.mxu1 }
 0xbd8   :  { %v10271_v25 = vpop.eup %7897 }
 0xbd9   :  { %v5739_v26 = vsel %vm588_vm1, %v10271_v25, 0.0 }
 0xbda   :  { %5394 = vadd.xlane.f32.xlu1 %v5393_v11  ;;  %v4766_v46 = vpop.permute.xlu1 %4765  ;;  %v7416_v11 = vld [vmem:[#allocation2 + $0x70] sm:$0xf0] }
 0xbdb   :  { %4796 = vmatpush.bf16.msra.mxu3 %v4766_v46  ;;  %v4715_v57 = vpop.xlane.xlu2 %4714  ;;  %v7071_v58 = vor.u32 %v7416_v11, %v7070_v33 }
 0xbde   :  { %5713 = vmax.xlane.f32.xlu0 %v5712_v0  ;;  %6972 = vmatmul.msk.bf16.vlgmr.msra.gmra.mxu3 %vm588_vm1, %v4741_v59  ;;  %v7900_v0 = vpop.eup %7899 }
 0xbdf   :  { %5809 = vrot.lane.b32.xlu2 %v7139_v27, %s8042_s6  ;;  %v10273_v47 = vpop.f32.mrf.mxu1  ;;  %v5082_v56 = vmul.f32 %v7900_v0, %v10123_v29 }
 0xbe2   :  { %v5114_v50 = vpop.permute.xlu1 %5113 }
 0xbe3   :  { %5141 = vmatpush.bf16.msrb.mxu1 %v5114_v50  ;;  %v5699_v59 = vpop.xlane.xlu2 %5698  ;;  %v7429_v50 = vld [vmem:[#allocation2 + $0x88] sm:$0xf0] }
 0xbe4   :  { %v5717_v27 = vsub.f32 %v10146_v49, %v5699_v59  ;;  %v7131_v44 = vor.u32 %v7429_v50, %v7130_v32  ;;  %v5716_v49 = vsub.f32 %v10115_v61, %v10249_v23 }
 0xbe7   :  { %5142 = vmatpush.bf16.msrb.mxu1 %v5112_v41  ;;  %v5727_v41 = vmul.f32 1.442695, %v5717_v27  ;;  %v10285_v39 = vpop.f32.mrf.mxu1 }
 0xbea   :  { %7028 = vmatmul.msk.bf16.vlgmr.msrb.gmra.mxu1 %vm588_vm1, %v5087_v4 }
 0xbeb   :  { %v5061_v22 = vpop.xlane.xlu2 %5060 }
 0xbf2   :  { %5459 = vrot.lane.b32.xlu0 %v7075_v42, %s8041_s0 }
 0xbf3   :  { %5461 = vrot.lane.b32.xlu1 %v7079_v63, %s8041_s0  ;;  %v10295_v63 = vpop.f32.mrf.mxu1  ;;  %v5362_v11 = vpop.xlane.xlu2 %5361 }
 0xbfa   :  { %5807 = vrot.lane.b32.xlu0 %v7135_v12, %s8042_s6 }
 0xbfb   :  { %v10304_v33 = vpop.f32.mrf.mxu1 }
 0xbff   :  { %v5055_v46 = vpop.xlane.xlu0 %5054 }
 0xc00   :  { %7901 = vrcp.f32 %v5055_v46 }
 0xc01   :  { %7903 = vpow2.f32 %v5381_v38 }
 0xc02   :  { %5457 = vrot.lane.b32.xlu0 %v7071_v58, %s8041_s0  ;;  %7905 = vrcp.f32 %v10224_v55 }
 0xc03   :  { %7907 = vpow2.f32 %v5727_v41 }
 0xc06   :  { %v7902_v53 = vpop.eup %7901 }
 0xc07   :  { %v5081_v54 = vmul.f32 %v7902_v53, %v10170_v35  ;;  %v10283_v24 = vpop.eup %7903  ;;  %v5725_v35 = vmul.f32 1.442695, %v5716_v49  ;;  %v10310_v53 = vpop.f32.mrf.mxu1 }
 0xc08   :  { %5740 = vadd.xlane.f32.xlu2 %v5739_v26  ;;  %v5399_v48 = vsel %vm588_vm1, %v10283_v24, 0.0  ;;  %v7906_v40 = vpop.eup %7905 }
 0xc09   :  { %v5088_v4 = vpack.c.bf16 %v5082_v56, %v5081_v54  ;;  %v10291_v6 = vpop.eup %7907  ;;  %v4736_v23 = vmul.f32 %v7906_v40, %v10097_v43  ;;  %v5359_v43 = vpop.xlane.xlu0 %5358 }
 0xc0a   :  { %5805 = vrot.lane.b32.xlu0 %v7131_v44, %s8042_s6  ;;  %v5745_v51 = vsel %vm588_vm1, %v10291_v6, 0.0  ;;  %v5373_v26 = vsub.f32 %v9902_v13, %v5359_v43  ;;  %v5374_v13 = vsub.f32 %v9911_v52, %v5362_v11 }
 0xc0b   :  { %7029 = vmatmul.msk.bf16.gmra.mxu1 %vm588_vm1, %v5088_v4 }
 0xc0d   :  { %v4709_v29 = vpop.xlane.xlu1 %4708 }
 0xc0e   :  { %7909 = vrcp.f32 %v4709_v29  ;;  %v7126_v29 = vld [vmem:[#allocation2 + $0x68] sm:$0xf] }
 0xc0f   :  { %7911 = vpow2.f32 %v5725_v35  ;;  %v10322_v4 = vpop.f32.mrf.mxu1  ;;  %v7428_v35 = vld [vmem:[#allocation2 + $0x70] sm:$0xf0] }
 0xc10   :  { %5400 = vadd.xlane.f32.xlu2 %v5399_v48  ;;  %7913 = vrcp.f32 %v4715_v57 }
 0xc11   :  { %v4724_v32 = vpop.xlane.xlu0 %4723 }
 0xc14   :  { %v7910_v61 = vpop.eup %7909 }
 0xc15   :  { %v4735_v42 = vmul.f32 %v7910_v61, %v10179_v9  ;;  %v5356_v55 = vpop.xlane.xlu1 %5355  ;;  %v10299_v12 = vpop.eup %7911 }
 0xc16   :  { %v5742_v1 = vsel %vm588_vm1, %v10299_v12, 0.0  ;;  %v5372_v2 = vsub.f32 %v9898_v3, %v5356_v55  ;;  %v7914_v46 = vpop.eup %7913  ;;  %v10314_v3 = vpop.xlane.xlu2 %5704  ;;  %v7127_v55 = vor.u32 %v7428_v35, %v7126_v29 }
 0xc17   :  { %v4742_v18 = vpack.c.bf16 %v4736_v23, %v4735_v42  ;;  %v4737_v38 = vmul.f32 %v7914_v46, %v10139_v15  ;;  %v5385_v15 = vmul.f32 1.442695, %v5373_v26  ;;  %v5387_v42 = vmul.f32 1.442695, %v5374_v13 }
 0xc18   :  { %5746 = vadd.xlane.f32.xlu2 %v5745_v51  ;;  %v5383_v59 = vmul.f32 1.442695, %v5372_v2 }
 0xc19   :  { %6973 = vmatmul.msk.bf16.gmra.mxu3 %vm588_vm1, %v4742_v18 }
 0xc1d   :  { %5743 = vadd.xlane.f32.xlu1 %v5742_v1  ;;  %v4718_v9 = vpop.xlane.xlu1 %4717 }
 0xc1e   :  { %7915 = vrcp.f32 %v4718_v9 }
 0xc1f   :  { %7917 = vpow2.f32 %v5383_v59 }
 0xc24   :  { %v7916_v58 = vpop.eup %7915 }
 0xc25   :  { %v4738_v0 = vmul.f32 %v7916_v58, %v10191_v34  ;;  %v5702_v57 = vpop.xlane.xlu1 %5701  ;;  %v10316_v34 = vpop.eup %7917 }
 0xc26   :  { %v5718_v27 = vsub.f32 %v10160_v14, %v5702_v57  ;;  %v10318_v14 = vpop.f32.mrf.mxu3  ;;  %v5402_v61 = vsel %vm588_vm1, %v10316_v34, 0.0 }
 0xc27   :  { %v4743_v50 = vpack.c.bf16 %v4738_v0, %v4737_v38 }
 0xc28   :  { %v5729_v56 = vmul.f32 1.442695, %v5718_v27 }
 0xc29   :  { %6974 = vmatmul.msk.bf16.gmra.mxu3 %vm588_vm1, %v4743_v50 }
 0xc2a   :  { %7919 = vpow2.f32 %v5729_v56  ;;  %v5067_v44 = vpop.xlane.xlu0 %5066 }
 0xc2b   :  { %7921 = vrcp.f32 %v5061_v22 }
 0xc2d   :  { %v5064_v54 = vpop.xlane.xlu1 %5063 }
 0xc2e   :  { %7923 = vrcp.f32 %v5064_v54  ;;  %v10334_v43 = vpop.f32.mrf.mxu3 }
 0xc2f   :  { %7925 = vpow2.f32 %v5385_v15 }
 0xc30   :  { %v10320_v41 = vpop.eup %7919  ;;  %7927 = vrcp.f32 %v4724_v32 }
 0xc31   :  { %v5748_v49 = vsel %vm588_vm1, %v10320_v41, 0.0  ;;  %v7922_v48 = vpop.eup %7921 }
 0xc32   :  { %v5070_v40 = vpop.xlane.xlu2 %5069  ;;  %5749 = vadd.xlane.f32.xlu2 %v5748_v49  ;;  %v5083_v22 = vmul.f32 %v7922_v48, %v10153_v5  ;;  %v5368_v9 = vpop.xlane.xlu0 %5367 }
 0xc33   :  { %v10339_v5 = vpop.f32.mrf.mxu1  ;;  %v5376_v50 = vsub.f32 %v9931_v60, %v5368_v9 }
 0xc34   :  { %v7924_v23 = vpop.eup %7923  ;;  %5403 = vadd.xlane.f32.xlu0 %v5402_v61 }
 0xc35   :  { %v5084_v52 = vmul.f32 %v7924_v23, %v10205_v28  ;;  %v4721_v51 = vpop.xlane.xlu1 %4720  ;;  %v10331_v18 = vpop.eup %7925  ;;  %v5391_v13 = vmul.f32 1.442695, %v5376_v50 }
 0xc36   :  { %7929 = vrcp.f32 %v4721_v51  ;;  %5803 = vrot.lane.b32.xlu1 %v7127_v55, %s8042_s6  ;;  %v5405_v11 = vsel %vm588_vm1, %v10331_v18, 0.0  ;;  %v7928_v2 = vpop.eup %7927  ;;  %v10347_v56 = vpop.f32.mrf.mxu3  ;;  %v5719_v55 = vsub.f32 %v10164_v16, %v10314_v3 }
 0xc37   :  { %v5089_v1 = vpack.c.bf16 %v5084_v52, %v5083_v22  ;;  %7931 = vpow2.f32 %v5387_v42  ;;  %v4740_v58 = vmul.f32 %v7928_v2, %v10181_v21 }
 0xc38   :  { %7933 = vrcp.f32 %v5070_v40  ;;  %v5731_v51 = vmul.f32 1.442695, %v5719_v55 }
 0xc39   :  { %7030 = vmatmul.msk.bf16.gmra.mxu1 %vm588_vm1, %v5089_v1  ;;  %7935 = vrcp.f32 %v5067_v44 }
 0xc3a   :  { %v5464_v28 = vpop.permute.xlu2 %5463  ;;  %5406 = vadd.xlane.f32.xlu2 %v5405_v11 }
 0xc3b   :  { %5485 = vmatpush.bf16.msrb.mxu3 %v5464_v28 }
 0xc3c   :  { %v7930_v46 = vpop.eup %7929 }
 0xc3d   :  { %v4739_v38 = vmul.f32 %v7930_v46, %v10213_v62  ;;  %v5708_v59 = vpop.xlane.xlu1 %5707  ;;  %v10343_v0 = vpop.eup %7931 }
 0xc3e   :  { %v5720_v57 = vsub.f32 %v10222_v20, %v5708_v59  ;;  %v7934_v32 = vpop.eup %7933  ;;  %v5408_v21 = vsel %vm588_vm1, %v10343_v0, 0.0  ;;  %v10352_v62 = vpop.f32.mrf.mxu1 }
 0xc3f   :  { %v4744_v27 = vpack.c.bf16 %v4740_v58, %v4739_v38  ;;  %v7936_v54 = vpop.eup %7935  ;;  %v5086_v20 = vmul.f32 %v7934_v32, %v10211_v37  ;;  %v10363_v42 = vpop.f32.mrf.mxu3 }
 0xc40   :  { %v5733_v26 = vmul.f32 1.442695, %v5720_v57  ;;  %v5085_v60 = vmul.f32 %v7936_v54, %v10203_v10 }
 0xc41   :  { %v5398_v15 = vpop.xlane.xlu0 %5397  ;;  %6975 = vmatmul.msk.bf16.gmra.mxu3 %vm588_vm1, %v4744_v27 }
 0xc42   :  { %7937 = vpow2.f32 %v5733_v26  ;;  %v5810_v44 = vpop.permute.xlu2 %5809  ;;  %5409 = vadd.xlane.f32.xlu2 %v5408_v21  ;;  %v5090_v35 = vpack.c.bf16 %v5086_v20, %v5085_v60 }
 0xc43   :  { %5831 = vmatpush.bf16.msra.mxu1 %v5810_v44  ;;  %7939 = vpow2.f32 %v5391_v13  ;;  %v3780_v44 = vpack.c.bf16 %v10258_v8, %v10258_v8 }
 0xc45   :  { %v5365_v49 = vpop.xlane.xlu1 %5364 }
 0xc46   :  { %v5375_v29 = vsub.f32 %v9922_v19, %v5365_v49  ;;  %v10365_v10 = vpop.f32.mrf.mxu1 }
 0xc47   :  { %v10378_v2 = vpop.f32.mrf.mxu3 }
 0xc48   :  { %v10357_v48 = vpop.eup %7937  ;;  %v5389_v40 = vmul.f32 1.442695, %v5375_v29 }
 0xc49   :  { %v5711_v61 = vpop.xlane.xlu0 %5710  ;;  %7031 = vmatmul.msk.bf16.gmra.mxu1 %vm588_vm1, %v5090_v35  ;;  %v5754_v23 = vsel %vm588_vm1, %v10357_v48, 0.0  ;;  %v10369_v22 = vpop.eup %7939  ;;  %v3781_v35 = vpack.c.bf16 %v10261_v7, %v10261_v7  ;;  %v4472_v7 = vpack.c.bf16 %v10322_v4, %v10322_v4 }
 0xc4a   :  { %7941 = vpow2.f32 %v5389_v40  ;;  %v5721_v37 = vsub.f32 %v10233_v17, %v5711_v61  ;;  %5755 = vadd.xlane.f32.xlu2 %v5754_v23  ;;  %v5414_v9 = vsel %vm588_vm1, %v10369_v22, 0.0  ;;  %v4127_v40 = vpack.c.bf16 %v10334_v43, %v10334_v43 }
 0xc4c   :  { %v5735_v19 = vmul.f32 1.442695, %v5721_v37 }
 0xc4d   :  { %v5395_v59 = vpop.xlane.xlu1 %5394 }
 0xc4e   :  { %7943 = vpow2.f32 %v5735_v19  ;;  %v10382_v28 = vpop.f32.mrf.mxu1 }
 0xc4f   :  { %7945 = vpow2.f32 %v5731_v51 }
 0xc50   :  { %v10371_v52 = vpop.eup %7941 }
 0xc51   :  { %v5714_v1 = vpop.xlane.xlu0 %5713  ;;  %v5411_v17 = vsel %vm588_vm1, %v10371_v52, 0.0 }
 0xc52   :  { %v5722_v11 = vsub.f32 %v10244_v31, %v5714_v1  ;;  %5415 = vadd.xlane.f32.xlu2 %v5414_v9  ;;  %5412 = vadd.xlane.f32.xlu0 %v5411_v17  ;;  %v10390_v31 = vpop.f32.mrf.mxu3 }
 0xc54   :  { %v5737_v16 = vmul.f32 1.442695, %v5722_v11  ;;  %v10380_v3 = vpop.eup %7943 }
 0xc55   :  { %v5757_v46 = vsel %vm588_vm1, %v10380_v3, 0.0  ;;  %v10386_v58 = vpop.eup %7945 }
 0xc56   :  { %7947 = vpow2.f32 %v5737_v16  ;;  %v5751_v27 = vsel %vm588_vm1, %v10386_v58, 0.0  ;;  %v10396_v32 = vpop.f32.mrf.mxu1 }
 0xc57   :  { %7949 = vrcp.f32 %v5395_v59 }
 0xc58   :  { %7951 = vrcp.f32 %v5398_v15 }
 0xc5a   :  { %5758 = vadd.xlane.f32.xlu0 %v5757_v46  ;;  %v10398_v26 = vpop.f32.mrf.mxu3 }
 0xc5c   :  { %v10388_v38 = vpop.eup %7947 }
 0xc5d   :  { %v5760_v57 = vsel %vm588_vm1, %v10388_v38, 0.0  ;;  %v7950_v13 = vpop.eup %7949 }
 0xc5e   :  { %5761 = vadd.xlane.f32.xlu2 %v5760_v57  ;;  %v10400_v54 = vpop.f32.mrf.mxu1  ;;  %v7952_v49 = vpop.eup %7951  ;;  %v5425_v29 = vmul.f32 %v7950_v13, %v10240_v30  ;;  %v4126_v30 = vpack.c.bf16 %v10318_v14, %v10318_v14 }
 0xc5f   :  { %v5426_v8 = vmul.f32 %v7952_v49, %v10229_v36  ;;  %v4473_v36 = vpack.c.bf16 %v10339_v5, %v10339_v5 }
 0xc60   :  { %5752 = vadd.xlane.f32.xlu1 %v5751_v27 }
 0xc61   :  { %v5433_v23 = vpack.c.bf16 %v5426_v8, %v5425_v29 }
 0xc62   :  { %v10405_v60 = vpop.f32.mrf.mxu3 }
 0xc64   :  { %v5460_v50 = vpop.permute.xlu0 %5459 }
 0xc65   :  { %v5462_v21 = vpop.permute.xlu1 %5461 }
 0xc66   :  { %5486 = vmatpush.bf16.msrb.mxu3 %v5462_v21  ;;  %v10412_v15 = vpop.f32.mrf.mxu1 }
 0xc6a   :  { %5487 = vmatpush.bf16.msrb.mxu3 %v5460_v50  ;;  %v4798_v37 = vpop.f32.mrf.mxu3 }
 0xc6b   :  { %v4818_v51 = vpack.c.bf16 %v4798_v37, %v4798_v37 }
 0xc6c   :  { %v5808_v20 = vpop.permute.xlu0 %5807 }
 0xc6d   :  { %5832 = vmatpush.bf16.msra.mxu1 %v5808_v20 }
 0xc6e   :  { %3796 = vrot.lane.b32.xlu0 %v3780_v44, %s8042_s6  ;;  %v5144_v43 = vpop.f32.mrf.mxu1 }
 0xc6f   :  { %v5164_v55 = vpack.c.bf16 %v5144_v43, %v5144_v43 }
 0xc72   :  { %v4800_v14 = vpop.f32.mrf.mxu3 }
 0xc73   :  { %v4819_v1 = vpack.c.bf16 %v4800_v14, %v4800_v14 }
 0xc74   :  { %v5458_v61 = vpop.permute.xlu0 %5457 }
 0xc75   :  { %5488 = vmatpush.bf16.msrb.mxu3 %v5458_v61 }
 0xc76   :  { %3798 = vrot.lane.b32.xlu2 %v3781_v35, %s8042_s6  ;;  %4144 = vrot.lane.b32.xlu0 %v4127_v40, %s8041_s0  ;;  %v5146_v4 = vpop.f32.mrf.mxu1 }
 0xc77   :  { %v5165_v5 = vpack.c.bf16 %v5146_v4, %v5146_v4 }
 0xc78   :  { %7084 = vmatmul.msk.bf16.vlgmr.msrb.gmra.mxu3 %vm588_vm1, %v5433_v23 }
 0xc79   :  { %4142 = vrot.lane.b32.xlu1 %v4126_v30, %s8041_s0 }
 0xc7b   :  { %v5741_v9 = vpop.xlane.xlu2 %5740 }
 0xc7c   :  { %v5806_v19 = vpop.permute.xlu0 %5805 }
 0xc7d   :  { %5833 = vmatpush.bf16.msra.mxu1 %v5806_v19 }
 0xc7e   :  { %4490 = vrot.lane.b32.xlu2 %v4473_v36, %s8040_s29  ;;  %4488 = vrot.lane.b32.xlu0 %v4472_v7, %s8040_s29 }
 0xc81   :  { %5180 = vrot.lane.b32.xlu1 %v5164_v55, %s8039_s26 }
 0xc83   :  { %v5401_v17 = vpop.xlane.xlu2 %5400 }
 0xc86   :  { %4836 = vrot.lane.b32.xlu2 %v4819_v1, %s8035_s20  ;;  %4834 = vrot.lane.b32.xlu0 %v4818_v51, %s8035_s20 }
 0xc8b   :  { %v5747_v16 = vpop.xlane.xlu2 %5746 }
 0xc8e   :  { %5182 = vrot.lane.b32.xlu0 %v5165_v5, %s8039_s26 }
 0xc90   :  { %v5744_v11 = vpop.xlane.xlu1 %5743 }
 0xc91   :  { %7953 = vrcp.f32 %v5744_v11 }
 0xc92   :  { %7955 = vrcp.f32 %v5741_v9 }
 0xc93   :  { %7957 = vrcp.f32 %v5401_v17 }
 0xc97   :  { %v7954_v46 = vpop.eup %7953 }
 0xc98   :  { %v7956_v59 = vpop.eup %7955  ;;  %v5772_v27 = vmul.f32 %v7954_v46, %v10299_v12 }
 0xc99   :  { %v5771_v21 = vmul.f32 %v7956_v59, %v10271_v25  ;;  %v7958_v13 = vpop.eup %7957 }
 0xc9a   :  { %v5427_v35 = vmul.f32 %v7958_v13, %v10283_v24 }
 0xc9b   :  { %v5779_v20 = vpack.c.bf16 %v5772_v27, %v5771_v21 }
 0xc9c   :  { %v10442_v55 = vpop.f32.mrf.mxu3 }
 0xca4   :  { %v10445_v1 = vpop.f32.mrf.mxu3 }
 0xca5   :  { %v5750_v57 = vpop.xlane.xlu2 %5749 }
 0xca7   :  { %v5404_v50 = vpop.xlane.xlu0 %5403 }
 0xca8   :  { %7959 = vrcp.f32 %v5404_v50  ;;  %v5804_v44 = vpop.permute.xlu1 %5803 }
 0xca9   :  { %5834 = vmatpush.bf16.msra.mxu1 %v5804_v44  ;;  %7961 = vrcp.f32 %v5750_v57 }
 0xcaa   :  { %7963 = vrcp.f32 %v5747_v16 }
 0xcac   :  { %7140 = vmatmul.msk.bf16.vlgmr.msra.gmra.mxu1 %vm588_vm1, %v5779_v20  ;;  %v10450_v17 = vpop.f32.mrf.mxu3 }
 0xcad   :  { %v5407_v49 = vpop.xlane.xlu2 %5406 }
 0xcae   :  { %v7960_v29 = vpop.eup %7959  ;;  %7965 = vrcp.f32 %v5407_v49 }
 0xcaf   :  { %v5428_v40 = vmul.f32 %v7960_v29, %v10316_v34  ;;  %v7962_v12 = vpop.eup %7961 }
 0xcb0   :  { %v7964_v25 = vpop.eup %7963  ;;  %v5774_v23 = vmul.f32 %v7962_v12, %v10320_v41  ;;  %v5149_v12 = vpop.f32.mrf.mxu1 }
 0xcb1   :  { %v5434_v8 = vpack.c.bf16 %v5428_v40, %v5427_v35  ;;  %v5773_v30 = vmul.f32 %v7964_v25, %v10291_v6 }
 0xcb3   :  { %7085 = vmatmul.msk.bf16.gmra.mxu3 %vm588_vm1, %v5434_v8  ;;  %v5780_v37 = vpack.c.bf16 %v5774_v23, %v5773_v30 }
 0xcb4   :  { %v7966_v7 = vpop.eup %7965  ;;  %v10456_v50 = vpop.f32.mrf.mxu3 }
 0xcb5   :  { %v5410_v61 = vpop.xlane.xlu2 %5409  ;;  %v5429_v43 = vmul.f32 %v7966_v7, %v10331_v18 }
 0xcb6   :  { %7967 = vrcp.f32 %v5410_v61 }
 0xcbc   :  { %v7968_v36 = vpop.eup %7967  ;;  %7141 = vmatmul.msk.bf16.gmra.mxu1 %vm588_vm1, %v5780_v37 }
 0xcbd   :  { %v5430_v24 = vmul.f32 %v7968_v36, %v10343_v0  ;;  %v5756_v34 = vpop.xlane.xlu2 %5755 }
 0xcbf   :  { %v5435_v19 = vpack.c.bf16 %v5430_v24, %v5429_v43 }
 0xcc3   :  { %7086 = vmatmul.msk.bf16.gmra.mxu3 %vm588_vm1, %v5435_v19  ;;  %v4129_v19 = vpack.c.bf16 %v10363_v42, %v10363_v42  ;;  %v3783_v42 = vpack.c.bf16 %v10273_v47, %v10273_v47  ;;  %v4475_v47 = vpack.c.bf16 %v10365_v10, %v10365_v10 }
 0xcc4   :  { %v10459_v49 = vpop.f32.mrf.mxu3 }
 0xcc5   :  { %v5416_v14 = vpop.xlane.xlu2 %5415  ;;  %v5413_v41 = vpop.xlane.xlu0 %5412 }
 0xcc6   :  { %7969 = vrcp.f32 %v5416_v14 }
 0xcc7   :  { %7971 = vrcp.f32 %v5413_v41  ;;  %v4820_v41 = vpack.c.bf16 %v10442_v55, %v10442_v55 }
 0xcc8   :  { %7973 = vrcp.f32 %v5756_v34  ;;  %v3782_v34 = vpack.c.bf16 %v10266_v45, %v10266_v45 }
 0xccc   :  { %v7970_v6 = vpop.eup %7969 }
 0xccd   :  { %v7972_v51 = vpop.eup %7971  ;;  %v5432_v4 = vmul.f32 %v7970_v6, %v10369_v22  ;;  %v5759_v16 = vpop.xlane.xlu0 %5758 }
 0xcce   :  { %v5431_v0 = vmul.f32 %v7972_v51, %v10371_v52  ;;  %v7974_v11 = vpop.eup %7973 }
 0xccf   :  { %v5776_v57 = vmul.f32 %v7974_v11, %v10357_v48 }
 0xcd0   :  { %v5436_v5 = vpack.c.bf16 %v5432_v4, %v5431_v0 }
 0xcd1   :  { %v5762_v9 = vpop.xlane.xlu2 %5761 }
 0xcd3   :  { %7087 = vmatmul.msk.bf16.gmra.mxu3 %vm588_vm1, %v5436_v5  ;;  %v5753_v18 = vpop.xlane.xlu1 %5752  ;;  %v4128_v5 = vpack.c.bf16 %v10347_v56, %v10347_v56 }
 0xcd4   :  { %7975 = vrcp.f32 %v5753_v18  ;;  %v4474_v18 = vpack.c.bf16 %v10352_v62, %v10352_v62  ;;  %v5166_v62 = vpack.c.bf16 %v5149_v12, %v5149_v12 }
 0xcd5   :  { %7977 = vrcp.f32 %v5762_v9 }
 0xcd6   :  { %7979 = vrcp.f32 %v5759_v16  ;;  %v4821_v16 = vpack.c.bf16 %v10445_v1, %v10445_v1 }
 0xcd9   :  { %v3799_v46 = vpop.permute.xlu2 %3798 }
 0xcda   :  { %v7976_v59 = vpop.eup %7975  ;;  %3821 = vst.msk [vmem:[#allocation3 + $0x24] sm:$0xf] %vm1101_vm3, %v3799_v46  ;;  %v3785_v46 = vpack.c.bf16 %v10295_v63, %v10295_v63 }
 0xcdb   :  { %v5775_v22 = vmul.f32 %v7976_v59, %v10386_v58  ;;  %v7978_v44 = vpop.eup %7977 }
 0xcdc   :  { %v7980_v20 = vpop.eup %7979  ;;  %v5778_v48 = vmul.f32 %v7978_v44, %v10388_v38  ;;  %v10469_v38 = vpop.f32.mrf.mxu3  ;;  %v4130_v44 = vpack.c.bf16 %v10378_v2, %v10378_v2 }
 0xcdd   :  { %v5781_v52 = vpack.c.bf16 %v5776_v57, %v5775_v22  ;;  %v5777_v29 = vmul.f32 %v7980_v20, %v10380_v3  ;;  %v5151_v3 = vpop.f32.mrf.mxu1  ;;  %v4476_v57 = vpack.c.bf16 %v10382_v28, %v10382_v28 }
 0xcde   :  { %v5167_v51 = vpack.c.bf16 %v5151_v3, %v5151_v3  ;;  %v3787_v3 = vpack.c.bf16 %v10310_v53, %v10310_v53 }
 0xcdf   :  { %7142 = vmatmul.msk.bf16.gmra.mxu1 %vm588_vm1, %v5781_v52  ;;  %v5782_v40 = vpack.c.bf16 %v5778_v48, %v5777_v29  ;;  %v4823_v52 = vpack.c.bf16 %v10456_v50, %v10456_v50  ;;  %v4477_v48 = vpack.c.bf16 %v10396_v32, %v10396_v32 }
 0xce0   :  { %v3797_v27 = vpop.permute.xlu0 %3796 }
 0xce1   :  { %3820 = vst.msk [vmem:[#allocation3 + $0x20] sm:$0xf] %vm1101_vm3, %v3797_v27  ;;  %v4491_v21 = vpop.permute.xlu2 %4490 }
 0xce5   :  { %v10475_v7 = vpop.f32.mrf.mxu1 }
 0xce6   :  { %v5168_v29 = vpack.c.bf16 %v10475_v7, %v10475_v7  ;;  %v4824_v7 = vpack.c.bf16 %v10459_v49, %v10459_v49 }
 0xce8   :  { %v4145_v13 = vpop.permute.xlu0 %4144 }
 0xce9   :  { %4167 = vst.msk [vmem:[#allocation3 + $0x24] sm:$0xf] %vm1448_vm4, %v4145_v13  ;;  %v4837_v58 = vpop.permute.xlu2 %4836  ;;  %v4131_v13 = vpack.c.bf16 %v10390_v31, %v10390_v31  ;;  %v4132_v31 = vpack.c.bf16 %v10398_v26, %v10398_v26  ;;  %v3786_v26 = vpack.c.bf16 %v10304_v33, %v10304_v33 }
 0xcea   :  { %4513 = vst.msk [vmem:[#allocation3 + $0x24] sm:$0xf] %vm1795_vm5, %v4491_v21  ;;  %v3784_v21 = vpack.c.bf16 %v10285_v39, %v10285_v39 }
 0xceb   :  { %4859 = vst.msk [vmem:[#allocation3 + $0x24] sm:$0xf] %vm2142_vm6, %v4837_v58  ;;  %v4143_v35 = vpop.permute.xlu1 %4142  ;;  %v4822_v58 = vpack.c.bf16 %v10450_v17, %v10450_v17  ;;  %v4479_v17 = vpack.c.bf16 %v10412_v15, %v10412_v15 }
 0xcec   :  { %4166 = vst.msk [vmem:[#allocation3 + $0x20] sm:$0xf] %vm1448_vm4, %v4143_v35 }
 0xced   :  { %v10480_v43 = vpop.f32.mrf.mxu1 }
 0xcee   :  { %v5169_v35 = vpack.c.bf16 %v10480_v43, %v10480_v43 }
 0xcef   :  { %7143 = vmatmul.msk.bf16.gmra.mxu1 %vm588_vm1, %v5782_v40 }
 0xcf0   :  { %v4489_v8 = vpop.permute.xlu0 %4488 }
 0xcf1   :  { %4512 = vst.msk [vmem:[#allocation3 + $0x20] sm:$0xf] %vm1795_vm5, %v4489_v8 }
 0xcf3   :  { %v5181_v61 = vpop.permute.xlu1 %5180 }
 0xcf5   :  { %v10486_v14 = vpop.f32.mrf.mxu1 }
 0xcf8   :  { %v4835_v25 = vpop.permute.xlu0 %4834 }
 0xcf9   :  { %4858 = vst.msk [vmem:[#allocation3 + $0x20] sm:$0xf] %vm2142_vm6, %v4835_v25 }
 0xcfa   :  { %5204 = vst.msk [vmem:[#allocation3 + $0x20] sm:$0xf] %vm2489_vm7, %v5181_v61  ;;  %v5170_v61 = vpack.c.bf16 %v10486_v14, %v10486_v14 }
 0xcfb   :  { %v5490_v23 = vpop.f32.mrf.mxu3 }
 0xcfc   :  { %v5510_v30 = vpack.c.bf16 %v5490_v23, %v5490_v23  ;;  %v4133_v23 = vpack.c.bf16 %v10405_v60, %v10405_v60  ;;  %v4825_v60 = vpack.c.bf16 %v10469_v38, %v10469_v38 }
 0xcfd   :  { %v10491_v6 = vpop.f32.mrf.mxu1 }
 0xcfe   :  { %5526 = vrot.lane.b32.xlu2 %v5510_v30, %s8037_s25 }
 0xd00   :  { %v5183_v37 = vpop.permute.xlu0 %5182 }
 0xd01   :  { %5205 = vst.msk [vmem:[#allocation3 + $0x24] sm:$0xf] %vm2489_vm7, %v5183_v37  ;;  %v4478_v37 = vpack.c.bf16 %v10400_v54, %v10400_v54 }
 0xd03   :  { %v5492_v36 = vpop.f32.mrf.mxu3 }
 0xd04   :  { %v5511_v24 = vpack.c.bf16 %v5492_v36, %v5492_v36  ;;  %v5171_v36 = vpack.c.bf16 %v10491_v6, %v10491_v6 }
 0xd06   :  { %5528 = vrot.lane.b32.xlu1 %v5511_v24, %s8037_s25 }
 0xd0e   :  { %3800 = vrot.lane.b32.xlu1 %v3782_v34, %s8042_s6 }
 0xd16   :  { %4148 = vrot.lane.b32.xlu1 %v4129_v19, %s8041_s0 }
 0xd1e   :  { %4838 = vrot.lane.b32.xlu1 %v4820_v41, %s8035_s20 }
 0xd26   :  { %5186 = vrot.lane.b32.xlu1 %v5167_v51, %s8039_s26 }
 0xd29   :  { %v5836_v45 = vpop.f32.mrf.mxu1 }
 0xd2a   :  { %v5856_v4 = vpack.c.bf16 %v5836_v45, %v5836_v45 }
 0xd2c   :  { %5872 = vrot.lane.b32.xlu0 %v5856_v4, %s8038_s2 }
 0xd31   :  { %v5838_v0 = vpop.f32.mrf.mxu1 }
 0xd32   :  { %v5857_v9 = vpack.c.bf16 %v5838_v0, %v5838_v0 }
 0xd34   :  { %3802 = vrot.lane.b32.xlu0 %v3783_v42, %s8042_s6  ;;  %5874 = vrot.lane.b32.xlu2 %v5857_v9, %s8038_s2 }
 0xd36   :  { %v5495_v56 = vpop.f32.mrf.mxu3 }
 0xd37   :  { %v5512_v59 = vpack.c.bf16 %v5495_v56, %v5495_v56 }
 0xd39   :  { %v5841_v55 = vpop.f32.mrf.mxu1 }
 0xd3a   :  { %v5858_v11 = vpack.c.bf16 %v5841_v55, %v5841_v55 }
 0xd3c   :  { %4492 = vrot.lane.b32.xlu0 %v4474_v18, %s8040_s29  ;;  %4146 = vrot.lane.b32.xlu2 %v4128_v5, %s8041_s0 }
 0xd3d   :  { %5876 = vrot.lane.b32.xlu1 %v5858_v11, %s8038_s2 }
 0xd3e   :  { %v5497_v10 = vpop.f32.mrf.mxu3 }
 0xd3f   :  { %v5513_v1 = vpack.c.bf16 %v5497_v10, %v5497_v10 }
 0xd41   :  { %v5843_v63 = vpop.f32.mrf.mxu1 }
 0xd42   :  { %v5859_v22 = vpack.c.bf16 %v5843_v63, %v5843_v63 }
 0xd44   :  { %4840 = vrot.lane.b32.xlu0 %v4821_v16, %s8035_s20  ;;  %4494 = vrot.lane.b32.xlu2 %v4475_v47, %s8040_s29 }
 0xd45   :  { %3806 = vrot.lane.b32.xlu1 %v3785_v46, %s8042_s6 }
 0xd46   :  { %v5500_v28 = vpop.f32.mrf.mxu3 }
 0xd47   :  { %v5514_v20 = vpack.c.bf16 %v5500_v28, %v5500_v28 }
 0xd4c   :  { %5530 = vrot.lane.b32.xlu0 %v5512_v59, %s8037_s25  ;;  %5184 = vrot.lane.b32.xlu2 %v5166_v62, %s8039_s26 }
 0xd4d   :  { %4496 = vrot.lane.b32.xlu1 %v4476_v57, %s8040_s29 }
 0xd4e   :  { %v5502_v32 = vpop.f32.mrf.mxu3 }
 0xd4f   :  { %v5515_v40 = vpack.c.bf16 %v5502_v32, %v5502_v32 }
 0xd54   :  { %5532 = vrot.lane.b32.xlu2 %v5513_v1, %s8037_s25  ;;  %5878 = vrot.lane.b32.xlu0 %v5859_v22, %s8038_s2 }
 0xd55   :  { %4844 = vrot.lane.b32.xlu1 %v4823_v52, %s8035_s20 }
 0xd56   :  { %v5505_v8 = vpop.f32.mrf.mxu3 }
 0xd57   :  { %v5516_v34 = vpack.c.bf16 %v5505_v8, %v5505_v8 }
 0xd58   :  { %v5527_v27 = vpop.permute.xlu2 %5526 }
 0xd59   :  { %5550 = vst.msk [vmem:[#allocation3 + $0x20] sm:$0xf] %vm2836_vm8, %v5527_v27 }
 0xd5c   :  { %3804 = vrot.lane.b32.xlu2 %v3784_v21, %s8042_s6  ;;  %4150 = vrot.lane.b32.xlu0 %v4130_v44, %s8041_s0  ;;  %v5846_v50 = vpop.f32.mrf.mxu1 }
 0xd5d   :  { %5534 = vrot.lane.b32.xlu1 %v5514_v20, %s8037_s25  ;;  %v5860_v25 = vpack.c.bf16 %v5846_v50, %v5846_v50 }
 0xd5e   :  { %v5507_v33 = vpop.f32.mrf.mxu3 }
 0xd5f   :  { %v5517_v30 = vpack.c.bf16 %v5507_v33, %v5507_v33 }
 0xd64   :  { %4152 = vrot.lane.b32.xlu2 %v4131_v13, %s8041_s0  ;;  %4498 = vrot.lane.b32.xlu0 %v4477_v48, %s8040_s29  ;;  %v5848_v39 = vpop.f32.mrf.mxu1 }
 0xd65   :  { %v5861_v2 = vpack.c.bf16 %v5848_v39, %v5848_v39 }
 0xd67   :  { %5882 = vrot.lane.b32.xlu1 %v5861_v2, %s8038_s2 }
 0xd6c   :  { %4842 = vrot.lane.b32.xlu2 %v4822_v58, %s8035_s20  ;;  %5188 = vrot.lane.b32.xlu0 %v5168_v29, %s8039_s26  ;;  %v5851_v54 = vpop.f32.mrf.mxu1 }
 0xd6d   :  { %v5862_v43 = vpack.c.bf16 %v5851_v54, %v5851_v54 }
 0xd6f   :  { %4154 = vrot.lane.b32.xlu1 %v4132_v31, %s8041_s0 }
 0xd74   :  { %5190 = vrot.lane.b32.xlu2 %v5169_v35, %s8039_s26  ;;  %5536 = vrot.lane.b32.xlu0 %v5515_v40, %s8037_s25  ;;  %v5853_v41 = vpop.f32.mrf.mxu1 }
 0xd75   :  { %v5863_v6 = vpack.c.bf16 %v5853_v41, %v5853_v41 }
 0xd77   :  { %4502 = vrot.lane.b32.xlu1 %v4479_v17, %s8040_s29 }
 0xd78   :  { %v5529_v12 = vpop.permute.xlu1 %5528 }
 0xd79   :  { %5551 = vst.msk [vmem:[#allocation3 + $0x24] sm:$0xf] %vm2836_vm8, %v5529_v12 }
 0xd7c   :  { %3808 = vrot.lane.b32.xlu0 %v3786_v26, %s8042_s6  ;;  %5880 = vrot.lane.b32.xlu2 %v5860_v25, %s8038_s2  ;;  %v7981_v25 = vld [vmem:[%s10639_s3] ss:$0 sm:$0xff]  ;;  %s8043_s3 = smov [#allocation7]  }
 0xd7d   :  { %s6105_s10 = sshll.u32 %s8043_s3, 4  ;;  %s6106_s10 = int_to_ptr.vmem [resolvable:$true] %s6105_s10 }
 0xd7f   :  { %5192 = vrot.lane.b32.xlu1 %v5170_v61, %s8039_s26 }
 0xd80   :  { %v3801_v15 = vpop.permute.xlu1 %3800 }
 0xd81   :  { %3822 = vst.msk [vmem:[#allocation3 + $0x28] sm:$0xf] %vm1101_vm3, %v3801_v15 }
 0xd84   :  { %4156 = vrot.lane.b32.xlu0 %v4133_v23, %s8041_s0  ;;  %3810 = vrot.lane.b32.xlu2 %v3787_v3, %s8042_s6 }
 0xd87   :  { %5540 = vrot.lane.b32.xlu1 %v5517_v30, %s8037_s25 }
 0xd88   :  { %v4149_v24 = vpop.permute.xlu1 %4148 }
 0xd8c   :  { %4846 = vrot.lane.b32.xlu0 %v4824_v7, %s8035_s20  ;;  %4500 = vrot.lane.b32.xlu2 %v4478_v37, %s8040_s29 }
 0xd8e   :  { %v5875_v53 = vpop.permute.xlu2 %5874 }
 0xd8f   :  { %5897 = vst.msk [vmem:[#allocation3 + $0x24] sm:$0xf] %vm3183_vm9, %v5875_v53 }
 0xd90   :  { %v4839_v19 = vpop.permute.xlu1 %4838 }
 0xd94   :  { %5194 = vrot.lane.b32.xlu0 %v5171_v36, %s8039_s26  ;;  %4848 = vrot.lane.b32.xlu2 %v4825_v60, %s8035_s20 }
 0xd96   :  { %v4147_v49 = vpop.permute.xlu2 %4146 }
 0xd97   :  { %4168 = vst.msk [vmem:[#allocation3 + $0x28] sm:$0xf] %vm1448_vm4, %v4147_v49 }
 0xd98   :  { %v5187_v0 = vpop.permute.xlu1 %5186 }
 0xd9c   :  { %5538 = vrot.lane.b32.xlu2 %v5516_v34, %s8037_s25  ;;  %5884 = vrot.lane.b32.xlu0 %v5862_v43, %s8038_s2 }
 0xd9e   :  { %v5873_v38 = vpop.permute.xlu0 %5872  ;;  %v4495_v14 = vpop.permute.xlu2 %4494 }
 0xd9f   :  { %5896 = vst.msk [vmem:[#allocation3 + $0x20] sm:$0xf] %vm3183_vm9, %v5873_v38 }
 0xda4   :  { %5886 = vrot.lane.b32.xlu2 %v5863_v6, %s8038_s2 }
 0xda6   :  { %v3803_v51 = vpop.permute.xlu0 %3802  ;;  %v5185_v45 = vpop.permute.xlu2 %5184  ;;  %v7436_v4 = vld [vmem:[#allocation3 + $0x20] sm:$0xff] }
 0xda7   :  { %3823 = vst.msk [vmem:[#allocation3 + $0x2c] sm:$0xf] %vm1101_vm3, %v3803_v51  ;;  %6064 = vmatmul.bf16.gmra.mxu2 %v7436_v4 }
 0xda8   :  { %4169 = vst.msk [vmem:[#allocation3 + $0x2c] sm:$0xf] %vm1448_vm4, %v4149_v24 }
 0xda9   :  { %4515 = vst.msk [vmem:[#allocation3 + $0x2c] sm:$0xf] %vm1795_vm5, %v4495_v14 }
 0xdae   :  { %v4493_v42 = vpop.permute.xlu0 %4492  ;;  %v5533_v9 = vpop.permute.xlu2 %5532 }
 0xdaf   :  { %4514 = vst.msk [vmem:[#allocation3 + $0x28] sm:$0xf] %vm1795_vm5, %v4493_v42  ;;  %v5877_v55 = vpop.permute.xlu1 %5876 }
 0xdb0   :  { %4860 = vst.msk [vmem:[#allocation3 + $0x28] sm:$0xf] %vm2142_vm6, %v4839_v19 }
 0xdb1   :  { %5206 = vst.msk [vmem:[#allocation3 + $0x28] sm:$0xf] %vm2489_vm7, %v5185_v45 }
 0xdb6   :  { %v4841_v5 = vpop.permute.xlu0 %4840  ;;  %v3805_v18 = vpop.permute.xlu2 %3804 }
 0xdb7   :  { %4861 = vst.msk [vmem:[#allocation3 + $0x2c] sm:$0xf] %vm2142_vm6, %v4841_v5  ;;  %v3807_v11 = vpop.permute.xlu1 %3806 }
 0xdb8   :  { %5207 = vst.msk [vmem:[#allocation3 + $0x2c] sm:$0xf] %vm2489_vm7, %v5187_v0 }
 0xdb9   :  { %5553 = vst.msk [vmem:[#allocation3 + $0x2c] sm:$0xf] %vm2836_vm8, %v5533_v9 }
 0xdba   :  { %3824 = vst.msk [vmem:[#allocation3 + $0x30] sm:$0xf] %vm1101_vm3, %v3805_v18 }
 0xdbb   :  { %3825 = vst.msk [vmem:[#allocation3 + $0x34] sm:$0xf] %vm1101_vm3, %v3807_v11 }
 0xdbe   :  { %v5531_v47 = vpop.permute.xlu0 %5530  ;;  %v4153_v16 = vpop.permute.xlu2 %4152 }
 0xdbf   :  { %5552 = vst.msk [vmem:[#allocation3 + $0x28] sm:$0xf] %vm2836_vm8, %v5531_v47  ;;  %v4497_v46 = vpop.permute.xlu1 %4496 }
 0xdc0   :  { %5898 = vst.msk [vmem:[#allocation3 + $0x28] sm:$0xf] %vm3183_vm9, %v5877_v55 }
 0xdc1   :  { %4171 = vst.msk [vmem:[#allocation3 + $0x34] sm:$0xf] %vm1448_vm4, %v4153_v16 }
 0xdc6   :  { %v4843_v56 = vpop.permute.xlu2 %4842  ;;  %v5879_v62 = vpop.permute.xlu0 %5878 }
 0xdc7   :  { %5899 = vst.msk [vmem:[#allocation3 + $0x2c] sm:$0xf] %vm3183_vm9, %v5879_v62  ;;  %v4845_v59 = vpop.permute.xlu1 %4844 }
 0xdce   :  { %v5191_v57 = vpop.permute.xlu2 %5190  ;;  %v4151_v10 = vpop.permute.xlu0 %4150  ;;  %v7437_v63 = vld [vmem:[#allocation3 + $0x28] sm:$0xff] }
 0xdcf   :  { %4170 = vst.msk [vmem:[#allocation3 + $0x30] sm:$0xf] %vm1448_vm4, %v4151_v10  ;;  %6069 = vmatmul.bf16.gmra.mxu2 %v7437_v63  ;;  %v5535_v52 = vpop.permute.xlu1 %5534 }
 0xdd0   :  { %4516 = vst.msk [vmem:[#allocation3 + $0x30] sm:$0xf] %vm1795_vm5, %v4497_v46 }
 0xdd1   :  { %4862 = vst.msk [vmem:[#allocation3 + $0x30] sm:$0xf] %vm2142_vm6, %v4843_v56 }
 0xdd6   :  { %v4499_v1 = vpop.permute.xlu0 %4498  ;;  %v5881_v22 = vpop.permute.xlu2 %5880 }
 0xdd7   :  { %4517 = vst.msk [vmem:[#allocation3 + $0x34] sm:$0xf] %vm1795_vm5, %v4499_v1 }
 0xdd8   :  { %4863 = vst.msk [vmem:[#allocation3 + $0x34] sm:$0xf] %vm2142_vm6, %v4845_v59 }
 0xdd9   :  { %5209 = vst.msk [vmem:[#allocation3 + $0x34] sm:$0xf] %vm2489_vm7, %v5191_v57  ;;  %v5883_v27 = vpop.permute.xlu1 %5882 }
 0xdde   :  { %v5189_v28 = vpop.permute.xlu0 %5188  ;;  %v3811_v21 = vpop.permute.xlu2 %3810 }
 0xddf   :  { %5208 = vst.msk [vmem:[#allocation3 + $0x30] sm:$0xf] %vm2489_vm7, %v5189_v28 }
 0xde0   :  { %5554 = vst.msk [vmem:[#allocation3 + $0x30] sm:$0xf] %vm2836_vm8, %v5535_v52 }
 0xde1   :  { %5900 = vst.msk [vmem:[#allocation3 + $0x30] sm:$0xf] %vm3183_vm9, %v5881_v22  ;;  %v4155_v20 = vpop.permute.xlu1 %4154 }
 0xde2   :  { %3827 = vst.msk [vmem:[#allocation3 + $0x3c] sm:$0xf] %vm1101_vm3, %v3811_v21 }
 0xde6   :  { %v5537_v44 = vpop.permute.xlu0 %5536  ;;  %v4501_v50 = vpop.permute.xlu2 %4500 }
 0xde7   :  { %5555 = vst.msk [vmem:[#allocation3 + $0x34] sm:$0xf] %vm2836_vm8, %v5537_v44 }
 0xde8   :  { %5901 = vst.msk [vmem:[#allocation3 + $0x34] sm:$0xf] %vm3183_vm9, %v5883_v27 }
 0xde9   :  { %v4503_v39 = vpop.permute.xlu1 %4502 }
 0xdee   :  { %v3809_v13 = vpop.permute.xlu0 %3808  ;;  %v4849_v2 = vpop.permute.xlu2 %4848 }
 0xdef   :  { %3826 = vst.msk [vmem:[#allocation3 + $0x38] sm:$0xf] %vm1101_vm3, %v3809_v13  ;;  %v7438_v48 = vld [vmem:[#allocation3 + $0x30] sm:$0xff] }
 0xdf0   :  { %4172 = vst.msk [vmem:[#allocation3 + $0x38] sm:$0xf] %vm1448_vm4, %v4155_v20  ;;  %6074 = vmatmul.bf16.gmra.mxu2 %v7438_v48 }
 0xdf1   :  { %4518 = vst.msk [vmem:[#allocation3 + $0x38] sm:$0xf] %vm1795_vm5, %v4501_v50  ;;  %v5193_v29 = vpop.permute.xlu1 %5192 }
 0xdf6   :  { %v4157_v58 = vpop.permute.xlu0 %4156  ;;  %v5539_v31 = vpop.permute.xlu2 %5538 }
 0xdf7   :  { %4173 = vst.msk [vmem:[#allocation3 + $0x3c] sm:$0xf] %vm1448_vm4, %v4157_v58 }
 0xdf8   :  { %4519 = vst.msk [vmem:[#allocation3 + $0x3c] sm:$0xf] %vm1795_vm5, %v4503_v39 }
 0xdf9   :  { %4865 = vst.msk [vmem:[#allocation3 + $0x3c] sm:$0xf] %vm2142_vm6, %v4849_v2  ;;  %v5541_v40 = vpop.permute.xlu1 %5540 }
 0xdfe   :  { %v4847_v32 = vpop.permute.xlu0 %4846  ;;  %v5887_v17 = vpop.permute.xlu2 %5886 }
 0xdff   :  { %4864 = vst.msk [vmem:[#allocation3 + $0x38] sm:$0xf] %vm2142_vm6, %v4847_v32 }
 0xe00   :  { %5210 = vst.msk [vmem:[#allocation3 + $0x38] sm:$0xf] %vm2489_vm7, %v5193_v29 }
 0xe01   :  { %5556 = vst.msk [vmem:[#allocation3 + $0x38] sm:$0xf] %vm2836_vm8, %v5539_v31 }
 0xe06   :  { %v5195_v35 = vpop.permute.xlu0 %5194 }
 0xe07   :  { %5211 = vst.msk [vmem:[#allocation3 + $0x3c] sm:$0xf] %vm2489_vm7, %v5195_v35 }
 0xe08   :  { %5557 = vst.msk [vmem:[#allocation3 + $0x3c] sm:$0xf] %vm2836_vm8, %v5541_v40 }
 0xe09   :  { %5903 = vst.msk [vmem:[#allocation3 + $0x3c] sm:$0xf] %vm3183_vm9, %v5887_v17 }
 0xe0e   :  { %v5885_v8 = vpop.permute.xlu0 %5884 }
 0xe0f   :  { %5902 = vst.msk [vmem:[#allocation3 + $0x38] sm:$0xf] %vm3183_vm9, %v5885_v8 }
 0xe16   :  { %v7439_v12 = vld [vmem:[#allocation3 + $0x38] sm:$0xff] }
 0xe17   :  { %6079 = vmatmul.bf16.gmra.mxu2 %v7439_v12 }
 0xe2a   :  { %v6065_v26 = vpop.f32.mrf.mxu2 }
 0xe2b   :  { %v6066_v61 = vadd.f32 %v7981_v25, %v6065_v26 }
 0xe2d   :  { %6093 = vst [vmem:[#allocation7 + $0x40] sm:$0xff] %v6066_v61 }
 0xe32   :  { %v6067_v15 = vpop.f32.mrf.mxu2 }
 0xe33   :  { %v6068_v3 = vadd.f32 %v7981_v25, %v6067_v15 }
 0xe35   :  { %6094 = vst [vmem:[#allocation7 + $0x48] sm:$0xff] %v6068_v3 }
 0xe52   :  { %v6070_v23 = vpop.f32.mrf.mxu2 }
 0xe53   :  { %v6071_v33 = vadd.f32 %v7981_v25, %v6070_v23 }
 0xe55   :  { %6095 = vst [vmem:[#allocation7 + $0x50] sm:$0xff] %v6071_v33 }
 0xe5a   :  { %v6072_v30 = vpop.f32.mrf.mxu2 }
 0xe5b   :  { %v6073_v37 = vadd.f32 %v7981_v25, %v6072_v30 }
 0xe5d   :  { %6096 = vst [vmem:[#allocation7 + $0x58] sm:$0xff] %v6073_v37 }
 0xe73   :  { %v6075_v7 = vpop.f32.mrf.mxu2 }
 0xe74   :  { %v6076_v53 = vadd.f32 %v7981_v25, %v6075_v7 }
 0xe76   :  { %6097 = vst [vmem:[#allocation7 + $0x60] sm:$0xff] %v6076_v53 }
 0xe7b   :  { %v6077_v60 = vpop.f32.mrf.mxu2 }
 0xe7c   :  { %v6078_v36 = vadd.f32 %v7981_v25, %v6077_v60 }
 0xe7e   :  { %6098 = vst [vmem:[#allocation7 + $0x68] sm:$0xff] %v6078_v36 }
 0xe9a   :  { %v6080_v24 = vpop.f32.mrf.mxu2 }
 0xe9b   :  { %v6081_v54 = vadd.f32 %v7981_v25, %v6080_v24 }
 0xe9d   :  { %6099 = vst [vmem:[#allocation7 + $0x70] sm:$0xff] %v6081_v54 }
 0xea2   :  { %v6082_v49 = vpop.f32.mrf.mxu2 }
 0xea3   :  { %v6083_v34 = vadd.f32 %v7981_v25, %v6082_v49 }
 0xea5   :  { %6100 = vst [vmem:[#allocation7 + $0x78] sm:$0xff] %v6083_v34 }
 0xea6   :  { %6113 = dma.vmem_to_hbm [thread:$0]  %s6106_s10, 2048, %s6108_s13, [#allocation6], %s8044_s14, %s8044_s14, %s8045_s15  }
 0xea7   :  { %8032 = dma.done.wait [#allocation6], 2048  }
 0xea8   :  { %8033 = vsyncadd [#allocation6], 4294965248 }
 0xea9   :  { %6118 = vsyncpa [#allocation5], 1 }
 0xeaa   :  { %6119 = vsyncpa [#allocation6], 1 }

</bundles_post_ra>
